<compile_context>
chip_gen: v6e
topology: v6e:2x2x1
jax: 0.10.0
libtpu: 0.0.40
codegen_flags: <defaults>
</compile_context>

<pallas_src>
import jax
import jax.numpy as jnp
from jax import lax
from jax.experimental import pallas as pl
from jax.experimental.pallas import tpu as pltpu

EPS = 1e-5
CP = 128                        # lane-dense channel padding (one full lane dimension)
TM = 512                        # M-tile for pointwise-conv matmuls (~85% of HBM roofline)


def _pick_vmem_limit():
    """96 MiB on 128-MiB-VMEM chips (v5e/v6e), ~48 MiB on v7x; safe fallback otherwise."""
    try:
        cap = pltpu.get_tpu_info().vmem_capacity_bytes
        return int(min(96 * 1024 * 1024, 0.75 * cap))
    except Exception:  # pragma: no cover - conservative fallback
        return 48 * 1024 * 1024


VMEM_LIMIT = _pick_vmem_limit()


# ---------------------------------------------------------------------------
# kernels
# ---------------------------------------------------------------------------
def _conv1_kernel(x_ref, w_ref, t_ref, s_ref, ss_ref):
    """1x1x1 conv as a lane-dense bf16 matmul; bf16 output, f32 BN partial sums."""
    t = jnp.dot(x_ref[...], w_ref[...], preferred_element_type=jnp.float32)
    c = t.shape[-1]
    s_ref[...] = jnp.sum(t.reshape(8, -1, c), axis=1)[None]
    ss_ref[...] = jnp.sum((t * t).reshape(8, -1, c), axis=1)[None]
    t_ref[...] = t.astype(t_ref.dtype)


def _bn_prelu_conv_kernel(t_ref, scale_ref, shift_ref, alpha_ref, w_ref,
                          o_ref, s_ref, ss_ref):
    """Fused BN(scale/shift) + PReLU + 1x1x1 conv; emits per-tile BN partial sums."""
    y = t_ref[...].astype(jnp.float32) * scale_ref[...] + shift_ref[...]
    y = jnp.where(y >= 0.0, y, alpha_ref[...] * y)
    o = jnp.dot(y.astype(jnp.bfloat16), w_ref[...],
                preferred_element_type=jnp.float32)
    o_ref[...] = o
    c = o.shape[-1]
    s_ref[...] = jnp.sum(o.reshape(8, -1, c), axis=1)[None]
    ss_ref[...] = jnp.sum((o * o).reshape(8, -1, c), axis=1)[None]


def _bn_residual_prelu_kernel(t_ref, x_ref, scale_ref, shift_ref, alpha_ref, o_ref):
    """Fused BN(scale/shift) + residual add + PReLU (element-wise, lane-dense store)."""
    y = t_ref[...] * scale_ref[...] + shift_ref[...] + x_ref[...]
    o_ref[...] = jnp.where(y >= 0.0, y, alpha_ref[...] * y)


def _dilated_gconv_kernel(t1_ref, scale_ref, shift_ref, alpha_ref, w2_ref,
                          t2_ref, s_ref, ss_ref, pad_ref, wide_ref, s_acc, ss_acc):
    """BN1 + PReLU fused into the grouped dilated 3x3x3 conv for one batch element.

    The whole (D, H, W, C) slab of conv1 output (bf16) is resident in VMEM, so t1 is read
    from HBM exactly once.  For each output D-slice, the three dilated D-taps are
    activated (BN1+PReLU, with out-of-range taps masked to zero = conv2's zero padding)
    into zero-halo pad buffers; the 27 taps are then applied with a single K-packed matmul
    (K = 9*C over (kd, kh), output lanes packed over kw) and the kw shift is resolved by
    summing three shifted slices of the wide result.  BN2 partial sums accumulate in f32.
    """
    D, H, W, C = t1_ref.shape
    WP = pad_ref.shape[2]

    scale = scale_ref[...].reshape(1, 1, C)
    shift = shift_ref[...].reshape(1, 1, C)
    alpha = alpha_ref[...].reshape(1, 1, C)

    # Zero once per grid step: halo rows/cols stay zero for every (d, kd); the interior
    # window is rewritten before each use.
    pad_ref[...] = jnp.zeros_like(pad_ref)
    s_acc[...] = jnp.zeros_like(s_acc)
    ss_acc[...] = jnp.zeros_like(ss_acc)

    def body(d, carry):
        idxs = (jnp.maximum(d - 2, 0), d, jnp.minimum(d + 2, D - 1))
        valid = ((d >= 2).astype(jnp.float32),       # D tap d-2
                 None,                               # D tap d (always valid)
                 (d < D - 2).astype(jnp.float32))    # D tap d+2
        for kd in range(3):
            t1 = t1_ref[pl.ds(idxs[kd], 1), :, :, :].reshape(H, W, C).astype(jnp.float32)
            y = t1 * scale + shift
            y = jnp.where(y >= 0.0, y, alpha * y)
            if valid[kd] is not None:
                y = y * valid[kd]                    # zero padding of conv2 along D
            pad_ref[kd, 2:2 + H, 2:2 + W, :] = y.astype(pad_ref.dtype)

        # 9 leading-axis row-slices (no strided window copies), lane-concat to K = 9*C.
        xbig = jnp.concatenate(
            [pad_ref[kd, 2 * kh:2 * kh + H, :, :].reshape(H * WP, C)
             for kd in range(3) for kh in range(3)], axis=-1)
        # single MXU matmul per D-slice: (H*WP, 9C) x (9C, 3C); kw packed into output lanes
        wide_ref[...] = jnp.dot(xbig, w2_ref[...],
                                preferred_element_type=jnp.float32).reshape(H, WP, 3 * C)
        out = (wide_ref[:, 0:W, 0:C]
               + wide_ref[:, 2:2 + W, C:2 * C]
               + wide_ref[:, 4:4 + W, 2 * C:3 * C])          # (H, W, C) f32

        t2_ref[pl.ds(d, 1), :, :, :] = out.reshape(1, H, W, C).astype(t2_ref.dtype)
        s_acc[...] += jnp.sum(out.reshape(8, -1, C), axis=1)
        ss_acc[...] += jnp.sum((out * out).reshape(8, -1, C), axis=1)
        return carry

    lax.fori_loop(0, D, body, 0)
    s_ref[...] = s_acc[...]
    ss_ref[...] = ss_acc[...]


# ---------------------------------------------------------------------------
# glue: global training-mode BN statistics -> per-channel scale/shift (f32)
# ---------------------------------------------------------------------------
def _bn_scale_shift(s, ss, count, gamma_p, beta_p):
    axes = tuple(range(s.ndim - 1))
    mean = (jnp.sum(s, axis=axes) / count).reshape(1, CP)
    ex2 = (jnp.sum(ss, axis=axes) / count).reshape(1, CP)
    var = jnp.maximum(ex2 - mean * mean, 0.0)        # biased variance (PyTorch training BN)
    scale = gamma_p * lax.rsqrt(var + EPS)           # padded lanes: gamma=0 -> scale=0
    shift = beta_p - mean * scale
    return scale, shift


# ---------------------------------------------------------------------------
# forward
# ---------------------------------------------------------------------------
@jax.jit
def dilated_bottleneck_forward(x_ncdhw, kparams):
    (w1p, w2big, w3p, g1p, b1p, g2p, b2p, g3p, b3p, alpha_b) = kparams
    N, C, D, H, W = x_ncdhw.shape
    M = N * D * H * W
    assert M % TM == 0 and (H * W) % 8 == 0, "tile-size assumptions violated"
    n_tiles = M // TM
    WP = ((W + 4 + 7) // 8) * 8                      # width pad rounded to sublane multiple
    fp32 = jnp.float32

    # channels-last + lane padding; bf16 copy feeds the MXU, f32 copy is the residual.
    x_cl = jnp.transpose(x_ncdhw, (0, 2, 3, 4, 1)).astype(fp32)
    x2d = jnp.pad(x_cl.reshape(M, C), ((0, 0), (0, CP - C)))
    x2d_bf16 = x2d.astype(jnp.bfloat16)

    row_spec = pl.BlockSpec((TM, CP), lambda i: (i, 0))
    vec_spec = pl.BlockSpec((1, CP), lambda i: (0, 0))
    sum_spec = pl.BlockSpec((1, 8, CP), lambda i: (i, 0, 0))
    wmat_spec = pl.BlockSpec((CP, CP), lambda i: (0, 0))
    cparams1d = pltpu.CompilerParams(dimension_semantics=("parallel",),
                                     vmem_limit_bytes=VMEM_LIMIT)

    # ---- stage A: conv1 (1x1x1) + BN1 partial sums (bf16 activations out) ---------
    t1, s1, ss1 = pl.pallas_call(
        _conv1_kernel,
        grid=(n_tiles,),
        in_specs=[row_spec, wmat_spec],
        out_specs=[row_spec, sum_spec, sum_spec],
        out_shape=[jax.ShapeDtypeStruct((M, CP), jnp.bfloat16),
                   jax.ShapeDtypeStruct((n_tiles, 8, CP), fp32),
                   jax.ShapeDtypeStruct((n_tiles, 8, CP), fp32)],
        compiler_params=cparams1d,
        cost_estimate=pl.CostEstimate(
            flops=2 * M * CP * CP, transcendentals=0,
            bytes_accessed=M * CP * 2 + CP * CP * 2 + M * CP * 2),
    )(x2d_bf16, w1p)
    scale1, shift1 = _bn_scale_shift(s1, ss1, float(M), g1p, b1p)

    # ---- stage B: BN1 + PReLU + grouped dilated 3x3x3 conv + BN2 partial sums -----
    t1_5d = t1.reshape(N, D, H, W, CP)
    t2, s2, ss2 = pl.pallas_call(
        _dilated_gconv_kernel,
        grid=(N,),
        in_specs=[
            pl.BlockSpec((None, D, H, W, CP), lambda n: (n, 0, 0, 0, 0)),   # t1 (read 1x)
            pl.BlockSpec((1, CP), lambda n: (0, 0)),                        # scale1
            pl.BlockSpec((1, CP), lambda n: (0, 0)),                        # shift1
            pl.BlockSpec((1, CP), lambda n: (0, 0)),                        # PReLU slope
            pl.BlockSpec((9 * CP, 3 * CP), lambda n: (0, 0)),               # packed weights
        ],
        out_specs=[
            pl.BlockSpec((None, D, H, W, CP), lambda n: (n, 0, 0, 0, 0)),
            pl.BlockSpec((None, 8, CP), lambda n: (n, 0, 0)),
            pl.BlockSpec((None, 8, CP), lambda n: (n, 0, 0)),
        ],
        out_shape=[jax.ShapeDtypeStruct((N, D, H, W, CP), jnp.bfloat16),
                   jax.ShapeDtypeStruct((N, 8, CP), fp32),
                   jax.ShapeDtypeStruct((N, 8, CP), fp32)],
        scratch_shapes=[pltpu.VMEM((3, H + 4, WP, CP), jnp.bfloat16),   # zero-halo pads
                        pltpu.VMEM((H, WP, 3 * CP), jnp.float32),       # wide matmul result
                        pltpu.VMEM((8, CP), jnp.float32),               # BN2 sum
                        pltpu.VMEM((8, CP), jnp.float32)],              # BN2 sum-of-squares
        compiler_params=pltpu.CompilerParams(
            dimension_semantics=("parallel",),
            vmem_limit_bytes=VMEM_LIMIT),
        cost_estimate=pl.CostEstimate(
            flops=2 * N * D * H * WP * (9 * CP) * (3 * CP), transcendentals=0,
            bytes_accessed=2 * M * CP * 2 + 27 * CP * CP * 2),
    )(t1_5d, scale1, shift1, alpha_b, w2big)
    scale2, shift2 = _bn_scale_shift(s2, ss2, float(M), g2p, b2p)

    # ---- stage C: BN2 + PReLU + conv3 (1x1x1) + BN3 partial sums ------------------
    t3, s3, ss3 = pl.pallas_call(
        _bn_prelu_conv_kernel,
        grid=(n_tiles,),
        in_specs=[row_spec, vec_spec, vec_spec, vec_spec, wmat_spec],
        out_specs=[row_spec, sum_spec, sum_spec],
        out_shape=[jax.ShapeDtypeStruct((M, CP), fp32),
                   jax.ShapeDtypeStruct((n_tiles, 8, CP), fp32),
                   jax.ShapeDtypeStruct((n_tiles, 8, CP), fp32)],
        compiler_params=cparams1d,
        cost_estimate=pl.CostEstimate(
            flops=2 * M * CP * CP, transcendentals=0,
            bytes_accessed=M * CP * 2 + CP * CP * 2 + M * CP * 4),
    )(t2.reshape(M, CP), scale2, shift2, alpha_b, w3p)
    scale3, shift3 = _bn_scale_shift(s3, ss3, float(M), g3p, b3p)

    # ---- stage D: BN3 + residual add + PReLU (in place into t3's buffer) ----------
    out2d = pl.pallas_call(
        _bn_residual_prelu_kernel,
        grid=(n_tiles,),
        in_specs=[row_spec, row_spec, vec_spec, vec_spec, vec_spec],
        out_specs=row_spec,
        out_shape=jax.ShapeDtypeStruct((M, CP), fp32),
        input_output_aliases={0: 0},
        compiler_params=cparams1d,
        cost_estimate=pl.CostEstimate(
            flops=4 * M * CP, transcendentals=0, bytes_accessed=3 * M * CP * 4),
    )(t3, x2d, scale3, shift3, alpha_b)

    out = out2d.reshape(N, D, H, W, CP)[..., :C]
    return jnp.transpose(out, (0, 4, 1, 2, 3))


# ---------------------------------------------------------------------------
# parameters
# ---------------------------------------------------------------------------
def init_params(key, inplanes, planes, cardinality):
    """Deterministic synthetic parameters with the PyTorch module's shapes.

    Conv weights are rounded to bf16-representable values so the f32 reference and the
    bf16-operand MXU path use numerically identical weights.
    """
    assert inplanes == 2 * planes, "residual add requires inplanes == planes * expansion"
    assert planes % cardinality == 0
    ks = jax.random.split(key, 9)
    bf16_exact = lambda w: w.astype(jnp.bfloat16).astype(jnp.float32)
    w1_oi = bf16_exact(0.2 * jax.random.normal(ks[0], (planes, inplanes), jnp.float32))
    w2_g = bf16_exact(0.2 * jax.random.normal(
        ks[1], (planes, planes // cardinality, 3, 3, 3), jnp.float32))
    w3_oi = bf16_exact(0.2 * jax.random.normal(ks[2], (2 * planes, planes), jnp.float32))
    g1 = 1.0 + 0.1 * jax.random.normal(ks[3], (1, planes), jnp.float32)
    b1 = 0.1 * jax.random.normal(ks[4], (1, planes), jnp.float32)
    g2 = 1.0 + 0.1 * jax.random.normal(ks[5], (1, planes), jnp.float32)
    b2 = 0.1 * jax.random.normal(ks[6], (1, planes), jnp.float32)
    g3 = 1.0 + 0.1 * jax.random.normal(ks[7], (1, 2 * planes), jnp.float32)
    b3 = 0.1 * jax.random.normal(ks[8], (1, 2 * planes), jnp.float32)
    alpha = jnp.full((1,), 0.25, jnp.float32)        # PReLU default init (shared slope)
    return (w1_oi, w2_g, w3_oi, g1, b1, g2, b2, g3, b3, alpha)


def prepare_kernel_params(torch_params, cardinality):
    """PyTorch-layout parameters -> lane-padded (CP=128), bf16 kernel-side weights."""
    w1_oi, w2_g, w3_oi, g1, b1, g2, b2, g3, b3, alpha = torch_params
    planes, inplanes = w1_oi.shape
    out_planes = w3_oi.shape[0]
    assert planes % cardinality == 0 and max(inplanes, planes, out_planes) <= CP

    # grouped conv -> dense block-diagonal per-tap matrices (kd, kh, kw, in, out)
    cpg = planes // cardinality
    w2_dense = jnp.zeros((3, 3, 3, planes, planes), jnp.float32)
    for g in range(cardinality):
        blk = w2_g[g * cpg:(g + 1) * cpg]            # (out/g, in/g, 3, 3, 3)
        blk_t = jnp.transpose(blk, (2, 3, 4, 1, 0))  # (3, 3, 3, in/g, out/g)
        w2_dense = w2_dense.at[:, :, :, g * cpg:(g + 1) * cpg,
                               g * cpg:(g + 1) * cpg].set(blk_t)

    # K-packed layout for stage B: rows grouped by (kd, kh), output lanes grouped by kw.
    w2big = jnp.zeros((9 * CP, 3 * CP), jnp.float32)
    for kd in range(3):
        for kh in range(3):
            r = (kd * 3 + kh) * CP
            for kw in range(3):
                w2big = w2big.at[r:r + planes,
                                 kw * CP:kw * CP + planes].set(w2_dense[kd, kh, kw])
    w2big = w2big.astype(jnp.bfloat16)

    def pad_mat(w, r, c):
        return jnp.zeros((CP, CP), jnp.float32).at[:r, :c].set(w).astype(jnp.bfloat16)

    w1p = pad_mat(w1_oi.T, inplanes, planes)
    w3p = pad_mat(w3_oi.T, planes, out_planes)

    def pad_gamma_beta(g, b):
        c = g.size
        gp = jnp.zeros((1, CP), jnp.float32).at[:, :c].set(g.reshape(1, c))  # pad gamma=0
        bp = jnp.zeros((1, CP), jnp.float32).at[:, :c].set(b.reshape(1, c))
        return gp, bp

    g1p, b1p = pad_gamma_beta(g1, b1)
    g2p, b2p = pad_gamma_beta(g2, b2)
    g3p, b3p = pad_gamma_beta(g3, b3)
    alpha_b = jnp.full((1, CP), alpha[0], jnp.float32)   # shared PReLU slope, lane-broadcast
    return (w1p, w2big, w3p, g1p, b1p, g2p, b2p, g3p, b3p, alpha_b)


# ---------------------------------------------------------------------------
# pure-JAX reference (mirrors the PyTorch forward, training-mode BN, f32 HIGHEST)
# ---------------------------------------------------------------------------
def ref_forward(x, torch_params, cardinality):
    w1_oi, w2_g, w3_oi, g1, b1, g2, b2, g3, b3, alpha = torch_params
    dn = ('NCDHW', 'OIDHW', 'NCDHW')
    hp = lax.Precision.HIGHEST

    def bn(v, g, b):
        mu = v.mean(axis=(0, 2, 3, 4), keepdims=True)
        var = jnp.square(v - mu).mean(axis=(0, 2, 3, 4), keepdims=True)
        return ((v - mu) * lax.rsqrt(var + EPS) * g.reshape(1, -1, 1, 1, 1)
                + b.reshape(1, -1, 1, 1, 1))

    def prelu(v):
        return jnp.where(v >= 0.0, v, alpha[0] * v)

    out = lax.conv_general_dilated(x, w1_oi.reshape(w1_oi.shape + (1, 1, 1)),
                                   (1, 1, 1), 'VALID', dimension_numbers=dn, precision=hp)
    out = prelu(bn(out, g1.ravel(), b1.ravel()))
    out = lax.conv_general_dilated(out, w2_g, (1, 1, 1), [(2, 2)] * 3,
                                   rhs_dilation=(2, 2, 2),
                                   feature_group_count=cardinality,
                                   dimension_numbers=dn, precision=hp)
    out = prelu(bn(out, g2.ravel(), b2.ravel()))
    out = lax.conv_general_dilated(out, w3_oi.reshape(w3_oi.shape + (1, 1, 1)),
                                   (1, 1, 1), 'VALID', dimension_numbers=dn, precision=hp)
    out = bn(out, g3.ravel(), b3.ravel())
    return prelu(out + x)


if __name__ == "__main__":
    planes, cardinality = 4, 2
    inplanes = planes * 2          # expansion = 2; residual add requires this
    N, D, H, W = 2, 8, 8, 8

    key = jax.random.PRNGKey(0)
    kx, kp = jax.random.split(key)
    x = jax.random.normal(kx, (N, inplanes, D, H, W), jnp.float32)

    torch_params = init_params(kp, inplanes, planes, cardinality)
    kparams = prepare_kernel_params(torch_params, cardinality)

    out = jax.block_until_ready(dilated_bottleneck_forward(x, kparams))
    ref = jax.block_until_ready(ref_forward(x, torch_params, cardinality))

    assert out.shape == (N, inplanes, D, H, W)
    # tolerance covers bf16 rounding of matmul operands AND of the bf16-stored t1/t2
    # intermediates (~2^-9 relative each); weights are bf16-exact so the f32 reference
    # uses numerically identical weights.
    assert jnp.allclose(out, ref, atol=4e-2, rtol=4e-2), (
        f"max abs err {float(jnp.max(jnp.abs(out - ref)))}")
    print("KERNEL_OK")
</pallas_src>

<mosaic_0001>
module attributes {stable_mosaic.version = 11 : i64} {
  func.func @_conv1_kernel(%arg0: i32, %arg1: memref<512x128xbf16, #tpu.memory_space<vmem>>, %arg2: memref<128x128xbf16, #tpu.memory_space<vmem>>, %arg3: memref<512x128xbf16, #tpu.memory_space<vmem>>, %arg4: memref<1x8x128xf32, #tpu.memory_space<vmem>>, %arg5: memref<1x8x128xf32, #tpu.memory_space<vmem>>) attributes {dimension_semantics = [#tpu.dimension_semantics<parallel>], iteration_bounds = array<i64: 2>, scalar_prefetch = 0 : i64, scratch_operands = 0 : i64, tpu.core_type = #tpu.core_type<tc>, window_params = [{transform_indices = @transform_0, window_bounds = array<i64: 512, 128>}, {pipeline_mode = #tpu.pipeline_mode<synchronous>, transform_indices = @transform_1, window_bounds = array<i64: 128, 128>}, {transform_indices = @transform_2, window_bounds = array<i64: 512, 128>}, {transform_indices = @transform_3, window_bounds = array<i64: 1, 8, 128>}, {transform_indices = @transform_4, window_bounds = array<i64: 1, 8, 128>}]} {
    %c0 = arith.constant 0 : index
    %c0_0 = arith.constant 0 : index
    %0 = vector.load %arg1[%c0, %c0_0] : memref<512x128xbf16, #tpu.memory_space<vmem>>, vector<512x128xbf16>
    %c0_1 = arith.constant 0 : index
    %c0_2 = arith.constant 0 : index
    %1 = vector.load %arg2[%c0_1, %c0_2] : memref<128x128xbf16, #tpu.memory_space<vmem>>, vector<128x128xbf16>
    %cst = arith.constant dense<0.000000e+00> : vector<512x128xf32>
    %2 = tpu.matmul %0, %1, %cst {dimension_numbers = #tpu.dot_dimension_numbers<[1], [0], [0], [1], [0, 0, 1, 1], [], []>} : vector<512x128xbf16>, vector<128x128xbf16>, vector<512x128xf32> -> vector<512x128xf32>
    %3 = vector.shape_cast %2 : vector<512x128xf32> to vector<8x64x128xf32>
    %cst_3 = arith.constant dense<0.000000e+00> : vector<8x128xf32>
    %4 = vector.multi_reduction <add>, %3, %cst_3 [1] : vector<8x64x128xf32> to vector<8x128xf32>
    %5 = vector.shape_cast %4 : vector<8x128xf32> to vector<1x8x128xf32>
    %c0_4 = arith.constant 0 : index
    %c0_5 = arith.constant 0 : index
    %c0_6 = arith.constant 0 : index
    %6 = vector.load %arg4[%c0_4, %c0_5, %c0_6] : memref<1x8x128xf32, #tpu.memory_space<vmem>>, vector<1x8x128xf32>
    tpu.vector_store %arg4[%c0_4, %c0_5, %c0_6], %5 {strides = array<i32>} : memref<1x8x128xf32, #tpu.memory_space<vmem>>, vector<1x8x128xf32>,
    %7 = arith.mulf %2, %2 : vector<512x128xf32>
    %8 = vector.shape_cast %7 : vector<512x128xf32> to vector<8x64x128xf32>
    %cst_7 = arith.constant dense<0.000000e+00> : vector<8x128xf32>
    %9 = vector.multi_reduction <add>, %8, %cst_7 [1] : vector<8x64x128xf32> to vector<8x128xf32>
    %10 = vector.shape_cast %9 : vector<8x128xf32> to vector<1x8x128xf32>
    %c0_8 = arith.constant 0 : index
    %c0_9 = arith.constant 0 : index
    %c0_10 = arith.constant 0 : index
    %11 = vector.load %arg5[%c0_8, %c0_9, %c0_10] : memref<1x8x128xf32, #tpu.memory_space<vmem>>, vector<1x8x128xf32>
    tpu.vector_store %arg5[%c0_8, %c0_9, %c0_10], %10 {strides = array<i32>} : memref<1x8x128xf32, #tpu.memory_space<vmem>>, vector<1x8x128xf32>,
    %12 = arith.truncf %2 : vector<512x128xf32> to vector<512x128xbf16>
    %c0_11 = arith.constant 0 : index
    %c0_12 = arith.constant 0 : index
    %13 = vector.load %arg3[%c0_11, %c0_12] : memref<512x128xbf16, #tpu.memory_space<vmem>>, vector<512x128xbf16>
    tpu.vector_store %arg3[%c0_11, %c0_12], %12 {strides = array<i32>} : memref<512x128xbf16, #tpu.memory_space<vmem>>, vector<512x128xbf16>,
    return
  }
  func.func @transform_0(%arg0: i32) -> (i32, i32) {
    %c0_i32 = arith.constant 0 : i32
    %c0_i32_0 = arith.constant 0 : i32
    return %arg0, %c0_i32 : i32, i32
  }
  func.func @transform_1(%arg0: i32) -> (i32, i32) {
    %c0_i32 = arith.constant 0 : i32
    %c0_i32_0 = arith.constant 0 : i32
    %c0_i32_1 = arith.constant 0 : i32
    return %c0_i32, %c0_i32_0 : i32, i32
  }
  func.func @transform_2(%arg0: i32) -> (i32, i32) {
    %c0_i32 = arith.constant 0 : i32
    %c0_i32_0 = arith.constant 0 : i32
    return %arg0, %c0_i32 : i32, i32
  }
  func.func @transform_3(%arg0: i32) -> (i32, i32, i32) {
    %c0_i32 = arith.constant 0 : i32
    %c0_i32_0 = arith.constant 0 : i32
    %c0_i32_1 = arith.constant 0 : i32
    return %arg0, %c0_i32, %c0_i32_0 : i32, i32, i32
  }
  func.func @transform_4(%arg0: i32) -> (i32, i32, i32) {
    %c0_i32 = arith.constant 0 : i32
    %c0_i32_0 = arith.constant 0 : i32
    %c0_i32_1 = arith.constant 0 : i32
    return %arg0, %c0_i32, %c0_i32_0 : i32, i32, i32
  }
}

module attributes {stable_mosaic.version = 11 : i64} {
  func.func @_bn_prelu_conv_kernel(%arg0: i32, %arg1: memref<512x128xbf16, #tpu.memory_space<vmem>>, %arg2: memref<1x128xf32, #tpu.memory_space<vmem>>, %arg3: memref<1x128xf32, #tpu.memory_space<vmem>>, %arg4: memref<1x128xf32, #tpu.memory_space<vmem>>, %arg5: memref<128x128xbf16, #tpu.memory_space<vmem>>, %arg6: memref<512x128xf32, #tpu.memory_space<vmem>>, %arg7: memref<1x8x128xf32, #tpu.memory_space<vmem>>, %arg8: memref<1x8x128xf32, #tpu.memory_space<vmem>>) attributes {dimension_semantics = [#tpu.dimension_semantics<parallel>], iteration_bounds = array<i64: 2>, scalar_prefetch = 0 : i64, scratch_operands = 0 : i64, tpu.core_type = #tpu.core_type<tc>, window_params = [{transform_indices = @transform_0, window_bounds = array<i64: 512, 128>}, {pipeline_mode = #tpu.pipeline_mode<synchronous>, transform_indices = @transform_1, window_bounds = array<i64: 1, 128>}, {pipeline_mode = #tpu.pipeline_mode<synchronous>, transform_indices = @transform_2, window_bounds = array<i64: 1, 128>}, {pipeline_mode = #tpu.pipeline_mode<synchronous>, transform_indices = @transform_3, window_bounds = array<i64: 1, 128>}, {pipeline_mode = #tpu.pipeline_mode<synchronous>, transform_indices = @transform_4, window_bounds = array<i64: 128, 128>}, {transform_indices = @transform_5, window_bounds = array<i64: 512, 128>}, {transform_indices = @transform_6, window_bounds = array<i64: 1, 8, 128>}, {transform_indices = @transform_7, window_bounds = array<i64: 1, 8, 128>}]} {
    %c0 = arith.constant 0 : index
    %c0_0 = arith.constant 0 : index
    %0 = vector.load %arg1[%c0, %c0_0] : memref<512x128xbf16, #tpu.memory_space<vmem>>, vector<512x128xbf16>
    %1 = arith.extf %0 : vector<512x128xbf16> to vector<512x128xf32>
    %c0_1 = arith.constant 0 : index
    %c0_2 = arith.constant 0 : index
    %2 = vector.load %arg2[%c0_1, %c0_2] : memref<1x128xf32, #tpu.memory_space<vmem>>, vector<1x128xf32>
    %3 = vector.broadcast %2 : vector<1x128xf32> to vector<512x128xf32>
    %4 = arith.mulf %1, %3 : vector<512x128xf32>
    %c0_3 = arith.constant 0 : index
    %c0_4 = arith.constant 0 : index
    %5 = vector.load %arg3[%c0_3, %c0_4] : memref<1x128xf32, #tpu.memory_space<vmem>>, vector<1x128xf32>
    %6 = vector.broadcast %5 : vector<1x128xf32> to vector<512x128xf32>
    %7 = arith.addf %4, %6 : vector<512x128xf32>
    %cst = arith.constant 0.000000e+00 : f32
    %8 = vector.broadcast %cst : f32 to vector<512x128xf32>
    %9 = arith.cmpf oge, %7, %8 : vector<512x128xf32>
    %c0_5 = arith.constant 0 : index
    %c0_6 = arith.constant 0 : index
    %10 = vector.load %arg4[%c0_5, %c0_6] : memref<1x128xf32, #tpu.memory_space<vmem>>, vector<1x128xf32>
    %11 = vector.broadcast %10 : vector<1x128xf32> to vector<512x128xf32>
    %12 = arith.mulf %11, %7 : vector<512x128xf32>
    %13 = arith.select %9, %7, %12 : vector<512x128xi1>, vector<512x128xf32>
    %14 = arith.truncf %13 : vector<512x128xf32> to vector<512x128xbf16>
    %c0_7 = arith.constant 0 : index
    %c0_8 = arith.constant 0 : index
    %15 = vector.load %arg5[%c0_7, %c0_8] : memref<128x128xbf16, #tpu.memory_space<vmem>>, vector<128x128xbf16>
    %cst_9 = arith.constant dense<0.000000e+00> : vector<512x128xf32>
    %16 = tpu.matmul %14, %15, %cst_9 {dimension_numbers = #tpu.dot_dimension_numbers<[1], [0], [0], [1], [0, 0, 1, 1], [], []>} : vector<512x128xbf16>, vector<128x128xbf16>, vector<512x128xf32> -> vector<512x128xf32>
    %c0_10 = arith.constant 0 : index
    %c0_11 = arith.constant 0 : index
    %17 = vector.load %arg6[%c0_10, %c0_11] : memref<512x128xf32, #tpu.memory_space<vmem>>, vector<512x128xf32>
    tpu.vector_store %arg6[%c0_10, %c0_11], %16 {strides = array<i32>} : memref<512x128xf32, #tpu.memory_space<vmem>>, vector<512x128xf32>,
    %18 = vector.shape_cast %16 : vector<512x128xf32> to vector<8x64x128xf32>
    %cst_12 = arith.constant dense<0.000000e+00> : vector<8x128xf32>
    %19 = vector.multi_reduction <add>, %18, %cst_12 [1] : vector<8x64x128xf32> to vector<8x128xf32>
    %20 = vector.shape_cast %19 : vector<8x128xf32> to vector<1x8x128xf32>
    %c0_13 = arith.constant 0 : index
    %c0_14 = arith.constant 0 : index
    %c0_15 = arith.constant 0 : index
    %21 = vector.load %arg7[%c0_13, %c0_14, %c0_15] : memref<1x8x128xf32, #tpu.memory_space<vmem>>, vector<1x8x128xf32>
    tpu.vector_store %arg7[%c0_13, %c0_14, %c0_15], %20 {strides = array<i32>} : memref<1x8x128xf32, #tpu.memory_space<vmem>>, vector<1x8x128xf32>,
    %22 = arith.mulf %16, %16 : vector<512x128xf32>
    %23 = vector.shape_cast %22 : vector<512x128xf32> to vector<8x64x128xf32>
    %cst_16 = arith.constant dense<0.000000e+00> : vector<8x128xf32>
    %24 = vector.multi_reduction <add>, %23, %cst_16 [1] : vector<8x64x128xf32> to vector<8x128xf32>
    %25 = vector.shape_cast %24 : vector<8x128xf32> to vector<1x8x128xf32>
    %c0_17 = arith.constant 0 : index
    %c0_18 = arith.constant 0 : index
    %c0_19 = arith.constant 0 : index
    %26 = vector.load %arg8[%c0_17, %c0_18, %c0_19] : memref<1x8x128xf32, #tpu.memory_space<vmem>>, vector<1x8x128xf32>
    tpu.vector_store %arg8[%c0_17, %c0_18, %c0_19], %25 {strides = array<i32>} : memref<1x8x128xf32, #tpu.memory_space<vmem>>, vector<1x8x128xf32>,
    return
  }
  func.func @transform_0(%arg0: i32) -> (i32, i32) {
    %c0_i32 = arith.constant 0 : i32
    %c0_i32_0 = arith.constant 0 : i32
    return %arg0, %c0_i32 : i32, i32
  }
  func.func @transform_1(%arg0: i32) -> (i32, i32) {
    %c0_i32 = arith.constant 0 : i32
    %c0_i32_0 = arith.constant 0 : i32
    %c0_i32_1 = arith.constant 0 : i32
    return %c0_i32, %c0_i32_0 : i32, i32
  }
  func.func @transform_2(%arg0: i32) -> (i32, i32) {
    %c0_i32 = arith.constant 0 : i32
    %c0_i32_0 = arith.constant 0 : i32
    %c0_i32_1 = arith.constant 0 : i32
    return %c0_i32, %c0_i32_0 : i32, i32
  }
  func.func @transform_3(%arg0: i32) -> (i32, i32) {
    %c0_i32 = arith.constant 0 : i32
    %c0_i32_0 = arith.constant 0 : i32
    %c0_i32_1 = arith.constant 0 : i32
    return %c0_i32, %c0_i32_0 : i32, i32
  }
  func.func @transform_4(%arg0: i32) -> (i32, i32) {
    %c0_i32 = arith.constant 0 : i32
    %c0_i32_0 = arith.constant 0 : i32
    %c0_i32_1 = arith.constant 0 : i32
    return %c0_i32, %c0_i32_0 : i32, i32
  }
  func.func @transform_5(%arg0: i32) -> (i32, i32) {
    %c0_i32 = arith.constant 0 : i32
    %c0_i32_0 = arith.constant 0 : i32
    return %arg0, %c0_i32 : i32, i32
  }
  func.func @transform_6(%arg0: i32) -> (i32, i32, i32) {
    %c0_i32 = arith.constant 0 : i32
    %c0_i32_0 = arith.constant 0 : i32
    %c0_i32_1 = arith.constant 0 : i32
    return %arg0, %c0_i32, %c0_i32_0 : i32, i32, i32
  }
  func.func @transform_7(%arg0: i32) -> (i32, i32, i32) {
    %c0_i32 = arith.constant 0 : i32
    %c0_i32_0 = arith.constant 0 : i32
    %c0_i32_1 = arith.constant 0 : i32
    return %arg0, %c0_i32, %c0_i32_0 : i32, i32, i32
  }
}

module attributes {stable_mosaic.version = 11 : i64} {
  func.func @_dilated_gconv_kernel(%arg0: i32, %arg1: memref<1x8x8x8x128xbf16, #tpu.memory_space<vmem>>, %arg2: memref<1x128xf32, #tpu.memory_space<vmem>>, %arg3: memref<1x128xf32, #tpu.memory_space<vmem>>, %arg4: memref<1x128xf32, #tpu.memory_space<vmem>>, %arg5: memref<1152x384xbf16, #tpu.memory_space<vmem>>, %arg6: memref<1x8x8x8x128xbf16, #tpu.memory_space<vmem>>, %arg7: memref<1x8x128xf32, #tpu.memory_space<vmem>>, %arg8: memref<1x8x128xf32, #tpu.memory_space<vmem>>, %arg9: memref<3x12x16x128xbf16, #tpu.memory_space<vmem>>, %arg10: memref<8x16x384xf32, #tpu.memory_space<vmem>>, %arg11: memref<8x128xf32, #tpu.memory_space<vmem>>, %arg12: memref<8x128xf32, #tpu.memory_space<vmem>>) attributes {dimension_semantics = [#tpu.dimension_semantics<parallel>], iteration_bounds = array<i64: 2>, scalar_prefetch = 0 : i64, scratch_operands = 4 : i64, tpu.core_type = #tpu.core_type<tc>, window_params = [{transform_indices = @transform_0, window_bounds = array<i64: 1, 8, 8, 8, 128>}, {pipeline_mode = #tpu.pipeline_mode<synchronous>, transform_indices = @transform_1, window_bounds = array<i64: 1, 128>}, {pipeline_mode = #tpu.pipeline_mode<synchronous>, transform_indices = @transform_2, window_bounds = array<i64: 1, 128>}, {pipeline_mode = #tpu.pipeline_mode<synchronous>, transform_indices = @transform_3, window_bounds = array<i64: 1, 128>}, {pipeline_mode = #tpu.pipeline_mode<synchronous>, transform_indices = @transform_4, window_bounds = array<i64: 1152, 384>}, {transform_indices = @transform_5, window_bounds = array<i64: 1, 8, 8, 8, 128>}, {transform_indices = @transform_6, window_bounds = array<i64: 1, 8, 128>}, {transform_indices = @transform_7, window_bounds = array<i64: 1, 8, 128>}]} {
    %c0 = arith.constant 0 : index
    %c0_0 = arith.constant 0 : index
    %0 = vector.load %arg2[%c0, %c0_0] : memref<1x128xf32, #tpu.memory_space<vmem>>, vector<1x128xf32>
    %1 = vector.shape_cast %0 : vector<1x128xf32> to vector<1x1x128xf32>
    %c0_1 = arith.constant 0 : index
    %c0_2 = arith.constant 0 : index
    %2 = vector.load %arg3[%c0_1, %c0_2] : memref<1x128xf32, #tpu.memory_space<vmem>>, vector<1x128xf32>
    %3 = vector.shape_cast %2 : vector<1x128xf32> to vector<1x1x128xf32>
    %c0_3 = arith.constant 0 : index
    %c0_4 = arith.constant 0 : index
    %4 = vector.load %arg4[%c0_3, %c0_4] : memref<1x128xf32, #tpu.memory_space<vmem>>, vector<1x128xf32>
    %5 = vector.shape_cast %4 : vector<1x128xf32> to vector<1x1x128xf32>
    %cst = arith.constant 0.000000e+00 : bf16
    %6 = vector.broadcast %cst : bf16 to vector<3x12x16x128xbf16>
    %c0_5 = arith.constant 0 : index
    %c0_6 = arith.constant 0 : index
    %c0_7 = arith.constant 0 : index
    %c0_8 = arith.constant 0 : index
    %7 = vector.load %arg9[%c0_5, %c0_6, %c0_7, %c0_8] : memref<3x12x16x128xbf16, #tpu.memory_space<vmem>>, vector<3x12x16x128xbf16>
    tpu.vector_store %arg9[%c0_5, %c0_6, %c0_7, %c0_8], %6 {strides = array<i32>} : memref<3x12x16x128xbf16, #tpu.memory_space<vmem>>, vector<3x12x16x128xbf16>,
    %cst_9 = arith.constant 0.000000e+00 : f32
    %8 = vector.broadcast %cst_9 : f32 to vector<8x128xf32>
    %c0_10 = arith.constant 0 : index
    %c0_11 = arith.constant 0 : index
    %9 = vector.load %arg11[%c0_10, %c0_11] : memref<8x128xf32, #tpu.memory_space<vmem>>, vector<8x128xf32>
    tpu.vector_store %arg11[%c0_10, %c0_11], %8 {strides = array<i32>} : memref<8x128xf32, #tpu.memory_space<vmem>>, vector<8x128xf32>,
    %cst_12 = arith.constant 0.000000e+00 : f32
    %10 = vector.broadcast %cst_12 : f32 to vector<8x128xf32>
    %c0_13 = arith.constant 0 : index
    %c0_14 = arith.constant 0 : index
    %11 = vector.load %arg12[%c0_13, %c0_14] : memref<8x128xf32, #tpu.memory_space<vmem>>, vector<8x128xf32>
    tpu.vector_store %arg12[%c0_13, %c0_14], %10 {strides = array<i32>} : memref<8x128xf32, #tpu.memory_space<vmem>>, vector<8x128xf32>,
    %c0_i32 = arith.constant 0 : i32
    %c8_i32 = arith.constant 8 : i32
    %12 = arith.addi %c0_i32, %c8_i32 : i32
    %c1_i32 = arith.constant 1 : i32
    scf.for %arg13 = %c0_i32 to %12 step %c1_i32  : i32 {
      %c2_i32 = arith.constant 2 : i32
      %21 = arith.subi %arg13, %c2_i32 : i32
      %c0_i32_26 = arith.constant 0 : i32
      %22 = arith.maxsi %21, %c0_i32_26 : i32
      %c2_i32_27 = arith.constant 2 : i32
      %23 = arith.addi %arg13, %c2_i32_27 : i32
      %c7_i32 = arith.constant 7 : i32
      %24 = arith.minsi %23, %c7_i32 : i32
      %c2_i32_28 = arith.constant 2 : i32
      %25 = arith.cmpi sge, %arg13, %c2_i32_28 : i32
      %26 = arith.extui %25 : i1 to i32
      %27 = arith.sitofp %26 : i32 to f32
      %c6_i32 = arith.constant 6 : i32
      %28 = arith.cmpi slt, %arg13, %c6_i32 : i32
      %29 = arith.extui %28 : i1 to i32
      %30 = arith.sitofp %29 : i32 to f32
      %c0_29 = arith.constant 0 : index
      %31 = arith.index_cast %22 : i32 to index
      %c0_30 = arith.constant 0 : index
      %c0_31 = arith.constant 0 : index
      %c0_32 = arith.constant 0 : index
      %32 = vector.load %arg1[%c0_29, %31, %c0_30, %c0_31, %c0_32] : memref<1x8x8x8x128xbf16, #tpu.memory_space<vmem>>, vector<1x1x8x8x128xbf16>
      %33 = vector.shape_cast %32 : vector<1x1x8x8x128xbf16> to vector<1x8x8x128xbf16>
      %34 = vector.shape_cast %33 : vector<1x8x8x128xbf16> to vector<8x8x128xbf16>
      %35 = arith.extf %34 : vector<8x8x128xbf16> to vector<8x8x128xf32>
      %36 = vector.broadcast %1 : vector<1x1x128xf32> to vector<8x8x128xf32>
      %37 = arith.mulf %35, %36 : vector<8x8x128xf32>
      %38 = vector.broadcast %3 : vector<1x1x128xf32> to vector<8x8x128xf32>
      %39 = arith.addf %37, %38 : vector<8x8x128xf32>
      %cst_33 = arith.constant 0.000000e+00 : f32
      %40 = vector.broadcast %cst_33 : f32 to vector<8x8x128xf32>
      %41 = arith.cmpf oge, %39, %40 : vector<8x8x128xf32>
      %42 = vector.broadcast %5 : vector<1x1x128xf32> to vector<8x8x128xf32>
      %43 = arith.mulf %42, %39 : vector<8x8x128xf32>
      %44 = arith.select %41, %39, %43 : vector<8x8x128xi1>, vector<8x8x128xf32>
      %45 = vector.broadcast %27 : f32 to vector<8x8x128xf32>
      %46 = arith.mulf %44, %45 : vector<8x8x128xf32>
      %47 = arith.truncf %46 : vector<8x8x128xf32> to vector<8x8x128xbf16>
      %c0_34 = arith.constant 0 : index
      %c2 = arith.constant 2 : index
      %c2_35 = arith.constant 2 : index
      %c0_36 = arith.constant 0 : index
      %48 = vector.load %arg9[%c0_34, %c2, %c2_35, %c0_36] : memref<3x12x16x128xbf16, #tpu.memory_space<vmem>>, vector<1x8x8x128xbf16>
      %49 = vector.shape_cast %48 : vector<1x8x8x128xbf16> to vector<8x8x128xbf16>
      %50 = vector.shape_cast %47 : vector<8x8x128xbf16> to vector<1x8x8x128xbf16>
      tpu.vector_store %arg9[%c0_34, %c2, %c2_35, %c0_36], %50 {strides = array<i32>} : memref<3x12x16x128xbf16, #tpu.memory_space<vmem>>, vector<1x8x8x128xbf16>,
      %c0_37 = arith.constant 0 : index
      %51 = arith.index_cast %arg13 : i32 to index
      %c0_38 = arith.constant 0 : index
      %c0_39 = arith.constant 0 : index
      %c0_40 = arith.constant 0 : index
      %52 = vector.load %arg1[%c0_37, %51, %c0_38, %c0_39, %c0_40] : memref<1x8x8x8x128xbf16, #tpu.memory_space<vmem>>, vector<1x1x8x8x128xbf16>
      %53 = vector.shape_cast %52 : vector<1x1x8x8x128xbf16> to vector<1x8x8x128xbf16>
      %54 = vector.shape_cast %53 : vector<1x8x8x128xbf16> to vector<8x8x128xbf16>
      %55 = arith.extf %54 : vector<8x8x128xbf16> to vector<8x8x128xf32>
      %56 = vector.broadcast %1 : vector<1x1x128xf32> to vector<8x8x128xf32>
      %57 = arith.mulf %55, %56 : vector<8x8x128xf32>
      %58 = vector.broadcast %3 : vector<1x1x128xf32> to vector<8x8x128xf32>
      %59 = arith.addf %57, %58 : vector<8x8x128xf32>
      %cst_41 = arith.constant 0.000000e+00 : f32
      %60 = vector.broadcast %cst_41 : f32 to vector<8x8x128xf32>
      %61 = arith.cmpf oge, %59, %60 : vector<8x8x128xf32>
      %62 = vector.broadcast %5 : vector<1x1x128xf32> to vector<8x8x128xf32>
      %63 = arith.mulf %62, %59 : vector<8x8x128xf32>
      %64 = arith.select %61, %59, %63 : vector<8x8x128xi1>, vector<8x8x128xf32>
      %65 = arith.truncf %64 : vector<8x8x128xf32> to vector<8x8x128xbf16>
      %c1 = arith.constant 1 : index
      %c2_42 = arith.constant 2 : index
      %c2_43 = arith.constant 2 : index
      %c0_44 = arith.constant 0 : index
      %66 = vector.load %arg9[%c1, %c2_42, %c2_43, %c0_44] : memref<3x12x16x128xbf16, #tpu.memory_space<vmem>>, vector<1x8x8x128xbf16>
      %67 = vector.shape_cast %66 : vector<1x8x8x128xbf16> to vector<8x8x128xbf16>
      %68 = vector.shape_cast %65 : vector<8x8x128xbf16> to vector<1x8x8x128xbf16>
      tpu.vector_store %arg9[%c1, %c2_42, %c2_43, %c0_44], %68 {strides = array<i32>} : memref<3x12x16x128xbf16, #tpu.memory_space<vmem>>, vector<1x8x8x128xbf16>,
      %c0_45 = arith.constant 0 : index
      %69 = arith.index_cast %24 : i32 to index
      %c0_46 = arith.constant 0 : index
      %c0_47 = arith.constant 0 : index
      %c0_48 = arith.constant 0 : index
      %70 = vector.load %arg1[%c0_45, %69, %c0_46, %c0_47, %c0_48] : memref<1x8x8x8x128xbf16, #tpu.memory_space<vmem>>, vector<1x1x8x8x128xbf16>
      %71 = vector.shape_cast %70 : vector<1x1x8x8x128xbf16> to vector<1x8x8x128xbf16>
      %72 = vector.shape_cast %71 : vector<1x8x8x128xbf16> to vector<8x8x128xbf16>
      %73 = arith.extf %72 : vector<8x8x128xbf16> to vector<8x8x128xf32>
      %74 = vector.broadcast %1 : vector<1x1x128xf32> to vector<8x8x128xf32>
      %75 = arith.mulf %73, %74 : vector<8x8x128xf32>
      %76 = vector.broadcast %3 : vector<1x1x128xf32> to vector<8x8x128xf32>
      %77 = arith.addf %75, %76 : vector<8x8x128xf32>
      %cst_49 = arith.constant 0.000000e+00 : f32
      %78 = vector.broadcast %cst_49 : f32 to vector<8x8x128xf32>
      %79 = arith.cmpf oge, %77, %78 : vector<8x8x128xf32>
      %80 = vector.broadcast %5 : vector<1x1x128xf32> to vector<8x8x128xf32>
      %81 = arith.mulf %80, %77 : vector<8x8x128xf32>
      %82 = arith.select %79, %77, %81 : vector<8x8x128xi1>, vector<8x8x128xf32>
      %83 = vector.broadcast %30 : f32 to vector<8x8x128xf32>
      %84 = arith.mulf %82, %83 : vector<8x8x128xf32>
      %85 = arith.truncf %84 : vector<8x8x128xf32> to vector<8x8x128xbf16>
      %c2_50 = arith.constant 2 : index
      %c2_51 = arith.constant 2 : index
      %c2_52 = arith.constant 2 : index
      %c0_53 = arith.constant 0 : index
      %86 = vector.load %arg9[%c2_50, %c2_51, %c2_52, %c0_53] : memref<3x12x16x128xbf16, #tpu.memory_space<vmem>>, vector<1x8x8x128xbf16>
      %87 = vector.shape_cast %86 : vector<1x8x8x128xbf16> to vector<8x8x128xbf16>
      %88 = vector.shape_cast %85 : vector<8x8x128xbf16> to vector<1x8x8x128xbf16>
      tpu.vector_store %arg9[%c2_50, %c2_51, %c2_52, %c0_53], %88 {strides = array<i32>} : memref<3x12x16x128xbf16, #tpu.memory_space<vmem>>, vector<1x8x8x128xbf16>,
      %c0_54 = arith.constant 0 : index
      %c0_55 = arith.constant 0 : index
      %c0_56 = arith.constant 0 : index
      %c0_57 = arith.constant 0 : index
      %89 = vector.load %arg9[%c0_54, %c0_55, %c0_56, %c0_57] : memref<3x12x16x128xbf16, #tpu.memory_space<vmem>>, vector<1x8x16x128xbf16>
      %90 = vector.shape_cast %89 : vector<1x8x16x128xbf16> to vector<8x16x128xbf16>
      %91 = vector.shape_cast %90 : vector<8x16x128xbf16> to vector<128x128xbf16>
      %c0_58 = arith.constant 0 : index
      %c2_59 = arith.constant 2 : index
      %c0_60 = arith.constant 0 : index
      %c0_61 = arith.constant 0 : index
      %92 = vector.load %arg9[%c0_58, %c2_59, %c0_60, %c0_61] : memref<3x12x16x128xbf16, #tpu.memory_space<vmem>>, vector<1x8x16x128xbf16>
      %93 = vector.shape_cast %92 : vector<1x8x16x128xbf16> to vector<8x16x128xbf16>
      %94 = vector.shape_cast %93 : vector<8x16x128xbf16> to vector<128x128xbf16>
      %c0_62 = arith.constant 0 : index
      %c4 = arith.constant 4 : index
      %c0_63 = arith.constant 0 : index
      %c0_64 = arith.constant 0 : index
      %95 = vector.load %arg9[%c0_62, %c4, %c0_63, %c0_64] : memref<3x12x16x128xbf16, #tpu.memory_space<vmem>>, vector<1x8x16x128xbf16>
      %96 = vector.shape_cast %95 : vector<1x8x16x128xbf16> to vector<8x16x128xbf16>
      %97 = vector.shape_cast %96 : vector<8x16x128xbf16> to vector<128x128xbf16>
      %c1_65 = arith.constant 1 : index
      %c0_66 = arith.constant 0 : index
      %c0_67 = arith.constant 0 : index
      %c0_68 = arith.constant 0 : index
      %98 = vector.load %arg9[%c1_65, %c0_66, %c0_67, %c0_68] : memref<3x12x16x128xbf16, #tpu.memory_space<vmem>>, vector<1x8x16x128xbf16>
      %99 = vector.shape_cast %98 : vector<1x8x16x128xbf16> to vector<8x16x128xbf16>
      %100 = vector.shape_cast %99 : vector<8x16x128xbf16> to vector<128x128xbf16>
      %c1_69 = arith.constant 1 : index
      %c2_70 = arith.constant 2 : index
      %c0_71 = arith.constant 0 : index
      %c0_72 = arith.constant 0 : index
      %101 = vector.load %arg9[%c1_69, %c2_70, %c0_71, %c0_72] : memref<3x12x16x128xbf16, #tpu.memory_space<vmem>>, vector<1x8x16x128xbf16>
      %102 = vector.shape_cast %101 : vector<1x8x16x128xbf16> to vector<8x16x128xbf16>
      %103 = vector.shape_cast %102 : vector<8x16x128xbf16> to vector<128x128xbf16>
      %c1_73 = arith.constant 1 : index
      %c4_74 = arith.constant 4 : index
      %c0_75 = arith.constant 0 : index
      %c0_76 = arith.constant 0 : index
      %104 = vector.load %arg9[%c1_73, %c4_74, %c0_75, %c0_76] : memref<3x12x16x128xbf16, #tpu.memory_space<vmem>>, vector<1x8x16x128xbf16>
      %105 = vector.shape_cast %104 : vector<1x8x16x128xbf16> to vector<8x16x128xbf16>
      %106 = vector.shape_cast %105 : vector<8x16x128xbf16> to vector<128x128xbf16>
      %c2_77 = arith.constant 2 : index
      %c0_78 = arith.constant 0 : index
      %c0_79 = arith.constant 0 : index
      %c0_80 = arith.constant 0 : index
      %107 = vector.load %arg9[%c2_77, %c0_78, %c0_79, %c0_80] : memref<3x12x16x128xbf16, #tpu.memory_space<vmem>>, vector<1x8x16x128xbf16>
      %108 = vector.shape_cast %107 : vector<1x8x16x128xbf16> to vector<8x16x128xbf16>
      %109 = vector.shape_cast %108 : vector<8x16x128xbf16> to vector<128x128xbf16>
      %c2_81 = arith.constant 2 : index
      %c2_82 = arith.constant 2 : index
      %c0_83 = arith.constant 0 : index
      %c0_84 = arith.constant 0 : index
      %110 = vector.load %arg9[%c2_81, %c2_82, %c0_83, %c0_84] : memref<3x12x16x128xbf16, #tpu.memory_space<vmem>>, vector<1x8x16x128xbf16>
      %111 = vector.shape_cast %110 : vector<1x8x16x128xbf16> to vector<8x16x128xbf16>
      %112 = vector.shape_cast %111 : vector<8x16x128xbf16> to vector<128x128xbf16>
      %c2_85 = arith.constant 2 : index
      %c4_86 = arith.constant 4 : index
      %c0_87 = arith.constant 0 : index
      %c0_88 = arith.constant 0 : index
      %113 = vector.load %arg9[%c2_85, %c4_86, %c0_87, %c0_88] : memref<3x12x16x128xbf16, #tpu.memory_space<vmem>>, vector<1x8x16x128xbf16>
      %114 = vector.shape_cast %113 : vector<1x8x16x128xbf16> to vector<8x16x128xbf16>
      %115 = vector.shape_cast %114 : vector<8x16x128xbf16> to vector<128x128xbf16>
      %116 = tpu.concatenate %91, %94, %97, %100, %103, %106, %109, %112, %115 in 1 : vector<128x128xbf16>, vector<128x128xbf16>, vector<128x128xbf16>, vector<128x128xbf16>, vector<128x128xbf16>, vector<128x128xbf16>, vector<128x128xbf16>, vector<128x128xbf16>, vector<128x128xbf16> -> vector<128x1152xbf16>
      %c0_89 = arith.constant 0 : index
      %c0_90 = arith.constant 0 : index
      %117 = vector.load %arg5[%c0_89, %c0_90] : memref<1152x384xbf16, #tpu.memory_space<vmem>>, vector<1152x384xbf16>
      %cst_91 = arith.constant dense<0.000000e+00> : vector<128x384xf32>
      %118 = tpu.matmul %116, %117, %cst_91 {dimension_numbers = #tpu.dot_dimension_numbers<[1], [0], [0], [1], [0, 0, 1, 1], [], []>} : vector<128x1152xbf16>, vector<1152x384xbf16>, vector<128x384xf32> -> vector<128x384xf32>
      %119 = vector.shape_cast %118 : vector<128x384xf32> to vector<8x16x384xf32>
      %c0_92 = arith.constant 0 : index
      %c0_93 = arith.constant 0 : index
      %c0_94 = arith.constant 0 : index
      %120 = vector.load %arg10[%c0_92, %c0_93, %c0_94] : memref<8x16x384xf32, #tpu.memory_space<vmem>>, vector<8x16x384xf32>
      tpu.vector_store %arg10[%c0_92, %c0_93, %c0_94], %119 {strides = array<i32>} : memref<8x16x384xf32, #tpu.memory_space<vmem>>, vector<8x16x384xf32>,
      %c0_95 = arith.constant 0 : index
      %c0_96 = arith.constant 0 : index
      %c0_97 = arith.constant 0 : index
      %121 = vector.load %arg10[%c0_95, %c0_96, %c0_97] : memref<8x16x384xf32, #tpu.memory_space<vmem>>, vector<8x8x128xf32>
      %c0_98 = arith.constant 0 : index
      %c2_99 = arith.constant 2 : index
      %c128 = arith.constant 128 : index
      %122 = vector.load %arg10[%c0_98, %c2_99, %c128] : memref<8x16x384xf32, #tpu.memory_space<vmem>>, vector<8x8x128xf32>
      %123 = arith.addf %121, %122 : vector<8x8x128xf32>
      %c0_100 = arith.constant 0 : index
      %c4_101 = arith.constant 4 : index
      %c256 = arith.constant 256 : index
      %124 = vector.load %arg10[%c0_100, %c4_101, %c256] : memref<8x16x384xf32, #tpu.memory_space<vmem>>, vector<8x8x128xf32>
      %125 = arith.addf %123, %124 : vector<8x8x128xf32>
      %126 = vector.shape_cast %125 : vector<8x8x128xf32> to vector<1x8x8x128xf32>
      %127 = arith.truncf %126 : vector<1x8x8x128xf32> to vector<1x8x8x128xbf16>
      %c0_102 = arith.constant 0 : index
      %128 = arith.index_cast %arg13 : i32 to index
      %c0_103 = arith.constant 0 : index
      %c0_104 = arith.constant 0 : index
      %c0_105 = arith.constant 0 : index
      %129 = vector.load %arg6[%c0_102, %128, %c0_103, %c0_104, %c0_105] : memref<1x8x8x8x128xbf16, #tpu.memory_space<vmem>>, vector<1x1x8x8x128xbf16>
      %130 = vector.shape_cast %129 : vector<1x1x8x8x128xbf16> to vector<1x8x8x128xbf16>
      %131 = vector.shape_cast %127 : vector<1x8x8x128xbf16> to vector<1x1x8x8x128xbf16>
      tpu.vector_store %arg6[%c0_102, %128, %c0_103, %c0_104, %c0_105], %131 {strides = array<i32>} : memref<1x8x8x8x128xbf16, #tpu.memory_space<vmem>>, vector<1x1x8x8x128xbf16>,
      %c0_106 = arith.constant 0 : index
      %c0_107 = arith.constant 0 : index
      %132 = vector.load %arg11[%c0_106, %c0_107] : memref<8x128xf32, #tpu.memory_space<vmem>>, vector<8x128xf32>
      %cst_108 = arith.constant dense<0.000000e+00> : vector<8x128xf32>
      %133 = vector.multi_reduction <add>, %125, %cst_108 [1] : vector<8x8x128xf32> to vector<8x128xf32>
      %134 = arith.addf %132, %133 : vector<8x128xf32>
      %c0_109 = arith.constant 0 : index
      %c0_110 = arith.constant 0 : index
      %135 = vector.load %arg11[%c0_109, %c0_110] : memref<8x128xf32, #tpu.memory_space<vmem>>, vector<8x128xf32>
      tpu.vector_store %arg11[%c0_109, %c0_110], %134 {strides = array<i32>} : memref<8x128xf32, #tpu.memory_space<vmem>>, vector<8x128xf32>,
      %c0_111 = arith.constant 0 : index
      %c0_112 = arith.constant 0 : index
      %136 = vector.load %arg12[%c0_111, %c0_112] : memref<8x128xf32, #tpu.memory_space<vmem>>, vector<8x128xf32>
      %137 = arith.mulf %125, %125 : vector<8x8x128xf32>
      %cst_113 = arith.constant dense<0.000000e+00> : vector<8x128xf32>
      %138 = vector.multi_reduction <add>, %137, %cst_113 [1] : vector<8x8x128xf32> to vector<8x128xf32>
      %139 = arith.addf %136, %138 : vector<8x128xf32>
      %c0_114 = arith.constant 0 : index
      %c0_115 = arith.constant 0 : index
      %140 = vector.load %arg12[%c0_114, %c0_115] : memref<8x128xf32, #tpu.memory_space<vmem>>, vector<8x128xf32>
      tpu.vector_store %arg12[%c0_114, %c0_115], %139 {strides = array<i32>} : memref<8x128xf32, #tpu.memory_space<vmem>>, vector<8x128xf32>,
    }
    %c8_i32_15 = arith.constant 8 : i32
    %c0_16 = arith.constant 0 : index
    %c0_17 = arith.constant 0 : index
    %13 = vector.load %arg11[%c0_16, %c0_17] : memref<8x128xf32, #tpu.memory_space<vmem>>, vector<8x128xf32>
    %c0_18 = arith.constant 0 : index
    %c0_19 = arith.constant 0 : index
    %c0_20 = arith.constant 0 : index
    %14 = vector.load %arg7[%c0_18, %c0_19, %c0_20] : memref<1x8x128xf32, #tpu.memory_space<vmem>>, vector<1x8x128xf32>
    %15 = vector.shape_cast %14 : vector<1x8x128xf32> to vector<8x128xf32>
    %16 = vector.shape_cast %13 : vector<8x128xf32> to vector<1x8x128xf32>
    tpu.vector_store %arg7[%c0_18, %c0_19, %c0_20], %16 {strides = array<i32>} : memref<1x8x128xf32, #tpu.memory_space<vmem>>, vector<1x8x128xf32>,
    %c0_21 = arith.constant 0 : index
    %c0_22 = arith.constant 0 : index
    %17 = vector.load %arg12[%c0_21, %c0_22] : memref<8x128xf32, #tpu.memory_space<vmem>>, vector<8x128xf32>
    %c0_23 = arith.constant 0 : index
    %c0_24 = arith.constant 0 : index
    %c0_25 = arith.constant 0 : index
    %18 = vector.load %arg8[%c0_23, %c0_24, %c0_25] : memref<1x8x128xf32, #tpu.memory_space<vmem>>, vector<1x8x128xf32>
    %19 = vector.shape_cast %18 : vector<1x8x128xf32> to vector<8x128xf32>
    %20 = vector.shape_cast %17 : vector<8x128xf32> to vector<1x8x128xf32>
    tpu.vector_store %arg8[%c0_23, %c0_24, %c0_25], %20 {strides = array<i32>} : memref<1x8x128xf32, #tpu.memory_space<vmem>>, vector<1x8x128xf32>,
    return
  }
  func.func @transform_0(%arg0: i32) -> (i32, i32, i32, i32, i32) {
    %c0_i32 = arith.constant 0 : i32
    %c0_i32_0 = arith.constant 0 : i32
    %c0_i32_1 = arith.constant 0 : i32
    %c0_i32_2 = arith.constant 0 : i32
    %c0_i32_3 = arith.constant 0 : i32
    return %arg0, %c0_i32, %c0_i32_0, %c0_i32_1, %c0_i32_2 : i32, i32, i32, i32, i32
  }
  func.func @transform_1(%arg0: i32) -> (i32, i32) {
    %c0_i32 = arith.constant 0 : i32
    %c0_i32_0 = arith.constant 0 : i32
    %c0_i32_1 = arith.constant 0 : i32
    return %c0_i32, %c0_i32_0 : i32, i32
  }
  func.func @transform_2(%arg0: i32) -> (i32, i32) {
    %c0_i32 = arith.constant 0 : i32
    %c0_i32_0 = arith.constant 0 : i32
    %c0_i32_1 = arith.constant 0 : i32
    return %c0_i32, %c0_i32_0 : i32, i32
  }
  func.func @transform_3(%arg0: i32) -> (i32, i32) {
    %c0_i32 = arith.constant 0 : i32
    %c0_i32_0 = arith.constant 0 : i32
    %c0_i32_1 = arith.constant 0 : i32
    return %c0_i32, %c0_i32_0 : i32, i32
  }
  func.func @transform_4(%arg0: i32) -> (i32, i32) {
    %c0_i32 = arith.constant 0 : i32
    %c0_i32_0 = arith.constant 0 : i32
    %c0_i32_1 = arith.constant 0 : i32
    return %c0_i32, %c0_i32_0 : i32, i32
  }
  func.func @transform_5(%arg0: i32) -> (i32, i32, i32, i32, i32) {
    %c0_i32 = arith.constant 0 : i32
    %c0_i32_0 = arith.constant 0 : i32
    %c0_i32_1 = arith.constant 0 : i32
    %c0_i32_2 = arith.constant 0 : i32
    %c0_i32_3 = arith.constant 0 : i32
    return %arg0, %c0_i32, %c0_i32_0, %c0_i32_1, %c0_i32_2 : i32, i32, i32, i32, i32
  }
  func.func @transform_6(%arg0: i32) -> (i32, i32, i32) {
    %c0_i32 = arith.constant 0 : i32
    %c0_i32_0 = arith.constant 0 : i32
    %c0_i32_1 = arith.constant 0 : i32
    return %arg0, %c0_i32, %c0_i32_0 : i32, i32, i32
  }
  func.func @transform_7(%arg0: i32) -> (i32, i32, i32) {
    %c0_i32 = arith.constant 0 : i32
    %c0_i32_0 = arith.constant 0 : i32
    %c0_i32_1 = arith.constant 0 : i32
    return %arg0, %c0_i32, %c0_i32_0 : i32, i32, i32
  }
}

module attributes {stable_mosaic.version = 11 : i64} {
  func.func @_bn_residual_prelu_kernel(%arg0: i32, %arg1: memref<512x128xf32, #tpu.memory_space<vmem>>, %arg2: memref<512x128xf32, #tpu.memory_space<vmem>>, %arg3: memref<1x128xf32, #tpu.memory_space<vmem>>, %arg4: memref<1x128xf32, #tpu.memory_space<vmem>>, %arg5: memref<1x128xf32, #tpu.memory_space<vmem>>, %arg6: memref<512x128xf32, #tpu.memory_space<vmem>>) attributes {dimension_semantics = [#tpu.dimension_semantics<parallel>], iteration_bounds = array<i64: 2>, scalar_prefetch = 0 : i64, scratch_operands = 0 : i64, tpu.core_type = #tpu.core_type<tc>, window_params = [{transform_indices = @transform_0, window_bounds = array<i64: 512, 128>}, {transform_indices = @transform_1, window_bounds = array<i64: 512, 128>}, {pipeline_mode = #tpu.pipeline_mode<synchronous>, transform_indices = @transform_2, window_bounds = array<i64: 1, 128>}, {pipeline_mode = #tpu.pipeline_mode<synchronous>, transform_indices = @transform_3, window_bounds = array<i64: 1, 128>}, {pipeline_mode = #tpu.pipeline_mode<synchronous>, transform_indices = @transform_4, window_bounds = array<i64: 1, 128>}, {transform_indices = @transform_5, window_bounds = array<i64: 512, 128>}]} {
    %c0 = arith.constant 0 : index
    %c0_0 = arith.constant 0 : index
    %0 = vector.load %arg1[%c0, %c0_0] : memref<512x128xf32, #tpu.memory_space<vmem>>, vector<512x128xf32>
    %c0_1 = arith.constant 0 : index
    %c0_2 = arith.constant 0 : index
    %1 = vector.load %arg3[%c0_1, %c0_2] : memref<1x128xf32, #tpu.memory_space<vmem>>, vector<1x128xf32>
    %2 = vector.broadcast %1 : vector<1x128xf32> to vector<512x128xf32>
    %3 = arith.mulf %0, %2 : vector<512x128xf32>
    %c0_3 = arith.constant 0 : index
    %c0_4 = arith.constant 0 : index
    %4 = vector.load %arg4[%c0_3, %c0_4] : memref<1x128xf32, #tpu.memory_space<vmem>>, vector<1x128xf32>
    %5 = vector.broadcast %4 : vector<1x128xf32> to vector<512x128xf32>
    %6 = arith.addf %3, %5 : vector<512x128xf32>
    %c0_5 = arith.constant 0 : index
    %c0_6 = arith.constant 0 : index
    %7 = vector.load %arg2[%c0_5, %c0_6] : memref<512x128xf32, #tpu.memory_space<vmem>>, vector<512x128xf32>
    %8 = arith.addf %6, %7 : vector<512x128xf32>
    %cst = arith.constant 0.000000e+00 : f32
    %9 = vector.broadcast %cst : f32 to vector<512x128xf32>
    %10 = arith.cmpf oge, %8, %9 : vector<512x128xf32>
    %c0_7 = arith.constant 0 : index
    %c0_8 = arith.constant 0 : index
    %11 = vector.load %arg5[%c0_7, %c0_8] : memref<1x128xf32, #tpu.memory_space<vmem>>, vector<1x128xf32>
    %12 = vector.broadcast %11 : vector<1x128xf32> to vector<512x128xf32>
    %13 = arith.mulf %12, %8 : vector<512x128xf32>
    %14 = arith.select %10, %8, %13 : vector<512x128xi1>, vector<512x128xf32>
    %c0_9 = arith.constant 0 : index
    %c0_10 = arith.constant 0 : index
    %15 = vector.load %arg6[%c0_9, %c0_10] : memref<512x128xf32, #tpu.memory_space<vmem>>, vector<512x128xf32>
    tpu.vector_store %arg6[%c0_9, %c0_10], %14 {strides = array<i32>} : memref<512x128xf32, #tpu.memory_space<vmem>>, vector<512x128xf32>,
    return
  }
  func.func @transform_0(%arg0: i32) -> (i32, i32) {
    %c0_i32 = arith.constant 0 : i32
    %c0_i32_0 = arith.constant 0 : i32
    return %arg0, %c0_i32 : i32, i32
  }
  func.func @transform_1(%arg0: i32) -> (i32, i32) {
    %c0_i32 = arith.constant 0 : i32
    %c0_i32_0 = arith.constant 0 : i32
    return %arg0, %c0_i32 : i32, i32
  }
  func.func @transform_2(%arg0: i32) -> (i32, i32) {
    %c0_i32 = arith.constant 0 : i32
    %c0_i32_0 = arith.constant 0 : i32
    %c0_i32_1 = arith.constant 0 : i32
    return %c0_i32, %c0_i32_0 : i32, i32
  }
  func.func @transform_3(%arg0: i32) -> (i32, i32) {
    %c0_i32 = arith.constant 0 : i32
    %c0_i32_0 = arith.constant 0 : i32
    %c0_i32_1 = arith.constant 0 : i32
    return %c0_i32, %c0_i32_0 : i32, i32
  }
  func.func @transform_4(%arg0: i32) -> (i32, i32) {
    %c0_i32 = arith.constant 0 : i32
    %c0_i32_0 = arith.constant 0 : i32
    %c0_i32_1 = arith.constant 0 : i32
    return %c0_i32, %c0_i32_0 : i32, i32
  }
  func.func @transform_5(%arg0: i32) -> (i32, i32) {
    %c0_i32 = arith.constant 0 : i32
    %c0_i32_0 = arith.constant 0 : i32
    return %arg0, %c0_i32 : i32, i32
  }
}

</mosaic_0001>

<bundles_post_ra>
// kernel: dilated_bottleneck_forward.4
= control target key start
LH: loop header
LB: loop body
LE: loop exit
PB: predicated region body
PF: predicated region fallthrough
CT: control target
= control target key end

     0   :  { %s2172_s15 = smov 0   ;;  %s2519_s0 = inlined_call_operand.vmem [shape: bf16[1024,128], index: 0, kind: input, shape index: {}]   ;;  %s2520_s1 = inlined_call_operand.vmem [shape: bf16[128,128], index: 1, kind: input, shape index: {}]   ;;  %s2521_s2 = inlined_call_operand.vmem [shape: bf16[1024,128], index: 2, kind: output, shape index: {0}]   ;;  %s2522_s3 = inlined_call_operand.vmem [shape: f32[2,8,128], index: 3, kind: output, shape index: {1}]   ;;  %s2523_s4 = inlined_call_operand.vmem [shape: f32[2,8,128], index: 4, kind: output, shape index: {2}]  }
   0x1 LB: > { %s2178_s16 = sadd.s32 4294967295, %s2145_s15   ;;  %p1587_p0 = scmp.ge.s32.totalorder %s2145_s15, 1  ;;  %s2145_s15 = sphi %s2172_s15, %s15_s15  }
   0x2   : > { %p168_p1 = scmp.lt.s32.totalorder %s2145_s15, 3 }
   0x4   : > { %p169_p2 = pnand %p1587_p0, %p168_p1 }
   0x5   : > { %s1588_s19 = sshll.u32 (!%p169_p2), %s2178_s16, 6  ;;  %p214_p4 = scmp.lt.s32.totalorder (!%p169_p2), %s2178_s16, 1 }
   0x6   : > { %172 = sbr.rel (%p169_p2) target bundleno = 328 (0x148), region = 28  ;;  %p203_p3 = scmp.lt.s32.totalorder (!%p169_p2), %s1588_s19, 127 }
   0xb   : > { %v2099_v0 = vld [vmem:[%s2520_s1 + $0x38] sm:$0xff]   ;;  %v2100_v1 = vld [vmem:[%s2520_s1 + $0x30] sm:$0xff]   ;;  %s2525_s19 = smov (!%p203_p3, %s1588_s19), 127  ;;  %v2101_v2 = vld [vmem:[%s2520_s1 + $0x28] sm:$0xff]   ;;  %vm944_vm0 = vcmask 1041409   ;;  %vm946_vm1 = vcmask 1042434  }
   0xc   : > { %1995 = vmatprep.subr.bf16.mxu0 %v2099_v0  ;;  %2075 = vmatprep.subr.bf16.mxu1 %v2099_v0  ;;  %s1589_s24 = sshll.u32 %s2525_s19, 2  ;;  %v2102_v3 = vld [vmem:[%s2520_s1 + $0x20] sm:$0xff]   ;;  %v2103_v6 = vld [vmem:[%s2520_s1 + $0x18] sm:$0xff]   ;;  %v2104_v7 = vld [vmem:[%s2520_s1 + $0x10] sm:$0xff]   ;;  %vm948_vm2 = vcmask 1043459   ;;  %vm950_vm3 = vcmask 1044484  }
   0xd   : > { %1996 = vmatpush3.bf16.msra.mxu0 %v2099_v0  ;;  %2083 = vmatpush3.bf16.msra.mxu1 %v2099_v0  ;;  %s2200_s27 = scalar_lea.vmem %s2519_s0, %s1589_s24  ;;  %v2105_v8 = vld [vmem:[%s2520_s1 + $0x8] sm:$0xff]   ;;  %v2106_v9 = vld [vmem:[%s2520_s1] sm:$0xff]   ;;  %s2254_s14 = scalar_lea.vmem %s2521_s2, %s1589_s24  ;;  %vm952_vm4 = vcmask 1045509   ;;  %vm954_vm5 = vcmask 1046534   ;;  %vm956_vm6 = vcmask 1047559  }
   0xe   : > { %1997 = vmatprep.subr.bf16.mxu0 %v2100_v1  ;;  %2076 = vmatprep.subr.bf16.mxu1 %v2100_v1  ;;  %v2107_v4 = vld [vmem:[%s2200_s27] sm:$0xff]   ;;  %v2109_v10 = vld [vmem:[%s2200_s27 + $0x8] sm:$0xff]   ;;  %v2111_v12 = vld [vmem:[%s2200_s27 + $0x10] sm:$0xff]   ;;  %s2527_s16 = smov (!%p214_p4, %s2178_s16), 1 }
   0xf   : > { %v2108_v5 = vld [vmem:[%s2200_s27 + $0x80] sm:$0xff]   ;;  %2011 = vmatprep.mubr.bf16.mxu0 %v2107_v4  ;;  %v2110_v11 = vld [vmem:[%s2200_s27 + $0x88] sm:$0xff]   ;;  %v2112_v13 = vld [vmem:[%s2200_s27 + $0x90] sm:$0xff]   ;;  %s1592_s17 = sshll.u32 %s2527_s16, 3 }
  0x10   : > { %2043 = vmatprep.mubr.bf16.mxu1 %v2108_v5  ;;  %v2113_v14 = vld [vmem:[%s2200_s27 + $0x18] sm:$0xff]   ;;  %v2115_v16 = vld [vmem:[%s2200_s27 + $0x20] sm:$0xff]   ;;  %v2117_v18 = vld [vmem:[%s2200_s27 + $0x28] sm:$0xff]   ;;  %s217_s19 = scalar_lea.vmem %s2522_s3, %s1592_s17  ;;  %s221_s22 = scalar_lea.vmem %s2523_s4, %s1592_s17 }
  0x11   : > { %1998 = vmatpush3.bf16.msra.mxu0 %v2100_v1  ;;  %2084 = vmatpush3.bf16.msra.mxu1 %v2100_v1  ;;  %v2114_v15 = vld [vmem:[%s2200_s27 + $0x98] sm:$0xff]   ;;  %v2116_v17 = vld [vmem:[%s2200_s27 + $0xa0] sm:$0xff]   ;;  %v2118_v19 = vld [vmem:[%s2200_s27 + $0xa8] sm:$0xff]  }
  0x12   : > { %1999 = vmatprep.subr.bf16.mxu0 %v2101_v2  ;;  %2077 = vmatprep.subr.bf16.mxu1 %v2101_v2  ;;  %v2119_v20 = vld [vmem:[%s2200_s27 + $0x30] sm:$0xff]   ;;  %v2121_v22 = vld [vmem:[%s2200_s27 + $0x38] sm:$0xff]   ;;  %v2123_v24 = vld [vmem:[%s2200_s27 + $0x40] sm:$0xff]  }
  0x13   : > { %v2120_v21 = vld [vmem:[%s2200_s27 + $0xb0] sm:$0xff]   ;;  %v2122_v23 = vld [vmem:[%s2200_s27 + $0xb8] sm:$0xff]   ;;  %v2124_v25 = vld [vmem:[%s2200_s27 + $0xc0] sm:$0xff]  }
  0x14   : > { %v2125_v26 = vld [vmem:[%s2200_s27 + $0x48] sm:$0xff]   ;;  %v2127_v28 = vld [vmem:[%s2200_s27 + $0x50] sm:$0xff]   ;;  %v2129_v30 = vld [vmem:[%s2200_s27 + $0x58] sm:$0xff]  }
  0x15   : > { %2000 = vmatpush3.bf16.msra.mxu0 %v2101_v2  ;;  %2085 = vmatpush3.bf16.msra.mxu1 %v2101_v2  ;;  %v2126_v27 = vld [vmem:[%s2200_s27 + $0xc8] sm:$0xff]   ;;  %v2128_v29 = vld [vmem:[%s2200_s27 + $0xd0] sm:$0xff]   ;;  %v2130_v31 = vld [vmem:[%s2200_s27 + $0xd8] sm:$0xff]  }
  0x16   : > { %2001 = vmatprep.subr.bf16.mxu0 %v2102_v3  ;;  %2078 = vmatprep.subr.bf16.mxu1 %v2102_v3  ;;  %v2131_v32 = vld [vmem:[%s2200_s27 + $0x60] sm:$0xff]   ;;  %v2133_v34 = vld [vmem:[%s2200_s27 + $0x68] sm:$0xff]   ;;  %v2135_v36 = vld [vmem:[%s2200_s27 + $0x70] sm:$0xff]  }
  0x17   : > { %v2132_v33 = vld [vmem:[%s2200_s27 + $0xe0] sm:$0xff]   ;;  %v2134_v35 = vld [vmem:[%s2200_s27 + $0xe8] sm:$0xff]   ;;  %v2136_v37 = vld [vmem:[%s2200_s27 + $0xf0] sm:$0xff]  }
  0x18   : > { %v2137_v38 = vld [vmem:[%s2200_s27 + $0x78] sm:$0xff]  }
  0x19   : > { %2002 = vmatpush3.bf16.msra.mxu0 %v2102_v3  ;;  %2086 = vmatpush3.bf16.msra.mxu1 %v2102_v3  ;;  %v2138_v39 = vld [vmem:[%s2200_s27 + $0xf8] sm:$0xff]  }
  0x1a   : > { %2003 = vmatprep.subr.bf16.mxu0 %v2103_v6  ;;  %2079 = vmatprep.subr.bf16.mxu1 %v2103_v6 }
  0x1d   : > { %2004 = vmatpush3.bf16.msra.mxu0 %v2103_v6  ;;  %2087 = vmatpush3.bf16.msra.mxu1 %v2103_v6 }
  0x1e   : > { %2005 = vmatprep.subr.bf16.mxu0 %v2104_v7  ;;  %2080 = vmatprep.subr.bf16.mxu1 %v2104_v7 }
  0x21   : > { %2006 = vmatpush3.bf16.msra.mxu0 %v2104_v7  ;;  %2088 = vmatpush3.bf16.msra.mxu1 %v2104_v7 }
  0x22   : > { %2007 = vmatprep.subr.bf16.mxu0 %v2105_v8  ;;  %2081 = vmatprep.subr.bf16.mxu1 %v2105_v8 }
  0x25   : > { %2008 = vmatpush3.bf16.msra.mxu0 %v2105_v8  ;;  %2089 = vmatpush3.bf16.msra.mxu1 %v2105_v8 }
  0x26   : > { %2009 = vmatprep.subr.bf16.mxu0 %v2106_v9  ;;  %2082 = vmatprep.subr.bf16.mxu1 %v2106_v9 }
  0x29   : > { %2010 = vmatpush3.bf16.msra.mxu0 %v2106_v9  ;;  %2090 = vmatpush3.bf16.msra.mxu1 %v2106_v9 }
  0x2c   : > { %2012 = vmatmul.mubr.bf16.vlgmr.msra.gmra.mxu0 %v2109_v10  ;;  %2044 = vmatmul.mubr.bf16.vlgmr.msra.gmra.mxu1 %v2110_v11 }
  0x2d   : > { %2015 = vmatprep.mubr.bf16.mxu0 %v2111_v12  ;;  %2047 = vmatprep.mubr.bf16.mxu1 %v2112_v13 }
  0x34   : > { %2016 = vmatmul.mubr.bf16.gmra.mxu0 %v2113_v14  ;;  %2048 = vmatmul.mubr.bf16.gmra.mxu1 %v2114_v15 }
  0x35   : > { %2019 = vmatprep.mubr.bf16.mxu0 %v2115_v16  ;;  %2051 = vmatprep.mubr.bf16.mxu1 %v2116_v17 }
  0x3c   : > { %2020 = vmatmul.mubr.bf16.gmra.mxu0 %v2117_v18  ;;  %2052 = vmatmul.mubr.bf16.gmra.mxu1 %v2118_v19 }
  0x3d   : > { %2023 = vmatprep.mubr.bf16.mxu0 %v2119_v20  ;;  %2055 = vmatprep.mubr.bf16.mxu1 %v2120_v21 }
  0x44   : > { %2024 = vmatmul.mubr.bf16.gmra.mxu0 %v2121_v22  ;;  %2056 = vmatmul.mubr.bf16.gmra.mxu1 %v2122_v23 }
  0x45   : > { %2027 = vmatprep.mubr.bf16.mxu0 %v2123_v24  ;;  %2059 = vmatprep.mubr.bf16.mxu1 %v2124_v25 }
  0x4c   : > { %2028 = vmatmul.mubr.bf16.gmra.mxu0 %v2125_v26  ;;  %2060 = vmatmul.mubr.bf16.gmra.mxu1 %v2126_v27 }
  0x4d   : > { %2031 = vmatprep.mubr.bf16.mxu0 %v2127_v28  ;;  %2063 = vmatprep.mubr.bf16.mxu1 %v2128_v29 }
  0x54   : > { %2032 = vmatmul.mubr.bf16.gmra.mxu0 %v2129_v30  ;;  %2064 = vmatmul.mubr.bf16.gmra.mxu1 %v2130_v31 }
  0x55   : > { %2035 = vmatprep.mubr.bf16.mxu0 %v2131_v32  ;;  %2067 = vmatprep.mubr.bf16.mxu1 %v2132_v33 }
  0x5c   : > { %2036 = vmatmul.mubr.bf16.gmra.mxu0 %v2133_v34  ;;  %2068 = vmatmul.mubr.bf16.gmra.mxu1 %v2134_v35 }
  0x5d   : > { %2039 = vmatprep.mubr.bf16.mxu0 %v2135_v36  ;;  %2071 = vmatprep.mubr.bf16.mxu1 %v2136_v37 }
  0x64   : > { %2040 = vmatmul.mubr.bf16.gmra.mxu0 %v2137_v38  ;;  %2072 = vmatmul.mubr.bf16.gmra.mxu1 %v2138_v39 }
  0xec   : > { %v2013_v40 = vpop.f32.mrf.mxu0  ;;  %v2045_v41 = vpop.f32.mrf.mxu1 }
  0xed   : > { %v962_v60 = vmul.f32 %v2013_v40, %v2013_v40  ;;  %v994_v0 = vmul.f32 %v2045_v41, %v2045_v41 }
  0xee   : > { %v577_v42 = vpop.f32.mrf.mxu0  ;;  %v705_v43 = vpop.f32.mrf.mxu1 }
  0xef   : > { %v960_v48 = vmul.f32 %v577_v42, %v577_v42  ;;  %v992_v55 = vmul.f32 %v705_v43, %v705_v43 }
  0xf0   : > { %v2014_v44 = vpop.f32.mrf.mxu0  ;;  %v2046_v45 = vpop.f32.mrf.mxu1 }
  0xf1   : > { %v1772_v46 = vpack.c.bf16 %v2014_v44, %v2013_v40  ;;  %v1852_v47 = vpack.c.bf16 %v2046_v45, %v2045_v41  ;;  %v963_v4 = vmul.f32 %v2014_v44, %v2014_v44  ;;  %v995_v8 = vmul.f32 %v2046_v45, %v2046_v45 }
  0xf2   : > { %v580_v49 = vpop.f32.mrf.mxu0  ;;  %v708_v50 = vpop.f32.mrf.mxu1 }
  0xf3   : > { %1924 = vst [vmem:[%s2254_s14 + $0x8] sm:$0xff] %v1772_v46   ;;  %1940 = vst [vmem:[%s2254_s14 + $0x88] sm:$0xff] %v1852_v47   ;;  %v832_v51 = vadd.f32 %v580_v49, %v577_v42  ;;  %v961_v52 = vmul.f32 %v580_v49, %v580_v49  ;;  %v1767_v53 = vpack.c.bf16 %v580_v49, %v577_v42 }
  0xf4   : > { %v884_v54 = vadd.f32 %v708_v50, %v705_v43  ;;  %v993_v56 = vmul.f32 %v708_v50, %v708_v50  ;;  %v1847_v57 = vpack.c.bf16 %v708_v50, %v705_v43  ;;  %v2017_v58 = vpop.f32.mrf.mxu0  ;;  %v2049_v59 = vpop.f32.mrf.mxu1 }
  0xf5   : > { %v833_v61 = vadd.f32 %v2013_v40, %v832_v51  ;;  %v1024_v62 = vadd.f32 %v961_v52, %v960_v48  ;;  %1768 = vst [vmem:[%s2254_s14] sm:$0xff] %v1767_v53   ;;  %v966_v32 = vmul.f32 %v2017_v58, %v2017_v58  ;;  %v998_v35 = vmul.f32 %v2049_v59, %v2049_v59 }
  0xf6   : > { %v885_v63 = vadd.f32 %v2045_v41, %v884_v54  ;;  %v1076_v1 = vadd.f32 %v993_v56, %v992_v55  ;;  %1939 = vst [vmem:[%s2254_s14 + $0x80] sm:$0xff] %v1847_v57   ;;  %v593_v2 = vpop.f32.mrf.mxu0  ;;  %v721_v3 = vpop.f32.mrf.mxu1 }
  0xf7   : > { %v1025_v5 = vadd.f32 %v1024_v62, %v962_v60  ;;  %v834_v6 = vadd.f32 %v2014_v44, %v833_v61  ;;  %v996_v10 = vmul.f32 %v721_v3, %v721_v3  ;;  %v964_v14 = vmul.f32 %v593_v2, %v593_v2 }
  0xf8   : > { %v886_v7 = vadd.f32 %v2046_v45, %v885_v63  ;;  %v1077_v9 = vadd.f32 %v1076_v1, %v994_v0  ;;  %v2018_v11 = vpop.f32.mrf.mxu0  ;;  %v2050_v12 = vpop.f32.mrf.mxu1 }
  0xf9   : > { %v835_v13 = vadd.f32 %v834_v6, %v593_v2  ;;  %v1026_v15 = vadd.f32 %v1025_v5, %v963_v4  ;;  %v1782_v18 = vpack.c.bf16 %v2018_v11, %v2017_v58  ;;  %v1862_v19 = vpack.c.bf16 %v2050_v12, %v2049_v59 }
  0xfa   : > { %v887_v16 = vadd.f32 %v886_v7, %v721_v3  ;;  %v1078_v17 = vadd.f32 %v1077_v9, %v995_v8  ;;  %v596_v20 = vpop.f32.mrf.mxu0  ;;  %v724_v21 = vpop.f32.mrf.mxu1  ;;  %v999_v41 = vmul.f32 %v2050_v12, %v2050_v12  ;;  %v967_v1 = vmul.f32 %v2018_v11, %v2018_v11 }
  0xfb   : > { %v1027_v22 = vadd.f32 %v1026_v15, %v964_v14  ;;  %v836_v23 = vadd.f32 %v835_v13, %v596_v20  ;;  %v965_v24 = vmul.f32 %v596_v20, %v596_v20  ;;  %v1777_v25 = vpack.c.bf16 %v596_v20, %v593_v2  ;;  %1926 = vst [vmem:[%s2254_s14 + $0x18] sm:$0xff] %v1782_v18  }
  0xfc   : > { %v1079_v26 = vadd.f32 %v1078_v17, %v996_v10  ;;  %1942 = vst [vmem:[%s2254_s14 + $0x98] sm:$0xff] %v1862_v19   ;;  %v888_v27 = vadd.f32 %v887_v16, %v724_v21  ;;  %v997_v28 = vmul.f32 %v724_v21, %v724_v21  ;;  %v1857_v29 = vpack.c.bf16 %v724_v21, %v721_v3  ;;  %v2021_v30 = vpop.f32.mrf.mxu0  ;;  %v2053_v31 = vpop.f32.mrf.mxu1 }
  0xfd   : > { %v837_v33 = vadd.f32 %v2017_v58, %v836_v23  ;;  %v1028_v34 = vadd.f32 %v1027_v22, %v965_v24  ;;  %1925 = vst [vmem:[%s2254_s14 + $0x10] sm:$0xff] %v1777_v25  }
  0xfe   : > { %v889_v36 = vadd.f32 %v2049_v59, %v888_v27  ;;  %v1080_v37 = vadd.f32 %v1079_v26, %v997_v28  ;;  %1941 = vst [vmem:[%s2254_s14 + $0x90] sm:$0xff] %v1857_v29   ;;  %v609_v38 = vpop.f32.mrf.mxu0  ;;  %v737_v39 = vpop.f32.mrf.mxu1 }
  0xff   : > { %v1029_v40 = vadd.f32 %v1028_v34, %v966_v32  ;;  %v838_v55 = vadd.f32 %v2018_v11, %v837_v33  ;;  %v968_v61 = vmul.f32 %v609_v38, %v609_v38  ;;  %v1000_v4 = vmul.f32 %v737_v39, %v737_v39 }
 0x100   : > { %v890_v42 = vadd.f32 %v2050_v12, %v889_v36  ;;  %v1081_v43 = vadd.f32 %v1080_v37, %v998_v35  ;;  %v2022_v44 = vpop.f32.mrf.mxu0  ;;  %v2054_v45 = vpop.f32.mrf.mxu1  ;;  %v970_v12 = vmul.f32 %v2021_v30, %v2021_v30  ;;  %v1002_v11 = vmul.f32 %v2053_v31, %v2053_v31 }
 0x101   : > { %v1792_v46 = vpack.c.bf16 %v2022_v44, %v2021_v30  ;;  %v1872_v48 = vpack.c.bf16 %v2054_v45, %v2053_v31  ;;  %v839_v3 = vrot.slane %v838_v55, 4  ;;  %v1030_v8 = vadd.f32 %v1029_v40, %v967_v1 }
 0x102   : > { %v2264_v47 = vadd.f32 %v1081_v43, %v999_v41  ;;  %v612_v49 = vpop.f32.mrf.mxu0  ;;  %v740_v50 = vpop.f32.mrf.mxu1  ;;  %v891_v9 = vrot.slane %v890_v42, 4  ;;  %v971_v26 = vmul.f32 %v2022_v44, %v2022_v44  ;;  %v1003_v35 = vmul.f32 %v2054_v45, %v2054_v45 }
 0x103   : > { %1928 = vst [vmem:[%s2254_s14 + $0x28] sm:$0xff] %v1792_v46   ;;  %1944 = vst [vmem:[%s2254_s14 + $0xa8] sm:$0xff] %v1872_v48   ;;  %v1787_v51 = vpack.c.bf16 %v612_v49, %v609_v38  ;;  %v845_v54 = vadd.f32 %v612_v49, %v609_v38  ;;  %v969_v56 = vmul.f32 %v612_v49, %v612_v49  ;;  %v1031_v22 = vrot.slane %v1030_v8, 4 }
 0x104   : > { %v2268_v52 = vpop.f32.mrf.mxu0  ;;  %v2270_v53 = vpop.f32.mrf.mxu1  ;;  %v897_v59 = vadd.f32 %v740_v50, %v737_v39  ;;  %v1867_v60 = vpack.c.bf16 %v740_v50, %v737_v39  ;;  %v1001_v62 = vmul.f32 %v740_v50, %v740_v50  ;;  %v2282_v17 = vadd.f32 %v839_v3, %v838_v55 }
 0x105   : > { %1927 = vst [vmem:[%s2254_s14 + $0x20] sm:$0xff] %v1787_v51   ;;  %v846_v2 = vadd.f32 %v2021_v30, %v845_v54  ;;  %v1037_v5 = vadd.f32 %v969_v56, %v968_v61  ;;  %v2288_v23 = vadd.f32 %v891_v9, %v890_v42  ;;  %v1083_v34 = vrot.slane %v2264_v47, 4 }
 0x106   : > { %v625_v57 = vpop.f32.mrf.mxu0  ;;  %v753_v58 = vpop.f32.mrf.mxu1  ;;  %1943 = vst [vmem:[%s2254_s14 + $0xa0] sm:$0xff] %v1867_v60   ;;  %v898_v10 = vadd.f32 %v2053_v31, %v897_v59  ;;  %v1089_v13 = vadd.f32 %v1001_v62, %v1000_v4  ;;  %v841_v33 = vrot.slane %v2282_v17, 2  ;;  %v1032_v39 = vadd.f32 %v1031_v22, %v1030_v8 }
 0x107   : > { %v847_v16 = vadd.f32 %v2022_v44, %v846_v2  ;;  %v1038_v18 = vadd.f32 %v1037_v5, %v970_v12  ;;  %v893_v40 = vrot.slane %v2288_v23, 2  ;;  %v972_v43 = vmul.f32 %v625_v57, %v625_v57 }
 0x108   : > { %v2273_v63 = vpop.f32.mrf.mxu0  ;;  %v2275_v0 = vpop.f32.mrf.mxu1  ;;  %v899_v24 = vadd.f32 %v2054_v45, %v898_v10  ;;  %v1090_v27 = vadd.f32 %v1089_v13, %v1002_v11  ;;  %v1004_v44 = vmul.f32 %v753_v58, %v753_v58  ;;  %v2310_v56 = vadd.f32 %v1083_v34, %v2264_v47 }
 0x109   : > { %v1802_v19 = vpack.c.bf16 %v2273_v63, %v2268_v52  ;;  %v1882_v25 = vpack.c.bf16 %v2275_v0, %v2270_v53  ;;  %v848_v32 = vadd.f32 %v847_v16, %v625_v57  ;;  %v1039_v36 = vadd.f32 %v1038_v18, %v971_v26 }
 0x10a   : > { %v628_v6 = vpop.f32.mrf.mxu0  ;;  %v2278_v7 = vpop.f32.mrf.mxu1  ;;  %v900_v41 = vadd.f32 %v899_v24, %v753_v58  ;;  %v1091_v46 = vadd.f32 %v1090_v27, %v1003_v35  ;;  %v842_v16 = vadd.f32 %v841_v33, %v2282_v17  ;;  %v1033_v11 = vrot.slane %v1032_v39, 2 }
 0x10b   : > { %1930 = vst [vmem:[%s2254_s14 + $0x38] sm:$0xff] %v1802_v19   ;;  %v1797_v28 = vpack.c.bf16 %v628_v6, %v625_v57  ;;  %v1877_v29 = vpack.c.bf16 %v2278_v7, %v753_v58  ;;  %1946 = vst [vmem:[%s2254_s14 + $0xb8] sm:$0xff] %v1882_v25   ;;  %v849_v50 = vadd.f32 %v848_v32, %v628_v6 }
 0x10c   : > { %v2029_v14 = vpop.f32.mrf.mxu0  ;;  %v2280_v15 = vpop.f32.mrf.mxu1  ;;  %v1040_v59 = vadd.f32 %v1039_v36, %v972_v43  ;;  %v973_v57 = vmul.f32 %v628_v6, %v628_v6  ;;  %v901_v62 = vadd.f32 %v900_v41, %v2278_v7  ;;  %v1092_v4 = vadd.f32 %v1091_v46, %v1004_v44 }
 0x10d   : > { %1929 = vst [vmem:[%s2254_s14 + $0x30] sm:$0xff] %v1797_v28   ;;  %1945 = vst [vmem:[%s2254_s14 + $0xb0] sm:$0xff] %v1877_v29   ;;  %v978_v1 = vmul.f32 %v2029_v14, %v2029_v14  ;;  %v850_v10 = vadd.f32 %v2268_v52, %v849_v50  ;;  %v1005_v12 = vmul.f32 %v2278_v7, %v2278_v7  ;;  %v1085_v7 = vrot.slane %v2310_v56, 2 }
 0x10e   : > { %v641_v20 = vpop.f32.mrf.mxu0  ;;  %v2286_v21 = vpop.f32.mrf.mxu1  ;;  %v1041_v22 = vadd.f32 %v1040_v59, %v973_v57  ;;  %v902_v24 = vadd.f32 %v2270_v53, %v901_v62  ;;  %v2336_v27 = vadd.f32 %v893_v40, %v2288_v23  ;;  %v974_v32 = vmul.f32 %v2268_v52, %v2268_v52 }
 0x10f   : > { %v976_v51 = vmul.f32 %v641_v20, %v641_v20  ;;  %v1008_v5 = vmul.f32 %v2286_v21, %v2286_v21  ;;  %v851_v33 = vadd.f32 %v2273_v63, %v850_v10  ;;  %v843_v23 = vrot.slane %v842_v16, 1 }
 0x110   : > { %v2030_v30 = vpop.f32.mrf.mxu0  ;;  %v2294_v31 = vpop.f32.mrf.mxu1  ;;  %v2349_v35 = vadd.f32 %v1033_v11, %v1032_v39  ;;  %v1006_v40 = vmul.f32 %v2270_v53, %v2270_v53  ;;  %v1042_v41 = vadd.f32 %v1041_v22, %v974_v32  ;;  %v903_v52 = vadd.f32 %v2275_v0, %v902_v24 }
 0x111   : > { %v1812_v42 = vpack.c.bf16 %v2030_v30, %v2029_v14  ;;  %v1892_v48 = vpack.c.bf16 %v2294_v31, %v2280_v15  ;;  %v979_v25 = vmul.f32 %v2030_v30, %v2030_v30  ;;  %v975_v39 = vmul.f32 %v2273_v63, %v2273_v63 }
 0x112   : > { %v644_v37 = vpop.f32.mrf.mxu0  ;;  %v772_v38 = vpop.f32.mrf.mxu1  ;;  %v1007_v43 = vmul.f32 %v2275_v0, %v2275_v0  ;;  %v1011_v44 = vmul.f32 %v2294_v31, %v2294_v31  ;;  %v852_v50 = vrot.slane %v851_v33, 4  ;;  %v2390_v10 = vadd.f32 %v843_v23, %v842_v16 }
 0x113   : > { %1932 = vst [vmem:[%s2254_s14 + $0x48] sm:$0xff] %v1812_v42   ;;  %v858_v54 = vadd.f32 %v644_v37, %v641_v20  ;;  %v977_v55 = vmul.f32 %v644_v37, %v644_v37  ;;  %1948 = vst [vmem:[%s2254_s14 + $0xc8] sm:$0xff] %v1892_v48   ;;  %v1807_v58 = vpack.c.bf16 %v644_v37, %v641_v20 }
 0x114   : > { %v2304_v49 = vpop.f32.mrf.mxu0  ;;  %v2306_v45 = vpop.f32.mrf.mxu1  ;;  %v910_v47 = vadd.f32 %v772_v38, %v2286_v21  ;;  %v1009_v6 = vmul.f32 %v772_v38, %v772_v38 }
 0x115   : > { %v859_v2 = vadd.f32 %v2029_v14, %v858_v54  ;;  %v1050_v3 = vadd.f32 %v977_v55, %v976_v51  ;;  %1931 = vst [vmem:[%s2254_s14 + $0x40] sm:$0xff] %v1807_v58   ;;  %v1887_v14 = vpack.c.bf16 %v772_v38, %v2286_v21  ;;  %v1010_v21 = vmul.f32 %v2280_v15, %v2280_v15 }
 0x116   : > { %v2313_v60 = vpop.f32.mrf.mxu0  ;;  %v2315_v61 = vpop.f32.mrf.mxu1  ;;  %v1102_v18 = vadd.f32 %v1009_v6, %v1008_v5  ;;  %v911_v17 = vadd.f32 %v2280_v15, %v910_v47  ;;  %v904_v58 = vrot.slane %v903_v52, 4 }
 0x117   : > { %v1051_v13 = vadd.f32 %v1050_v3, %v978_v1  ;;  %1947 = vst [vmem:[%s2254_s14 + $0xc0] sm:$0xff] %v1887_v14   ;;  %v860_v26 = vadd.f32 %v2030_v30, %v859_v2  ;;  %v1093_v30 = vadd.f32 %v1092_v4, %v1005_v12  ;;  %v980_v42 = vmul.f32 %v2313_v60, %v2313_v60 }
 0x118   : > { %v2322_v8 = vpop.f32.mrf.mxu0  ;;  %v2324_v9 = vpop.f32.mrf.mxu1  ;;  %v1103_v36 = vadd.f32 %v1102_v18, %v1010_v21  ;;  %v912_v46 = vadd.f32 %v2294_v31, %v911_v17  ;;  %v1012_v55 = vmul.f32 %v2315_v61, %v2315_v61  ;;  %v2378_v31 = vadd.f32 %v1042_v41, %v975_v39 }
 0x119   : > { %v1052_v34 = vadd.f32 %v1051_v13, %v979_v25  ;;  %v861_v37 = vadd.f32 %v860_v26, %v2313_v60  ;;  %v1094_v51 = vadd.f32 %v1093_v30, %v1006_v40  ;;  %v1822_v63 = vpack.c.bf16 %v2322_v8, %v2304_v49 }
 0x11a   : > { %v660_v19 = vpop.f32.mrf.mxu0  ;;  %v2331_v20 = vpop.f32.mrf.mxu1  ;;  %v1104_v0 = vadd.f32 %v1103_v36, %v1011_v44  ;;  %v1902_v59 = vpack.c.bf16 %v2324_v9, %v2306_v45  ;;  %v895_v3 = vrot.slane %v2336_v27, 1  ;;  %v2384_v4 = vadd.f32 %v1085_v7, %v2310_v56 }
 0x11b   : > { %v1053_v54 = vadd.f32 %v1052_v34, %v980_v42  ;;  %v862_v57 = vadd.f32 %v861_v37, %v660_v19  ;;  %1934 = vst [vmem:[%s2254_s14 + $0x58] sm:$0xff] %v1822_v63   ;;  %v981_v62 = vmul.f32 %v660_v19, %v660_v19  ;;  %v1817_v1 = vpack.c.bf16 %v660_v19, %v2313_v60 }
 0x11c   : > { %v2342_v28 = vpop.f32.mrf.mxu0  ;;  %v2344_v29 = vpop.f32.mrf.mxu1  ;;  %v913_v5 = vadd.f32 %v912_v46, %v2315_v61  ;;  %1950 = vst [vmem:[%s2254_s14 + $0xd8] sm:$0xff] %v1902_v59   ;;  %v1897_v47 = vpack.c.bf16 %v2331_v20, %v2315_v61  ;;  %v1035_v12 = vrot.slane %v2349_v35, 1  ;;  %v2393_v13 = vadd.f32 %v1094_v51, %v1007_v43 }
 0x11d   : > { %v1054_v60 = vadd.f32 %v1053_v54, %v981_v62  ;;  %1933 = vst [vmem:[%s2254_s14 + $0x50] sm:$0xff] %v1817_v1   ;;  %v2396_v14 = vadd.f32 %v852_v50, %v851_v33  ;;  %v1105_v11 = vadd.f32 %v1104_v0, %v1012_v55  ;;  %v863_v56 = vadd.f32 %v2304_v49, %v862_v57 }
 0x11e   : > { %v2352_v38 = vpop.f32.mrf.mxu0  ;;  %v2354_v15 = vpop.f32.mrf.mxu1  ;;  %v1013_v18 = vmul.f32 %v2331_v20, %v2331_v20  ;;  %1949 = vst [vmem:[%s2254_s14 + $0xd0] sm:$0xff] %v1897_v47   ;;  %v1044_v61 = vrot.slane %v2378_v31, 4  ;;  %v2403_v16 = vadd.f32 %v904_v58, %v903_v52  ;;  %v982_v19 = vmul.f32 %v2304_v49, %v2304_v49 }
 0x11f   : > { %v983_v25 = vmul.f32 %v2322_v8, %v2322_v8  ;;  %v914_v26 = vadd.f32 %v913_v5, %v2331_v20  ;;  %v984_v32 = vmul.f32 %v2352_v38, %v2352_v38  ;;  %v864_v34 = vadd.f32 %v2322_v8, %v863_v56 }
 0x120   : > { %v2368_v48 = vpop.f32.mrf.mxu0  ;;  %v2370_v53 = vpop.f32.mrf.mxu1  ;;  %v1055_v49 = vadd.f32 %v1054_v60, %v982_v19  ;;  %v1106_v23 = vadd.f32 %v1105_v11, %v1013_v18  ;;  %v986_v20 = vmul.f32 %v2342_v28, %v2342_v28  ;;  %v1016_v37 = vmul.f32 %v2354_v15, %v2354_v15 }
 0x121   : > { %v1832_v22 = vpack.c.bf16 %v2368_v48, %v2342_v28  ;;  %v1912_v7 = vpack.c.bf16 %v2370_v53, %v2344_v29  ;;  %v1014_v8 = vmul.f32 %v2306_v45, %v2306_v45  ;;  %v1018_v39 = vmul.f32 %v2344_v29, %v2344_v29 }
 0x122   : > { %v676_v2 = vpop.f32.mrf.mxu0  ;;  %v804_v6 = vpop.f32.mrf.mxu1  ;;  %v1056_v46 = vadd.f32 %v1055_v49, %v983_v25  ;;  %v1087_v54 = vrot.slane %v2384_v4, 1  ;;  %v1096_v63 = vrot.slane %v2393_v13, 4  ;;  %v865_v55 = vrot.slane %v864_v34, 4 }
 0x123   : > { %v871_v21 = vadd.f32 %v676_v2, %v2352_v38  ;;  %1936 = vst [vmem:[%s2254_s14 + $0x68] sm:$0xff] %v1832_v22   ;;  %v985_v33 = vmul.f32 %v676_v2, %v676_v2  ;;  %v1827_v30 = vpack.c.bf16 %v676_v2, %v2352_v38  ;;  %1952 = vst [vmem:[%s2254_s14 + $0xe8] sm:$0xff] %v1912_v7  }
 0x124   : > { %v2409_v24 = vpop.f32.mrf.mxu0  ;;  %v2417_v17 = vpop.f32.mrf.mxu1  ;;  %v923_v36 = vadd.f32 %v804_v6, %v2354_v15  ;;  %v1017_v52 = vmul.f32 %v804_v6, %v804_v6  ;;  %v915_v38 = vadd.f32 %v2306_v45, %v914_v26  ;;  %v1907_v43 = vpack.c.bf16 %v804_v6, %v2354_v15 }
 0x125   : > { %v872_v40 = vadd.f32 %v2342_v28, %v871_v21  ;;  %v1063_v41 = vadd.f32 %v985_v33, %v984_v32  ;;  %1935 = vst [vmem:[%s2254_s14 + $0x60] sm:$0xff] %v1827_v30   ;;  %v987_v0 = vmul.f32 %v2368_v48, %v2368_v48  ;;  %v854_v45 = vrot.slane %v2396_v14, 2 }
 0x126   : > { %v689_v42 = vpop.f32.mrf.mxu0  ;;  %v817_v44 = vpop.f32.mrf.mxu1  ;;  %v924_v28 = vadd.f32 %v2344_v29, %v923_v36  ;;  %v1115_v51 = vadd.f32 %v1017_v52, %v1016_v37  ;;  %1951 = vst [vmem:[%s2254_s14 + $0xe0] sm:$0xff] %v1907_v43   ;;  %v1107_v59 = vadd.f32 %v1106_v23, %v1014_v8  ;;  %v1045_v62 = vadd.f32 %v1044_v61, %v2378_v31 }
 0x127   : > { %v1064_v50 = vadd.f32 %v1063_v41, %v986_v20  ;;  %v873_v15 = vadd.f32 %v2368_v48, %v872_v40  ;;  %v906_v29 = vrot.slane %v2403_v16, 2  ;;  %v916_v1 = vadd.f32 %v2324_v9, %v915_v38 }
 0x128   : > { %v1116_v57 = vadd.f32 %v1115_v51, %v1018_v39  ;;  %v2042_v58 = vpop.f32.mrf.mxu0  ;;  %v2074_v5 = vpop.f32.mrf.mxu1  ;;  %v1015_v47 = vmul.f32 %v2324_v9, %v2324_v9  ;;  %v1057_v6 = vrot.slane %v1056_v46, 4  ;;  %v1019_v60 = vmul.f32 %v2370_v53, %v2370_v53 }
 0x129   : > { %v1065_v2 = vadd.f32 %v1064_v50, %v987_v0  ;;  %v925_v11 = vadd.f32 %v2370_v53, %v924_v28  ;;  %v866_v56 = vadd.f32 %v865_v55, %v864_v34  ;;  %v874_v48 = vadd.f32 %v873_v15, %v689_v42 }
 0x12a   : > { %v988_v18 = vmul.f32 %v689_v42, %v689_v42  ;;  %v1020_v19 = vmul.f32 %v817_v44, %v817_v44  ;;  %v2455_v31 = vadd.f32 %v1096_v63, %v2393_v13  ;;  %v1108_v61 = vadd.f32 %v1107_v59, %v1015_v47  ;;  %v692_v26 = vpop.f32.mrf.mxu0  ;;  %v820_v49 = vpop.f32.mrf.mxu1 }
 0x12b   : > { %v926_v22 = vadd.f32 %v925_v11, %v817_v44  ;;  %v1117_v25 = vadd.f32 %v1116_v57, %v1019_v60  ;;  %v2458_v9 = vadd.f32 %v854_v45, %v2396_v14  ;;  %v917_v7 = vrot.slane %v916_v1, 4 }
 0x12c   : > { %v1066_v21 = vadd.f32 %v1065_v2, %v988_v18  ;;  %v1842_v53 = vpack.c.bf16 %v2042_v58, %v2409_v24  ;;  %v1046_v32 = vrot.slane %v1045_v62, 2  ;;  %v1058_v33 = vadd.f32 %v1057_v6, %v1056_v46 }
 0x12d   : > { %v1118_v30 = vadd.f32 %v1117_v25, %v1020_v19  ;;  %v1922_v13 = vpack.c.bf16 %v2074_v5, %v2417_v17  ;;  %v867_v34 = vrot.slane %v866_v56, 2  ;;  %v875_v23 = vadd.f32 %v874_v48, %v692_v26 }
 0x12e   : > { %1938 = vst [vmem:[%s2254_s14 + $0x78] sm:$0xff] %v1842_v53   ;;  %v989_v20 = vmul.f32 %v692_v26, %v692_v26  ;;  %v1837_v36 = vpack.c.bf16 %v692_v26, %v689_v42  ;;  %v1109_v37 = vrot.slane %v1108_v61, 4  ;;  %v927_v14 = vadd.f32 %v926_v22, %v820_v49 }
 0x12f   : > { %1954 = vst [vmem:[%s2254_s14 + $0xf8] sm:$0xff] %v1922_v13   ;;  %v1021_v40 = vmul.f32 %v820_v49, %v820_v49  ;;  %v1917_v41 = vpack.c.bf16 %v820_v49, %v817_v44  ;;  %v918_v52 = vadd.f32 %v917_v7, %v916_v1  ;;  %v990_v8 = vmul.f32 %v2409_v24, %v2409_v24 }
 0x130   : > { %v876_v38 = vadd.f32 %v2409_v24, %v875_v23  ;;  %v1067_v39 = vadd.f32 %v1066_v21, %v989_v20  ;;  %1937 = vst [vmem:[%s2254_s14 + $0x70] sm:$0xff] %v1837_v36   ;;  %v1059_v43 = vrot.slane %v1058_v33, 2  ;;  %v1022_v46 = vmul.f32 %v2417_v17, %v2417_v17 }
 0x131   : > { %v928_v50 = vadd.f32 %v2417_v17, %v927_v14  ;;  %v1119_v42 = vadd.f32 %v1118_v30, %v1021_v40  ;;  %1953 = vst [vmem:[%s2254_s14 + $0xf0] sm:$0xff] %v1917_v41   ;;  %v868_v28 = vadd.f32 %v867_v34, %v866_v56  ;;  %v991_v51 = vmul.f32 %v2042_v58, %v2042_v58 }
 0x132   : > { %v877_v63 = vadd.f32 %v2042_v58, %v876_v38  ;;  %v1068_v44 = vadd.f32 %v1067_v39, %v990_v8  ;;  %v1110_v55 = vadd.f32 %v1109_v37, %v1108_v61  ;;  %v1023_v0 = vmul.f32 %v2074_v5, %v2074_v5 }
 0x133   : > { %v929_v45 = vadd.f32 %v2074_v5, %v928_v50  ;;  %v1120_v59 = vadd.f32 %v1119_v42, %v1022_v46  ;;  %v1047_v24 = vadd.f32 %v1046_v32, %v1045_v62  ;;  %v1098_v57 = vrot.slane %v2455_v31, 2 }
 0x134   : > { %v878_v15 = vrot.slane %v877_v63, 4  ;;  %v1069_v1 = vadd.f32 %v1068_v44, %v991_v51  ;;  %v1060_v2 = vadd.f32 %v1059_v43, %v1058_v33  ;;  %v919_v17 = vrot.slane %v918_v52, 2 }
 0x135   : > { %v930_v47 = vrot.slane %v929_v45, 4  ;;  %v1121_v6 = vadd.f32 %v1120_v59, %v1023_v0  ;;  %v856_v58 = vrot.slane %v2458_v9, 1  ;;  %v907_v60 = vadd.f32 %v906_v29, %v2403_v16 }
 0x136   : > { %v879_v5 = vadd.f32 %v878_v15, %v877_v63  ;;  %v1070_v62 = vrot.slane %v1069_v1, 4  ;;  %v869_v11 = vrot.slane %v868_v28, 1  ;;  %v1111_v56 = vrot.slane %v1110_v55, 2 }
 0x137   : > { %v931_v48 = vadd.f32 %v930_v47, %v929_v45  ;;  %v1122_v18 = vrot.slane %v1121_v6, 4  ;;  %v1048_v19 = vrot.slane %v1047_v24, 1  ;;  %v1099_v61 = vadd.f32 %v1098_v57, %v2455_v31 }
 0x138   : > { %v880_v22 = vrot.slane %v879_v5, 2  ;;  %v1071_v25 = vadd.f32 %v1070_v62, %v1069_v1  ;;  %v1061_v26 = vrot.slane %v1060_v2, 1  ;;  %v920_v7 = vadd.f32 %v919_v17, %v918_v52 }
 0x139   : > { %v932_v16 = vrot.slane %v931_v48, 2  ;;  %v1123_v29 = vadd.f32 %v1122_v18, %v1121_v6  ;;  %v857_v21 = vadd.f32 %v856_v58, %v2458_v9  ;;  %v908_v53 = vrot.slane %v907_v60, 1 }
 0x13a   : > { %v881_v49 = vadd.f32 %v880_v22, %v879_v5  ;;  %v1072_v32 = vrot.slane %v1071_v25, 2  ;;  %v870_v33 = vadd.f32 %v869_v11, %v868_v28  ;;  %v1112_v30 = vadd.f32 %v1111_v56, %v1110_v55 }
 0x13b   : > { %v933_v13 = vadd.f32 %v932_v16, %v931_v48  ;;  %v1124_v31 = vrot.slane %v1123_v29, 2  ;;  %v1036_v34 = vadd.f32 %v1035_v12, %v2349_v35  ;;  %v1049_v23 = vadd.f32 %v1048_v19, %v1047_v24 }
 0x13c   : > { %v882_v20 = vrot.slane %v881_v49, 1  ;;  %v1073_v36 = vadd.f32 %v1072_v32, %v1071_v25  ;;  %v1100_v37 = vrot.slane %v1099_v61, 1  ;;  %v1062_v9 = vadd.f32 %v1061_v26, %v1060_v2 }
 0x13d   : > { %v921_v14 = vrot.slane %v920_v7, 1  ;;  %v1125_v40 = vadd.f32 %v1124_v31, %v1123_v29  ;;  %v945_v41 = vsel %vm944_vm0, %v857_v21, %v2390_v10  ;;  %v934_v38 = vrot.slane %v933_v13, 1 }
 0x13e   : > { %v883_v52 = vadd.f32 %v882_v20, %v881_v49  ;;  %v1074_v8 = vrot.slane %v1073_v36, 1  ;;  %v896_v39 = vadd.f32 %v895_v3, %v2336_v27  ;;  %v909_v43 = vadd.f32 %v908_v53, %v907_v60 }
 0x13f   : > { %v947_v35 = vsel %vm946_vm1, %v870_v33, %v945_v41  ;;  %v1113_v12 = vrot.slane %v1112_v30, 1  ;;  %v1136_v46 = vsel %vm944_vm0, %v1049_v23, %v1036_v34  ;;  %v1126_v28 = vrot.slane %v1125_v40, 1 }
 0x140   : > { %v949_v50 = vsel %vm948_vm2, %v883_v52, %v947_v35  ;;  %v1075_v42 = vadd.f32 %v1074_v8, %v1073_v36  ;;  %v1088_v10 = vadd.f32 %v1087_v54, %v2384_v4  ;;  %v1137_v51 = vsel %vm946_vm1, %v1062_v9, %v1136_v46 }
 0x141   : > { %v922_v63 = vadd.f32 %v921_v14, %v920_v7  ;;  %v951_v27 = vsel %vm950_vm3, %v896_v39, %v949_v50  ;;  %v1101_v3 = vadd.f32 %v1100_v37, %v1099_v61  ;;  %v935_v55 = vadd.f32 %v934_v38, %v933_v13 }
 0x142   : > { %v1138_v44 = vsel %vm948_vm2, %v1075_v42, %v1137_v51  ;;  %v953_v0 = vsel %vm952_vm4, %v909_v43, %v951_v27  ;;  %v1114_v45 = vadd.f32 %v1113_v12, %v1112_v30  ;;  %v1127_v24 = vadd.f32 %v1126_v28, %v1125_v40 }
 0x143   : > { %v1139_v59 = vsel %vm950_vm3, %v1088_v10, %v1138_v44  ;;  %v955_v4 = vsel %vm954_vm5, %v922_v63, %v953_v0 }
 0x144   : > { %v957_v54 = vsel %vm956_vm6, %v935_v55, %v955_v4  ;;  %v1140_v57 = vsel %vm952_vm4, %v1101_v3, %v1139_v59 }
 0x145   : > { %959 = vst [vmem:[%s217_s19] sm:$0xff] %v957_v54  ;;  %v1141_v15 = vsel %vm954_vm5, %v1114_v45, %v1140_v57 }
 0x146   : > { %v1142_v1 = vsel %vm956_vm6, %v1127_v24, %v1141_v15 }
 0x147   : > { %1144 = vst [vmem:[%s221_s22] sm:$0xff] %v1142_v1 }
 0x148 PF: > { %s15_s15 = sadd.s32 1, %s2145_s15  }
 0x149   : > { %p12_p5 = scmp.ge.s32.totalorder %s15_s15, 4  }
 0x14b   :  { %14 = sbr.rel (!%p12_p5) target bundleno = 1 (0x1), region = 82 }

// kernel: dilated_bottleneck_forward.6
= control target key start
LH: loop header
LB: loop body
LE: loop exit
PB: predicated region body
PF: predicated region fallthrough
CT: control target
= control target key end

     0   :  { %s2036_s24 = smov 0   ;;  %s2583_s0 = inlined_call_operand.vmem [shape: bf16[1024,128], index: 0, kind: input, shape index: {}]   ;;  %s2584_s1 = inlined_call_operand.vmem [shape: f32[1,128], index: 1, kind: input, shape index: {}]   ;;  %s2585_s2 = inlined_call_operand.vmem [shape: f32[1,128], index: 2, kind: input, shape index: {}]   ;;  %s2586_s3 = inlined_call_operand.vmem [shape: f32[1,128], index: 3, kind: input, shape index: {}]   ;;  %s2587_s4 = inlined_call_operand.vmem [shape: bf16[128,128], index: 4, kind: input, shape index: {}]   ;;  %s2588_s5 = inlined_call_operand.vmem [shape: f32[1024,128], index: 5, kind: output, shape index: {0}]   ;;  %s2589_s6 = inlined_call_operand.vmem [shape: f32[2,8,128], index: 6, kind: output, shape index: {1}]   ;;  %s2590_s7 = inlined_call_operand.vmem [shape: f32[2,8,128], index: 7, kind: output, shape index: {2}]  }
   0x1 LB: > { %s2042_s25 = sadd.s32 4294967295, %s1994_s24   ;;  %p1657_p0 = scmp.ge.s32.totalorder %s1994_s24, 1  ;;  %s1994_s24 = sphi %s2036_s24, %s18_s24  }
   0x2   : > { %p243_p1 = scmp.lt.s32.totalorder %s1994_s24, 3 }
   0x4   : > { %p244_p2 = pnand %p1657_p0, %p243_p1 }
   0x5   : > { %s1658_s28 = sshll.u32 (!%p244_p2), %s2042_s25, 6  ;;  %p295_p4 = scmp.lt.s32.totalorder (!%p244_p2), %s2042_s25, 1 }
   0x6   : > { %247 = sbr.rel (%p244_p2) target bundleno = 347 (0x15b), region = 40  ;;  %p284_p3 = scmp.lt.s32.totalorder (!%p244_p2), %s1658_s28, 127 }
   0xb   : > { %v1980_v0 = vld [vmem:[%s2587_s4 + $0x38] sm:$0xff]   ;;  %v1981_v1 = vld [vmem:[%s2587_s4 + $0x30] sm:$0xff]   ;;  %s2592_s28 = smov (!%p284_p3, %s1658_s28), 127  ;;  %v1982_v2 = vld [vmem:[%s2587_s4 + $0x28] sm:$0xff]   ;;  %s2594_s25 = smov (!%p295_p4, %s2042_s25), 1 }
   0xc   : > { %1876 = vmatprep.subr.bf16.mxu0 %v1980_v0  ;;  %1956 = vmatprep.subr.bf16.mxu1 %v1980_v0  ;;  %s1659_s10 = sshll.u32 %s2592_s28, 2  ;;  %v1983_v3 = vld [vmem:[%s2587_s4 + $0x20] sm:$0xff]   ;;  %v1984_v21 = vld [vmem:[%s2587_s4 + $0x18] sm:$0xff]   ;;  %v1985_v37 = vld [vmem:[%s2587_s4 + $0x10] sm:$0xff]  }
   0xd   : > { %1877 = vmatpush3.bf16.msra.mxu0 %v1980_v0  ;;  %1964 = vmatpush3.bf16.msra.mxu1 %v1980_v0  ;;  %s2062_s13 = scalar_lea.vmem %s2583_s0, %s1659_s10  ;;  %v2071_v5 = vld [vmem:[%s2584_s1] ss:$0 sm:$0xff]  ;;  %v1986_v51 = vld [vmem:[%s2587_s4 + $0x8] sm:$0xff]   ;;  %s1661_s10 = sshll.u32 %s2592_s28, 3 }
   0xe   : > { %1878 = vmatprep.subr.bf16.mxu0 %v1981_v1  ;;  %1957 = vmatprep.subr.bf16.mxu1 %v1981_v1  ;;  %v1678_v4 = vld [vmem:[%s2062_s13] sm:$0xff]   ;;  %v1805_v9 = vld [vmem:[%s2062_s13 + $0x8] sm:$0xff]   ;;  %v2082_v16 = vld [vmem:[%s2062_s13 + $0x10] sm:$0xff]   ;;  %s1662_s28 = sshll.u32 %s2594_s25, 3 }
   0xf   : > { %v1679_v6 = vunpack.c.l.bf16 %v1678_v4  ;;  %v1680_v7 = vunpack.c.h.bf16 %v1678_v4  ;;  %v1820_v8 = vld [vmem:[%s2062_s13 + $0x80] sm:$0xff]   ;;  %v1683_v13 = vunpack.c.l.bf16 %v1805_v9  ;;  %v1684_v14 = vunpack.c.h.bf16 %v1805_v9  ;;  %v1821_v15 = vld [vmem:[%s2062_s13 + $0x88] sm:$0xff]   ;;  %v1822_v47 = vld [vmem:[%s2062_s13 + $0x90] sm:$0xff]   ;;  %s298_s15 = scalar_lea.vmem %s2589_s6, %s1662_s28  ;;  %s302_s18 = scalar_lea.vmem %s2590_s7, %s1662_s28 }
  0x10   : > { %v2078_v10 = vld [vmem:[%s2585_s2] ss:$0 sm:$0xff]  ;;  %v1743_v11 = vunpack.c.l.bf16 %v1820_v8  ;;  %v1744_v12 = vunpack.c.h.bf16 %v1820_v8  ;;  %v1747_v19 = vunpack.c.l.bf16 %v1821_v15  ;;  %v1748_v20 = vunpack.c.h.bf16 %v1821_v15  ;;  %v1807_v59 = vld [vmem:[%s2062_s13 + $0x18] sm:$0xff]  }
  0x11   : > { %1879 = vmatpush3.bf16.msra.mxu0 %v1981_v1  ;;  %1965 = vmatpush3.bf16.msra.mxu1 %v1981_v1  ;;  %v439_v17 = vmul.f32 %v1679_v6, %v2071_v5  ;;  %v440_v18 = vmul.f32 %v1680_v7, %v2071_v5  ;;  %v2092_v22 = vld [vmem:[%s2586_s3] ss:$0 sm:$0xff]  ;;  %v441_v25 = vmul.f32 %v1683_v13, %v2071_v5  ;;  %v1687_v26 = vunpack.c.l.bf16 %v2082_v16  ;;  %v1823_v9 = vld [vmem:[%s2062_s13 + $0x98] sm:$0xff]  }
  0x12   : > { %1880 = vmatprep.subr.bf16.mxu0 %v1982_v2  ;;  %1958 = vmatprep.subr.bf16.mxu1 %v1982_v2  ;;  %v471_v23 = vmul.f32 %v1743_v11, %v2071_v5  ;;  %v472_v24 = vmul.f32 %v1744_v12, %v2071_v5  ;;  %v442_v29 = vmul.f32 %v1684_v14, %v2071_v5  ;;  %v1688_v54 = vunpack.c.h.bf16 %v2082_v16 }
  0x13   : > { %v510_v27 = vadd.f32 %v2078_v10, %v439_v17  ;;  %v511_v28 = vadd.f32 %v2078_v10, %v440_v18  ;;  %v473_v30 = vmul.f32 %v1747_v19, %v2071_v5  ;;  %v512_v33 = vadd.f32 %v2078_v10, %v441_v25 }
  0x14   : > { %v542_v31 = vadd.f32 %v2078_v10, %v471_v23  ;;  %v543_v32 = vadd.f32 %v2078_v10, %v472_v24  ;;  %v474_v34 = vmul.f32 %v1748_v20, %v2071_v5  ;;  %v513_v42 = vadd.f32 %v2078_v10, %v442_v29 }
  0x15   : > { %1881 = vmatpush3.bf16.msra.mxu0 %v1982_v2  ;;  %1966 = vmatpush3.bf16.msra.mxu1 %v1982_v2  ;;  %vm574_vm0 = vcmp.ge.f32.partialorder %v510_v27, 0.0  ;;  %vm575_vm1 = vcmp.ge.f32.partialorder %v511_v28, 0.0  ;;  %v645_v35 = vmul.f32 %v2092_v22, %v510_v27  ;;  %v646_v36 = vmul.f32 %v2092_v22, %v511_v28 }
  0x16   : > { %1882 = vmatprep.subr.bf16.mxu0 %v1983_v3  ;;  %1959 = vmatprep.subr.bf16.mxu1 %v1983_v3  ;;  %vm606_vm2 = vcmp.ge.f32.partialorder %v542_v31, 0.0  ;;  %vm607_vm3 = vcmp.ge.f32.partialorder %v543_v32, 0.0  ;;  %v677_v38 = vmul.f32 %v2092_v22, %v542_v31  ;;  %v678_v39 = vmul.f32 %v2092_v22, %v543_v32 }
  0x17   : > { %v709_v40 = vsel %vm574_vm0, %v510_v27, %v645_v35  ;;  %v710_v41 = vsel %vm575_vm1, %v511_v28, %v646_v36  ;;  %vm576_vm4 = vcmp.ge.f32.partialorder %v512_v33, 0.0  ;;  %v647_v46 = vmul.f32 %v2092_v22, %v512_v33  ;;  %v1808_v28 = vld [vmem:[%s2062_s13 + $0x20] sm:$0xff]  }
  0x18   : > { %v773_v43 = vpack.c.bf16 %v710_v41, %v709_v40  ;;  %v741_v44 = vsel %vm606_vm2, %v542_v31, %v677_v38  ;;  %v742_v45 = vsel %vm607_vm3, %v543_v32, %v678_v39  ;;  %vm577_vm5 = vcmp.ge.f32.partialorder %v513_v42, 0.0  ;;  %v1824_v32 = vld [vmem:[%s2062_s13 + $0xa0] sm:$0xff]  }
  0x19   : > { %1883 = vmatpush3.bf16.msra.mxu0 %v1983_v3  ;;  %1967 = vmatpush3.bf16.msra.mxu1 %v1983_v3  ;;  %v789_v48 = vpack.c.bf16 %v742_v45, %v741_v44  ;;  %v648_v49 = vmul.f32 %v2092_v22, %v513_v42  ;;  %v544_v50 = vadd.f32 %v2078_v10, %v473_v30  ;;  %v1751_v58 = vunpack.c.l.bf16 %v1822_v47  ;;  %v1987_v3 = vld [vmem:[%s2587_s4] sm:$0xff]  }
  0x1a   : > { %1884 = vmatprep.subr.bf16.mxu0 %v1984_v21  ;;  %1960 = vmatprep.subr.bf16.mxu1 %v1984_v21  ;;  %v2121_v52 = vsel %vm576_vm4, %v512_v33, %v647_v46  ;;  %v545_v53 = vadd.f32 %v2078_v10, %v474_v34  ;;  %v443_v55 = vmul.f32 %v1687_v26, %v2071_v5  ;;  %v1752_v1 = vunpack.c.h.bf16 %v1822_v47 }
  0x1b   : > { %1892 = vmatprep.mubr.bf16.mxu0 %v773_v43  ;;  %1924 = vmatprep.mubr.bf16.mxu1 %v789_v48  ;;  %v2126_v56 = vsel %vm577_vm5, %v513_v42, %v648_v49  ;;  %vm608_vm6 = vcmp.ge.f32.partialorder %v544_v50, 0.0  ;;  %v679_v57 = vmul.f32 %v2092_v22, %v544_v50  ;;  %v444_v62 = vmul.f32 %v1688_v54, %v2071_v5  ;;  %v1809_v48 = vld [vmem:[%s2062_s13 + $0x28] sm:$0xff]  }
  0x1c   : > { %v774_v60 = vpack.c.bf16 %v2126_v56, %v2121_v52  ;;  %vm609_vm7 = vcmp.ge.f32.partialorder %v545_v53, 0.0  ;;  %v680_v61 = vmul.f32 %v2092_v22, %v545_v53  ;;  %v514_v0 = vadd.f32 %v2078_v10, %v443_v55 }
  0x1d   : > { %1885 = vmatpush3.bf16.msra.mxu0 %v1984_v21  ;;  %1968 = vmatpush3.bf16.msra.mxu1 %v1984_v21  ;;  %v743_v63 = vsel %vm608_vm6, %v544_v50, %v679_v57  ;;  %v475_v2 = vmul.f32 %v1751_v58, %v2071_v5  ;;  %v515_v6 = vadd.f32 %v2078_v10, %v444_v62  ;;  %v1691_v7 = vunpack.c.l.bf16 %v1807_v59  ;;  %v1825_v62 = vld [vmem:[%s2062_s13 + $0xa8] sm:$0xff]  }
  0x1e   : > { %1886 = vmatprep.subr.bf16.mxu0 %v1985_v37  ;;  %1961 = vmatprep.subr.bf16.mxu1 %v1985_v37  ;;  %v744_v4 = vsel %vm609_vm7, %v545_v53, %v680_v61  ;;  %v1692_v8 = vunpack.c.h.bf16 %v1807_v59  ;;  %vm578_vm8 = vcmp.ge.f32.partialorder %v514_v0, 0.0  ;;  %v649_v12 = vmul.f32 %v2092_v22, %v514_v0 }
  0x1f   : > { %v790_v11 = vpack.c.bf16 %v744_v4, %v743_v63  ;;  %v476_v13 = vmul.f32 %v1752_v1, %v2071_v5  ;;  %vm579_vm9 = vcmp.ge.f32.partialorder %v515_v6, 0.0  ;;  %v650_v14 = vmul.f32 %v2092_v22, %v515_v6 }
  0x20   : > { %v546_v15 = vadd.f32 %v2078_v10, %v475_v2  ;;  %v445_v16 = vmul.f32 %v1691_v7, %v2071_v5  ;;  %v713_v17 = vsel %vm578_vm8, %v514_v0, %v649_v12  ;;  %v446_v19 = vmul.f32 %v1692_v8, %v2071_v5 }
  0x21   : > { %1887 = vmatpush3.bf16.msra.mxu0 %v1985_v37  ;;  %1969 = vmatpush3.bf16.msra.mxu1 %v1985_v37  ;;  %v547_v18 = vadd.f32 %v2078_v10, %v476_v13  ;;  %v1755_v20 = vunpack.c.l.bf16 %v1823_v9  ;;  %v714_v21 = vsel %vm579_vm9, %v515_v6, %v650_v14  ;;  %v1756_v31 = vunpack.c.h.bf16 %v1823_v9  ;;  %v1810_v9 = vld [vmem:[%s2062_s13 + $0x30] sm:$0xff]  }
  0x22   : > { %1888 = vmatprep.subr.bf16.mxu0 %v1986_v51  ;;  %1962 = vmatprep.subr.bf16.mxu1 %v1986_v51  ;;  %vm610_vm10 = vcmp.ge.f32.partialorder %v546_v15, 0.0  ;;  %v681_v23 = vmul.f32 %v2092_v22, %v546_v15  ;;  %v516_v24 = vadd.f32 %v2078_v10, %v445_v16  ;;  %v775_v25 = vpack.c.bf16 %v714_v21, %v713_v17 }
  0x23   : > { %vm611_vm11 = vcmp.ge.f32.partialorder %v547_v18, 0.0  ;;  %v682_v26 = vmul.f32 %v2092_v22, %v547_v18  ;;  %v517_v27 = vadd.f32 %v2078_v10, %v446_v19  ;;  %v477_v35 = vmul.f32 %v1755_v20, %v2071_v5 }
  0x24   : > { %v745_v29 = vsel %vm610_vm10, %v546_v15, %v681_v23  ;;  %vm580_vm12 = vcmp.ge.f32.partialorder %v516_v24, 0.0  ;;  %v651_v30 = vmul.f32 %v2092_v22, %v516_v24  ;;  %v478_v38 = vmul.f32 %v1756_v31, %v2071_v5 }
  0x25   : > { %1889 = vmatpush3.bf16.msra.mxu0 %v1986_v51  ;;  %1970 = vmatpush3.bf16.msra.mxu1 %v1986_v51  ;;  %v746_v33 = vsel %vm611_vm11, %v547_v18, %v682_v26  ;;  %vm581_vm13 = vcmp.ge.f32.partialorder %v517_v27, 0.0  ;;  %v652_v34 = vmul.f32 %v2092_v22, %v517_v27  ;;  %v1695_v39 = vunpack.c.l.bf16 %v1808_v28 }
  0x26   : > { %1890 = vmatprep.subr.bf16.mxu0 %v1987_v3  ;;  %1963 = vmatprep.subr.bf16.mxu1 %v1987_v3  ;;  %v791_v36 = vpack.c.bf16 %v746_v33, %v745_v29  ;;  %v715_v37 = vsel %vm580_vm12, %v516_v24, %v651_v30  ;;  %v548_v41 = vadd.f32 %v2078_v10, %v477_v35  ;;  %v1696_v42 = vunpack.c.h.bf16 %v1808_v28 }
  0x27   : > { %v716_v40 = vsel %vm581_vm13, %v517_v27, %v652_v34  ;;  %v1759_v43 = vunpack.c.l.bf16 %v1824_v32  ;;  %v549_v45 = vadd.f32 %v2078_v10, %v478_v38  ;;  %v447_v46 = vmul.f32 %v1695_v39, %v2071_v5 }
  0x28   : > { %v776_v44 = vpack.c.bf16 %v716_v40, %v715_v37  ;;  %v1760_v47 = vunpack.c.h.bf16 %v1824_v32  ;;  %vm612_vm14 = vcmp.ge.f32.partialorder %v548_v41, 0.0  ;;  %v683_v49 = vmul.f32 %v2092_v22, %v548_v41 }
  0x29   : > { %1891 = vmatpush3.bf16.msra.mxu0 %v1987_v3  ;;  %1971 = vmatpush3.bf16.msra.mxu1 %v1987_v3  ;;  %v448_v50 = vmul.f32 %v1696_v42, %v2071_v5  ;;  %v479_v51 = vmul.f32 %v1759_v43, %v2071_v5  ;;  %vm613_vm15 = vcmp.ge.f32.partialorder %v549_v45, 0.0  ;;  %v684_v52 = vmul.f32 %v2092_v22, %v549_v45 }
  0x2a   : > { %v518_v53 = vadd.f32 %v2078_v10, %v447_v46  ;;  %v480_v54 = vmul.f32 %v1760_v47, %v2071_v5  ;;  %v747_v55 = vsel %vm612_vm14, %v548_v41, %v683_v49  ;;  %v1699_v58 = vunpack.c.l.bf16 %v1809_v48  ;;  %v1811_v41 = vld [vmem:[%s2062_s13 + $0x38] sm:$0xff]  }
  0x2b   : > { %v519_v56 = vadd.f32 %v2078_v10, %v448_v50  ;;  %v550_v57 = vadd.f32 %v2078_v10, %v479_v51  ;;  %v748_v59 = vsel %vm613_vm15, %v549_v45, %v684_v52  ;;  %v1700_v6 = vunpack.c.h.bf16 %v1809_v48  ;;  %v1827_v45 = vld [vmem:[%s2062_s13 + $0xb8] sm:$0xff]  }
  0x2c   : > { %1893 = vmatmul.mubr.bf16.vlgmr.msra.gmra.mxu0 %v774_v60  ;;  %1925 = vmatmul.mubr.bf16.vlgmr.msra.gmra.mxu1 %v790_v11  ;;  %vm582_vm0 = vcmp.ge.f32.partialorder %v518_v53, 0.0  ;;  %v653_v60 = vmul.f32 %v2092_v22, %v518_v53  ;;  %v551_v61 = vadd.f32 %v2078_v10, %v480_v54  ;;  %v792_v63 = vpack.c.bf16 %v748_v59, %v747_v55  ;;  %v1826_v11 = vld [vmem:[%s2062_s13 + $0xb0] sm:$0xff]  }
  0x2d   : > { %1896 = vmatprep.mubr.bf16.mxu0 %v775_v25  ;;  %1928 = vmatprep.mubr.bf16.mxu1 %v791_v36  ;;  %vm583_vm1 = vcmp.ge.f32.partialorder %v519_v56, 0.0  ;;  %v654_v0 = vmul.f32 %v2092_v22, %v519_v56  ;;  %vm614_vm2 = vcmp.ge.f32.partialorder %v550_v57, 0.0  ;;  %v685_v2 = vmul.f32 %v2092_v22, %v550_v57 }
  0x2e   : > { %v717_v1 = vsel %vm582_vm0, %v518_v53, %v653_v60  ;;  %vm615_vm3 = vcmp.ge.f32.partialorder %v551_v61, 0.0  ;;  %v686_v3 = vmul.f32 %v2092_v22, %v551_v61  ;;  %v449_v7 = vmul.f32 %v1699_v58, %v2071_v5 }
  0x2f   : > { %v718_v4 = vsel %vm583_vm1, %v519_v56, %v654_v0  ;;  %v1763_v8 = vunpack.c.l.bf16 %v1825_v62  ;;  %v749_v13 = vsel %vm614_vm2, %v550_v57, %v685_v2  ;;  %v1764_v15 = vunpack.c.h.bf16 %v1825_v62  ;;  %v1812_v57 = vld [vmem:[%s2062_s13 + $0x40] sm:$0xff]  }
  0x30   : > { %v777_v12 = vpack.c.bf16 %v718_v4, %v717_v1  ;;  %v750_v14 = vsel %vm615_vm3, %v551_v61, %v686_v3  ;;  %v450_v17 = vmul.f32 %v1700_v6, %v2071_v5  ;;  %v520_v18 = vadd.f32 %v2078_v10, %v449_v7 }
  0x31   : > { %v793_v16 = vpack.c.bf16 %v750_v14, %v749_v13  ;;  %v481_v19 = vmul.f32 %v1763_v8, %v2071_v5  ;;  %v482_v20 = vmul.f32 %v1764_v15, %v2071_v5  ;;  %v1703_v21 = vunpack.c.l.bf16 %v1810_v9 }
  0x32   : > { %v1704_v23 = vunpack.c.h.bf16 %v1810_v9  ;;  %v1767_v24 = vunpack.c.l.bf16 %v1826_v11  ;;  %v521_v25 = vadd.f32 %v2078_v10, %v450_v17  ;;  %vm584_vm4 = vcmp.ge.f32.partialorder %v520_v18, 0.0 }
  0x33   : > { %v655_v26 = vmul.f32 %v2092_v22, %v520_v18  ;;  %v552_v27 = vadd.f32 %v2078_v10, %v481_v19  ;;  %v553_v28 = vadd.f32 %v2078_v10, %v482_v20  ;;  %v451_v29 = vmul.f32 %v1703_v21, %v2071_v5 }
  0x34   : > { %1897 = vmatmul.mubr.bf16.gmra.mxu0 %v776_v44  ;;  %1929 = vmatmul.mubr.bf16.gmra.mxu1 %v792_v63  ;;  %v452_v30 = vmul.f32 %v1704_v23, %v2071_v5  ;;  %v1768_v31 = vunpack.c.h.bf16 %v1826_v11  ;;  %vm585_vm5 = vcmp.ge.f32.partialorder %v521_v25, 0.0  ;;  %v656_v32 = vmul.f32 %v2092_v22, %v521_v25 }
  0x35   : > { %1900 = vmatprep.mubr.bf16.mxu0 %v777_v12  ;;  %1932 = vmatprep.mubr.bf16.mxu1 %v793_v16  ;;  %v719_v33 = vsel %vm584_vm4, %v520_v18, %v655_v26  ;;  %vm616_vm6 = vcmp.ge.f32.partialorder %v552_v27, 0.0  ;;  %vm617_vm7 = vcmp.ge.f32.partialorder %v553_v28, 0.0  ;;  %v687_v34 = vmul.f32 %v2092_v22, %v552_v27  ;;  %v1828_v16 = vld [vmem:[%s2062_s13 + $0xc0] sm:$0xff]  }
  0x36   : > { %v688_v35 = vmul.f32 %v2092_v22, %v553_v28  ;;  %v522_v36 = vadd.f32 %v2078_v10, %v451_v29  ;;  %v720_v37 = vsel %vm585_vm5, %v521_v25, %v656_v32  ;;  %v523_v38 = vadd.f32 %v2078_v10, %v452_v30  ;;  %v1829_v29 = vld [vmem:[%s2062_s13 + $0xc8] sm:$0xff]  }
  0x37   : > { %v483_v39 = vmul.f32 %v1767_v24, %v2071_v5  ;;  %v484_v40 = vmul.f32 %v1768_v31, %v2071_v5  ;;  %v778_v42 = vpack.c.bf16 %v720_v37, %v719_v33  ;;  %v751_v43 = vsel %vm616_vm6, %v552_v27, %v687_v34  ;;  %v1813_v24 = vld [vmem:[%s2062_s13 + $0x48] sm:$0xff]  }
  0x38   : > { %v752_v44 = vsel %vm617_vm7, %v553_v28, %v688_v35  ;;  %vm586_vm8 = vcmp.ge.f32.partialorder %v522_v36, 0.0  ;;  %vm587_vm9 = vcmp.ge.f32.partialorder %v523_v38, 0.0  ;;  %v657_v47 = vmul.f32 %v2092_v22, %v522_v36 }
  0x39   : > { %v794_v46 = vpack.c.bf16 %v752_v44, %v751_v43  ;;  %v658_v48 = vmul.f32 %v2092_v22, %v523_v38  ;;  %v554_v49 = vadd.f32 %v2078_v10, %v483_v39  ;;  %v555_v50 = vadd.f32 %v2078_v10, %v484_v40  ;;  %v1814_v44 = vld [vmem:[%s2062_s13 + $0x50] sm:$0xff]  }
  0x3a   : > { %v1707_v51 = vunpack.c.l.bf16 %v1811_v41  ;;  %v1708_v52 = vunpack.c.h.bf16 %v1811_v41  ;;  %v721_v53 = vsel %vm586_vm8, %v522_v36, %v657_v47  ;;  %v1771_v55 = vunpack.c.l.bf16 %v1827_v45 }
  0x3b   : > { %v722_v54 = vsel %vm587_vm9, %v523_v38, %v658_v48  ;;  %v1772_v56 = vunpack.c.h.bf16 %v1827_v45  ;;  %vm618_vm10 = vcmp.ge.f32.partialorder %v554_v49, 0.0  ;;  %vm619_vm11 = vcmp.ge.f32.partialorder %v555_v50, 0.0 }
  0x3c   : > { %1901 = vmatmul.mubr.bf16.gmra.mxu0 %v778_v42  ;;  %1933 = vmatmul.mubr.bf16.gmra.mxu1 %v794_v46  ;;  %v779_v58 = vpack.c.bf16 %v722_v54, %v721_v53  ;;  %v689_v59 = vmul.f32 %v2092_v22, %v554_v49  ;;  %v690_v60 = vmul.f32 %v2092_v22, %v555_v50  ;;  %v1711_v2 = vunpack.c.l.bf16 %v1812_v57 }
  0x3d   : > { %v453_v61 = vmul.f32 %v1707_v51, %v2071_v5  ;;  %v454_v62 = vmul.f32 %v1708_v52, %v2071_v5  ;;  %v485_v63 = vmul.f32 %v1771_v55, %v2071_v5  ;;  %v486_v1 = vmul.f32 %v1772_v56, %v2071_v5 }
  0x3e   : > { %1904 = vmatprep.mubr.bf16.mxu0 %v779_v58  ;;  %v753_v0 = vsel %vm618_vm10, %v554_v49, %v689_v59  ;;  %v1712_v3 = vunpack.c.h.bf16 %v1812_v57  ;;  %v754_v4 = vsel %vm619_vm11, %v555_v50, %v690_v60  ;;  %v455_v12 = vmul.f32 %v1711_v2, %v2071_v5 }
  0x3f   : > { %v524_v6 = vadd.f32 %v2078_v10, %v453_v61  ;;  %v525_v7 = vadd.f32 %v2078_v10, %v454_v62  ;;  %v556_v8 = vadd.f32 %v2078_v10, %v485_v63  ;;  %v795_v9 = vpack.c.bf16 %v754_v4, %v753_v0  ;;  %v1830_v63 = vld [vmem:[%s2062_s13 + $0xd0] sm:$0xff]   ;;  %v1815_v4 = vld [vmem:[%s2062_s13 + $0x58] sm:$0xff]  }
  0x40   : > { %v557_v11 = vadd.f32 %v2078_v10, %v486_v1  ;;  %v456_v13 = vmul.f32 %v1712_v3, %v2071_v5  ;;  %v526_v21 = vadd.f32 %v2078_v10, %v455_v12  ;;  %v1775_v28 = vunpack.c.l.bf16 %v1828_v16 }
  0x41   : > { %vm588_vm12 = vcmp.ge.f32.partialorder %v524_v6, 0.0  ;;  %vm589_vm13 = vcmp.ge.f32.partialorder %v525_v7, 0.0  ;;  %v659_v14 = vmul.f32 %v2092_v22, %v524_v6  ;;  %v660_v15 = vmul.f32 %v2092_v22, %v525_v7  ;;  %1936 = vmatprep.mubr.bf16.mxu1 %v795_v9 }
  0x42   : > { %vm620_vm14 = vcmp.ge.f32.partialorder %v556_v8, 0.0  ;;  %vm621_vm15 = vcmp.ge.f32.partialorder %v557_v11, 0.0  ;;  %v691_v17 = vmul.f32 %v2092_v22, %v556_v8  ;;  %v692_v18 = vmul.f32 %v2092_v22, %v557_v11 }
  0x43   : > { %v723_v19 = vsel %vm588_vm12, %v524_v6, %v659_v14  ;;  %v724_v20 = vsel %vm589_vm13, %v525_v7, %v660_v15  ;;  %v527_v23 = vadd.f32 %v2078_v10, %v456_v13  ;;  %vm590_vm0 = vcmp.ge.f32.partialorder %v526_v21, 0.0  ;;  %v1831_v6 = vld [vmem:[%s2062_s13 + $0xd8] sm:$0xff]  }
  0x44   : > { %v780_v25 = vpack.c.bf16 %v724_v20, %v723_v19  ;;  %v755_v26 = vsel %vm620_vm14, %v556_v8, %v691_v17  ;;  %v756_v27 = vsel %vm621_vm15, %v557_v11, %v692_v18  ;;  %v661_v31 = vmul.f32 %v2092_v22, %v526_v21 }
  0x45   : > { %v796_v30 = vpack.c.bf16 %v756_v27, %v755_v26  ;;  %vm591_vm1 = vcmp.ge.f32.partialorder %v527_v23, 0.0  ;;  %v662_v32 = vmul.f32 %v2092_v22, %v527_v23  ;;  %v1776_v33 = vunpack.c.h.bf16 %v1828_v16 }
  0x46   : > { %1905 = vmatmul.mubr.bf16.gmra.mxu0 %v780_v25  ;;  %v487_v34 = vmul.f32 %v1775_v28, %v2071_v5  ;;  %v1715_v35 = vunpack.c.l.bf16 %v1813_v24  ;;  %v725_v36 = vsel %vm590_vm0, %v526_v21, %v661_v31  ;;  %v1716_v37 = vunpack.c.h.bf16 %v1813_v24 }
  0x47   : > { %1937 = vmatmul.mubr.bf16.gmra.mxu1 %v796_v30  ;;  %v1779_v38 = vunpack.c.l.bf16 %v1829_v29  ;;  %v1780_v39 = vunpack.c.h.bf16 %v1829_v29  ;;  %v726_v40 = vsel %vm591_vm1, %v527_v23, %v662_v32  ;;  %v488_v41 = vmul.f32 %v1776_v33, %v2071_v5 }
  0x48   : > { %v558_v42 = vadd.f32 %v2078_v10, %v487_v34  ;;  %v457_v43 = vmul.f32 %v1715_v35, %v2071_v5  ;;  %v781_v45 = vpack.c.bf16 %v726_v40, %v725_v36  ;;  %v458_v46 = vmul.f32 %v1716_v37, %v2071_v5  ;;  %v1816_v37 = vld [vmem:[%s2062_s13 + $0x60] sm:$0xff]  }
  0x49   : > { %v489_v47 = vmul.f32 %v1779_v38, %v2071_v5  ;;  %v490_v48 = vmul.f32 %v1780_v39, %v2071_v5  ;;  %v559_v49 = vadd.f32 %v2078_v10, %v488_v41  ;;  %v1719_v55 = vunpack.c.l.bf16 %v1814_v44 }
  0x4a   : > { %vm622_vm2 = vcmp.ge.f32.partialorder %v558_v42, 0.0  ;;  %v693_v50 = vmul.f32 %v2092_v22, %v558_v42  ;;  %v528_v51 = vadd.f32 %v2078_v10, %v457_v43  ;;  %1908 = vmatprep.mubr.bf16.mxu0 %v781_v45  ;;  %v529_v52 = vadd.f32 %v2078_v10, %v458_v46 }
  0x4b   : > { %v560_v53 = vadd.f32 %v2078_v10, %v489_v47  ;;  %v561_v54 = vadd.f32 %v2078_v10, %v490_v48  ;;  %vm623_vm3 = vcmp.ge.f32.partialorder %v559_v49, 0.0  ;;  %v694_v56 = vmul.f32 %v2092_v22, %v559_v49  ;;  %v1832_v48 = vld [vmem:[%s2062_s13 + $0xe0] sm:$0xff]  }
  0x4c   : > { %v757_v57 = vsel %vm622_vm2, %v558_v42, %v693_v50  ;;  %vm592_vm4 = vcmp.ge.f32.partialorder %v528_v51, 0.0  ;;  %vm593_vm5 = vcmp.ge.f32.partialorder %v529_v52, 0.0  ;;  %v663_v58 = vmul.f32 %v2092_v22, %v528_v51 }
  0x4d   : > { %v664_v59 = vmul.f32 %v2092_v22, %v529_v52  ;;  %vm624_vm6 = vcmp.ge.f32.partialorder %v560_v53, 0.0  ;;  %v758_v60 = vsel %vm623_vm3, %v559_v49, %v694_v56  ;;  %vm625_vm7 = vcmp.ge.f32.partialorder %v561_v54, 0.0 }
  0x4e   : > { %v695_v61 = vmul.f32 %v2092_v22, %v560_v53  ;;  %v696_v62 = vmul.f32 %v2092_v22, %v561_v54  ;;  %v797_v0 = vpack.c.bf16 %v758_v60, %v757_v57  ;;  %v727_v1 = vsel %vm592_vm4, %v528_v51, %v663_v58 }
  0x4f   : > { %v728_v2 = vsel %vm593_vm5, %v529_v52, %v664_v59  ;;  %v1720_v3 = vunpack.c.h.bf16 %v1814_v44  ;;  %v459_v11 = vmul.f32 %v1719_v55, %v2071_v5  ;;  %v1783_v14 = vunpack.c.l.bf16 %v1830_v63 }
  0x50   : > { %v782_v7 = vpack.c.bf16 %v728_v2, %v727_v1  ;;  %v759_v8 = vsel %vm624_vm6, %v560_v53, %v695_v61  ;;  %v760_v9 = vsel %vm625_vm7, %v561_v54, %v696_v62  ;;  %1940 = vmatprep.mubr.bf16.mxu1 %v797_v0  ;;  %v1784_v15 = vunpack.c.h.bf16 %v1830_v63  ;;  %v1817_v53 = vld [vmem:[%s2062_s13 + $0x68] sm:$0xff]  }
  0x51   : > { %v798_v12 = vpack.c.bf16 %v760_v9, %v759_v8  ;;  %v460_v13 = vmul.f32 %v1720_v3, %v2071_v5  ;;  %v530_v16 = vadd.f32 %v2078_v10, %v459_v11  ;;  %v1723_v17 = vunpack.c.l.bf16 %v1815_v4 }
  0x52   : > { %1909 = vmatmul.mubr.bf16.gmra.mxu0 %v782_v7  ;;  %v1724_v18 = vunpack.c.h.bf16 %v1815_v4  ;;  %v1787_v19 = vunpack.c.l.bf16 %v1831_v6  ;;  %v491_v21 = vmul.f32 %v1783_v14, %v2071_v5  ;;  %v492_v23 = vmul.f32 %v1784_v15, %v2071_v5  ;;  %v1833_v4 = vld [vmem:[%s2062_s13 + $0xe8] sm:$0xff]  }
  0x53   : > { %1941 = vmatmul.mubr.bf16.gmra.mxu1 %v798_v12  ;;  %v531_v20 = vadd.f32 %v2078_v10, %v460_v13  ;;  %v1788_v24 = vunpack.c.h.bf16 %v1831_v6  ;;  %vm594_vm8 = vcmp.ge.f32.partialorder %v530_v16, 0.0  ;;  %v665_v25 = vmul.f32 %v2092_v22, %v530_v16 }
  0x54   : > { %v461_v26 = vmul.f32 %v1723_v17, %v2071_v5  ;;  %v462_v27 = vmul.f32 %v1724_v18, %v2071_v5  ;;  %v562_v29 = vadd.f32 %v2078_v10, %v491_v21  ;;  %v563_v30 = vadd.f32 %v2078_v10, %v492_v23 }
  0x55   : > { %vm595_vm9 = vcmp.ge.f32.partialorder %v531_v20, 0.0  ;;  %v666_v28 = vmul.f32 %v2092_v22, %v531_v20  ;;  %v729_v31 = vsel %vm594_vm8, %v530_v16, %v665_v25  ;;  %v493_v34 = vmul.f32 %v1787_v19, %v2071_v5 }
  0x56   : > { %v532_v32 = vadd.f32 %v2078_v10, %v461_v26  ;;  %v533_v33 = vadd.f32 %v2078_v10, %v462_v27  ;;  %vm626_vm10 = vcmp.ge.f32.partialorder %v562_v29, 0.0  ;;  %vm627_vm11 = vcmp.ge.f32.partialorder %v563_v30, 0.0 }
  0x57   : > { %v730_v35 = vsel %vm595_vm9, %v531_v20, %v666_v28  ;;  %v697_v36 = vmul.f32 %v2092_v22, %v562_v29  ;;  %v698_v39 = vmul.f32 %v2092_v22, %v563_v30  ;;  %v494_v43 = vmul.f32 %v1788_v24, %v2071_v5  ;;  %v1818_v24 = vld [vmem:[%s2062_s13 + $0x70] sm:$0xff]  }
  0x58   : > { %v783_v38 = vpack.c.bf16 %v730_v35, %v729_v31  ;;  %vm596_vm12 = vcmp.ge.f32.partialorder %v532_v32, 0.0  ;;  %vm597_vm13 = vcmp.ge.f32.partialorder %v533_v33, 0.0  ;;  %v667_v41 = vmul.f32 %v2092_v22, %v532_v32  ;;  %v1834_v28 = vld [vmem:[%s2062_s13 + $0xf0] sm:$0xff]  }
  0x59   : > { %v761_v40 = vsel %vm626_vm10, %v562_v29, %v697_v36  ;;  %v668_v42 = vmul.f32 %v2092_v22, %v533_v33  ;;  %v762_v44 = vsel %vm627_vm11, %v563_v30, %v698_v39  ;;  %v564_v45 = vadd.f32 %v2078_v10, %v493_v34 }
  0x5a   : > { %1912 = vmatprep.mubr.bf16.mxu0 %v783_v38  ;;  %v1727_v46 = vunpack.c.l.bf16 %v1816_v37  ;;  %v1728_v47 = vunpack.c.h.bf16 %v1816_v37  ;;  %v799_v49 = vpack.c.bf16 %v762_v44, %v761_v40  ;;  %v731_v50 = vsel %vm596_vm12, %v532_v32, %v667_v41  ;;  %v1819_v44 = vld [vmem:[%s2062_s13 + $0x78] sm:$0xff]  }
  0x5b   : > { %v732_v51 = vsel %vm597_vm13, %v533_v33, %v668_v42  ;;  %v565_v52 = vadd.f32 %v2078_v10, %v494_v43  ;;  %vm628_vm14 = vcmp.ge.f32.partialorder %v564_v45, 0.0  ;;  %v699_v55 = vmul.f32 %v2092_v22, %v564_v45 }
  0x5c   : > { %v784_v54 = vpack.c.bf16 %v732_v51, %v731_v50  ;;  %v463_v56 = vmul.f32 %v1727_v46, %v2071_v5  ;;  %1944 = vmatprep.mubr.bf16.mxu1 %v799_v49  ;;  %v464_v58 = vmul.f32 %v1728_v47, %v2071_v5  ;;  %v1791_v59 = vunpack.c.l.bf16 %v1832_v48 }
  0x5d   : > { %vm629_vm15 = vcmp.ge.f32.partialorder %v565_v52, 0.0  ;;  %v700_v57 = vmul.f32 %v2092_v22, %v565_v52  ;;  %v763_v60 = vsel %vm628_vm14, %v564_v45, %v699_v55  ;;  %v1792_v62 = vunpack.c.h.bf16 %v1832_v48 }
  0x5e   : > { %1913 = vmatmul.mubr.bf16.gmra.mxu0 %v784_v54  ;;  %v534_v61 = vadd.f32 %v2078_v10, %v463_v56  ;;  %v1731_v63 = vunpack.c.l.bf16 %v1817_v53  ;;  %v535_v1 = vadd.f32 %v2078_v10, %v464_v58  ;;  %v495_v2 = vmul.f32 %v1791_v59, %v2071_v5  ;;  %v1835_v58 = vld [vmem:[%s2062_s13 + $0xf8] sm:$0xff]   ;;  %s2332_s13 = scalar_lea.vmem %s2588_s5, %s1661_s10 }
  0x5f   : > { %v764_v0 = vsel %vm629_vm15, %v565_v52, %v700_v57  ;;  %v1732_v3 = vunpack.c.h.bf16 %v1817_v53  ;;  %v496_v8 = vmul.f32 %v1792_v62, %v2071_v5  ;;  %v1795_v16 = vunpack.c.l.bf16 %v1833_v4 }
  0x60   : > { %v800_v6 = vpack.c.bf16 %v764_v0, %v763_v60  ;;  %vm598_vm0 = vcmp.ge.f32.partialorder %v534_v61, 0.0  ;;  %v669_v7 = vmul.f32 %v2092_v22, %v534_v61  ;;  %vm599_vm1 = vcmp.ge.f32.partialorder %v535_v1, 0.0 }
  0x61   : > { %v670_v9 = vmul.f32 %v2092_v22, %v535_v1  ;;  %v566_v11 = vadd.f32 %v2078_v10, %v495_v2  ;;  %v465_v12 = vmul.f32 %v1731_v63, %v2071_v5  ;;  %v567_v14 = vadd.f32 %v2078_v10, %v496_v8 }
  0x62   : > { %1945 = vmatmul.mubr.bf16.gmra.mxu1 %v800_v6  ;;  %v733_v13 = vsel %vm598_vm0, %v534_v61, %v669_v7  ;;  %v466_v15 = vmul.f32 %v1732_v3, %v2071_v5  ;;  %v1796_v27 = vunpack.c.h.bf16 %v1833_v4  ;;  %v497_v31 = vmul.f32 %v1795_v16, %v2071_v5 }
  0x63   : > { %v734_v17 = vsel %vm599_vm1, %v535_v1, %v670_v9  ;;  %vm630_vm2 = vcmp.ge.f32.partialorder %v566_v11, 0.0  ;;  %v701_v18 = vmul.f32 %v2092_v22, %v566_v11  ;;  %v536_v19 = vadd.f32 %v2078_v10, %v465_v12 }
  0x64   : > { %v785_v20 = vpack.c.bf16 %v734_v17, %v733_v13  ;;  %vm631_vm3 = vcmp.ge.f32.partialorder %v567_v14, 0.0  ;;  %v702_v21 = vmul.f32 %v2092_v22, %v567_v14  ;;  %v537_v23 = vadd.f32 %v2078_v10, %v466_v15 }
  0x65   : > { %v765_v25 = vsel %vm630_vm2, %v566_v11, %v701_v18  ;;  %vm600_vm4 = vcmp.ge.f32.partialorder %v536_v19, 0.0  ;;  %v671_v26 = vmul.f32 %v2092_v22, %v536_v19  ;;  %v498_v34 = vmul.f32 %v1796_v27, %v2071_v5 }
  0x66   : > { %1916 = vmatprep.mubr.bf16.mxu0 %v785_v20  ;;  %v766_v29 = vsel %vm631_vm3, %v567_v14, %v702_v21  ;;  %vm601_vm5 = vcmp.ge.f32.partialorder %v537_v23, 0.0  ;;  %v672_v30 = vmul.f32 %v2092_v22, %v537_v23  ;;  %v1735_v35 = vunpack.c.l.bf16 %v1818_v24 }
  0x67   : > { %v801_v32 = vpack.c.bf16 %v766_v29, %v765_v25  ;;  %v735_v33 = vsel %vm600_vm4, %v536_v19, %v671_v26  ;;  %v568_v37 = vadd.f32 %v2078_v10, %v497_v31  ;;  %v1736_v38 = vunpack.c.h.bf16 %v1818_v24 }
  0x68   : > { %v736_v36 = vsel %vm601_vm5, %v537_v23, %v672_v30  ;;  %v1799_v39 = vunpack.c.l.bf16 %v1834_v28  ;;  %v569_v41 = vadd.f32 %v2078_v10, %v498_v34  ;;  %v467_v42 = vmul.f32 %v1735_v35, %v2071_v5 }
  0x69   : > { %1948 = vmatprep.mubr.bf16.mxu1 %v801_v32  ;;  %v786_v40 = vpack.c.bf16 %v736_v36, %v735_v33  ;;  %v1800_v43 = vunpack.c.h.bf16 %v1834_v28  ;;  %vm632_vm6 = vcmp.ge.f32.partialorder %v568_v37, 0.0  ;;  %v703_v45 = vmul.f32 %v2092_v22, %v568_v37 }
  0x6a   : > { %v468_v46 = vmul.f32 %v1736_v38, %v2071_v5  ;;  %v499_v47 = vmul.f32 %v1799_v39, %v2071_v5  ;;  %vm633_vm7 = vcmp.ge.f32.partialorder %v569_v41, 0.0  ;;  %v704_v48 = vmul.f32 %v2092_v22, %v569_v41 }
  0x6b   : > { %1917 = vmatmul.mubr.bf16.gmra.mxu0 %v786_v40  ;;  %v538_v49 = vadd.f32 %v2078_v10, %v467_v42  ;;  %v500_v50 = vmul.f32 %v1800_v43, %v2071_v5  ;;  %v767_v51 = vsel %vm632_vm6, %v568_v37, %v703_v45  ;;  %v1739_v54 = vunpack.c.l.bf16 %v1819_v44 }
  0x6c   : > { %v539_v52 = vadd.f32 %v2078_v10, %v468_v46  ;;  %v570_v53 = vadd.f32 %v2078_v10, %v499_v47  ;;  %v768_v55 = vsel %vm633_vm7, %v569_v41, %v704_v48  ;;  %v1740_v1 = vunpack.c.h.bf16 %v1819_v44 }
  0x6d   : > { %vm602_vm8 = vcmp.ge.f32.partialorder %v538_v49, 0.0  ;;  %v673_v56 = vmul.f32 %v2092_v22, %v538_v49  ;;  %v571_v57 = vadd.f32 %v2078_v10, %v500_v50  ;;  %v802_v59 = vpack.c.bf16 %v768_v55, %v767_v51 }
  0x6e   : > { %vm603_vm9 = vcmp.ge.f32.partialorder %v539_v52, 0.0  ;;  %v674_v60 = vmul.f32 %v2092_v22, %v539_v52  ;;  %vm634_vm10 = vcmp.ge.f32.partialorder %v570_v53, 0.0  ;;  %v705_v62 = vmul.f32 %v2092_v22, %v570_v53 }
  0x6f   : > { %v737_v61 = vsel %vm602_vm8, %v538_v49, %v673_v56  ;;  %vm635_vm11 = vcmp.ge.f32.partialorder %v571_v57, 0.0  ;;  %v706_v63 = vmul.f32 %v2092_v22, %v571_v57  ;;  %1949 = vmatmul.mubr.bf16.gmra.mxu1 %v802_v59  ;;  %v469_v2 = vmul.f32 %v1739_v54, %v2071_v5 }
  0x70   : > { %v738_v0 = vsel %vm603_vm9, %v539_v52, %v674_v60  ;;  %v1803_v3 = vunpack.c.l.bf16 %v1835_v58  ;;  %v769_v6 = vsel %vm634_vm10, %v570_v53, %v705_v62  ;;  %v1804_v8 = vunpack.c.h.bf16 %v1835_v58 }
  0x71   : > { %v787_v4 = vpack.c.bf16 %v738_v0, %v737_v61  ;;  %v770_v7 = vsel %vm635_vm11, %v571_v57, %v706_v63  ;;  %v470_v11 = vmul.f32 %v1740_v1, %v2071_v5  ;;  %v540_v12 = vadd.f32 %v2078_v10, %v469_v2 }
  0x72   : > { %v803_v9 = vpack.c.bf16 %v770_v7, %v769_v6  ;;  %v501_v13 = vmul.f32 %v1803_v3, %v2071_v5  ;;  %v502_v14 = vmul.f32 %v1804_v8, %v2071_v5  ;;  %vm1334_vm0 = vcmask 1041409  }
  0x73   : > { %1920 = vmatprep.mubr.bf16.mxu0 %v787_v4  ;;  %v541_v15 = vadd.f32 %v2078_v10, %v470_v11  ;;  %vm604_vm12 = vcmp.ge.f32.partialorder %v540_v12, 0.0  ;;  %v675_v16 = vmul.f32 %v2092_v22, %v540_v12  ;;  %vm1336_vm1 = vcmask 1042434  }
  0x74   : > { %1952 = vmatprep.mubr.bf16.mxu1 %v803_v9  ;;  %v572_v17 = vadd.f32 %v2078_v10, %v501_v13  ;;  %v573_v18 = vadd.f32 %v2078_v10, %v502_v14  ;;  %vm1338_vm2 = vcmask 1043459   ;;  %vm1340_vm3 = vcmask 1044484  }
  0x75   : > { %vm605_vm13 = vcmp.ge.f32.partialorder %v541_v15, 0.0  ;;  %v676_v19 = vmul.f32 %v2092_v22, %v541_v15  ;;  %v739_v20 = vsel %vm604_vm12, %v540_v12, %v675_v16  ;;  %vm1342_vm4 = vcmask 1045509  }
  0x76   : > { %vm636_vm14 = vcmp.ge.f32.partialorder %v572_v17, 0.0  ;;  %vm637_vm15 = vcmp.ge.f32.partialorder %v573_v18, 0.0  ;;  %v707_v21 = vmul.f32 %v2092_v22, %v572_v17  ;;  %v708_v5 = vmul.f32 %v2092_v22, %v573_v18 }
  0x77   : > { %v740_v23 = vsel %vm605_vm13, %v541_v15, %v676_v19  ;;  %vm1344_vm5 = vcmask 1046534   ;;  %vm1346_vm6 = vcmask 1047559  }
  0x78   : > { %v788_v24 = vpack.c.bf16 %v740_v23, %v739_v20  ;;  %v771_v25 = vsel %vm636_vm14, %v572_v17, %v707_v21  ;;  %v772_v26 = vsel %vm637_vm15, %v573_v18, %v708_v5 }
  0x79   : > { %v804_v27 = vpack.c.bf16 %v772_v26, %v771_v25 }
  0x7a   : > { %1921 = vmatmul.mubr.bf16.gmra.mxu0 %v788_v24 }
  0x7b   : > { %1953 = vmatmul.mubr.bf16.gmra.mxu1 %v804_v27 }
  0xec   : > { %v1894_v10 = vpop.f32.mrf.mxu0  ;;  %v1926_v22 = vpop.f32.mrf.mxu1 }
  0xed   : > { %1160 = vst [vmem:[%s2332_s13 + $0x10] sm:$0xff] %v1894_v10  ;;  %1192 = vst [vmem:[%s2332_s13 + $0x110] sm:$0xff] %v1926_v22  ;;  %v1352_v40 = vmul.f32 %v1894_v10, %v1894_v10  ;;  %v1384_v41 = vmul.f32 %v1926_v22, %v1926_v22 }
  0xee   : > { %v903_v28 = vpop.f32.mrf.mxu0  ;;  %v1031_v29 = vpop.f32.mrf.mxu1 }
  0xef   : > { %1158 = vst [vmem:[%s2332_s13] sm:$0xff] %v903_v28  ;;  %1190 = vst [vmem:[%s2332_s13 + $0x100] sm:$0xff] %v1031_v29  ;;  %v1350_v32 = vmul.f32 %v903_v28, %v903_v28  ;;  %v1382_v33 = vmul.f32 %v1031_v29, %v1031_v29 }
  0xf0   : > { %v1895_v30 = vpop.f32.mrf.mxu0  ;;  %v1927_v31 = vpop.f32.mrf.mxu1 }
  0xf1   : > { %1161 = vst [vmem:[%s2332_s13 + $0x18] sm:$0xff] %v1895_v30  ;;  %1193 = vst [vmem:[%s2332_s13 + $0x118] sm:$0xff] %v1927_v31  ;;  %v1353_v48 = vmul.f32 %v1895_v30, %v1895_v30  ;;  %v1385_v51 = vmul.f32 %v1927_v31, %v1927_v31 }
  0xf2   : > { %v906_v34 = vpop.f32.mrf.mxu0  ;;  %v1034_v35 = vpop.f32.mrf.mxu1 }
  0xf3   : > { %1159 = vst [vmem:[%s2332_s13 + $0x8] sm:$0xff] %v906_v34  ;;  %v1222_v36 = vadd.f32 %v906_v34, %v903_v28  ;;  %v1351_v37 = vmul.f32 %v906_v34, %v906_v34  ;;  %1191 = vst [vmem:[%s2332_s13 + $0x108] sm:$0xff] %v1034_v35  ;;  %v1274_v38 = vadd.f32 %v1034_v35, %v1031_v29 }
  0xf4   : > { %v1383_v39 = vmul.f32 %v1034_v35, %v1034_v35  ;;  %v1898_v42 = vpop.f32.mrf.mxu0  ;;  %v1930_v43 = vpop.f32.mrf.mxu1 }
  0xf5   : > { %v1223_v44 = vadd.f32 %v1894_v10, %v1222_v36  ;;  %v1414_v45 = vadd.f32 %v1351_v37, %v1350_v32  ;;  %v1275_v46 = vadd.f32 %v1926_v22, %v1274_v38  ;;  %1164 = vst [vmem:[%s2332_s13 + $0x30] sm:$0xff] %v1898_v42  ;;  %1196 = vst [vmem:[%s2332_s13 + $0x130] sm:$0xff] %v1930_v43 }
  0xf6   : > { %v1466_v47 = vadd.f32 %v1383_v39, %v1382_v33  ;;  %v919_v49 = vpop.f32.mrf.mxu0  ;;  %v1047_v50 = vpop.f32.mrf.mxu1  ;;  %v1356_v9 = vmul.f32 %v1898_v42, %v1898_v42  ;;  %v1388_v13 = vmul.f32 %v1930_v43, %v1930_v43 }
  0xf7   : > { %v1415_v52 = vadd.f32 %v1414_v45, %v1352_v40  ;;  %1162 = vst [vmem:[%s2332_s13 + $0x20] sm:$0xff] %v919_v49  ;;  %v1224_v54 = vadd.f32 %v1895_v30, %v1223_v44  ;;  %1194 = vst [vmem:[%s2332_s13 + $0x120] sm:$0xff] %v1047_v50  ;;  %v1276_v55 = vadd.f32 %v1927_v31, %v1275_v46 }
  0xf8   : > { %v1467_v53 = vadd.f32 %v1466_v47, %v1384_v41  ;;  %v1386_v56 = vmul.f32 %v1047_v50, %v1047_v50  ;;  %v1899_v57 = vpop.f32.mrf.mxu0  ;;  %v1931_v58 = vpop.f32.mrf.mxu1  ;;  %v1354_v60 = vmul.f32 %v919_v49, %v919_v49 }
  0xf9   : > { %v1225_v59 = vadd.f32 %v1224_v54, %v919_v49  ;;  %v1416_v61 = vadd.f32 %v1415_v52, %v1353_v48  ;;  %1165 = vst [vmem:[%s2332_s13 + $0x38] sm:$0xff] %v1899_v57  ;;  %1197 = vst [vmem:[%s2332_s13 + $0x138] sm:$0xff] %v1931_v58  ;;  %v1277_v63 = vadd.f32 %v1276_v55, %v1047_v50 }
  0xfa   : > { %v1468_v62 = vadd.f32 %v1467_v53, %v1385_v51  ;;  %v922_v0 = vpop.f32.mrf.mxu0  ;;  %v1050_v1 = vpop.f32.mrf.mxu1  ;;  %v1357_v17 = vmul.f32 %v1899_v57, %v1899_v57  ;;  %v1389_v21 = vmul.f32 %v1931_v58, %v1931_v58 }
  0xfb   : > { %v1417_v2 = vadd.f32 %v1416_v61, %v1354_v60  ;;  %1163 = vst [vmem:[%s2332_s13 + $0x28] sm:$0xff] %v922_v0  ;;  %v1226_v4 = vadd.f32 %v1225_v59, %v922_v0  ;;  %v1355_v6 = vmul.f32 %v922_v0, %v922_v0  ;;  %1195 = vst [vmem:[%s2332_s13 + $0x128] sm:$0xff] %v1050_v1 }
  0xfc   : > { %v1469_v3 = vadd.f32 %v1468_v62, %v1386_v56  ;;  %v1278_v7 = vadd.f32 %v1277_v63, %v1050_v1  ;;  %v1387_v8 = vmul.f32 %v1050_v1, %v1050_v1  ;;  %v2350_v16 = vpop.f32.mrf.mxu0  ;;  %v1934_v20 = vpop.f32.mrf.mxu1 }
  0xfd   : > { %v1227_v11 = vadd.f32 %v1898_v42, %v1226_v4  ;;  %v1418_v12 = vadd.f32 %v1417_v2, %v1355_v6  ;;  %1168 = vst [vmem:[%s2332_s13 + $0x50] sm:$0xff] %v2350_v16  ;;  %1200 = vst [vmem:[%s2332_s13 + $0x150] sm:$0xff] %v1934_v20  ;;  %v1392_v33 = vmul.f32 %v1934_v20, %v1934_v20 }
  0xfe   : > { %v1279_v14 = vadd.f32 %v1930_v43, %v1278_v7  ;;  %v1470_v15 = vadd.f32 %v1469_v3, %v1387_v8  ;;  %v935_v24 = vpop.f32.mrf.mxu0  ;;  %v1063_v26 = vpop.f32.mrf.mxu1  ;;  %v1360_v1 = vmul.f32 %v2350_v16, %v2350_v16 }
  0xff   : > { %v2352_v18 = vadd.f32 %v1899_v57, %v1227_v11  ;;  %v1419_v19 = vadd.f32 %v1418_v12, %v1356_v9  ;;  %1166 = vst [vmem:[%s2332_s13 + $0x40] sm:$0xff] %v935_v24  ;;  %1198 = vst [vmem:[%s2332_s13 + $0x140] sm:$0xff] %v1063_v26  ;;  %v1390_v30 = vmul.f32 %v1063_v26, %v1063_v26 }
 0x100   : > { %v2356_v5 = vadd.f32 %v1931_v58, %v1279_v14  ;;  %v1471_v23 = vadd.f32 %v1470_v15, %v1388_v13  ;;  %v2365_v10 = vpop.f32.mrf.mxu0  ;;  %v1935_v22 = vpop.f32.mrf.mxu1  ;;  %v1358_v58 = vmul.f32 %v935_v24, %v935_v24 }
 0x101   : > { %v2359_v25 = vadd.f32 %v1419_v19, %v1357_v17  ;;  %1169 = vst [vmem:[%s2332_s13 + $0x58] sm:$0xff] %v2365_v10  ;;  %1201 = vst [vmem:[%s2332_s13 + $0x158] sm:$0xff] %v1935_v22  ;;  %v1393_v36 = vmul.f32 %v1935_v22, %v1935_v22  ;;  %v1229_v0 = vrot.slane %v2352_v18, 4  ;;  %v1361_v13 = vmul.f32 %v2365_v10, %v2365_v10 }
 0x102   : > { %v2362_v27 = vadd.f32 %v1471_v23, %v1389_v21  ;;  %v938_v28 = vpop.f32.mrf.mxu0  ;;  %v1066_v29 = vpop.f32.mrf.mxu1  ;;  %v1281_v6 = vrot.slane %v2356_v5, 4 }
 0x103   : > { %1167 = vst [vmem:[%s2332_s13 + $0x48] sm:$0xff] %v938_v28  ;;  %1199 = vst [vmem:[%s2332_s13 + $0x148] sm:$0xff] %v1066_v29  ;;  %v1287_v31 = vadd.f32 %v1066_v29, %v1063_v26  ;;  %v1391_v32 = vmul.f32 %v1066_v29, %v1066_v29  ;;  %v1235_v53 = vadd.f32 %v938_v28, %v935_v24 }
 0x104   : > { %v1359_v55 = vmul.f32 %v938_v28, %v938_v28  ;;  %v1230_v12 = vadd.f32 %v1229_v0, %v2352_v18  ;;  %v1282_v18 = vadd.f32 %v1281_v6, %v2356_v5 }
 0x105   : > { %v1288_v34 = vadd.f32 %v1934_v20, %v1287_v31  ;;  %v1479_v35 = vadd.f32 %v1391_v32, %v1390_v30  ;;  %v1236_v59 = vadd.f32 %v2350_v16, %v1235_v53  ;;  %v1421_v16 = vrot.slane %v2359_v25, 4 }
 0x106   : > { %v2372_v38 = vpop.f32.mrf.mxu0  ;;  %v1427_v61 = vadd.f32 %v1359_v55, %v1358_v58  ;;  %v1231_v30 = vrot.slane %v1230_v12, 2  ;;  %v1473_v31 = vrot.slane %v2362_v27, 4 }
 0x107   : > { %v1480_v37 = vadd.f32 %v1479_v35, %v1392_v33  ;;  %v2374_v39 = vadd.f32 %v1935_v22, %v1288_v34  ;;  %1172 = vst [vmem:[%s2332_s13 + $0x70] sm:$0xff] %v2372_v38  ;;  %v2378_v40 = vpop.f32.mrf.mxu1  ;;  %v1237_v3 = vadd.f32 %v2365_v10, %v1236_v59  ;;  %v1422_v34 = vadd.f32 %v1421_v16, %v2359_v25 }
 0x108   : > { %1204 = vst [vmem:[%s2332_s13 + $0x170] sm:$0xff] %v2378_v40  ;;  %v2382_v41 = vpop.f32.mrf.mxu0  ;;  %v1428_v7 = vadd.f32 %v1427_v61, %v1360_v1  ;;  %v1232_v55 = vadd.f32 %v1231_v30, %v1230_v12 }
 0x109   : > { %v2384_v42 = vadd.f32 %v1480_v37, %v1393_v36  ;;  %1170 = vst [vmem:[%s2332_s13 + $0x60] sm:$0xff] %v2382_v41  ;;  %v2388_v43 = vpop.f32.mrf.mxu1  ;;  %v1238_v17 = vadd.f32 %v1237_v3, %v2382_v41  ;;  %v1362_v5 = vmul.f32 %v2382_v41, %v2382_v41 }
 0x10a   : > { %1202 = vst [vmem:[%s2332_s13 + $0x160] sm:$0xff] %v2388_v43  ;;  %v2392_v44 = vpop.f32.mrf.mxu0  ;;  %v1429_v21 = vadd.f32 %v1428_v7, %v1361_v13  ;;  %v1290_v23 = vadd.f32 %v2374_v39, %v2388_v43  ;;  %v1394_v32 = vmul.f32 %v2388_v43, %v2388_v43  ;;  %v1283_v39 = vrot.slane %v1282_v18, 2 }
 0x10b   : > { %1173 = vst [vmem:[%s2332_s13 + $0x78] sm:$0xff] %v2392_v44  ;;  %v2396_v45 = vpop.f32.mrf.mxu1  ;;  %v1364_v7 = vmul.f32 %v2372_v38, %v2372_v38 }
 0x10c   : > { %1205 = vst [vmem:[%s2332_s13 + $0x178] sm:$0xff] %v2396_v45  ;;  %v2400_v46 = vpop.f32.mrf.mxu0 }
 0x10d   : > { %1171 = vst [vmem:[%s2332_s13 + $0x68] sm:$0xff] %v2400_v46  ;;  %v2404_v47 = vpop.f32.mrf.mxu1  ;;  %v1239_v35 = vadd.f32 %v1238_v17, %v2400_v46 }
 0x10e   : > { %1203 = vst [vmem:[%s2332_s13 + $0x168] sm:$0xff] %v2404_v47  ;;  %v1291_v41 = vadd.f32 %v1290_v23, %v2404_v47 }
 0x10f   : > { %v1240_v58 = vadd.f32 %v2372_v38, %v1239_v35 }
 0x110   : > { %v1292_v1 = vadd.f32 %v2378_v40, %v1291_v41 }
 0x112   : > { %v1910_v48 = vpop.f32.mrf.mxu0 }
 0x113   : > { %1176 = vst [vmem:[%s2332_s13 + $0x90] sm:$0xff] %v1910_v48  ;;  %v2409_v49 = vpop.f32.mrf.mxu1  ;;  %v1368_v9 = vmul.f32 %v1910_v48, %v1910_v48 }
 0x114   : > { %1208 = vst [vmem:[%s2332_s13 + $0x190] sm:$0xff] %v2409_v49  ;;  %v967_v50 = vpop.f32.mrf.mxu0  ;;  %v1400_v43 = vmul.f32 %v2409_v49, %v2409_v49 }
 0x115   : > { %1174 = vst [vmem:[%s2332_s13 + $0x80] sm:$0xff] %v967_v50  ;;  %v1095_v51 = vpop.f32.mrf.mxu1  ;;  %v1366_v62 = vmul.f32 %v967_v50, %v967_v50 }
 0x116   : > { %1206 = vst [vmem:[%s2332_s13 + $0x180] sm:$0xff] %v1095_v51  ;;  %v1911_v52 = vpop.f32.mrf.mxu0  ;;  %v1398_v10 = vmul.f32 %v1095_v51, %v1095_v51 }
 0x117   : > { %1177 = vst [vmem:[%s2332_s13 + $0x98] sm:$0xff] %v1911_v52  ;;  %v2416_v54 = vpop.f32.mrf.mxu1  ;;  %v1369_v22 = vmul.f32 %v1911_v52, %v1911_v52 }
 0x118   : > { %1209 = vst [vmem:[%s2332_s13 + $0x198] sm:$0xff] %v2416_v54  ;;  %v970_v56 = vpop.f32.mrf.mxu0 }
 0x119   : > { %1175 = vst [vmem:[%s2332_s13 + $0x88] sm:$0xff] %v970_v56  ;;  %v1098_v57 = vpop.f32.mrf.mxu1  ;;  %v1367_v60 = vmul.f32 %v970_v56, %v970_v56  ;;  %v1248_v63 = vadd.f32 %v970_v56, %v967_v50  ;;  %v1363_v50 = vmul.f32 %v2400_v46, %v2400_v46  ;;  %v1474_v56 = vadd.f32 %v1473_v31, %v2362_v27 }
 0x11a   : > { %1207 = vst [vmem:[%s2332_s13 + $0x188] sm:$0xff] %v1098_v57  ;;  %v1399_v20 = vmul.f32 %v1098_v57, %v1098_v57  ;;  %v1300_v28 = vadd.f32 %v1098_v57, %v1095_v51  ;;  %v1482_v57 = vadd.f32 %v2384_v42, %v1394_v32  ;;  %v1395_v46 = vmul.f32 %v2404_v47, %v2404_v47 }
 0x11b   : > { %v1440_v4 = vadd.f32 %v1367_v60, %v1366_v62  ;;  %v1249_v11 = vadd.f32 %v1910_v48, %v1248_v63  ;;  %v1430_v48 = vadd.f32 %v1429_v21, %v1362_v5  ;;  %v1423_v62 = vrot.slane %v1422_v34, 2 }
 0x11c   : > { %v1492_v36 = vadd.f32 %v1399_v20, %v1398_v10  ;;  %v1301_v25 = vadd.f32 %v2409_v49, %v1300_v28  ;;  %v2480_v63 = vadd.f32 %v1283_v39, %v1282_v18  ;;  %v1401_v27 = vmul.f32 %v2416_v54, %v2416_v54 }
 0x11d   : > { %v1441_v19 = vadd.f32 %v1440_v4, %v1368_v9  ;;  %v1250_v29 = vadd.f32 %v1911_v52, %v1249_v11  ;;  %v1431_v0 = vadd.f32 %v1430_v48, %v1363_v50  ;;  %v1233_v4 = vrot.slane %v1232_v55, 1 }
 0x11e   : > { %v2426_v2 = vpop.f32.mrf.mxu0  ;;  %v1493_v59 = vadd.f32 %v1492_v36, %v1400_v43  ;;  %v1302_v42 = vadd.f32 %v2416_v54, %v1301_v25  ;;  %v1475_v6 = vrot.slane %v1474_v56, 2  ;;  %v1241_v9 = vadd.f32 %v2392_v44, %v1240_v58 }
 0x11f   : > { %1180 = vst [vmem:[%s2332_s13 + $0xb0] sm:$0xff] %v2426_v2  ;;  %v1442_v37 = vadd.f32 %v1441_v19, %v1369_v22  ;;  %v2493_v54 = vadd.f32 %v1423_v62, %v1422_v34  ;;  %v1285_v17 = vrot.slane %v2480_v63, 1  ;;  %v1396_v19 = vmul.f32 %v2378_v40, %v2378_v40 }
 0x120   : > { %v983_v8 = vpop.f32.mrf.mxu0  ;;  %v1494_v12 = vadd.f32 %v1493_v59, %v1401_v27  ;;  %v1432_v38 = vadd.f32 %v1431_v0, %v1364_v7  ;;  %v1293_v18 = vadd.f32 %v2396_v45, %v1292_v1  ;;  %v1372_v21 = vmul.f32 %v2426_v2, %v2426_v2 }
 0x121   : > { %1178 = vst [vmem:[%s2332_s13 + $0xa0] sm:$0xff] %v983_v8  ;;  %v1251_v52 = vadd.f32 %v1250_v29, %v983_v8  ;;  %v1370_v53 = vmul.f32 %v983_v8, %v983_v8  ;;  %v1483_v8 = vadd.f32 %v1482_v57, %v1395_v46  ;;  %v1242_v31 = vrot.slane %v1241_v9, 4 }
 0x122   : > { %v2436_v14 = vpop.f32.mrf.mxu1  ;;  %v2438_v15 = vpop.f32.mrf.mxu0  ;;  %v2509_v35 = vadd.f32 %v1233_v4, %v1232_v55  ;;  %v1397_v39 = vmul.f32 %v2396_v45, %v2396_v45  ;;  %v1294_v25 = vrot.slane %v1293_v18, 4 }
 0x123   : > { %1212 = vst [vmem:[%s2332_s13 + $0x1b0] sm:$0xff] %v2436_v14  ;;  %1181 = vst [vmem:[%s2332_s13 + $0xb8] sm:$0xff] %v2438_v15  ;;  %v1443_v60 = vadd.f32 %v1442_v37, %v1370_v53  ;;  %v1484_v22 = vadd.f32 %v1483_v8, %v1396_v19  ;;  %v1373_v48 = vmul.f32 %v2438_v15, %v2438_v15 }
 0x124   : > { %v2449_v24 = vpop.f32.mrf.mxu1  ;;  %v986_v26 = vpop.f32.mrf.mxu0 }
 0x125   : > { %1210 = vst [vmem:[%s2332_s13 + $0x1a0] sm:$0xff] %v2449_v24  ;;  %1179 = vst [vmem:[%s2332_s13 + $0xa8] sm:$0xff] %v986_v26  ;;  %v1371_v61 = vmul.f32 %v986_v26, %v986_v26  ;;  %v1252_v47 = vadd.f32 %v1251_v52, %v986_v26  ;;  %v1402_v11 = vmul.f32 %v2449_v24, %v2449_v24 }
 0x126   : > { %v2459_v33 = vpop.f32.mrf.mxu1  ;;  %v1303_v23 = vadd.f32 %v1302_v42, %v2449_v24  ;;  %v2511_v24 = vadd.f32 %v1475_v6, %v1474_v56  ;;  %v1485_v56 = vadd.f32 %v1484_v22, %v1397_v39 }
 0x127   : > { %1213 = vst [vmem:[%s2332_s13 + $0x1b8] sm:$0xff] %v2459_v33  ;;  %v1444_v13 = vadd.f32 %v1443_v60, %v1371_v61  ;;  %v1253_v26 = vadd.f32 %v2426_v2, %v1252_v47  ;;  %v1495_v5 = vadd.f32 %v1494_v12, %v1402_v11  ;;  %v1365_v2 = vmul.f32 %v2392_v44, %v2392_v44 }
 0x128   : > { %v2468_v51 = vpop.f32.mrf.mxu1  ;;  %v1243_v44 = vadd.f32 %v1242_v31, %v1241_v9  ;;  %v2526_v47 = vadd.f32 %v1294_v25, %v1293_v18 }
 0x129   : > { %1211 = vst [vmem:[%s2332_s13 + $0x1a8] sm:$0xff] %v2468_v51  ;;  %v1445_v32 = vadd.f32 %v1444_v13, %v1372_v21  ;;  %v1403_v34 = vmul.f32 %v2468_v51, %v2468_v51  ;;  %v1254_v50 = vadd.f32 %v2438_v15, %v1253_v26  ;;  %v1304_v41 = vadd.f32 %v1303_v23, %v2468_v51 }
 0x12a   : > { %v1433_v43 = vadd.f32 %v1432_v38, %v1365_v2  ;;  %v1404_v15 = vmul.f32 %v2436_v14, %v2436_v14  ;;  %v1244_v12 = vrot.slane %v1243_v44, 2  ;;  %v1486_v13 = vrot.slane %v1485_v56, 4 }
 0x12b   : > { %v1918_v49 = vpop.f32.mrf.mxu0  ;;  %v1446_v57 = vadd.f32 %v1445_v32, %v1373_v48  ;;  %v1496_v46 = vadd.f32 %v1495_v5, %v1403_v34  ;;  %v1255_v51 = vrot.slane %v1254_v50, 4  ;;  %v1305_v61 = vadd.f32 %v2436_v14, %v1304_v41 }
 0x12c   : > { %1184 = vst [vmem:[%s2332_s13 + $0xd0] sm:$0xff] %v1918_v49  ;;  %v1376_v52 = vmul.f32 %v1918_v49, %v1918_v49  ;;  %v1434_v42 = vrot.slane %v1433_v43, 4  ;;  %v1296_v34 = vrot.slane %v2526_v47, 2  ;;  %v1487_v2 = vadd.f32 %v1486_v13, %v1485_v56 }
 0x12d   : > { %v999_v3 = vpop.f32.mrf.mxu0  ;;  %v1497_v4 = vadd.f32 %v1496_v46, %v1404_v15  ;;  %v1306_v19 = vadd.f32 %v2459_v33, %v1305_v61  ;;  %v1245_v48 = vadd.f32 %v1244_v12, %v1243_v44 }
 0x12e   : > { %1182 = vst [vmem:[%s2332_s13 + $0xc0] sm:$0xff] %v999_v3  ;;  %v1374_v28 = vmul.f32 %v999_v3, %v999_v3  ;;  %v1297_v13 = vadd.f32 %v1296_v34, %v2526_v47 }
 0x12f   : > { %v1919_v16 = vpop.f32.mrf.mxu0  ;;  %v1950_v20 = vpop.f32.mrf.mxu1  ;;  %v1246_v12 = vrot.slane %v1245_v48, 1 }
 0x130   : > { %1185 = vst [vmem:[%s2332_s13 + $0xd8] sm:$0xff] %v1919_v16  ;;  %1216 = vst [vmem:[%s2332_s13 + $0x1d0] sm:$0xff] %v1950_v20  ;;  %v1377_v62 = vmul.f32 %v1919_v16, %v1919_v16  ;;  %v1408_v0 = vmul.f32 %v1950_v20, %v1950_v20 }
 0x131   : > { %v1002_v10 = vpop.f32.mrf.mxu0  ;;  %v1127_v29 = vpop.f32.mrf.mxu1 }
 0x132   : > { %1183 = vst [vmem:[%s2332_s13 + $0xc8] sm:$0xff] %v1002_v10  ;;  %v1261_v40 = vadd.f32 %v1002_v10, %v999_v3  ;;  %v1375_v30 = vmul.f32 %v1002_v10, %v1002_v10  ;;  %1214 = vst [vmem:[%s2332_s13 + $0x1c0] sm:$0xff] %v1127_v29  ;;  %v1406_v58 = vmul.f32 %v1127_v29, %v1127_v29  ;;  %v1447_v3 = vrot.slane %v1446_v57, 4 }
 0x133   : > { %v1951_v36 = vpop.f32.mrf.mxu1  ;;  %v1435_v10 = vadd.f32 %v1434_v42, %v1433_v43 }
 0x134   : > { %v1453_v37 = vadd.f32 %v1375_v30, %v1374_v28  ;;  %1217 = vst [vmem:[%s2332_s13 + $0x1d8] sm:$0xff] %v1951_v36  ;;  %v1262_v53 = vadd.f32 %v1918_v49, %v1261_v40  ;;  %v1409_v7 = vmul.f32 %v1951_v36, %v1951_v36  ;;  %v1425_v30 = vrot.slane %v2493_v54, 1 }
 0x135   : > { %v1130_v55 = vpop.f32.mrf.mxu1  ;;  %v1448_v31 = vadd.f32 %v1447_v3, %v1446_v57 }
 0x136   : > { %1215 = vst [vmem:[%s2332_s13 + $0x1c8] sm:$0xff] %v1130_v55  ;;  %v1454_v45 = vadd.f32 %v1453_v37, %v1376_v52  ;;  %v1313_v59 = vadd.f32 %v1130_v55, %v1127_v29  ;;  %v1407_v60 = vmul.f32 %v1130_v55, %v1130_v55  ;;  %v1263_v27 = vadd.f32 %v1919_v16, %v1262_v53 }
 0x137   : > { %v1405_v16 = vmul.f32 %v2459_v33, %v2459_v33  ;;  %v1477_v33 = vrot.slane %v2511_v24, 1  ;;  %v1436_v52 = vrot.slane %v1435_v10, 2  ;;  %v1449_v46 = vrot.slane %v1448_v31, 2 }
 0x138   : > { %v1314_v49 = vadd.f32 %v1950_v20, %v1313_v59  ;;  %v1505_v1 = vadd.f32 %v1407_v60, %v1406_v58  ;;  %v1455_v11 = vadd.f32 %v1454_v45, %v1377_v62  ;;  %v1256_v20 = vadd.f32 %v1255_v51, %v1254_v50 }
 0x139   : > { %v1498_v22 = vadd.f32 %v1497_v4, %v1405_v16  ;;  %v1437_v3 = vadd.f32 %v1436_v52, %v1435_v10  ;;  %v1488_v4 = vrot.slane %v1487_v2, 2 }
 0x13a   : > { %v1922_v6 = vpop.f32.mrf.mxu0  ;;  %v1506_v8 = vadd.f32 %v1505_v1, %v1408_v0  ;;  %v1315_v14 = vadd.f32 %v1951_v36, %v1314_v49  ;;  %v1307_v36 = vrot.slane %v1306_v19, 4  ;;  %v1257_v50 = vrot.slane %v1256_v20, 2 }
 0x13b   : > { %1188 = vst [vmem:[%s2332_s13 + $0xf0] sm:$0xff] %v1922_v6  ;;  %v1954_v9 = vpop.f32.mrf.mxu1  ;;  %v1499_v53 = vrot.slane %v1498_v22, 4  ;;  %v1380_v58 = vmul.f32 %v1922_v6, %v1922_v6 }
 0x13c   : > { %1220 = vst [vmem:[%s2332_s13 + $0x1f0] sm:$0xff] %v1954_v9  ;;  %v1015_v38 = vpop.f32.mrf.mxu0  ;;  %v1507_v26 = vadd.f32 %v1506_v8, %v1409_v7  ;;  %v1308_v56 = vadd.f32 %v1307_v36, %v1306_v19  ;;  %v1412_v60 = vmul.f32 %v1954_v9, %v1954_v9  ;;  %v1258_v61 = vadd.f32 %v1257_v50, %v1256_v20 }
 0x13d   : > { %1186 = vst [vmem:[%s2332_s13 + $0xe0] sm:$0xff] %v1015_v38  ;;  %v1264_v18 = vadd.f32 %v1263_v27, %v1015_v38  ;;  %v1378_v21 = vmul.f32 %v1015_v38, %v1015_v38  ;;  %v1143_v23 = vpop.f32.mrf.mxu1  ;;  %v1500_v49 = vadd.f32 %v1499_v53, %v1498_v22  ;;  %v1450_v8 = vadd.f32 %v1449_v46, %v1448_v31 }
 0x13e   : > { %1218 = vst [vmem:[%s2332_s13 + $0x1e0] sm:$0xff] %v1143_v23  ;;  %v1316_v28 = vadd.f32 %v1315_v14, %v1143_v23  ;;  %v1410_v29 = vmul.f32 %v1143_v23, %v1143_v23  ;;  %v1923_v40 = vpop.f32.mrf.mxu0  ;;  %v1259_v38 = vrot.slane %v1258_v61, 1  ;;  %v1438_v23 = vrot.slane %v1437_v3, 1 }
 0x13f   : > { %v1456_v5 = vadd.f32 %v1455_v11, %v1378_v21  ;;  %1189 = vst [vmem:[%s2332_s13 + $0xf8] sm:$0xff] %v1923_v40  ;;  %v1955_v32 = vpop.f32.mrf.mxu1  ;;  %v1381_v44 = vmul.f32 %v1923_v40, %v1923_v40  ;;  %v1309_v11 = vrot.slane %v1308_v56, 2  ;;  %v1501_v20 = vrot.slane %v1500_v49, 2 }
 0x140   : > { %v1508_v37 = vadd.f32 %v1507_v26, %v1410_v29  ;;  %1221 = vst [vmem:[%s2332_s13 + $0x1f8] sm:$0xff] %v1955_v32  ;;  %v1018_v39 = vpop.f32.mrf.mxu0  ;;  %v1413_v1 = vmul.f32 %v1955_v32, %v1955_v32  ;;  %v1489_v26 = vadd.f32 %v1488_v4, %v1487_v2  ;;  %v1247_v31 = vadd.f32 %v1246_v12, %v1245_v48 }
 0x141   : > { %1187 = vst [vmem:[%s2332_s13 + $0xe8] sm:$0xff] %v1018_v39  ;;  %v1265_v41 = vadd.f32 %v1264_v18, %v1018_v39  ;;  %v1379_v43 = vmul.f32 %v1018_v39, %v1018_v39  ;;  %v1146_v25 = vpop.f32.mrf.mxu1  ;;  %v1310_v29 = vadd.f32 %v1309_v11, %v1308_v56  ;;  %v1260_v36 = vadd.f32 %v1259_v38, %v1258_v61 }
 0x142   : > { %1219 = vst [vmem:[%s2332_s13 + $0x1e8] sm:$0xff] %v1146_v25  ;;  %v1317_v55 = vadd.f32 %v1316_v28, %v1146_v25  ;;  %v1411_v57 = vmul.f32 %v1146_v25, %v1146_v25  ;;  %v1451_v28 = vrot.slane %v1450_v8, 1  ;;  %v1426_v2 = vadd.f32 %v1425_v30, %v2493_v54 }
 0x143   : > { %v1266_v45 = vadd.f32 %v1922_v6, %v1265_v41  ;;  %v1457_v59 = vadd.f32 %v1456_v5, %v1379_v43  ;;  %v1298_v5 = vrot.slane %v1297_v13, 1  ;;  %v1439_v41 = vadd.f32 %v1438_v23, %v1437_v3 }
 0x144   : > { %v1318_v15 = vadd.f32 %v1954_v9, %v1317_v55  ;;  %v1509_v51 = vadd.f32 %v1508_v37, %v1411_v57  ;;  %v1502_v37 = vadd.f32 %v1501_v20, %v1500_v49  ;;  %v1490_v52 = vrot.slane %v1489_v26, 1 }
 0x145   : > { %v1267_v62 = vadd.f32 %v1923_v40, %v1266_v45  ;;  %v1458_v0 = vadd.f32 %v1457_v59, %v1380_v58  ;;  %v1452_v48 = vadd.f32 %v1451_v28, %v1450_v8  ;;  %v1311_v53 = vrot.slane %v1310_v29, 1 }
 0x146   : > { %v1319_v27 = vadd.f32 %v1955_v32, %v1318_v15  ;;  %v1510_v42 = vadd.f32 %v1509_v51, %v1412_v60  ;;  %v1335_v57 = vsel %vm1334_vm0, %v1247_v31, %v2509_v35  ;;  %v1286_v59 = vadd.f32 %v1285_v17, %v2480_v63 }
 0x147   : > { %v1268_v7 = vrot.slane %v1267_v62, 4  ;;  %v1459_v6 = vadd.f32 %v1458_v0, %v1381_v44  ;;  %v1299_v56 = vadd.f32 %v1298_v5, %v1297_v13  ;;  %v1337_v54 = vsel %vm1336_vm1, %v1260_v36, %v1335_v57 }
 0x148   : > { %v1320_v9 = vrot.slane %v1319_v27, 4  ;;  %v1511_v14 = vadd.f32 %v1510_v42, %v1413_v1  ;;  %v1503_v30 = vrot.slane %v1502_v37, 1  ;;  %v1526_v60 = vsel %vm1334_vm0, %v1439_v41, %v1426_v2 }
 0x149   : > { %v1269_v16 = vadd.f32 %v1268_v7, %v1267_v62  ;;  %v1460_v19 = vrot.slane %v1459_v6, 4  ;;  %v1478_v35 = vadd.f32 %v1477_v33, %v2511_v24  ;;  %v1527_v44 = vsel %vm1336_vm1, %v1452_v48, %v1526_v60 }
 0x14a   : > { %v1321_v18 = vadd.f32 %v1320_v9, %v1319_v27  ;;  %v1512_v21 = vrot.slane %v1511_v14, 4  ;;  %v1312_v62 = vadd.f32 %v1311_v53, %v1310_v29  ;;  %v1491_v17 = vadd.f32 %v1490_v52, %v1489_v26 }
 0x14b   : > { %v1270_v10 = vrot.slane %v1269_v16, 2  ;;  %v1461_v22 = vadd.f32 %v1460_v19, %v1459_v6  ;;  %v1504_v27 = vadd.f32 %v1503_v30, %v1502_v37 }
 0x14c   : > { %v1322_v40 = vrot.slane %v1321_v18, 2  ;;  %v1513_v47 = vadd.f32 %v1512_v21, %v1511_v14 }
 0x14d   : > { %v1271_v32 = vadd.f32 %v1270_v10, %v1269_v16  ;;  %v1462_v34 = vrot.slane %v1461_v22, 2 }
 0x14e   : > { %v1323_v39 = vadd.f32 %v1322_v40, %v1321_v18  ;;  %v1514_v50 = vrot.slane %v1513_v47, 2 }
 0x14f   : > { %v1272_v43 = vrot.slane %v1271_v32, 1  ;;  %v1463_v25 = vadd.f32 %v1462_v34, %v1461_v22 }
 0x150   : > { %v1515_v55 = vadd.f32 %v1514_v50, %v1513_v47  ;;  %v1324_v45 = vrot.slane %v1323_v39, 1 }
 0x151   : > { %v1273_v46 = vadd.f32 %v1272_v43, %v1271_v32  ;;  %v1464_v58 = vrot.slane %v1463_v25, 1 }
 0x152   : > { %v1516_v61 = vrot.slane %v1515_v55, 1  ;;  %v1325_v49 = vadd.f32 %v1324_v45, %v1323_v39 }
 0x153   : > { %v1339_v15 = vsel %vm1338_vm2, %v1273_v46, %v1337_v54  ;;  %v1465_v51 = vadd.f32 %v1464_v58, %v1463_v25 }
 0x154   : > { %v1341_v63 = vsel %vm1340_vm3, %v1286_v59, %v1339_v15  ;;  %v1517_v3 = vadd.f32 %v1516_v61, %v1515_v55 }
 0x155   : > { %v1528_v0 = vsel %vm1338_vm2, %v1465_v51, %v1527_v44  ;;  %v1343_v1 = vsel %vm1342_vm4, %v1299_v56, %v1341_v63 }
 0x156   : > { %v1529_v42 = vsel %vm1340_vm3, %v1478_v35, %v1528_v0  ;;  %v1345_v24 = vsel %vm1344_vm5, %v1312_v62, %v1343_v1 }
 0x157   : > { %v1347_v33 = vsel %vm1346_vm6, %v1325_v49, %v1345_v24  ;;  %v1530_v4 = vsel %vm1342_vm4, %v1491_v17, %v1529_v42 }
 0x158   : > { %1349 = vst [vmem:[%s298_s15] sm:$0xff] %v1347_v33  ;;  %v1531_v7 = vsel %vm1344_vm5, %v1504_v27, %v1530_v4 }
 0x159   : > { %v1532_v6 = vsel %vm1346_vm6, %v1517_v3, %v1531_v7 }
 0x15a   : > { %1534 = vst [vmem:[%s302_s18] sm:$0xff] %v1532_v6 }
 0x15b PF: > { %s18_s24 = sadd.s32 1, %s1994_s24  }
 0x15c   : > { %p15_p5 = scmp.ge.s32.totalorder %s18_s24, 4  }
 0x15e   :  { %17 = sbr.rel (!%p15_p5) target bundleno = 1 (0x1), region = 94 }

// kernel: dilated_bottleneck_forward.7
= control target key start
LH: loop header
LB: loop body
LE: loop exit
PB: predicated region body
PF: predicated region fallthrough
CT: control target
= control target key end

     0   :  { %s979_s18 = smov 0   ;;  %s1597_s0 = inlined_call_operand.vmem [shape: f32[1024,128], index: 0, kind: input, shape index: {}, may-alias: {0,5}]   ;;  %s1598_s1 = inlined_call_operand.vmem [shape: f32[1024,128], index: 1, kind: input, shape index: {}]   ;;  %s1599_s2 = inlined_call_operand.vmem [shape: f32[1,128], index: 2, kind: input, shape index: {}]   ;;  %s1600_s3 = inlined_call_operand.vmem [shape: f32[1,128], index: 3, kind: input, shape index: {}]   ;;  %s1601_s4 = inlined_call_operand.vmem [shape: f32[1,128], index: 4, kind: input, shape index: {}]   ;;  %s1602_s5 = inlined_call_operand.vmem [shape: f32[1024,128], index: 5, kind: output, shape index: {}, may-alias: {0,5}]  }
   0x1 LB: > { %s915_s19 = sadd.s32 4294967295, %s947_s18   ;;  %p919_p0 = scmp.ge.s32.totalorder %s947_s18, 1  ;;  %s947_s18 = sphi %s979_s18, %s15_s18  }
   0x2   : > { %p199_p1 = scmp.lt.s32.totalorder %s947_s18, 3 }
   0x4   : > { %p200_p2 = pnand %p919_p0, %p199_p1 }
   0x6   : > { %203 = sbr.rel (%p200_p2) target bundleno = 126 (0x7e), region = 40 }
   0xb   : > { %s920_s20 = sshll.u32 %s915_s19, 6  ;;  %v992_v0 = vld [vmem:[%s1599_s2] ss:$0 sm:$0xff] }
   0xc   : > { %p233_p3 = scmp.lt.s32.totalorder %s920_s20, 127  ;;  %1605 = vst [vmem:[#allocation2_spill] sm:$0xff] %v992_v0  ;;  %v1003_v1 = vld [vmem:[%s1600_s3] ss:$0 sm:$0xff] }
   0xe   : > { %s1644_s20 = smov (!%p233_p3, %s920_s20), 127 }
   0xf   : > { %s987_s21 = sshll.u32 %s1644_s20, 3 }
  0x10   : > { %s998_s26 = scalar_lea.vmem %s1597_s0, %s987_s21  ;;  %s1177_s6 = scalar_lea.vmem %s1598_s1, %s987_s21 }
  0x11   : > { %v250_v2 = vld [vmem:[%s998_s26] sm:$0xff]  ;;  %v251_v3 = vld [vmem:[%s998_s26 + $0x8] sm:$0xff]  ;;  %v252_v4 = vld [vmem:[%s998_s26 + $0x10] sm:$0xff]  ;;  %s1247_s11 = scalar_lea.vmem %s1602_s5, %s987_s21 }
  0x12   : > { %v253_v5 = vld [vmem:[%s998_s26 + $0x18] sm:$0xff]  ;;  %v254_v6 = vld [vmem:[%s998_s26 + $0x20] sm:$0xff]  ;;  %v255_v7 = vld [vmem:[%s998_s26 + $0x28] sm:$0xff]  ;;  %v321_v8 = vmul.f32 %v992_v0, %v250_v2  ;;  %v322_v9 = vmul.f32 %v992_v0, %v251_v3  ;;  %v323_v10 = vmul.f32 %v992_v0, %v252_v4 }
  0x13   : > { %v256_v11 = vld [vmem:[%s998_s26 + $0x30] sm:$0xff]  ;;  %v257_v12 = vld [vmem:[%s998_s26 + $0x38] sm:$0xff]  ;;  %v258_v13 = vld [vmem:[%s998_s26 + $0x40] sm:$0xff]  ;;  %v324_v14 = vmul.f32 %v992_v0, %v253_v5  ;;  %v325_v15 = vmul.f32 %v992_v0, %v254_v6  ;;  %v326_v16 = vmul.f32 %v992_v0, %v255_v7 }
  0x14   : > { %v259_v17 = vld [vmem:[%s998_s26 + $0x48] sm:$0xff]  ;;  %v260_v18 = vld [vmem:[%s998_s26 + $0x50] sm:$0xff]  ;;  %v261_v19 = vld [vmem:[%s998_s26 + $0x58] sm:$0xff]  ;;  %v1024_v20 = vadd.f32 %v1003_v1, %v321_v8  ;;  %v1027_v21 = vadd.f32 %v1003_v1, %v322_v9  ;;  %v1030_v22 = vadd.f32 %v1003_v1, %v323_v10  ;;  %v327_v23 = vmul.f32 %v992_v0, %v256_v11 }
  0x15   : > { %v262_v24 = vld [vmem:[%s998_s26 + $0x60] sm:$0xff]  ;;  %v263_v25 = vld [vmem:[%s998_s26 + $0x68] sm:$0xff]  ;;  %v264_v26 = vld [vmem:[%s998_s26 + $0x70] sm:$0xff]  ;;  %v1037_v27 = vadd.f32 %v1003_v1, %v324_v14  ;;  %v1040_v28 = vadd.f32 %v1003_v1, %v325_v15  ;;  %v1043_v29 = vadd.f32 %v1003_v1, %v326_v16  ;;  %v328_v30 = vmul.f32 %v992_v0, %v257_v12 }
  0x16   : > { %v265_v31 = vld [vmem:[%s998_s26 + $0x78] sm:$0xff]  ;;  %v1048_v32 = vadd.f32 %v1003_v1, %v327_v23  ;;  %v329_v33 = vmul.f32 %v992_v0, %v258_v13  ;;  %v330_v34 = vmul.f32 %v992_v0, %v259_v17  ;;  %v331_v35 = vmul.f32 %v992_v0, %v260_v18  ;;  %v266_v36 = vld [vmem:[%s998_s26 + $0x80] sm:$0xff]  ;;  %v267_v37 = vld [vmem:[%s998_s26 + $0x88] sm:$0xff] }
  0x17   : > { %v268_v38 = vld [vmem:[%s998_s26 + $0x90] sm:$0xff]  ;;  %v1057_v39 = vadd.f32 %v1003_v1, %v328_v30  ;;  %v332_v40 = vmul.f32 %v992_v0, %v261_v19  ;;  %v333_v41 = vmul.f32 %v992_v0, %v262_v24  ;;  %v334_v42 = vmul.f32 %v992_v0, %v263_v25  ;;  %v269_v43 = vld [vmem:[%s998_s26 + $0x98] sm:$0xff]  ;;  %v270_v44 = vld [vmem:[%s998_s26 + $0xa0] sm:$0xff] }
  0x18   : > { %v271_v45 = vld [vmem:[%s998_s26 + $0xa8] sm:$0xff]  ;;  %v1066_v46 = vadd.f32 %v1003_v1, %v329_v33  ;;  %v1069_v47 = vadd.f32 %v1003_v1, %v330_v34  ;;  %v1072_v48 = vadd.f32 %v1003_v1, %v331_v35  ;;  %v335_v49 = vmul.f32 %v992_v0, %v264_v26  ;;  %v272_v50 = vld [vmem:[%s998_s26 + $0xb0] sm:$0xff]  ;;  %v273_v55 = vld [vmem:[%s998_s26 + $0xb8] sm:$0xff] }
  0x19   : > { %v1077_v51 = vadd.f32 %v1003_v1, %v332_v40  ;;  %v1080_v52 = vadd.f32 %v1003_v1, %v333_v41  ;;  %v1083_v53 = vadd.f32 %v1003_v1, %v334_v42  ;;  %v336_v54 = vmul.f32 %v992_v0, %v265_v31  ;;  %v274_v60 = vld [vmem:[%s998_s26 + $0xc0] sm:$0xff]  ;;  %v275_v61 = vld [vmem:[%s998_s26 + $0xc8] sm:$0xff]  ;;  %v276_v62 = vld [vmem:[%s998_s26 + $0xd0] sm:$0xff] }
  0x1a   : > { %v1088_v56 = vadd.f32 %v1003_v1, %v335_v49  ;;  %v337_v57 = vmul.f32 %v992_v0, %v266_v36  ;;  %v338_v58 = vmul.f32 %v992_v0, %v267_v37  ;;  %v339_v59 = vmul.f32 %v992_v0, %v268_v38  ;;  %v277_v5 = vld [vmem:[%s998_s26 + $0xd8] sm:$0xff]  ;;  %v278_v6 = vld [vmem:[%s998_s26 + $0xe0] sm:$0xff]  ;;  %v279_v7 = vld [vmem:[%s998_s26 + $0xe8] sm:$0xff] }
  0x1b   : > { %v1097_v63 = vadd.f32 %v1003_v1, %v336_v54  ;;  %v340_v2 = vmul.f32 %v992_v0, %v269_v43  ;;  %v341_v3 = vmul.f32 %v992_v0, %v270_v44  ;;  %v342_v4 = vmul.f32 %v992_v0, %v271_v45  ;;  %v280_v12 = vld [vmem:[%s998_s26 + $0xf0] sm:$0xff]  ;;  %v281_v17 = vld [vmem:[%s998_s26 + $0xf8] sm:$0xff]  ;;  %v282_v25 = vld [vmem:[%s998_s26 + $0x100] sm:$0xff] }
  0x1c   : > { %v1106_v8 = vadd.f32 %v1003_v1, %v337_v57  ;;  %v1109_v9 = vadd.f32 %v1003_v1, %v338_v58  ;;  %v1112_v10 = vadd.f32 %v1003_v1, %v339_v59  ;;  %v343_v11 = vmul.f32 %v992_v0, %v272_v50  ;;  %v283_v26 = vld [vmem:[%s998_s26 + $0x108] sm:$0xff]  ;;  %v284_v30 = vld [vmem:[%s998_s26 + $0x110] sm:$0xff]  ;;  %v285_v36 = vld [vmem:[%s998_s26 + $0x118] sm:$0xff] }
  0x1d   : > { %v1117_v13 = vadd.f32 %v1003_v1, %v340_v2  ;;  %v1120_v14 = vadd.f32 %v1003_v1, %v341_v3  ;;  %v1123_v15 = vadd.f32 %v1003_v1, %v342_v4  ;;  %v344_v16 = vmul.f32 %v992_v0, %v273_v55  ;;  %v286_v37 = vld [vmem:[%s998_s26 + $0x120] sm:$0xff]  ;;  %v287_v38 = vld [vmem:[%s998_s26 + $0x128] sm:$0xff]  ;;  %v288_v44 = vld [vmem:[%s998_s26 + $0x130] sm:$0xff] }
  0x1e   : > { %v1128_v18 = vadd.f32 %v1003_v1, %v343_v11  ;;  %v345_v19 = vmul.f32 %v992_v0, %v274_v60  ;;  %v346_v23 = vmul.f32 %v992_v0, %v275_v61  ;;  %v347_v24 = vmul.f32 %v992_v0, %v276_v62  ;;  %v289_v55 = vld [vmem:[%s998_s26 + $0x138] sm:$0xff]  ;;  %v290_v61 = vld [vmem:[%s998_s26 + $0x140] sm:$0xff]  ;;  %v291_v62 = vld [vmem:[%s998_s26 + $0x148] sm:$0xff] }
  0x1f   : > { %v1137_v31 = vadd.f32 %v1003_v1, %v344_v16  ;;  %v348_v33 = vmul.f32 %v992_v0, %v277_v5  ;;  %v349_v34 = vmul.f32 %v992_v0, %v278_v6  ;;  %v350_v35 = vmul.f32 %v992_v0, %v279_v7  ;;  %v292_v2 = vld [vmem:[%s998_s26 + $0x150] sm:$0xff]  ;;  %v293_v7 = vld [vmem:[%s998_s26 + $0x158] sm:$0xff] }
  0x20   : > { %v1146_v40 = vadd.f32 %v1003_v1, %v345_v19  ;;  %v1149_v41 = vadd.f32 %v1003_v1, %v346_v23  ;;  %v1152_v42 = vadd.f32 %v1003_v1, %v347_v24  ;;  %v351_v43 = vmul.f32 %v992_v0, %v280_v12 }
  0x21   : > { %v1157_v45 = vadd.f32 %v1003_v1, %v348_v33  ;;  %v1160_v49 = vadd.f32 %v1003_v1, %v349_v34  ;;  %v1163_v50 = vadd.f32 %v1003_v1, %v350_v35  ;;  %v352_v54 = vmul.f32 %v992_v0, %v281_v17  ;;  %v457_v33 = vld [vmem:[%s1177_s6 + $0x8] sm:$0xff] }
  0x22   : > { %v1168_v57 = vadd.f32 %v1003_v1, %v351_v43  ;;  %v353_v58 = vmul.f32 %v992_v0, %v282_v25  ;;  %v354_v59 = vmul.f32 %v992_v0, %v283_v26  ;;  %v355_v60 = vmul.f32 %v992_v0, %v284_v30  ;;  %v456_v26 = vld [vmem:[%s1177_s6] sm:$0xff] }
  0x23   : > { %v1183_v3 = vadd.f32 %v1003_v1, %v352_v54  ;;  %v356_v4 = vmul.f32 %v992_v0, %v285_v36  ;;  %v357_v5 = vmul.f32 %v992_v0, %v286_v37  ;;  %v358_v6 = vmul.f32 %v992_v0, %v287_v38  ;;  %v1213_v30 = vld [vmem:[%s1601_s4] ss:$0 sm:$0xff]  ;;  %v459_v54 = vld [vmem:[%s1177_s6 + $0x18] sm:$0xff] }
  0x24   : > { %v1190_v11 = vadd.f32 %v1003_v1, %v353_v58  ;;  %v1193_v12 = vadd.f32 %v1003_v1, %v354_v59  ;;  %v1196_v16 = vadd.f32 %v1003_v1, %v355_v60  ;;  %v359_v17 = vmul.f32 %v992_v0, %v288_v44  ;;  %v458_v44 = vld [vmem:[%s1177_s6 + $0x10] sm:$0xff] }
  0x25   : > { %v1200_v19 = vadd.f32 %v1003_v1, %v356_v4  ;;  %v1203_v23 = vadd.f32 %v1003_v1, %v357_v5  ;;  %v1206_v24 = vadd.f32 %v1003_v1, %v358_v6  ;;  %v360_v25 = vmul.f32 %v992_v0, %v289_v55  ;;  %v460_v55 = vld [vmem:[%s1177_s6 + $0x20] sm:$0xff]  ;;  %v1265_v4 = vld [vmem:[%s998_s26 + $0x188] sm:$0xff]  ;;  %v1268_v5 = vld [vmem:[%s998_s26 + $0x190] sm:$0xff] }
  0x26   : > { %v1217_v34 = vadd.f32 %v1003_v1, %v359_v17  ;;  %v361_v35 = vmul.f32 %v992_v0, %v290_v61  ;;  %v1221_v36 = vmul.f32 %v992_v0, %v291_v62  ;;  %v1224_v37 = vmul.f32 %v992_v0, %v292_v2  ;;  %v1250_v62 = vld [vmem:[%s998_s26 + $0x160] sm:$0xff]  ;;  %v1259_v2 = vld [vmem:[%s998_s26 + $0x178] sm:$0xff]  ;;  %1610 = vst [vmem:[#allocation7_spill] sm:$0xff] %v1265_v4  ;;  %v1277_v17 = vld [vmem:[%s998_s26 + $0x1a8] sm:$0xff] }
  0x27   : > { %v520_v38 = vadd.f32 %v456_v26, %v1024_v20  ;;  %v521_v43 = vadd.f32 %v457_v33, %v1027_v21  ;;  %v1232_v58 = vadd.f32 %v1003_v1, %v360_v25  ;;  %v1235_v59 = vmul.f32 %v992_v0, %v293_v7  ;;  %1608 = vst [vmem:[#allocation5_spill] sm:$0xff] %v1259_v2  ;;  %v1271_v6 = vld [vmem:[%s998_s26 + $0x198] sm:$0xff]  ;;  %v1274_v7 = vld [vmem:[%s998_s26 + $0x1a0] sm:$0xff]  ;;  %v1280_v25 = vld [vmem:[%s998_s26 + $0x1b0] sm:$0xff] }
  0x28   : > { %v522_v20 = vadd.f32 %v458_v44, %v1030_v22  ;;  %v523_v21 = vadd.f32 %v459_v54, %v1037_v27  ;;  %v524_v60 = vadd.f32 %v460_v55, %v1040_v28  ;;  %v1241_v61 = vadd.f32 %v1003_v1, %v361_v35  ;;  %v1253_v22 = vld [vmem:[%s998_s26 + $0x168] sm:$0xff]  ;;  %v1256_v27 = vld [vmem:[%s998_s26 + $0x170] sm:$0xff]  ;;  %v1262_v28 = vld [vmem:[%s998_s26 + $0x180] sm:$0xff]  ;;  %1611 = vst [vmem:[#allocation8_spill] sm:$0xff] %v1268_v5 }
  0x29   : > { %1606 = vst [vmem:[#allocation3_spill] sm:$0xff] %v1253_v22  ;;  %1607 = vst [vmem:[#allocation4_spill] sm:$0xff] %v1256_v27  ;;  %v1283_v26 = vld [vmem:[%s998_s26 + $0x1b8] sm:$0xff]  ;;  %v1286_v33 = vld [vmem:[%s998_s26 + $0x1c0] sm:$0xff]  ;;  %vm584_vm0 = vcmp.ge.f32.partialorder %v520_v38, 0.0  ;;  %vm585_vm1 = vcmp.ge.f32.partialorder %v521_v43, 0.0 }
  0x2a   : > { %1609 = vst [vmem:[#allocation6_spill] sm:$0xff] %v1262_v28  ;;  %1612 = vst [vmem:[#allocation9_spill] sm:$0xff] %v1271_v6  ;;  %v1289_v35 = vld [vmem:[%s998_s26 + $0x1c8] sm:$0xff]  ;;  %v1292_v44 = vld [vmem:[%s998_s26 + $0x1d0] sm:$0xff]  ;;  %vm586_vm2 = vcmp.ge.f32.partialorder %v522_v20, 0.0  ;;  %vm587_vm3 = vcmp.ge.f32.partialorder %v523_v21, 0.0  ;;  %v659_v27 = vmul.f32 %v1213_v30, %v524_v60 }
  0x2b   : > { %1613 = vst [vmem:[#allocation10_spill] sm:$0xff] %v1274_v7  ;;  %1614 = vst [vmem:[#allocation11_spill] sm:$0xff] %v1277_v17  ;;  %v1295_v54 = vld [vmem:[%s998_s26 + $0x1d8] sm:$0xff]  ;;  %v1298_v55 = vld [vmem:[%s998_s26 + $0x1e0] sm:$0xff]  ;;  %vm588_vm4 = vcmp.ge.f32.partialorder %v524_v60, 0.0 }
  0x2c   : > { %1615 = vst [vmem:[#allocation12_spill] sm:$0xff] %v1280_v25  ;;  %1616 = vst [vmem:[#allocation13_spill] sm:$0xff] %v1283_v26  ;;  %v655_v25 = vmul.f32 %v1213_v30, %v520_v38  ;;  %v656_v26 = vmul.f32 %v1213_v30, %v521_v43  ;;  %v462_v17 = vld [vmem:[%s1177_s6 + $0x30] sm:$0xff]  ;;  %v465_v7 = vld [vmem:[%s1177_s6 + $0x48] sm:$0xff] }
  0x2d   : > { %1617 = vst [vmem:[#allocation14_spill] sm:$0xff] %v1286_v33  ;;  %1618 = vst [vmem:[#allocation15_spill] sm:$0xff] %v1289_v35  ;;  %v461_v33 = vld [vmem:[%s1177_s6 + $0x28] sm:$0xff]  ;;  %v463_v35 = vld [vmem:[%s1177_s6 + $0x38] sm:$0xff] }
  0x2e   : > { %1619 = vst [vmem:[#allocation16_spill] sm:$0xff] %v1292_v44  ;;  %1620 = vst [vmem:[#allocation17_spill] sm:$0xff] %v1295_v54  ;;  %v657_v44 = vmul.f32 %v1213_v30, %v522_v20  ;;  %v658_v54 = vmul.f32 %v1213_v30, %v523_v21  ;;  %v1310_v6 = vld [vmem:[%s998_s26 + $0x1e8] sm:$0xff]  ;;  %v1313_v5 = vld [vmem:[%s998_s26 + $0x1f0] sm:$0xff]  ;;  %v719_v28 = vsel %vm584_vm0, %v520_v38, %v655_v25 }
  0x2f   : > { %1621 = vst [vmem:[#allocation18_spill] sm:$0xff] %v1298_v55  ;;  %v464_v55 = vld [vmem:[%s1177_s6 + $0x40] sm:$0xff]  ;;  %1622 = vst [vmem:[#allocation19_spill] sm:$0xff] %v1310_v6  ;;  %v1316_v4 = vld [vmem:[%s998_s26 + $0x1f8] sm:$0xff]  ;;  %v720_v2 = vsel %vm585_vm1, %v521_v43, %v656_v26  ;;  %v525_v6 = vadd.f32 %v461_v33, %v1043_v29  ;;  %v723_v38 = vsel %vm588_vm4, %v524_v60, %v659_v27 }
  0x30   : > { %1623 = vst [vmem:[#allocation20_spill] sm:$0xff] %v1313_v5  ;;  %783 = vst [vmem:[%s1247_s11] sm:$0xff] %v719_v28  ;;  %v721_v22 = vsel %vm586_vm2, %v522_v20, %v657_v44  ;;  %v722_v0 = vsel %vm587_vm3, %v523_v21, %v658_v54  ;;  %v526_v5 = vadd.f32 %v462_v17, %v1048_v32  ;;  %v467_v32 = vld [vmem:[%s1177_s6 + $0x58] sm:$0xff]  ;;  %v470_v60 = vld [vmem:[%s1177_s6 + $0x70] sm:$0xff] }
  0x31   : > { %784 = vst [vmem:[%s1247_s11 + $0x8] sm:$0xff] %v720_v2  ;;  %785 = vst [vmem:[%s1247_s11 + $0x10] sm:$0xff] %v721_v22  ;;  %v527_v43 = vadd.f32 %v463_v35, %v1057_v39  ;;  %v528_v28 = vadd.f32 %v464_v55, %v1066_v46  ;;  %v529_v2 = vadd.f32 %v465_v7, %v1069_v47  ;;  %vm589_vm5 = vcmp.ge.f32.partialorder %v525_v6, 0.0  ;;  %v468_v46 = vld [vmem:[%s1177_s6 + $0x60] sm:$0xff]  ;;  %v469_v47 = vld [vmem:[%s1177_s6 + $0x68] sm:$0xff] }
  0x32   : > { %786 = vst [vmem:[%s1247_s11 + $0x18] sm:$0xff] %v722_v0  ;;  %787 = vst [vmem:[%s1247_s11 + $0x20] sm:$0xff] %v723_v38  ;;  %v660_v20 = vmul.f32 %v1213_v30, %v525_v6  ;;  %vm590_vm6 = vcmp.ge.f32.partialorder %v526_v5, 0.0  ;;  %v661_v29 = vmul.f32 %v1213_v30, %v526_v5  ;;  %v466_v0 = vld [vmem:[%s1177_s6 + $0x50] sm:$0xff]  ;;  %v531_v33 = vadd.f32 %v467_v32, %v1077_v51  ;;  %v471_v51 = vld [vmem:[%s1177_s6 + $0x78] sm:$0xff] }
  0x33   : > { %vm591_vm7 = vcmp.ge.f32.partialorder %v527_v43, 0.0  ;;  %v662_v21 = vmul.f32 %v1213_v30, %v527_v43  ;;  %vm592_vm8 = vcmp.ge.f32.partialorder %v528_v28, 0.0  ;;  %v663_v39 = vmul.f32 %v1213_v30, %v528_v28  ;;  %v472_v55 = vld [vmem:[%s1177_s6 + $0x80] sm:$0xff] }
  0x34   : > { %v724_v22 = vsel %vm589_vm5, %v525_v6, %v660_v20  ;;  %v725_v27 = vsel %vm590_vm6, %v526_v5, %v661_v29  ;;  %vm593_vm9 = vcmp.ge.f32.partialorder %v529_v2, 0.0  ;;  %v664_v7 = vmul.f32 %v1213_v30, %v529_v2 }
  0x35   : > { %788 = vst [vmem:[%s1247_s11 + $0x28] sm:$0xff] %v724_v22  ;;  %789 = vst [vmem:[%s1247_s11 + $0x30] sm:$0xff] %v725_v27  ;;  %v726_v17 = vsel %vm591_vm7, %v527_v43, %v662_v21  ;;  %v727_v25 = vsel %vm592_vm8, %v528_v28, %v663_v39  ;;  %v530_v26 = vadd.f32 %v466_v0, %v1072_v48  ;;  %vm595_vm11 = vcmp.ge.f32.partialorder %v531_v33, 0.0  ;;  %v475_v43 = vld [vmem:[%s1177_s6 + $0x98] sm:$0xff]  ;;  %v477_v27 = vld [vmem:[%s1177_s6 + $0xa8] sm:$0xff] }
  0x36   : > { %790 = vst [vmem:[%s1247_s11 + $0x38] sm:$0xff] %v726_v17  ;;  %791 = vst [vmem:[%s1247_s11 + $0x40] sm:$0xff] %v727_v25  ;;  %v728_v35 = vsel %vm593_vm9, %v529_v2, %v664_v7  ;;  %v532_v5 = vadd.f32 %v468_v46, %v1080_v52  ;;  %v533_v6 = vadd.f32 %v469_v47, %v1083_v53  ;;  %v473_v53 = vld [vmem:[%s1177_s6 + $0x88] sm:$0xff]  ;;  %v480_v17 = vld [vmem:[%s1177_s6 + $0xc0] sm:$0xff] }
  0x37   : > { %v534_v44 = vadd.f32 %v470_v60, %v1088_v56  ;;  %792 = vst [vmem:[%s1247_s11 + $0x48] sm:$0xff] %v728_v35  ;;  %vm594_vm10 = vcmp.ge.f32.partialorder %v530_v26, 0.0  ;;  %v665_v54 = vmul.f32 %v1213_v30, %v530_v26  ;;  %v666_v48 = vmul.f32 %v1213_v30, %v531_v33  ;;  %v474_v56 = vld [vmem:[%s1177_s6 + $0x90] sm:$0xff] }
  0x38   : > { %vm596_vm12 = vcmp.ge.f32.partialorder %v532_v5, 0.0  ;;  %v667_v38 = vmul.f32 %v1213_v30, %v532_v5  ;;  %vm597_vm13 = vcmp.ge.f32.partialorder %v533_v6, 0.0  ;;  %v668_v52 = vmul.f32 %v1213_v30, %v533_v6 }
  0x39   : > { %v729_v28 = vsel %vm594_vm10, %v530_v26, %v665_v54  ;;  %v730_v2 = vsel %vm595_vm11, %v531_v33, %v666_v48  ;;  %vm598_vm14 = vcmp.ge.f32.partialorder %v534_v44, 0.0  ;;  %v669_v20 = vmul.f32 %v1213_v30, %v534_v44 }
  0x3a   : > { %793 = vst [vmem:[%s1247_s11 + $0x50] sm:$0xff] %v729_v28  ;;  %794 = vst [vmem:[%s1247_s11 + $0x58] sm:$0xff] %v730_v2  ;;  %v731_v29 = vsel %vm596_vm12, %v532_v5, %v667_v38  ;;  %v732_v0 = vsel %vm597_vm13, %v533_v6, %v668_v52  ;;  %v535_v32 = vadd.f32 %v471_v51, %v1097_v63  ;;  %v482_v52 = vld [vmem:[%s1177_s6 + $0xd0] sm:$0xff] }
  0x3b   : > { %v536_v21 = vadd.f32 %v472_v55, %v1106_v8  ;;  %795 = vst [vmem:[%s1247_s11 + $0x60] sm:$0xff] %v731_v29  ;;  %796 = vst [vmem:[%s1247_s11 + $0x68] sm:$0xff] %v732_v0  ;;  %v733_v39 = vsel %vm598_vm14, %v534_v44, %v669_v20  ;;  %v537_v46 = vadd.f32 %v473_v53, %v1109_v9  ;;  %v476_v8 = vld [vmem:[%s1177_s6 + $0xa0] sm:$0xff] }
  0x3c   : > { %v538_v47 = vadd.f32 %v474_v56, %v1112_v10  ;;  %v539_v60 = vadd.f32 %v475_v43, %v1117_v13  ;;  %797 = vst [vmem:[%s1247_s11 + $0x70] sm:$0xff] %v733_v39  ;;  %vm599_vm15 = vcmp.ge.f32.partialorder %v535_v32, 0.0  ;;  %v670_v22 = vmul.f32 %v1213_v30, %v535_v32  ;;  %v478_v10 = vld [vmem:[%s1177_s6 + $0xb0] sm:$0xff]  ;;  %v479_v13 = vld [vmem:[%s1177_s6 + $0xb8] sm:$0xff]  ;;  %v485_v56 = vld [vmem:[%s1177_s6 + $0xe8] sm:$0xff] }
  0x3d   : > { %vm600_vm0 = vcmp.ge.f32.partialorder %v536_v21, 0.0  ;;  %v671_v63 = vmul.f32 %v1213_v30, %v536_v21  ;;  %vm601_vm1 = vcmp.ge.f32.partialorder %v537_v46, 0.0  ;;  %v672_v7 = vmul.f32 %v1213_v30, %v537_v46 }
  0x3e   : > { %vm602_vm2 = vcmp.ge.f32.partialorder %v538_v47, 0.0  ;;  %v673_v9 = vmul.f32 %v1213_v30, %v538_v47  ;;  %v734_v25 = vsel %vm599_vm15, %v535_v32, %v670_v22  ;;  %vm603_vm3 = vcmp.ge.f32.partialorder %v539_v60, 0.0  ;;  %v487_v22 = vld [vmem:[%s1177_s6 + $0xf8] sm:$0xff] }
  0x3f   : > { %v735_v26 = vsel %vm600_vm0, %v536_v21, %v671_v63  ;;  %v674_v33 = vmul.f32 %v1213_v30, %v539_v60  ;;  %798 = vst [vmem:[%s1247_s11 + $0x78] sm:$0xff] %v734_v25  ;;  %v736_v35 = vsel %vm601_vm1, %v537_v46, %v672_v7  ;;  %v540_v6 = vadd.f32 %v476_v8, %v1120_v14  ;;  %v490_v8 = vld [vmem:[%s1177_s6 + $0x110] sm:$0xff] }
  0x40   : > { %799 = vst [vmem:[%s1247_s11 + $0x80] sm:$0xff] %v735_v26  ;;  %v737_v5 = vsel %vm602_vm2, %v538_v47, %v673_v9  ;;  %v541_v44 = vadd.f32 %v477_v27, %v1123_v15  ;;  %800 = vst [vmem:[%s1247_s11 + $0x88] sm:$0xff] %v736_v35  ;;  %v542_v48 = vadd.f32 %v478_v10, %v1128_v18  ;;  %v481_v15 = vld [vmem:[%s1177_s6 + $0xc8] sm:$0xff] }
  0x41   : > { %801 = vst [vmem:[%s1247_s11 + $0x90] sm:$0xff] %v737_v5  ;;  %v738_v54 = vsel %vm603_vm3, %v539_v60, %v674_v33  ;;  %v543_v51 = vadd.f32 %v479_v13, %v1137_v31  ;;  %v544_v55 = vadd.f32 %v480_v17, %v1146_v40  ;;  %vm604_vm4 = vcmp.ge.f32.partialorder %v540_v6, 0.0  ;;  %v483_v31 = vld [vmem:[%s1177_s6 + $0xd8] sm:$0xff]  ;;  %v484_v40 = vld [vmem:[%s1177_s6 + $0xe0] sm:$0xff] }
  0x42   : > { %802 = vst [vmem:[%s1247_s11 + $0x98] sm:$0xff] %v738_v54  ;;  %v675_v38 = vmul.f32 %v1213_v30, %v540_v6  ;;  %vm605_vm5 = vcmp.ge.f32.partialorder %v541_v44, 0.0  ;;  %v676_v14 = vmul.f32 %v1213_v30, %v541_v44  ;;  %vm606_vm6 = vcmp.ge.f32.partialorder %v542_v48, 0.0 }
  0x43   : > { %v677_v53 = vmul.f32 %v1213_v30, %v542_v48  ;;  %vm607_vm7 = vcmp.ge.f32.partialorder %v543_v51, 0.0  ;;  %v678_v18 = vmul.f32 %v1213_v30, %v543_v51  ;;  %vm608_vm8 = vcmp.ge.f32.partialorder %v544_v55, 0.0 }
  0x44   : > { %v739_v43 = vsel %vm604_vm4, %v540_v6, %v675_v38  ;;  %v740_v28 = vsel %vm605_vm5, %v541_v44, %v676_v14  ;;  %v679_v2 = vmul.f32 %v1213_v30, %v544_v55  ;;  %v545_v0 = vadd.f32 %v481_v15, %v1149_v41  ;;  %v492_v44 = vld [vmem:[%s1177_s6 + $0x120] sm:$0xff] }
  0x45   : > { %803 = vst [vmem:[%s1247_s11 + $0xa0] sm:$0xff] %v739_v43  ;;  %804 = vst [vmem:[%s1247_s11 + $0xa8] sm:$0xff] %v740_v28  ;;  %v741_v20 = vsel %vm606_vm6, %v542_v48, %v677_v53  ;;  %v742_v29 = vsel %vm607_vm7, %v543_v51, %v678_v18  ;;  %v546_v32 = vadd.f32 %v482_v52, %v1152_v42  ;;  %v486_v42 = vld [vmem:[%s1177_s6 + $0xf0] sm:$0xff]  ;;  %v495_v48 = vld [vmem:[%s1177_s6 + $0x138] sm:$0xff] }
  0x46   : > { %805 = vst [vmem:[%s1247_s11 + $0xb0] sm:$0xff] %v741_v20  ;;  %806 = vst [vmem:[%s1247_s11 + $0xb8] sm:$0xff] %v742_v29  ;;  %v743_v21 = vsel %vm608_vm8, %v544_v55, %v679_v2  ;;  %v547_v39 = vadd.f32 %v483_v31, %v1157_v45  ;;  %v548_v46 = vadd.f32 %v484_v40, %v1160_v49  ;;  %vm609_vm9 = vcmp.ge.f32.partialorder %v545_v0, 0.0  ;;  %v488_v49 = vld [vmem:[%s1177_s6 + $0x100] sm:$0xff]  ;;  %v497_v20 = vld [vmem:[%s1177_s6 + $0x148] sm:$0xff] }
  0x47   : > { %v549_v47 = vadd.f32 %v485_v56, %v1163_v50  ;;  %807 = vst [vmem:[%s1247_s11 + $0xc0] sm:$0xff] %v743_v21  ;;  %v680_v60 = vmul.f32 %v1213_v30, %v545_v0  ;;  %vm610_vm10 = vcmp.ge.f32.partialorder %v546_v32, 0.0  ;;  %v681_v41 = vmul.f32 %v1213_v30, %v546_v32  ;;  %v489_v50 = vld [vmem:[%s1177_s6 + $0x108] sm:$0xff] }
  0x48   : > { %vm611_vm11 = vcmp.ge.f32.partialorder %v547_v39, 0.0  ;;  %v682_v63 = vmul.f32 %v1213_v30, %v547_v39  ;;  %vm612_vm12 = vcmp.ge.f32.partialorder %v548_v46, 0.0  ;;  %v683_v45 = vmul.f32 %v1213_v30, %v548_v46 }
  0x49   : > { %v744_v27 = vsel %vm609_vm9, %v545_v0, %v680_v60  ;;  %v745_v7 = vsel %vm610_vm10, %v546_v32, %v681_v41  ;;  %vm613_vm13 = vcmp.ge.f32.partialorder %v549_v47, 0.0  ;;  %v684_v9 = vmul.f32 %v1213_v30, %v549_v47 }
  0x4a   : > { %808 = vst [vmem:[%s1247_s11 + $0xc8] sm:$0xff] %v744_v27  ;;  %809 = vst [vmem:[%s1247_s11 + $0xd0] sm:$0xff] %v745_v7  ;;  %v746_v10 = vsel %vm611_vm11, %v547_v39, %v682_v63  ;;  %v747_v13 = vsel %vm612_vm12, %v548_v46, %v683_v45  ;;  %v550_v17 = vadd.f32 %v486_v42, %v1168_v57  ;;  %v498_v39 = vld [vmem:[%s1177_s6 + $0x150] sm:$0xff]  ;;  %v499_v46 = vld [vmem:[%s1177_s6 + $0x158] sm:$0xff] }
  0x4b   : > { %v551_v25 = vadd.f32 %v487_v22, %v1183_v3  ;;  %810 = vst [vmem:[%s1247_s11 + $0xd8] sm:$0xff] %v746_v10  ;;  %811 = vst [vmem:[%s1247_s11 + $0xe0] sm:$0xff] %v747_v13  ;;  %v748_v26 = vsel %vm613_vm13, %v549_v47, %v684_v9  ;;  %v552_v33 = vadd.f32 %v488_v49, %v1190_v11  ;;  %v491_v3 = vld [vmem:[%s1177_s6 + $0x118] sm:$0xff]  ;;  %v1624_v42 = vld [vmem:[#allocation2_spill] sm:$0xff] }
  0x4c   : > { %v553_v35 = vadd.f32 %v489_v50, %v1193_v12  ;;  %v554_v5 = vadd.f32 %v490_v8, %v1196_v16  ;;  %812 = vst [vmem:[%s1247_s11 + $0xe8] sm:$0xff] %v748_v26  ;;  %vm614_vm14 = vcmp.ge.f32.partialorder %v550_v17, 0.0  ;;  %v685_v6 = vmul.f32 %v1213_v30, %v550_v17  ;;  %v493_v12 = vld [vmem:[%s1177_s6 + $0x128] sm:$0xff]  ;;  %v494_v16 = vld [vmem:[%s1177_s6 + $0x130] sm:$0xff] }
  0x4d   : > { %vm615_vm15 = vcmp.ge.f32.partialorder %v551_v25, 0.0  ;;  %v686_v57 = vmul.f32 %v1213_v30, %v551_v25  ;;  %vm616_vm0 = vcmp.ge.f32.partialorder %v552_v33, 0.0  ;;  %v687_v54 = vmul.f32 %v1213_v30, %v552_v33  ;;  %v1625_v63 = vld [vmem:[#allocation3_spill] sm:$0xff] }
  0x4e   : > { %vm617_vm1 = vcmp.ge.f32.partialorder %v553_v35, 0.0  ;;  %v688_v11 = vmul.f32 %v1213_v30, %v553_v35  ;;  %v749_v51 = vsel %vm614_vm14, %v550_v17, %v685_v6  ;;  %vm618_vm2 = vcmp.ge.f32.partialorder %v554_v5, 0.0  ;;  %v501_v27 = vld [vmem:[%s1177_s6 + $0x168] sm:$0xff] }
  0x4f   : > { %v750_v55 = vsel %vm615_vm15, %v551_v25, %v686_v57  ;;  %v689_v38 = vmul.f32 %v1213_v30, %v554_v5  ;;  %813 = vst [vmem:[%s1247_s11 + $0xf0] sm:$0xff] %v749_v51  ;;  %v751_v14 = vsel %vm616_vm0, %v552_v33, %v687_v54  ;;  %v555_v52 = vadd.f32 %v491_v3, %v1200_v19  ;;  %v1627_v3 = vld [vmem:[#allocation5_spill] sm:$0xff]  ;;  %v1628_v54 = vld [vmem:[#allocation6_spill] sm:$0xff] }
  0x50   : > { %814 = vst [vmem:[%s1247_s11 + $0xf8] sm:$0xff] %v750_v55  ;;  %v752_v15 = vsel %vm617_vm1, %v553_v35, %v688_v11  ;;  %v556_v53 = vadd.f32 %v492_v44, %v1203_v23  ;;  %815 = vst [vmem:[%s1247_s11 + $0x100] sm:$0xff] %v751_v14  ;;  %v557_v31 = vadd.f32 %v493_v12, %v1206_v24  ;;  %v496_v23 = vld [vmem:[%s1177_s6 + $0x140] sm:$0xff] }
  0x51   : > { %816 = vst [vmem:[%s1247_s11 + $0x108] sm:$0xff] %v752_v15  ;;  %v753_v18 = vsel %vm618_vm2, %v554_v5, %v689_v38  ;;  %v558_v40 = vadd.f32 %v494_v16, %v1217_v34  ;;  %v559_v56 = vadd.f32 %v495_v48, %v1232_v58  ;;  %vm619_vm3 = vcmp.ge.f32.partialorder %v555_v52, 0.0  ;;  %v502_v5 = vld [vmem:[%s1177_s6 + $0x170] sm:$0xff]  ;;  %v503_v48 = vld [vmem:[%s1177_s6 + $0x178] sm:$0xff]  ;;  %v504_v51 = vld [vmem:[%s1177_s6 + $0x180] sm:$0xff] }
  0x52   : > { %817 = vst [vmem:[%s1247_s11 + $0x110] sm:$0xff] %v753_v18  ;;  %v690_v43 = vmul.f32 %v1213_v30, %v555_v52  ;;  %vm620_vm4 = vcmp.ge.f32.partialorder %v556_v53, 0.0  ;;  %v691_v19 = vmul.f32 %v1213_v30, %v556_v53  ;;  %vm621_vm5 = vcmp.ge.f32.partialorder %v557_v31, 0.0  ;;  %v1629_v15 = vld [vmem:[#allocation7_spill] sm:$0xff] }
  0x53   : > { %v692_v24 = vmul.f32 %v1213_v30, %v557_v31  ;;  %vm622_vm6 = vcmp.ge.f32.partialorder %v558_v40, 0.0  ;;  %v693_v34 = vmul.f32 %v1213_v30, %v558_v40  ;;  %vm623_vm7 = vcmp.ge.f32.partialorder %v559_v56, 0.0 }
  0x54   : > { %v754_v58 = vsel %vm619_vm3, %v555_v52, %v690_v43  ;;  %v755_v28 = vsel %vm620_vm4, %v556_v53, %v691_v19  ;;  %v694_v2 = vmul.f32 %v1213_v30, %v559_v56  ;;  %v560_v32 = vadd.f32 %v496_v23, %v1241_v61 }
  0x55   : > { %818 = vst [vmem:[%s1247_s11 + $0x118] sm:$0xff] %v754_v58  ;;  %819 = vst [vmem:[%s1247_s11 + $0x120] sm:$0xff] %v755_v28  ;;  %v756_v29 = vsel %vm621_vm5, %v557_v31, %v692_v24  ;;  %v757_v0 = vsel %vm622_vm6, %v558_v40, %v693_v34  ;;  %v433_v21 = vadd.f32 %v1003_v1, %v1221_v36  ;;  %v1630_v31 = vld [vmem:[#allocation8_spill] sm:$0xff]  ;;  %v505_v34 = vld [vmem:[%s1177_s6 + $0x188] sm:$0xff] }
  0x56   : > { %820 = vst [vmem:[%s1247_s11 + $0x128] sm:$0xff] %v756_v29  ;;  %821 = vst [vmem:[%s1247_s11 + $0x130] sm:$0xff] %v757_v0  ;;  %v758_v47 = vsel %vm623_vm7, %v559_v56, %v694_v2  ;;  %v434_v60 = vadd.f32 %v1003_v1, %v1224_v37  ;;  %v435_v41 = vadd.f32 %v1003_v1, %v1235_v59  ;;  %vm624_vm8 = vcmp.ge.f32.partialorder %v560_v32, 0.0  ;;  %v500_v37 = vld [vmem:[%s1177_s6 + $0x160] sm:$0xff]  ;;  %v1626_v59 = vld [vmem:[#allocation4_spill] sm:$0xff] }
  0x57   : > { %v365_v22 = vmul.f32 %v1624_v42, %v1250_v62  ;;  %822 = vst [vmem:[%s1247_s11 + $0x138] sm:$0xff] %v758_v47  ;;  %v695_v36 = vmul.f32 %v1213_v30, %v560_v32  ;;  %v561_v61 = vadd.f32 %v497_v20, %v433_v21  ;;  %v366_v45 = vmul.f32 %v1624_v42, %v1625_v63  ;;  %v1631_v56 = vld [vmem:[#allocation9_spill] sm:$0xff]  ;;  %v506_v58 = vld [vmem:[%s1177_s6 + $0x190] sm:$0xff]  ;;  %v1632_v0 = vld [vmem:[#allocation10_spill] sm:$0xff] }
  0x58   : > { %v562_v49 = vadd.f32 %v498_v39, %v434_v60  ;;  %v563_v50 = vadd.f32 %v499_v46, %v435_v41  ;;  %v367_v62 = vmul.f32 %v1624_v42, %v1626_v59  ;;  %v368_v44 = vmul.f32 %v1624_v42, %v1627_v3  ;;  %v507_v28 = vld [vmem:[%s1177_s6 + $0x198] sm:$0xff]  ;;  %v1633_v63 = vld [vmem:[#allocation11_spill] sm:$0xff] }
  0x59   : > { %v436_v8 = vadd.f32 %v1003_v1, %v365_v22  ;;  %v759_v7 = vsel %vm624_vm8, %v560_v32, %v695_v36  ;;  %vm625_vm9 = vcmp.ge.f32.partialorder %v561_v61, 0.0  ;;  %v696_v9 = vmul.f32 %v1213_v30, %v561_v61  ;;  %v508_v22 = vld [vmem:[%s1177_s6 + $0x1a0] sm:$0xff] }
  0x5a   : > { %v437_v10 = vadd.f32 %v1003_v1, %v366_v45  ;;  %823 = vst [vmem:[%s1247_s11 + $0x140] sm:$0xff] %v759_v7  ;;  %vm626_vm10 = vcmp.ge.f32.partialorder %v562_v49, 0.0  ;;  %v697_v13 = vmul.f32 %v1213_v30, %v562_v49  ;;  %vm627_vm11 = vcmp.ge.f32.partialorder %v563_v50, 0.0  ;;  %v509_v7 = vld [vmem:[%s1177_s6 + $0x1a8] sm:$0xff] }
  0x5b   : > { %v698_v17 = vmul.f32 %v1213_v30, %v563_v50  ;;  %v760_v25 = vsel %vm625_vm9, %v561_v61, %v696_v9  ;;  %v564_v26 = vadd.f32 %v500_v37, %v436_v8  ;;  %v438_v35 = vadd.f32 %v1003_v1, %v367_v62  ;;  %v510_v9 = vld [vmem:[%s1177_s6 + $0x1b0] sm:$0xff] }
  0x5c   : > { %v565_v33 = vadd.f32 %v501_v27, %v437_v10  ;;  %824 = vst [vmem:[%s1247_s11 + $0x148] sm:$0xff] %v760_v25  ;;  %v761_v6 = vsel %vm626_vm10, %v562_v49, %v697_v13  ;;  %v369_v11 = vmul.f32 %v1624_v42, %v1628_v54  ;;  %v439_v38 = vadd.f32 %v1003_v1, %v368_v44  ;;  %v1634_v49 = vld [vmem:[#allocation12_spill] sm:$0xff]  ;;  %v1635_v25 = vld [vmem:[#allocation13_spill] sm:$0xff]  ;;  %v1636_v54 = vld [vmem:[#allocation14_spill] sm:$0xff] }
  0x5d   : > { %v762_v57 = vsel %vm627_vm11, %v563_v50, %v698_v17  ;;  %825 = vst [vmem:[%s1247_s11 + $0x150] sm:$0xff] %v761_v6  ;;  %vm628_vm12 = vcmp.ge.f32.partialorder %v564_v26, 0.0  ;;  %v699_v12 = vmul.f32 %v1213_v30, %v564_v26  ;;  %v566_v55 = vadd.f32 %v502_v5, %v438_v35  ;;  %v511_v44 = vld [vmem:[%s1177_s6 + $0x1b8] sm:$0xff] }
  0x5e   : > { %826 = vst [vmem:[%s1247_s11 + $0x158] sm:$0xff] %v762_v57  ;;  %vm629_vm13 = vcmp.ge.f32.partialorder %v565_v33, 0.0  ;;  %v700_v16 = vmul.f32 %v1213_v30, %v565_v33  ;;  %v440_v14 = vadd.f32 %v1003_v1, %v369_v11  ;;  %v370_v52 = vmul.f32 %v1624_v42, %v1629_v15 }
  0x5f   : > { %v763_v53 = vsel %vm628_vm12, %v564_v26, %v699_v12  ;;  %v371_v40 = vmul.f32 %v1624_v42, %v1630_v31  ;;  %v372_v43 = vmul.f32 %v1624_v42, %v1631_v56  ;;  %vm630_vm14 = vcmp.ge.f32.partialorder %v566_v55, 0.0  ;;  %v939_v31 = vld [vmem:[%s1600_s3] ss:$0 sm:$0xff] }
  0x60   : > { %v764_v18 = vsel %vm629_vm13, %v565_v33, %v700_v16  ;;  %827 = vst [vmem:[%s1247_s11 + $0x160] sm:$0xff] %v763_v53  ;;  %v701_v19 = vmul.f32 %v1213_v30, %v566_v55  ;;  %v567_v23 = vadd.f32 %v503_v48, %v439_v38  ;;  %v568_v24 = vadd.f32 %v504_v51, %v440_v14  ;;  %v1637_v16 = vld [vmem:[#allocation15_spill] sm:$0xff]  ;;  %v1638_v51 = vld [vmem:[#allocation16_spill] sm:$0xff]  ;;  %v1639_v38 = vld [vmem:[#allocation17_spill] sm:$0xff] }
  0x61   : > { %828 = vst [vmem:[%s1247_s11 + $0x168] sm:$0xff] %v764_v18  ;;  %v441_v2 = vadd.f32 %v1003_v1, %v370_v52  ;;  %v442_v20 = vadd.f32 %v1003_v1, %v371_v40  ;;  %v443_v29 = vadd.f32 %v1003_v1, %v372_v43  ;;  %v373_v32 = vmul.f32 %v1624_v42, %v1632_v0  ;;  %v512_v52 = vld [vmem:[%s1177_s6 + $0x1c0] sm:$0xff]  ;;  %v513_v53 = vld [vmem:[%s1177_s6 + $0x1c8] sm:$0xff] }
  0x62   : > { %v765_v21 = vsel %vm630_vm14, %v566_v55, %v701_v19  ;;  %vm631_vm15 = vcmp.ge.f32.partialorder %v567_v23, 0.0  ;;  %v702_v39 = vmul.f32 %v1213_v30, %v567_v23  ;;  %vm632_vm0 = vcmp.ge.f32.partialorder %v568_v24, 0.0  ;;  %v515_v19 = vld [vmem:[%s1177_s6 + $0x1d8] sm:$0xff] }
  0x63   : > { %829 = vst [vmem:[%s1247_s11 + $0x170] sm:$0xff] %v765_v21  ;;  %v703_v46 = vmul.f32 %v1213_v30, %v568_v24  ;;  %v569_v47 = vadd.f32 %v505_v34, %v441_v2  ;;  %v570_v60 = vadd.f32 %v506_v58, %v442_v20  ;;  %v571_v41 = vadd.f32 %v507_v28, %v443_v29  ;;  %v940_v58 = vld [vmem:[%s1599_s2] ss:$0 sm:$0xff] }
  0x64   : > { %v766_v36 = vsel %vm631_vm15, %v567_v23, %v702_v39  ;;  %v444_v61 = vadd.f32 %v1003_v1, %v373_v32  ;;  %v374_v45 = vmul.f32 %v1624_v42, %v1633_v63  ;;  %v375_v50 = vmul.f32 %v1624_v42, %v1634_v49  ;;  %v1640_v28 = vld [vmem:[#allocation18_spill] sm:$0xff]  ;;  %v517_v63 = vld [vmem:[%s1177_s6 + $0x1e8] sm:$0xff] }
  0x65   : > { %830 = vst [vmem:[%s1247_s11 + $0x178] sm:$0xff] %v766_v36  ;;  %v767_v8 = vsel %vm632_vm0, %v568_v24, %v703_v46  ;;  %vm633_vm1 = vcmp.ge.f32.partialorder %v569_v47, 0.0  ;;  %v704_v37 = vmul.f32 %v1213_v30, %v569_v47  ;;  %vm634_vm2 = vcmp.ge.f32.partialorder %v570_v60, 0.0  ;;  %v516_v46 = vld [vmem:[%s1177_s6 + $0x1e0] sm:$0xff] }
  0x66   : > { %831 = vst [vmem:[%s1247_s11 + $0x180] sm:$0xff] %v767_v8  ;;  %v705_v27 = vmul.f32 %v1213_v30, %v570_v60  ;;  %vm635_vm3 = vcmp.ge.f32.partialorder %v571_v41, 0.0  ;;  %v706_v59 = vmul.f32 %v1213_v30, %v571_v41  ;;  %v572_v62 = vadd.f32 %v508_v22, %v444_v61 }
  0x67   : > { %v768_v10 = vsel %vm633_vm1, %v569_v47, %v704_v37  ;;  %v445_v13 = vadd.f32 %v1003_v1, %v374_v45  ;;  %v446_v17 = vadd.f32 %v1003_v1, %v375_v50  ;;  %v376_v26 = vmul.f32 %v1624_v42, %v1635_v25  ;;  %v1641_v47 = vld [vmem:[#allocation19_spill] sm:$0xff]  ;;  %v519_v25 = vld [vmem:[%s1177_s6 + $0x1f8] sm:$0xff] }
  0x68   : > { %832 = vst [vmem:[%s1247_s11 + $0x188] sm:$0xff] %v768_v10  ;;  %v769_v33 = vsel %vm634_vm2, %v570_v60, %v705_v27  ;;  %v770_v35 = vsel %vm635_vm3, %v571_v41, %v706_v59  ;;  %vm636_vm4 = vcmp.ge.f32.partialorder %v572_v62, 0.0  ;;  %v707_v5 = vmul.f32 %v1213_v30, %v572_v62  ;;  %v1642_v59 = vld [vmem:[#allocation20_spill] sm:$0xff] }
  0x69   : > { %833 = vst [vmem:[%s1247_s11 + $0x190] sm:$0xff] %v769_v33  ;;  %834 = vst [vmem:[%s1247_s11 + $0x198] sm:$0xff] %v770_v35  ;;  %v573_v6 = vadd.f32 %v509_v7, %v445_v13  ;;  %v574_v57 = vadd.f32 %v510_v9, %v446_v17  ;;  %v447_v3 = vadd.f32 %v1003_v1, %v376_v26  ;;  %v518_v17 = vld [vmem:[%s1177_s6 + $0x1f0] sm:$0xff] }
  0x6a   : > { %v377_v11 = vmul.f32 %v1624_v42, %v1636_v54  ;;  %v771_v12 = vsel %vm636_vm4, %v572_v62, %v707_v5  ;;  %v378_v48 = vmul.f32 %v1624_v42, %v1637_v16  ;;  %v379_v55 = vmul.f32 %v1624_v42, %v1638_v51 }
  0x6b   : > { %v380_v14 = vmul.f32 %v1624_v42, %v1639_v38  ;;  %835 = vst [vmem:[%s1247_s11 + $0x1a0] sm:$0xff] %v771_v12  ;;  %vm637_vm5 = vcmp.ge.f32.partialorder %v573_v6, 0.0  ;;  %v708_v1 = vmul.f32 %v1213_v30, %v573_v6  ;;  %vm638_vm6 = vcmp.ge.f32.partialorder %v574_v57, 0.0  ;;  %v514_v42 = vld [vmem:[%s1177_s6 + $0x1d0] sm:$0xff] }
  0x6c   : > { %v709_v15 = vmul.f32 %v1213_v30, %v574_v57  ;;  %v575_v18 = vadd.f32 %v511_v44, %v447_v3  ;;  %v448_v40 = vadd.f32 %v939_v31, %v377_v11  ;;  %v449_v56 = vadd.f32 %v939_v31, %v378_v48 }
  0x6d   : > { %v450_v43 = vadd.f32 %v939_v31, %v379_v55  ;;  %v772_v23 = vsel %vm637_vm5, %v573_v6, %v708_v1  ;;  %v451_v34 = vadd.f32 %v939_v31, %v380_v14  ;;  %v381_v2 = vmul.f32 %v940_v58, %v1640_v28 }
  0x6e   : > { %v773_v24 = vsel %vm638_vm6, %v574_v57, %v709_v15  ;;  %836 = vst [vmem:[%s1247_s11 + $0x1a8] sm:$0xff] %v772_v23  ;;  %vm639_vm7 = vcmp.ge.f32.partialorder %v575_v18, 0.0  ;;  %v710_v20 = vmul.f32 %v1213_v30, %v575_v18  ;;  %v576_v29 = vadd.f32 %v512_v52, %v448_v40 }
  0x6f   : > { %837 = vst [vmem:[%s1247_s11 + $0x1b0] sm:$0xff] %v773_v24  ;;  %v577_v0 = vadd.f32 %v513_v53, %v449_v56  ;;  %v578_v32 = vadd.f32 %v514_v42, %v450_v43  ;;  %v579_v21 = vadd.f32 %v515_v19, %v451_v34  ;;  %v452_v39 = vadd.f32 %v939_v31, %v381_v2 }
  0x70   : > { %v382_v60 = vmul.f32 %v940_v58, %v1641_v47  ;;  %v774_v41 = vsel %vm639_vm7, %v575_v18, %v710_v20  ;;  %vm640_vm8 = vcmp.ge.f32.partialorder %v576_v29, 0.0  ;;  %v711_v22 = vmul.f32 %v1213_v30, %v576_v29 }
  0x71   : > { %vm641_vm9 = vcmp.ge.f32.partialorder %v577_v0, 0.0  ;;  %838 = vst [vmem:[%s1247_s11 + $0x1b8] sm:$0xff] %v774_v41  ;;  %v712_v36 = vmul.f32 %v1213_v30, %v577_v0  ;;  %vm642_vm10 = vcmp.ge.f32.partialorder %v578_v32, 0.0  ;;  %v713_v61 = vmul.f32 %v1213_v30, %v578_v32 }
  0x72   : > { %vm643_vm11 = vcmp.ge.f32.partialorder %v579_v21, 0.0  ;;  %v775_v45 = vsel %vm640_vm8, %v576_v29, %v711_v22  ;;  %v714_v49 = vmul.f32 %v1213_v30, %v579_v21  ;;  %v580_v50 = vadd.f32 %v516_v46, %v452_v39 }
  0x73   : > { %v453_v8 = vadd.f32 %v939_v31, %v382_v60  ;;  %839 = vst [vmem:[%s1247_s11 + $0x1c0] sm:$0xff] %v775_v45  ;;  %v776_v37 = vsel %vm641_vm9, %v577_v0, %v712_v36  ;;  %v777_v27 = vsel %vm642_vm10, %v578_v32, %v713_v61  ;;  %v383_v62 = vmul.f32 %v940_v58, %v1642_v59 }
  0x74   : > { %v384_v7 = vmul.f32 %v940_v58, %v1316_v4  ;;  %840 = vst [vmem:[%s1247_s11 + $0x1c8] sm:$0xff] %v776_v37  ;;  %841 = vst [vmem:[%s1247_s11 + $0x1d0] sm:$0xff] %v777_v27  ;;  %v778_v9 = vsel %vm643_vm11, %v579_v21, %v714_v49  ;;  %vm644_vm12 = vcmp.ge.f32.partialorder %v580_v50, 0.0  ;;  %v715_v10 = vmul.f32 %v1213_v30, %v580_v50 }
  0x75   : > { %v581_v13 = vadd.f32 %v517_v63, %v453_v8  ;;  %842 = vst [vmem:[%s1247_s11 + $0x1d8] sm:$0xff] %v778_v9  ;;  %v454_v26 = vadd.f32 %v939_v31, %v383_v62 }
  0x76   : > { %v455_v33 = vadd.f32 %v939_v31, %v384_v7  ;;  %v779_v35 = vsel %vm644_vm12, %v580_v50, %v715_v10 }
  0x77   : > { %vm645_vm13 = vcmp.ge.f32.partialorder %v581_v13, 0.0  ;;  %v716_v5 = vmul.f32 %v1213_v30, %v581_v13  ;;  %843 = vst [vmem:[%s1247_s11 + $0x1e0] sm:$0xff] %v779_v35  ;;  %v582_v4 = vadd.f32 %v518_v17, %v454_v26 }
  0x78   : > { %v583_v6 = vadd.f32 %v519_v25, %v455_v33 }
  0x79   : > { %v780_v57 = vsel %vm645_vm13, %v581_v13, %v716_v5  ;;  %vm646_vm14 = vcmp.ge.f32.partialorder %v582_v4, 0.0  ;;  %v717_v3 = vmul.f32 %v1213_v30, %v582_v4 }
  0x7a   : > { %844 = vst [vmem:[%s1247_s11 + $0x1e8] sm:$0xff] %v780_v57  ;;  %vm647_vm15 = vcmp.ge.f32.partialorder %v583_v6, 0.0  ;;  %v718_v44 = vmul.f32 %v1213_v30, %v583_v6 }
  0x7b   : > { %v781_v54 = vsel %vm646_vm14, %v582_v4, %v717_v3 }
  0x7c   : > { %v782_v11 = vsel %vm647_vm15, %v583_v6, %v718_v44  ;;  %845 = vst [vmem:[%s1247_s11 + $0x1f0] sm:$0xff] %v781_v54 }
  0x7d   : > { %846 = vst [vmem:[%s1247_s11 + $0x1f8] sm:$0xff] %v782_v11 }
  0x7e PF: > { %s15_s18 = sadd.s32 1, %s947_s18  }
  0x7f   : > { %p12_p4 = scmp.ge.s32.totalorder %s15_s18, 4  }
  0x81   :  { %14 = sbr.rel (!%p12_p4) target bundleno = 1 (0x1), region = 73 }

// kernel: dilated_bottleneck_forward.5
= control target key start
LH: loop header
LB: loop body
LE: loop exit
PB: predicated region body
PF: predicated region fallthrough
CT: control target
= control target key end

     0   :  { %s5664_s24 = smov 0   ;;  %s7214_s0 = inlined_call_operand.vmem [shape: bf16[2,8,8,8,128], index: 0, kind: input, shape index: {}]   ;;  %s7215_s1 = inlined_call_operand.vmem [shape: f32[1,128], index: 1, kind: input, shape index: {}]   ;;  %s7216_s2 = inlined_call_operand.vmem [shape: f32[1,128], index: 2, kind: input, shape index: {}]   ;;  %s7217_s3 = inlined_call_operand.vmem [shape: f32[1,128], index: 3, kind: input, shape index: {}]   ;;  %s7218_s4 = inlined_call_operand.vmem [shape: bf16[1152,384], index: 4, kind: input, shape index: {}]   ;;  %s7219_s5 = inlined_call_operand.vmem [shape: bf16[2,8,8,8,128], index: 5, kind: output, shape index: {0}]   ;;  %s7220_s6 = inlined_call_operand.vmem [shape: f32[2,8,128], index: 6, kind: output, shape index: {1}]   ;;  %s7221_s7 = inlined_call_operand.vmem [shape: f32[2,8,128], index: 7, kind: output, shape index: {2}]  }
   0x1 LB: > { %s4426_s25 = sadd.s32 4294967295, %s5615_s24   ;;  %p4430_p0 = scmp.ge.s32.totalorder %s5615_s24, 1  ;;  %s5615_s24 = sphi %s5664_s24, %s18_s24  }
   0x2   : > { %p242_p1 = scmp.lt.s32.totalorder %s5615_s24, 3 }
   0x4   : > { %p243_p2 = pnand %p4430_p0, %p242_p1 }
   0x6   : > { %246 = sbr.rel (%p243_p2) target bundleno = 674 (0x2a2), region = 40 }
   0xb   : > { %p5674_p3 = scmp.lt.s32.totalorder %s4426_s25, 1  ;;  %v5681_v0 = vld [vmem:[%s7215_s1] ss:$0 sm:$0xff]  ;;  %v5621_v3 = vmov 0   ;;  %v5622_v4 = vmov 0.0  }
   0xc   : > { %7226 = vst [vmem:[#allocation6_spill] sm:$0xff] %v5681_v0  ;;  %v5686_v1 = vld [vmem:[%s7216_s2] ss:$0 sm:$0xff]  ;;  %304 = vst [vmem:[#allocation2] sm:$0xf] %v5621_v3 }
   0xd   : > { %7227 = vst [vmem:[#allocation7_spill] sm:$0xff] %v5686_v1  ;;  %v5691_v2 = vld [vmem:[%s7217_s3] ss:$0 sm:$0xff]  ;;  %305 = vst [vmem:[#allocation2 + $0x4] sm:$0xf] %v5621_v3  ;;  %s7304_s25 = smov (!%p5674_p3, %s4426_s25), 1 }
   0xe   : > { %7228 = vst [vmem:[#allocation8_spill] sm:$0xff] %v5691_v2  ;;  %306 = vst [vmem:[#allocation2 + $0x8] sm:$0xf] %v5621_v3  ;;  %s4762_s10 = sshll.u32 %s7304_s25, 8  ;;  %s4435_s11 = sshll.u32 %s7304_s25, 3 }
   0xf   : > { %307 = vst [vmem:[#allocation2 + $0xc] sm:$0xf] %v5621_v3  ;;  %308 = vst [vmem:[#allocation2 + $0x10] sm:$0xf] %v5621_v3  ;;  %s5772_s14 = scalar_lea.vmem %s7214_s0, %s4762_s10  ;;  %s5777_s17 = scalar_lea.vmem %s7219_s5, %s4762_s10 }
  0x10   : > { %309 = vst [vmem:[#allocation2 + $0x14] sm:$0xf] %v5621_v3  ;;  %310 = vst [vmem:[#allocation2 + $0x18] sm:$0xf] %v5621_v3  ;;  %s5782_s20 = scalar_lea.vmem %s7220_s6, %s4435_s11  ;;  %s5787_s23 = scalar_lea.vmem %s7221_s7, %s4435_s11 }
  0x11   : > { %311 = vst [vmem:[#allocation2 + $0x1c] sm:$0xf] %v5621_v3  ;;  %312 = vst [vmem:[#allocation2 + $0x20] sm:$0xf] %v5621_v3  ;;  %s5789_s25 = smov 0  }
  0x12   : > { %313 = vst [vmem:[#allocation2 + $0x24] sm:$0xf] %v5621_v3  ;;  %314 = vst [vmem:[#allocation2 + $0x28] sm:$0xf] %v5621_v3 }
  0x13   : > { %315 = vst [vmem:[#allocation2 + $0x2c] sm:$0xf] %v5621_v3  ;;  %316 = vst [vmem:[#allocation2 + $0x30] sm:$0xf] %v5621_v3 }
  0x14   : > { %317 = vst [vmem:[#allocation2 + $0x34] sm:$0xf] %v5621_v3  ;;  %318 = vst [vmem:[#allocation2 + $0x38] sm:$0xf] %v5621_v3 }
  0x15   : > { %319 = vst [vmem:[#allocation2 + $0x3c] sm:$0xf] %v5621_v3  ;;  %320 = vst [vmem:[#allocation2 + $0x40] sm:$0xf] %v5621_v3 }
  0x16   : > { %321 = vst [vmem:[#allocation2 + $0x44] sm:$0xf] %v5621_v3  ;;  %322 = vst [vmem:[#allocation2 + $0x48] sm:$0xf] %v5621_v3 }
  0x17   : > { %323 = vst [vmem:[#allocation2 + $0x4c] sm:$0xf] %v5621_v3  ;;  %324 = vst [vmem:[#allocation2 + $0x50] sm:$0xf] %v5621_v3 }
  0x18   : > { %325 = vst [vmem:[#allocation2 + $0x54] sm:$0xf] %v5621_v3  ;;  %326 = vst [vmem:[#allocation2 + $0x58] sm:$0xf] %v5621_v3 }
  0x19   : > { %327 = vst [vmem:[#allocation2 + $0x5c] sm:$0xf] %v5621_v3  ;;  %328 = vst [vmem:[#allocation2 + $0x60] sm:$0xf] %v5621_v3 }
  0x1a   : > { %329 = vst [vmem:[#allocation2 + $0x64] sm:$0xf] %v5621_v3  ;;  %330 = vst [vmem:[#allocation2 + $0x68] sm:$0xf] %v5621_v3 }
  0x1b   : > { %331 = vst [vmem:[#allocation2 + $0x6c] sm:$0xf] %v5621_v3  ;;  %332 = vst [vmem:[#allocation2 + $0x70] sm:$0xf] %v5621_v3 }
  0x1c   : > { %333 = vst [vmem:[#allocation2 + $0x74] sm:$0xf] %v5621_v3  ;;  %334 = vst [vmem:[#allocation2 + $0x78] sm:$0xf] %v5621_v3 }
  0x1d   : > { %335 = vst [vmem:[#allocation2 + $0x7c] sm:$0xf] %v5621_v3  ;;  %336 = vst [vmem:[#allocation2 + $0x80] sm:$0xf] %v5621_v3 }
  0x1e   : > { %337 = vst [vmem:[#allocation2 + $0x84] sm:$0xf] %v5621_v3  ;;  %338 = vst [vmem:[#allocation2 + $0x88] sm:$0xf] %v5621_v3 }
  0x1f   : > { %339 = vst [vmem:[#allocation2 + $0x8c] sm:$0xf] %v5621_v3  ;;  %340 = vst [vmem:[#allocation2 + $0x90] sm:$0xf] %v5621_v3 }
  0x20   : > { %341 = vst [vmem:[#allocation2 + $0x94] sm:$0xf] %v5621_v3  ;;  %342 = vst [vmem:[#allocation2 + $0x98] sm:$0xf] %v5621_v3 }
  0x21   : > { %343 = vst [vmem:[#allocation2 + $0x9c] sm:$0xf] %v5621_v3  ;;  %344 = vst [vmem:[#allocation2 + $0xa0] sm:$0xf] %v5621_v3 }
  0x22   : > { %345 = vst [vmem:[#allocation2 + $0xa4] sm:$0xf] %v5621_v3  ;;  %346 = vst [vmem:[#allocation2 + $0xa8] sm:$0xf] %v5621_v3 }
  0x23   : > { %347 = vst [vmem:[#allocation2 + $0xac] sm:$0xf] %v5621_v3  ;;  %348 = vst [vmem:[#allocation2 + $0xb0] sm:$0xf] %v5621_v3 }
  0x24   : > { %349 = vst [vmem:[#allocation2 + $0xb4] sm:$0xf] %v5621_v3  ;;  %350 = vst [vmem:[#allocation2 + $0xb8] sm:$0xf] %v5621_v3 }
  0x25   : > { %351 = vst [vmem:[#allocation2 + $0xbc] sm:$0xf] %v5621_v3  ;;  %352 = vst [vmem:[#allocation2 + $0xc0] sm:$0xf] %v5621_v3 }
  0x26   : > { %353 = vst [vmem:[#allocation2 + $0xc4] sm:$0xf] %v5621_v3  ;;  %354 = vst [vmem:[#allocation2 + $0xc8] sm:$0xf] %v5621_v3 }
  0x27   : > { %355 = vst [vmem:[#allocation2 + $0xcc] sm:$0xf] %v5621_v3  ;;  %356 = vst [vmem:[#allocation2 + $0xd0] sm:$0xf] %v5621_v3 }
  0x28   : > { %357 = vst [vmem:[#allocation2 + $0xd4] sm:$0xf] %v5621_v3  ;;  %358 = vst [vmem:[#allocation2 + $0xd8] sm:$0xf] %v5621_v3 }
  0x29   : > { %359 = vst [vmem:[#allocation2 + $0xdc] sm:$0xf] %v5621_v3  ;;  %360 = vst [vmem:[#allocation2 + $0xe0] sm:$0xf] %v5621_v3 }
  0x2a   : > { %361 = vst [vmem:[#allocation2 + $0xe4] sm:$0xf] %v5621_v3  ;;  %362 = vst [vmem:[#allocation2 + $0xe8] sm:$0xf] %v5621_v3 }
  0x2b   : > { %363 = vst [vmem:[#allocation2 + $0xec] sm:$0xf] %v5621_v3  ;;  %364 = vst [vmem:[#allocation2 + $0xf0] sm:$0xf] %v5621_v3 }
  0x2c   : > { %365 = vst [vmem:[#allocation2 + $0xf4] sm:$0xf] %v5621_v3  ;;  %366 = vst [vmem:[#allocation2 + $0xf8] sm:$0xf] %v5621_v3 }
  0x2d   : > { %367 = vst [vmem:[#allocation2 + $0xfc] sm:$0xf] %v5621_v3  ;;  %368 = vst [vmem:[#allocation2 + $0x100] sm:$0xf] %v5621_v3 }
  0x2e   : > { %369 = vst [vmem:[#allocation2 + $0x104] sm:$0xf] %v5621_v3  ;;  %370 = vst [vmem:[#allocation2 + $0x108] sm:$0xf] %v5621_v3 }
  0x2f   : > { %371 = vst [vmem:[#allocation2 + $0x10c] sm:$0xf] %v5621_v3  ;;  %372 = vst [vmem:[#allocation2 + $0x110] sm:$0xf] %v5621_v3 }
  0x30   : > { %373 = vst [vmem:[#allocation2 + $0x114] sm:$0xf] %v5621_v3  ;;  %374 = vst [vmem:[#allocation2 + $0x118] sm:$0xf] %v5621_v3 }
  0x31   : > { %375 = vst [vmem:[#allocation2 + $0x11c] sm:$0xf] %v5621_v3  ;;  %376 = vst [vmem:[#allocation4] sm:$0xff] %v5622_v4 }
  0x32   : > { %377 = vst [vmem:[#allocation5] sm:$0xff] %v5622_v4 }
  0x33 LB: >> { %v7229_v2 = vld [vmem:[#allocation8_spill] sm:$0xff]  ;;  %v7230_v1 = vld [vmem:[#allocation7_spill] sm:$0xff]  ;;  %v7231_v0 = vld [vmem:[#allocation6_spill] sm:$0xff]  ;;  %s4437_s12 = sadd.s32 4294967294, %s5619_s25  ;;  %p390_p5 = scmp.ge.s32.totalorder %s5619_s25, 2  ;;  %s5619_s25 = sphi %s5789_s25, %s383_s25  }
  0x34   : >> { %v5195_v5 = vld [vmem:[%s7218_s4 + $0xac] ss:$12 sps:$4 sm:$0xff]   ;;  %v5199_v7 = vld [vmem:[%s7218_s4 + $0xa8] ss:$12 sps:$4 sm:$0xff]   ;;  %v5205_v11 = vld [vmem:[%s7218_s4 + $0x90] ss:$12 sps:$4 sm:$0xff]  }
  0x35   : >> { %v5197_v6 = vld [vmem:[%s7218_s4 + $0x22c] ss:$12 sps:$4 sm:$0xff]   ;;  %2873 = vmatprep.subr.bf16.mxu0 %v5195_v5  ;;  %v5200_v8 = vld [vmem:[%s7218_s4 + $0x228] ss:$12 sps:$4 sm:$0xff]   ;;  %v5206_v12 = vld [vmem:[%s7218_s4 + $0x210] ss:$12 sps:$4 sm:$0xff]  }
  0x36   : >> { %2986 = vmatprep.subr.bf16.mxu1 %v5197_v6  ;;  %v5201_v9 = vld [vmem:[%s7218_s4 + $0x94] ss:$12 sps:$4 sm:$0xff]   ;;  %2874 = vmatpush1.bf16.msra.mxu0 %v5199_v7  ;;  %v5207_v13 = vld [vmem:[%s7218_s4 + $0x7c] ss:$12 sps:$4 sm:$0xff]   ;;  %v5211_v15 = vld [vmem:[%s7218_s4 + $0x78] ss:$12 sps:$4 sm:$0xff]  }
  0x37   : >> { %2987 = vmatpush1.bf16.msra.mxu1 %v5200_v8  ;;  %v5203_v10 = vld [vmem:[%s7218_s4 + $0x214] ss:$12 sps:$4 sm:$0xff]   ;;  %2875 = vmatprep.subr.bf16.mxu0 %v5201_v9  ;;  %v5209_v14 = vld [vmem:[%s7218_s4 + $0x1fc] ss:$12 sps:$4 sm:$0xff]   ;;  %v5212_v16 = vld [vmem:[%s7218_s4 + $0x1f8] ss:$12 sps:$4 sm:$0xff]  }
  0x38   : >> { %2988 = vmatprep.subr.bf16.mxu1 %v5203_v10  ;;  %v5213_v17 = vld [vmem:[%s7218_s4 + $0x64] ss:$12 sps:$4 sm:$0xff]   ;;  %v5217_v19 = vld [vmem:[%s7218_s4 + $0x60] ss:$12 sps:$4 sm:$0xff]   ;;  %v5223_v23 = vld [vmem:[%s7218_s4 + $0x48] ss:$12 sps:$4 sm:$0xff]  }
  0x39   : >> { %v5215_v18 = vld [vmem:[%s7218_s4 + $0x1e4] ss:$12 sps:$4 sm:$0xff]   ;;  %v5218_v20 = vld [vmem:[%s7218_s4 + $0x1e0] ss:$12 sps:$4 sm:$0xff]   ;;  %v5224_v24 = vld [vmem:[%s7218_s4 + $0x1c8] ss:$12 sps:$4 sm:$0xff]  }
  0x3a   : >> { %2876 = vmatpush1.bf16.msra.mxu0 %v5205_v11  ;;  %v5219_v21 = vld [vmem:[%s7218_s4 + $0x4c] ss:$12 sps:$4 sm:$0xff]   ;;  %v5225_v25 = vld [vmem:[%s7218_s4 + $0x34] ss:$12 sps:$4 sm:$0xff]   ;;  %v5229_v27 = vld [vmem:[%s7218_s4 + $0x30] ss:$12 sps:$4 sm:$0xff]  }
  0x3b   : >> { %2989 = vmatpush1.bf16.msra.mxu1 %v5206_v12  ;;  %2877 = vmatprep.subr.bf16.mxu0 %v5207_v13  ;;  %v5221_v22 = vld [vmem:[%s7218_s4 + $0x1cc] ss:$12 sps:$4 sm:$0xff]   ;;  %v5227_v26 = vld [vmem:[%s7218_s4 + $0x1b4] ss:$12 sps:$4 sm:$0xff]   ;;  %v5230_v28 = vld [vmem:[%s7218_s4 + $0x1b0] ss:$12 sps:$4 sm:$0xff]  }
  0x3c   : >> { %2990 = vmatprep.subr.bf16.mxu1 %v5209_v14  ;;  %v5231_v29 = vld [vmem:[%s7218_s4 + $0x1c] ss:$12 sps:$4 sm:$0xff]   ;;  %v5235_v31 = vld [vmem:[%s7218_s4 + $0x18] ss:$12 sps:$4 sm:$0xff]   ;;  %v5241_v35 = vld [vmem:[%s7218_s4] ss:$12 sps:$4 sm:$0xff]  }
  0x3d   : >> { %v5233_v30 = vld [vmem:[%s7218_s4 + $0x19c] ss:$12 sps:$4 sm:$0xff]   ;;  %v5236_v32 = vld [vmem:[%s7218_s4 + $0x198] ss:$12 sps:$4 sm:$0xff]   ;;  %v5242_v36 = vld [vmem:[%s7218_s4 + $0x180] ss:$12 sps:$4 sm:$0xff]  }
  0x3e   : >> { %2878 = vmatpush1.bf16.msra.mxu0 %v5211_v15  ;;  %v5237_v33 = vld [vmem:[%s7218_s4 + $0x4] ss:$12 sps:$4 sm:$0xff]   ;;  %v5243_v37 = vld [vmem:[%s7218_s4 + $0x16c] ss:$12 sps:$4 sm:$0xff]   ;;  %p385_p4 = scmp.gt.s32.totalorder %s4437_s12, 0  ;;  %s4773_s18 = sshll.u32 %s5619_s25, 5 }
  0x3f   : >> { %2991 = vmatpush1.bf16.msra.mxu1 %v5212_v16  ;;  %2879 = vmatprep.subr.bf16.mxu0 %v5213_v17  ;;  %v5239_v34 = vld [vmem:[%s7218_s4 + $0x184] ss:$12 sps:$4 sm:$0xff]   ;;  %v5245_v38 = vld [vmem:[%s7218_s4 + $0x2ec] ss:$12 sps:$4 sm:$0xff]   ;;  %v5247_v39 = vld [vmem:[%s7218_s4 + $0x168] ss:$12 sps:$4 sm:$0xff]   ;;  %s6004_s10 = scalar_lea.vmem %s5772_s14, %s4773_s18  ;;  %s7143_s13 = scalar_lea.vmem %s5777_s17, %s4773_s18 }
  0x40   : >> { %2992 = vmatprep.subr.bf16.mxu1 %v5215_v18  ;;  %v5248_v40 = vld [vmem:[%s7218_s4 + $0x2e8] ss:$12 sps:$4 sm:$0xff]   ;;  %s7306_s12 = smov (!%p385_p4, %s4437_s12), 0  ;;  %v5253_v43 = vld [vmem:[%s7218_s4 + $0x150] ss:$12 sps:$4 sm:$0xff]   ;;  %v5292_v57 = vld [vmem:[#allocation2 + $0x60] sm:$0xff]  }
  0x41   : >> { %v5249_v41 = vld [vmem:[%s7218_s4 + $0x154] ss:$12 sps:$4 sm:$0xff]   ;;  %v5254_v44 = vld [vmem:[%s7218_s4 + $0x2d0] ss:$12 sps:$4 sm:$0xff]   ;;  %s4764_s22 = sshll.u32 %s7306_s12, 5  ;;  %3018 = vmatprep.mubr.bf16.mxu1 %v5292_v57  ;;  %s387_s21 = sadd.s32 2, %s5619_s25 }
  0x42   : >> { %2880 = vmatpush1.bf16.msra.mxu0 %v5217_v19  ;;  %v5251_v42 = vld [vmem:[%s7218_s4 + $0x2d4] ss:$12 sps:$4 sm:$0xff]   ;;  %v5255_v45 = vld [vmem:[%s7218_s4 + $0x13c] ss:$12 sps:$4 sm:$0xff]   ;;  %v5259_v47 = vld [vmem:[%s7218_s4 + $0x138] ss:$12 sps:$4 sm:$0xff]   ;;  %s5929_s9 = scalar_lea.vmem %s5772_s14, %s4764_s22 }
  0x43   : >> { %2993 = vmatpush1.bf16.msra.mxu1 %v5218_v20  ;;  %2881 = vmatprep.subr.bf16.mxu0 %v5219_v21  ;;  %v5257_v46 = vld [vmem:[%s7218_s4 + $0x2bc] ss:$12 sps:$4 sm:$0xff]   ;;  %v5260_v48 = vld [vmem:[%s7218_s4 + $0x2b8] ss:$12 sps:$4 sm:$0xff]   ;;  %s5936_s11 = scalar_select %p390_p5, 1, 0 }
  0x44   : >> { %2994 = vmatprep.subr.bf16.mxu1 %v5221_v22  ;;  %v5261_v49 = vld [vmem:[%s7218_s4 + $0x124] ss:$12 sps:$4 sm:$0xff]   ;;  %v5265_v51 = vld [vmem:[%s7218_s4 + $0x120] ss:$12 sps:$4 sm:$0xff]   ;;  %v5271_v3 = vld [vmem:[%s7218_s4 + $0x108] ss:$12 sps:$4 sm:$0xff]  }
  0x45   : >> { %v5263_v50 = vld [vmem:[%s7218_s4 + $0x2a4] ss:$12 sps:$4 sm:$0xff]   ;;  %v5266_v52 = vld [vmem:[%s7218_s4 + $0x2a0] ss:$12 sps:$4 sm:$0xff]   ;;  %s392_s29 = scvt.s32.f32 %s5936_s11  ;;  %v5272_v4 = vld [vmem:[%s7218_s4 + $0x288] ss:$12 sps:$4 sm:$0xff]  }
  0x46   : >> { %2882 = vmatpush1.bf16.msra.mxu0 %v5223_v23  ;;  %v4793_v53 = vld [vmem:[%s5929_s9] sm:$0xff]   ;;  %v5267_v54 = vld [vmem:[%s7218_s4 + $0x10c] ss:$12 sps:$4 sm:$0xff]   ;;  %v5277_v16 = vld [vmem:[%s7218_s4 + $0xf0] ss:$12 sps:$4 sm:$0xff]   ;;  %p6203_p6 = scmp.lt.s32.totalorder %s387_s21, 7 }
  0x47   : >> { %2995 = vmatpush1.bf16.msra.mxu1 %v5224_v24  ;;  %2883 = vmatprep.subr.bf16.mxu0 %v5225_v25  ;;  %v4794_v55 = vunpack.c.l.bf16 %v4793_v53  ;;  %v4795_v56 = vunpack.c.h.bf16 %v4793_v53  ;;  %v5269_v58 = vld [vmem:[%s7218_s4 + $0x28c] ss:$12 sps:$4 sm:$0xff]   ;;  %v5273_v7 = vld [vmem:[%s7218_s4 + $0xf4] ss:$12 sps:$4 sm:$0xff]   ;;  %v5969_v8 = vstv %s392_s29  ;;  %v5278_v19 = vld [vmem:[%s7218_s4 + $0x270] ss:$12 sps:$4 sm:$0xff]  }
  0x48   : >> { %2996 = vmatprep.subr.bf16.mxu1 %v5227_v26  ;;  %v4860_v60 = vld [vmem:[%s5929_s9 + $0x8] sm:$0xff]   ;;  %v5275_v11 = vld [vmem:[%s7218_s4 + $0x274] ss:$12 sps:$4 sm:$0xff]   ;;  %p393_p7 = scmp.lt.s32.totalorder %s5619_s25, 6  ;;  %s7308_s21 = smov (!%p6203_p6, %s387_s21), 7 }
  0x49   : >> { %v421_v59 = vmul.f32 %v4794_v55, %v7231_v0  ;;  %v422_v61 = vmul.f32 %v4795_v56, %v7231_v0  ;;  %v4798_v62 = vunpack.c.l.bf16 %v4860_v60  ;;  %v4799_v63 = vunpack.c.h.bf16 %v4860_v60  ;;  %v5279_v23 = vld [vmem:[%s7218_s4 + $0xdc] ss:$12 sps:$4 sm:$0xff]   ;;  %v5297_v53 = vld [vmem:[%s7218_s4 + $0x3ac] ss:$12 sps:$4 sm:$0xff]   ;;  %s383_s25 = sadd.s32 1, %s5619_s25  }
  0x4a   : >> { %2884 = vmatpush1.bf16.msra.mxu0 %v5229_v27  ;;  %v5281_v24 = vld [vmem:[%s7218_s4 + $0x25c] ss:$12 sps:$4 sm:$0xff]   ;;  %s6235_s16 = scalar_select %p393_p7, 1, 0 }
  0x4b   : >> { %2997 = vmatpush1.bf16.msra.mxu1 %v5230_v28  ;;  %2885 = vmatprep.subr.bf16.mxu0 %v5231_v29  ;;  %v435_v5 = vadd.f32 %v7230_v1, %v421_v59  ;;  %v436_v6 = vadd.f32 %v7230_v1, %v422_v61  ;;  %v423_v9 = vmul.f32 %v4798_v62, %v7231_v0  ;;  %v5283_v29 = vld [vmem:[%s7218_s4 + $0xd8] ss:$12 sps:$4 sm:$0xff]   ;;  %p380_p8 = scmp.ge.s32.totalorder %s383_s25, 8  }
  0x4c   : >> { %2998 = vmatprep.subr.bf16.mxu1 %v5233_v30  ;;  %v424_v10 = vmul.f32 %v4799_v63, %v7231_v0  ;;  %v5293_v63 = vld [vmem:[#allocation2] sm:$0xff]   ;;  %s395_s30 = scvt.s32.f32 %s6235_s16 }
  0x4d   : >> { %vm443_vm0 = vcmp.ge.f32.partialorder %v435_v5, 0.0  ;;  %v457_v12 = vmul.f32 %v7229_v2, %v435_v5  ;;  %vm444_vm1 = vcmp.ge.f32.partialorder %v436_v6, 0.0  ;;  %v458_v13 = vmul.f32 %v7229_v2, %v436_v6 }
  0x4e   : >> { %2886 = vmatpush1.bf16.msra.mxu0 %v5235_v31  ;;  %v437_v14 = vadd.f32 %v7230_v1, %v423_v9  ;;  %v438_v15 = vadd.f32 %v7230_v1, %v424_v10 }
  0x4f   : >> { %2999 = vmatpush1.bf16.msra.mxu1 %v5236_v32  ;;  %2887 = vmatprep.subr.bf16.mxu0 %v5237_v33  ;;  %v465_v17 = vsel %vm443_vm0, %v435_v5, %v457_v12  ;;  %v466_v18 = vsel %vm444_vm1, %v436_v6, %v458_v13  ;;  %v5284_v32 = vld [vmem:[%s7218_s4 + $0x258] ss:$12 sps:$4 sm:$0xff]   ;;  %v5298_v12 = vld [vmem:[%s7218_s4 + $0x528] ss:$12 sps:$4 sm:$0xff]  }
  0x50   : >> { %3000 = vmatprep.subr.bf16.mxu1 %v5239_v34  ;;  %v474_v20 = vmul.f32 %v5969_v8, %v465_v17  ;;  %vm445_vm2 = vcmp.ge.f32.partialorder %v437_v14, 0.0  ;;  %v459_v21 = vmul.f32 %v7229_v2, %v437_v14  ;;  %v475_v22 = vmul.f32 %v5969_v8, %v466_v18  ;;  %v5285_v33 = vld [vmem:[%s7218_s4 + $0xc4] ss:$12 sps:$4 sm:$0xff]  }
  0x51   : >> { %vm446_vm3 = vcmp.ge.f32.partialorder %v438_v15, 0.0  ;;  %v460_v25 = vmul.f32 %v7229_v2, %v438_v15 }
  0x52   : >> { %2888 = vmatpush1.bf16.msra.mxu0 %v5241_v35  ;;  %v4765_v26 = vpack.c.bf16 %v474_v20, %v474_v20  ;;  %v467_v27 = vsel %vm445_vm2, %v437_v14, %v459_v21  ;;  %v4766_v28 = vpack.c.bf16 %v475_v22, %v475_v22  ;;  %v5301_v21 = vld [vmem:[%s7218_s4 + $0x390] ss:$12 sps:$4 sm:$0xff]   ;;  %v5308_v22 = vld [vmem:[#allocation2 + $0x68] sm:$0xff]  }
  0x53   : >> { %3001 = vmatpush1.bf16.msra.mxu1 %v5242_v36  ;;  %2889 = vmatprep.subr.bf16.mxu0 %v5243_v37  ;;  %v476_v30 = vmul.f32 %v5969_v8, %v467_v27  ;;  %v468_v31 = vsel %vm446_vm3, %v438_v15, %v460_v25  ;;  %v5287_v37 = vld [vmem:[%s7218_s4 + $0x244] ss:$12 sps:$4 sm:$0xff]   ;;  %v5306_v15 = vld [vmem:[%s7218_s4 + $0x514] ss:$12 sps:$4 sm:$0xff]  }
  0x54   : >> { %3002 = vmatprep.subr.bf16.mxu1 %v5245_v38  ;;  %v514_v34 = vrot.slane %v4765_v26, 7  ;;  %v516_v35 = vrot.slane %v4766_v28, 7  ;;  %v477_v36 = vmul.f32 %v5969_v8, %v468_v31  ;;  %v5304_v28 = vld [vmem:[%s7218_s4 + $0x510] ss:$12 sps:$4 sm:$0xff]  }
  0x55   : >> { %v4767_v38 = vpack.c.bf16 %v476_v30, %v476_v30 }
  0x56   : >> { %2890 = vmatpush2.bf16.msra.mxu0 %v5247_v39  ;;  %v515_v39 = vrot.slane %v514_v34, 4  ;;  %547 = vst [vmem:[#allocation2 + $0x10] sm:$0xe] %v514_v34  ;;  %549 = vst [vmem:[#allocation2 + $0x18] sm:$0xe] %v516_v35  ;;  %v5309_v34 = vld [vmem:[#allocation2 + $0x8] sm:$0xff]  }
  0x57   : >> { %3003 = vmatpush2.bf16.msra.mxu1 %v5248_v40  ;;  %2891 = vmatprep.subr.bf16.mxu0 %v5249_v41  ;;  %v517_v40 = vrot.slane %v516_v35, 4  ;;  %v4768_v41 = vpack.c.bf16 %v477_v36, %v477_v36 }
  0x58   : >> { %3004 = vmatprep.subr.bf16.mxu1 %v5251_v42  ;;  %v4809_v42 = vld [vmem:[%s6004_s10] sm:$0xff]   ;;  %548 = vst [vmem:[#allocation2 + $0x14] sm:$0x1] %v515_v39 }
  0x59   : >> { %550 = vst [vmem:[#allocation2 + $0x1c] sm:$0x1] %v517_v40  ;;  %v5314_v40 = vld [vmem:[%s7218_s4 + $0x4f8] ss:$12 sps:$4 sm:$0xff]  }
  0x5a   : >> { %2892 = vmatpush2.bf16.msra.mxu0 %v5253_v43  ;;  %v4861_v43 = vld [vmem:[%s5929_s9 + $0x10] sm:$0xff]  }
  0x5b   : >> { %3005 = vmatpush2.bf16.msra.mxu1 %v5254_v44  ;;  %2893 = vmatprep.subr.bf16.mxu0 %v5255_v45  ;;  %v5289_v44 = vld [vmem:[%s7218_s4 + $0xc0] ss:$12 sps:$4 sm:$0xff]   ;;  %v518_v45 = vrot.slane %v4767_v38, 7  ;;  %v5316_v38 = vld [vmem:[%s7218_s4 + $0x4fc] ss:$12 sps:$4 sm:$0xff]  }
  0x5c   : >> { %3006 = vmatprep.subr.bf16.mxu1 %v5257_v46  ;;  %v4810_v46 = vunpack.c.l.bf16 %v4809_v42 }
  0x5d   : >> { %551 = vst [vmem:[#allocation2 + $0x20] sm:$0xe] %v518_v45 }
  0x5e   : >> { %2894 = vmatpush2.bf16.msra.mxu0 %v5259_v47  ;;  %v4802_v47 = vunpack.c.l.bf16 %v4861_v43  ;;  %v582_v55 = vmul.f32 %v4810_v46, %v7231_v0  ;;  %v5322_v46 = vld [vmem:[%s7218_s4 + $0x4e4] ss:$12 sps:$4 sm:$0xff]  }
  0x5f   : >> { %3007 = vmatpush2.bf16.msra.mxu1 %v5260_v48  ;;  %2895 = vmatprep.subr.bf16.mxu0 %v5261_v49  ;;  %v4811_v48 = vunpack.c.h.bf16 %v4809_v42  ;;  %v5290_v49 = vld [vmem:[%s7218_s4 + $0x240] ss:$12 sps:$4 sm:$0xff]  }
  0x60   : >> { %3008 = vmatprep.subr.bf16.mxu1 %v5263_v50  ;;  %v520_v50 = vrot.slane %v4768_v41, 7  ;;  %v425_v56 = vmul.f32 %v4802_v47, %v7231_v0  ;;  %v590_v60 = vadd.f32 %v7230_v1, %v582_v55  ;;  %v5319_v41 = vld [vmem:[%s7218_s4 + $0x364] ss:$12 sps:$4 sm:$0xff]   ;;  %v5329_v47 = vld [vmem:[%s7218_s4 + $0x34c] ss:$12 sps:$4 sm:$0xff]  }
  0x61   : >> { %v583_v57 = vmul.f32 %v4811_v48, %v7231_v0  ;;  %v4863_v48 = vld [vmem:[%s6004_s10 + $0x8] sm:$0xff]  }
  0x62   : >> { %2896 = vmatpush2.bf16.msra.mxu0 %v5265_v51  ;;  %v4803_v51 = vunpack.c.h.bf16 %v4861_v43  ;;  %553 = vst [vmem:[#allocation2 + $0x28] sm:$0xe] %v520_v50  ;;  %v439_v61 = vadd.f32 %v7230_v1, %v425_v56  ;;  %vm598_vm4 = vcmp.ge.f32.partialorder %v590_v60, 0.0  ;;  %v606_v5 = vmul.f32 %v7229_v2, %v590_v60  ;;  %v5327_v55 = vld [vmem:[%s7218_s4 + $0x348] ss:$12 sps:$4 sm:$0xff]  }
  0x63   : >> { %3009 = vmatpush2.bf16.msra.mxu1 %v5266_v52  ;;  %2897 = vmatprep.subr.bf16.mxu0 %v5267_v54  ;;  %v519_v52 = vrot.slane %v518_v45, 4  ;;  %v5300_v54 = vld [vmem:[%s7218_s4 + $0x52c] ss:$12 sps:$4 sm:$0xff]   ;;  %v591_v62 = vadd.f32 %v7230_v1, %v583_v57 }
  0x64   : >> { %3010 = vmatprep.subr.bf16.mxu1 %v5269_v58  ;;  %v521_v58 = vrot.slane %v520_v50, 4  ;;  %v426_v59 = vmul.f32 %v4803_v51, %v7231_v0  ;;  %vm447_vm5 = vcmp.ge.f32.partialorder %v439_v61, 0.0  ;;  %v461_v6 = vmul.f32 %v7229_v2, %v439_v61  ;;  %v5317_v45 = vld [vmem:[%s7218_s4 + $0x360] ss:$12 sps:$4 sm:$0xff]  }
  0x65   : >> { %552 = vst [vmem:[#allocation2 + $0x24] sm:$0x1] %v519_v52  ;;  %vm599_vm6 = vcmp.ge.f32.partialorder %v591_v62, 0.0  ;;  %v607_v9 = vmul.f32 %v7229_v2, %v591_v62  ;;  %v614_v13 = vsel %vm598_vm4, %v590_v60, %v606_v5  ;;  %v4814_v50 = vunpack.c.l.bf16 %v4863_v48  ;;  %v5332_v52 = vld [vmem:[%s7218_s4 + $0x4cc] ss:$12 sps:$4 sm:$0xff]   ;;  %v5325_v60 = vld [vmem:[#allocation2 + $0x10] sm:$0xff]  }
  0x66   : >> { %2898 = vmatpush2.bf16.msra.mxu0 %v5271_v3  ;;  %554 = vst [vmem:[#allocation2 + $0x2c] sm:$0x1] %v521_v58  ;;  %v440_v3 = vadd.f32 %v7230_v1, %v426_v59  ;;  %v469_v14 = vsel %vm447_vm5, %v439_v61, %v461_v6  ;;  %v4774_v17 = vpack.c.bf16 %v614_v13, %v614_v13  ;;  %v4815_v51 = vunpack.c.h.bf16 %v4863_v48  ;;  %v5335_v61 = vld [vmem:[%s7218_s4 + $0x334] ss:$12 sps:$4 sm:$0xff]  }
  0x67   : >> { %3011 = vmatpush2.bf16.msra.mxu1 %v5272_v4  ;;  %2899 = vmatprep.subr.bf16.mxu0 %v5273_v7  ;;  %v5295_v4 = vld [vmem:[%s7218_s4 + $0x3a8] ss:$12 sps:$4 sm:$0xff]   ;;  %v478_v18 = vmul.f32 %v5969_v8, %v469_v14  ;;  %v584_v56 = vmul.f32 %v4814_v50, %v7231_v0 }
  0x68   : >> { %3012 = vmatprep.subr.bf16.mxu1 %v5275_v11  ;;  %v5303_v7 = vld [vmem:[%s7218_s4 + $0x394] ss:$12 sps:$4 sm:$0xff]   ;;  %vm448_vm7 = vcmp.ge.f32.partialorder %v440_v3, 0.0  ;;  %v462_v10 = vmul.f32 %v7229_v2, %v440_v3  ;;  %v654_v26 = vrot.slane %v4774_v17, 7  ;;  %v585_v58 = vmul.f32 %v4815_v51, %v7231_v0 }
  0x69   : >> { %v5291_v11 = vld [vmem:[#allocation2 + $0x10] sm:$0xff]   ;;  %v4769_v27 = vpack.c.bf16 %v478_v18, %v478_v18 }
  0x6a   : >> { %2900 = vmatpush2.bf16.msra.mxu0 %v5277_v16  ;;  %v5307_v16 = vld [vmem:[#allocation2 + $0x18] sm:$0xff]   ;;  %v470_v20 = vsel %vm448_vm7, %v440_v3, %v462_v10  ;;  %2905 = vmatprep.mubr.bf16.mxu0 %v5291_v11  ;;  %687 = vst [vmem:[#allocation2 + $0x70] sm:$0xe] %v654_v26  ;;  %v592_v3 = vadd.f32 %v7230_v1, %v584_v56  ;;  %v5359_v48 = vld [vmem:[%s7218_s4 + $0x468] ss:$12 sps:$4 sm:$0xff]  }
  0x6b   : >> { %3013 = vmatpush2.bf16.msra.mxu1 %v5278_v19  ;;  %2901 = vmatprep.subr.bf16.mxu0 %v5279_v23  ;;  %v615_v19 = vsel %vm599_vm6, %v591_v62, %v607_v9  ;;  %v5330_v62 = vld [vmem:[%s7218_s4 + $0x4c8] ss:$12 sps:$4 sm:$0xff]   ;;  %v593_v5 = vadd.f32 %v7230_v1, %v585_v58  ;;  %v5365_v58 = vld [vmem:[%s7218_s4 + $0x450] ss:$12 sps:$4 sm:$0xff]  }
  0x6c   : >> { %3014 = vmatprep.subr.bf16.mxu1 %v5281_v24  ;;  %v4775_v23 = vpack.c.bf16 %v615_v19, %v615_v19  ;;  %v479_v24 = vmul.f32 %v5969_v8, %v470_v20  ;;  %v5294_v25 = vld [vmem:[#allocation2 + $0x20] sm:$0xff]   ;;  %vm600_vm8 = vcmp.ge.f32.partialorder %v592_v3, 0.0  ;;  %v608_v10 = vmul.f32 %v7229_v2, %v592_v3  ;;  %v5341_v19 = vld [vmem:[#allocation2 + $0x18] sm:$0xff]   ;;  %v4864_v51 = vld [vmem:[%s6004_s10 + $0x10] sm:$0xff]  }
  0x6d   : >> { %v5323_v42 = vld [vmem:[#allocation2 + $0x20] sm:$0xff]   ;;  %vm601_vm9 = vcmp.ge.f32.partialorder %v593_v5, 0.0  ;;  %v609_v13 = vmul.f32 %v7229_v2, %v593_v5  ;;  %v5345_v20 = vld [vmem:[%s7218_s4 + $0x31c] ss:$12 sps:$4 sm:$0xff]  }
  0x6e   : >> { %2902 = vmatpush2.bf16.msra.mxu0 %v5283_v29  ;;  %v5313_v29 = vld [vmem:[%s7218_s4 + $0x37c] ss:$12 sps:$4 sm:$0xff]   ;;  %v656_v30 = vrot.slane %v4775_v23, 7  ;;  %v4770_v31 = vpack.c.bf16 %v479_v24, %v479_v24  ;;  %v616_v17 = vsel %vm600_vm8, %v592_v3, %v608_v10  ;;  %v5343_v24 = vld [vmem:[%s7218_s4 + $0x318] ss:$12 sps:$4 sm:$0xff]   ;;  %vm4011_vm8 = vcmask 1045504  }
  0x6f   : >> { %3015 = vmatpush2.bf16.msra.mxu1 %v5284_v32  ;;  %2903 = vmatprep.subr.bf16.mxu0 %v5285_v33  ;;  %v655_v32 = vrot.slane %v654_v26, 4  ;;  %v522_v33 = vrot.slane %v4769_v27, 7 }
  0x70   : >> { %3016 = vmatprep.subr.bf16.mxu1 %v5287_v37  ;;  %v657_v35 = vrot.slane %v656_v30, 4  ;;  %689 = vst [vmem:[#allocation2 + $0x78] sm:$0xe] %v656_v30  ;;  %v524_v36 = vrot.slane %v4770_v31, 7  ;;  %v5311_v37 = vld [vmem:[%s7218_s4 + $0x378] ss:$12 sps:$4 sm:$0xff]  }
  0x71   : >> { %688 = vst [vmem:[#allocation2 + $0x74] sm:$0x1] %v655_v32  ;;  %v523_v39 = vrot.slane %v522_v33, 4  ;;  %555 = vst [vmem:[#allocation2 + $0x30] sm:$0xe] %v522_v33 }
  0x72   : >> { %2904 = vmatpush2.bf16.msra.mxu0 %v5289_v44  ;;  %690 = vst [vmem:[#allocation2 + $0x7c] sm:$0x1] %v657_v35  ;;  %v525_v43 = vrot.slane %v524_v36, 4  ;;  %557 = vst [vmem:[#allocation2 + $0x38] sm:$0xe] %v524_v36  ;;  %v5310_v44 = vld [vmem:[#allocation2 + $0x28] sm:$0xff]  }
  0x73   : >> { %3017 = vmatpush2.bf16.msra.mxu1 %v5290_v49  ;;  %3099 = vmatprep.subr.bf16.mxu0 %v5297_v53  ;;  %556 = vst [vmem:[#allocation2 + $0x34] sm:$0x1] %v523_v39  ;;  %v5320_v49 = vld [vmem:[%s7218_s4 + $0x4e0] ss:$12 sps:$4 sm:$0xff]   ;;  %v4862_v53 = vld [vmem:[%s5929_s9 + $0x18] sm:$0xff]   ;;  %s4782_s9 = sshll.u32 %s7308_s21, 5 }
  0x74   : >> { %3212 = vmatprep.subr.bf16.mxu1 %v5300_v54  ;;  %558 = vst [vmem:[#allocation2 + $0x3c] sm:$0x1] %v525_v43  ;;  %v4806_v57 = vunpack.c.l.bf16 %v4862_v53  ;;  %v4807_v59 = vunpack.c.h.bf16 %v4862_v53  ;;  %v5349_v39 = vld [vmem:[%s7218_s4 + $0x300] ss:$12 sps:$4 sm:$0xff]   ;;  %s6253_s11 = scalar_lea.vmem %s5772_s14, %s4782_s9 }
  0x75   : >> { %2906 = vmatmul.mubr.bf16.vlgmr.msra.gmra.mxu0 %v5293_v63  ;;  %v5339_v63 = vld [vmem:[#allocation2 + $0x28] sm:$0xff]   ;;  %v5367_v53 = vld [vmem:[%s7218_s4 + $0x454] ss:$12 sps:$4 sm:$0xff]  }
  0x76   : >> { %3100 = vmatpush1.bf16.msra.mxu0 %v5295_v4  ;;  %2915 = vmatprep.mubr.bf16.mxu0 %v5307_v16  ;;  %v427_v4 = vmul.f32 %v4806_v57, %v7231_v0  ;;  %v5336_v16 = vld [vmem:[%s7218_s4 + $0x4b0] ss:$12 sps:$4 sm:$0xff]   ;;  %v5352_v43 = vld [vmem:[%s7218_s4 + $0x480] ss:$12 sps:$4 sm:$0xff]  }
  0x77   : >> { %3019 = vmatmul.mubr.bf16.vlgmr.msra.gmra.mxu1 %v5294_v25  ;;  %3101 = vmatprep.subr.bf16.mxu0 %v5303_v7  ;;  %v428_v7 = vmul.f32 %v4807_v59, %v7231_v0 }
  0x78   : >> { %3213 = vmatpush1.bf16.msra.mxu1 %v5298_v12  ;;  %3028 = vmatprep.mubr.bf16.mxu1 %v5308_v22  ;;  %v5324_v54 = vld [vmem:[#allocation2 + $0x70] sm:$0xff]   ;;  %v441_v11 = vadd.f32 %v7230_v1, %v427_v4  ;;  %v617_v22 = vsel %vm601_vm9, %v593_v5, %v609_v13  ;;  %v5378_v13 = vld [vmem:[%s7218_s4 + $0x5b8] ss:$12 sps:$4 sm:$0xff]   ;;  %vm4084_vm9 = vcmask 1043456  }
  0x79   : >> { %3214 = vmatprep.subr.bf16.mxu1 %v5306_v15  ;;  %v5340_v9 = vld [vmem:[#allocation2 + $0x78] sm:$0xff]   ;;  %v5338_v12 = vld [vmem:[%s7218_s4 + $0x4b4] ss:$12 sps:$4 sm:$0xff]   ;;  %v442_v14 = vadd.f32 %v7230_v1, %v428_v7  ;;  %v4777_v26 = vpack.c.bf16 %v617_v22, %v617_v22 }
  0x7a   : >> { %3102 = vmatpush1.bf16.msra.mxu0 %v5301_v21  ;;  %v5326_v6 = vld [vmem:[#allocation2 + $0x30] sm:$0xff]   ;;  %vm449_vm10 = vcmp.ge.f32.partialorder %v441_v11, 0.0  ;;  %v463_v18 = vmul.f32 %v7229_v2, %v441_v11  ;;  %v4776_v21 = vpack.c.bf16 %v616_v17, %v616_v17  ;;  %v5375_v7 = vld [vmem:[%s7218_s4 + $0x438] ss:$12 sps:$4 sm:$0xff]  }
  0x7b   : >> { %3103 = vmatprep.subr.bf16.mxu0 %v5313_v29  ;;  %v5333_v15 = vld [vmem:[%s7218_s4 + $0x330] ss:$12 sps:$4 sm:$0xff]   ;;  %vm450_vm11 = vcmp.ge.f32.partialorder %v442_v14, 0.0  ;;  %v464_v23 = vmul.f32 %v7229_v2, %v442_v14 }
  0x7c   : >> { %3215 = vmatpush1.bf16.msra.mxu1 %v5304_v28  ;;  %v471_v25 = vsel %vm449_vm10, %v441_v11, %v463_v18  ;;  %v5342_v27 = vld [vmem:[#allocation2 + $0x38] sm:$0xff]   ;;  %v5351_v29 = vld [vmem:[%s7218_s4 + $0x304] ss:$12 sps:$4 sm:$0xff]   ;;  %v658_v30 = vrot.slane %v4776_v21, 7  ;;  %v5373_v11 = vld [vmem:[#allocation2 + $0x28] sm:$0xff]   ;;  %vm4200_vm10 = vcmask 1041409  }
  0x7d   : >> { %2916 = vmatmul.mubr.bf16.gmra.mxu0 %v5309_v34  ;;  %3216 = vmatprep.subr.bf16.mxu1 %v5316_v38  ;;  %v5348_v28 = vld [vmem:[%s7218_s4 + $0x49c] ss:$12 sps:$4 sm:$0xff]   ;;  %v480_v31 = vmul.f32 %v5969_v8, %v471_v25  ;;  %v472_v32 = vsel %vm450_vm11, %v442_v14, %v464_v23  ;;  %v5355_v33 = vld [vmem:[#allocation2 + $0x30] sm:$0xff]   ;;  %v660_v34 = vrot.slane %v4777_v26, 7  ;;  %v5346_v38 = vld [vmem:[%s7218_s4 + $0x498] ss:$12 sps:$4 sm:$0xff]  }
  0x7e   : >> { %3104 = vmatpush1.bf16.msra.mxu0 %v5311_v37  ;;  %2925 = vmatprep.mubr.bf16.mxu0 %v5323_v42  ;;  %v481_v35 = vmul.f32 %v5969_v8, %v472_v32  ;;  %v659_v36 = vrot.slane %v658_v30, 4  ;;  %691 = vst [vmem:[#allocation2 + $0x80] sm:$0xe] %v658_v30  ;;  %v5354_v8 = vld [vmem:[%s7218_s4 + $0x484] ss:$12 sps:$4 sm:$0xff]   ;;  %v5371_v56 = vld [vmem:[#allocation2 + $0x38] sm:$0xff]  }
  0x7f   : >> { %3029 = vmatmul.mubr.bf16.gmra.mxu1 %v5310_v44  ;;  %3105 = vmatprep.subr.bf16.mxu0 %v5319_v41  ;;  %v4771_v37 = vpack.c.bf16 %v480_v31, %v480_v31  ;;  %693 = vst [vmem:[#allocation2 + $0x88] sm:$0xe] %v660_v34  ;;  %v5383_v17 = vld [vmem:[%s7218_s4 + $0x424] ss:$12 sps:$4 sm:$0xff]   ;;  %v5393_v23 = vld [vmem:[%s7218_s4 + $0x40c] ss:$12 sps:$4 sm:$0xff]  }
  0x80   : >> { %3217 = vmatpush1.bf16.msra.mxu1 %v5314_v40  ;;  %3038 = vmatprep.mubr.bf16.mxu1 %v5324_v54  ;;  %v661_v40 = vrot.slane %v660_v34, 4  ;;  %v4772_v41 = vpack.c.bf16 %v481_v35, %v481_v35  ;;  %692 = vst [vmem:[#allocation2 + $0x84] sm:$0x1] %v659_v36  ;;  %v4818_v54 = vunpack.c.l.bf16 %v4864_v51  ;;  %v5386_v21 = vld [vmem:[%s7218_s4 + $0x5a4] ss:$12 sps:$4 sm:$0xff]   ;;  %vm4202_vm11 = vcmask 1042434  }
  0x81   : >> { %3218 = vmatprep.subr.bf16.mxu1 %v5322_v46  ;;  %v526_v42 = vrot.slane %v4771_v37, 7  ;;  %v5384_v25 = vld [vmem:[%s7218_s4 + $0x5a0] ss:$12 sps:$4 sm:$0xff]   ;;  %v5391_v30 = vld [vmem:[%s7218_s4 + $0x408] ss:$12 sps:$4 sm:$0xff]  }
  0x82   : >> { %3106 = vmatpush1.bf16.msra.mxu0 %v5317_v45  ;;  %694 = vst [vmem:[#allocation2 + $0x8c] sm:$0x1] %v661_v40  ;;  %v528_v44 = vrot.slane %v4772_v41, 7  ;;  %v5357_v45 = vld [vmem:[#allocation2 + $0x20] sm:$0xff]   ;;  %v586_v59 = vmul.f32 %v4818_v54, %v7231_v0  ;;  %v5396_v31 = vld [vmem:[%s7218_s4 + $0x58c] ss:$12 sps:$4 sm:$0xff]  }
  0x83   : >> { %3107 = vmatprep.subr.bf16.mxu0 %v5329_v47  ;;  %v527_v46 = vrot.slane %v526_v42, 4  ;;  %559 = vst [vmem:[#allocation2 + $0x40] sm:$0xe] %v526_v42  ;;  %v5361_v47 = vld [vmem:[%s7218_s4 + $0x46c] ss:$12 sps:$4 sm:$0xff]   ;;  %v5390_v35 = vld [vmem:[#allocation2 + $0x50] sm:$0xff]  }
  0x84   : >> { %3219 = vmatpush1.bf16.msra.mxu1 %v5320_v49  ;;  %v5364_v49 = vld [vmem:[%s7218_s4 + $0x5ec] ss:$12 sps:$4 sm:$0xff]   ;;  %v529_v50 = vrot.slane %v528_v44, 4  ;;  %561 = vst [vmem:[#allocation2 + $0x48] sm:$0xe] %v528_v44  ;;  %v594_v3 = vadd.f32 %v7230_v1, %v586_v59 }
  0x85   : >> { %2926 = vmatmul.mubr.bf16.gmra.mxu0 %v5325_v60  ;;  %3220 = vmatprep.subr.bf16.mxu1 %v5332_v52  ;;  %560 = vst [vmem:[#allocation2 + $0x44] sm:$0x1] %v527_v46  ;;  %v5362_v52 = vld [vmem:[%s7218_s4 + $0x5e8] ss:$12 sps:$4 sm:$0xff]   ;;  %v5397_v36 = vld [vmem:[%s7218_s4 + $0x3f0] ss:$12 sps:$4 sm:$0xff]  }
  0x86   : >> { %3108 = vmatpush1.bf16.msra.mxu0 %v5327_v55  ;;  %2935 = vmatprep.mubr.bf16.mxu0 %v5339_v63  ;;  %562 = vst [vmem:[#allocation2 + $0x4c] sm:$0x1] %v529_v50  ;;  %v4819_v55 = vunpack.c.h.bf16 %v4864_v51  ;;  %v5377_v63 = vld [vmem:[%s7218_s4 + $0x43c] ss:$12 sps:$4 sm:$0xff]   ;;  %vm602_vm12 = vcmp.ge.f32.partialorder %v594_v3, 0.0 }
  0x87   : >> { %3039 = vmatmul.mubr.bf16.gmra.mxu1 %v5326_v6  ;;  %3109 = vmatprep.subr.bf16.mxu0 %v5335_v61  ;;  %v5356_v57 = vld [vmem:[#allocation2 + $0x80] sm:$0xff]   ;;  %v5394_v34 = vld [vmem:[%s7218_s4 + $0x588] ss:$12 sps:$4 sm:$0xff]   ;;  %v5406_v51 = vld [vmem:[#allocation2 + $0x58] sm:$0xff]  }
  0x88   : >> { %3221 = vmatpush1.bf16.msra.mxu1 %v5330_v62  ;;  %3048 = vmatprep.mubr.bf16.mxu1 %v5340_v9  ;;  %v587_v60 = vmul.f32 %v4819_v55, %v7231_v0  ;;  %v5370_v61 = vld [vmem:[%s7218_s4 + $0x5d4] ss:$12 sps:$4 sm:$0xff]   ;;  %v5368_v62 = vld [vmem:[%s7218_s4 + $0x5d0] ss:$12 sps:$4 sm:$0xff]   ;;  %v610_v9 = vmul.f32 %v7229_v2, %v594_v3  ;;  %v5410_v44 = vld [vmem:[%s7218_s4 + $0x558] ss:$12 sps:$4 sm:$0xff]  }
  0x89   : >> { %3222 = vmatprep.subr.bf16.mxu1 %v5338_v12  ;;  %v5372_v5 = vld [vmem:[#allocation2 + $0x88] sm:$0xff]   ;;  %v5402_v37 = vld [vmem:[%s7218_s4 + $0x574] ss:$12 sps:$4 sm:$0xff]   ;;  %v5415_v46 = vld [vmem:[%s7218_s4 + $0x3c4] ss:$12 sps:$4 sm:$0xff]  }
  0x8a   : >> { %3110 = vmatpush1.bf16.msra.mxu0 %v5333_v15  ;;  %v595_v4 = vadd.f32 %v7230_v1, %v587_v60  ;;  %v5380_v12 = vld [vmem:[%s7218_s4 + $0x5bc] ss:$12 sps:$4 sm:$0xff]   ;;  %v618_v15 = vsel %vm602_vm12, %v594_v3, %v610_v9  ;;  %vm4204_vm12 = vcmask 1043459  }
  0x8b   : >> { %3111 = vmatprep.subr.bf16.mxu0 %v5345_v20  ;;  %v4778_v18 = vpack.c.bf16 %v618_v15, %v618_v15  ;;  %v5381_v20 = vld [vmem:[%s7218_s4 + $0x420] ss:$12 sps:$4 sm:$0xff]   ;;  %v5409_v40 = vld [vmem:[%s7218_s4 + $0x3dc] ss:$12 sps:$4 sm:$0xff]  }
  0x8c   : >> { %3223 = vmatpush1.bf16.msra.mxu1 %v5336_v16  ;;  %v5358_v6 = vld [vmem:[#allocation2 + $0x40] sm:$0xff]   ;;  %v611_v10 = vmul.f32 %v7229_v2, %v595_v4  ;;  %vm603_vm13 = vcmp.ge.f32.partialorder %v595_v4, 0.0 }
  0x8d   : >> { %2936 = vmatmul.mubr.bf16.gmra.mxu0 %v5341_v19  ;;  %3224 = vmatprep.subr.bf16.mxu1 %v5348_v28  ;;  %v5387_v14 = vld [vmem:[#allocation2 + $0x40] sm:$0xff]   ;;  %v662_v22 = vrot.slane %v4778_v18, 7  ;;  %v5389_v28 = vld [vmem:[#allocation2 + $0x30] sm:$0xff]   ;;  %v5403_v32 = vld [vmem:[#allocation2 + $0x48] sm:$0xff]  }
  0x8e   : >> { %3112 = vmatpush1.bf16.msra.mxu0 %v5343_v24  ;;  %2945 = vmatprep.mubr.bf16.mxu0 %v5355_v33  ;;  %v619_v16 = vsel %vm603_vm13, %v595_v4, %v611_v10  ;;  %v5374_v24 = vld [vmem:[#allocation2 + $0x48] sm:$0xff]   ;;  %v5399_v33 = vld [vmem:[%s7218_s4 + $0x3f4] ss:$12 sps:$4 sm:$0xff]   ;;  %vm4206_vm13 = vcmask 1044484  }
  0x8f   : >> { %3049 = vmatmul.mubr.bf16.gmra.mxu1 %v5342_v27  ;;  %3113 = vmatprep.subr.bf16.mxu0 %v5351_v29  ;;  %v4779_v19 = vpack.c.bf16 %v619_v16, %v619_v16  ;;  %v663_v27 = vrot.slane %v662_v22, 4  ;;  %695 = vst [vmem:[#allocation2 + $0x90] sm:$0xe] %v662_v22  ;;  %v5430_v4 = vld [vmem:[%s7218_s4 + $0x694] ss:$12 sps:$4 sm:$0xff]  }
  0x90   : >> { %3225 = vmatpush1.bf16.msra.mxu1 %v5346_v38  ;;  %3058 = vmatprep.mubr.bf16.mxu1 %v5356_v57  ;;  %v5400_v38 = vld [vmem:[%s7218_s4 + $0x570] ss:$12 sps:$4 sm:$0xff]   ;;  %v5423_v57 = vld [vmem:[%s7218_s4 + $0x6ac] ss:$12 sps:$4 sm:$0xff]  }
  0x91   : >> { %3226 = vmatprep.subr.bf16.mxu1 %v5354_v8  ;;  %v664_v26 = vrot.slane %v4779_v19, 7  ;;  %696 = vst [vmem:[#allocation2 + $0x94] sm:$0x1] %v663_v27  ;;  %v5407_v8 = vld [vmem:[%s7218_s4 + $0x3d8] ss:$12 sps:$4 sm:$0xff]  }
  0x92   : >> { %3114 = vmatpush1.bf16.msra.mxu0 %v5349_v39  ;;  %v5405_v39 = vld [vmem:[#allocation2 + $0x38] sm:$0xff]   ;;  %v5444_v27 = vld [vmem:[%s7218_s4 + $0x664] ss:$12 sps:$4 sm:$0xff]  }
  0x93   : >> { %3115 = vmatprep.subr.bf16.mxu0 %v5361_v47  ;;  %v665_v29 = vrot.slane %v664_v26, 4  ;;  %697 = vst [vmem:[#allocation2 + $0x98] sm:$0xe] %v664_v26  ;;  %v4825_v47 = vld [vmem:[%s6253_s11] sm:$0xff]   ;;  %v5437_v16 = vld [vmem:[%s7218_s4 + $0x67c] ss:$12 sps:$4 sm:$0xff]  }
  0x94   : >> { %3227 = vmatpush1.bf16.msra.mxu1 %v5352_v43  ;;  %v5412_v43 = vld [vmem:[%s7218_s4 + $0x55c] ss:$12 sps:$4 sm:$0xff]   ;;  %v4827_v50 = vunpack.c.h.bf16 %v4825_v47  ;;  %v5435_v26 = vld [vmem:[%s7218_s4 + $0x678] ss:$12 sps:$4 sm:$0xff]  }
  0x95   : >> { %2946 = vmatmul.mubr.bf16.gmra.mxu0 %v5357_v45  ;;  %3228 = vmatprep.subr.bf16.mxu1 %v5364_v49  ;;  %698 = vst [vmem:[#allocation2 + $0x9c] sm:$0x1] %v665_v29  ;;  %v5419_v45 = vld [vmem:[#allocation2 + $0x80] sm:$0xff]   ;;  %v4826_v49 = vunpack.c.l.bf16 %v4825_v47  ;;  %v5427_v19 = vld [vmem:[#allocation2 + $0x78] sm:$0xff]  }
  0x96   : >> { %3116 = vmatpush2.bf16.msra.mxu0 %v5359_v48  ;;  %2955 = vmatprep.mubr.bf16.mxu0 %v5371_v56  ;;  %v5413_v48 = vld [vmem:[%s7218_s4 + $0x3c0] ss:$12 sps:$4 sm:$0xff]   ;;  %v723_v55 = vmul.f32 %v4827_v50, %v7231_v0  ;;  %v5420_v56 = vld [vmem:[#allocation2 + $0x70] sm:$0xff]  }
  0x97   : >> { %3117 = vmatprep.subr.bf16.mxu0 %v5367_v53  ;;  %3059 = vmatmul.mubr.bf16.gmra.mxu1 %v5358_v6  ;;  %v5416_v53 = vld [vmem:[%s7218_s4 + $0x540] ss:$12 sps:$4 sm:$0xff]   ;;  %v722_v54 = vmul.f32 %v4826_v49, %v7231_v0 }
  0x98   : >> { %3229 = vmatpush2.bf16.msra.mxu1 %v5362_v52  ;;  %3068 = vmatprep.mubr.bf16.mxu1 %v5372_v5  ;;  %v5388_v41 = vld [vmem:[#allocation2 + $0x90] sm:$0xff]   ;;  %v731_v60 = vadd.f32 %v7230_v1, %v723_v55 }
  0x99   : >> { %3230 = vmatprep.subr.bf16.mxu1 %v5370_v61  ;;  %v5418_v52 = vld [vmem:[%s7218_s4 + $0x544] ss:$12 sps:$4 sm:$0xff]   ;;  %v730_v59 = vadd.f32 %v7230_v1, %v722_v54  ;;  %v6285_v61 = vstv %s395_s30  ;;  %v5449_v54 = vld [vmem:[%s7218_s4 + $0x648] ss:$12 sps:$4 sm:$0xff]  }
  0x9a   : >> { %3118 = vmatpush2.bf16.msra.mxu0 %v5365_v58  ;;  %v5421_v58 = vld [vmem:[%s7218_s4 + $0x6a8] ss:$12 sps:$4 sm:$0xff]   ;;  %vm739_vm15 = vcmp.ge.f32.partialorder %v731_v60, 0.0  ;;  %v747_v3 = vmul.f32 %v7229_v2, %v731_v60 }
  0x9b   : >> { %3119 = vmatprep.subr.bf16.mxu0 %v5377_v63  ;;  %vm738_vm14 = vcmp.ge.f32.partialorder %v730_v59, 0.0  ;;  %v746_v63 = vmul.f32 %v7229_v2, %v730_v59 }
  0x9c   : >> { %3231 = vmatpush2.bf16.msra.mxu1 %v5368_v62  ;;  %v5404_v42 = vld [vmem:[#allocation2 + $0x98] sm:$0xff]   ;;  %v5426_v62 = vld [vmem:[#allocation2 + $0x88] sm:$0xff]   ;;  %v755_v6 = vsel %vm739_vm15, %v731_v60, %v747_v3  ;;  %vm4210_vm15 = vcmask 1046534  }
  0x9d   : >> { %2956 = vmatmul.mubr.bf16.gmra.mxu0 %v5373_v11  ;;  %3232 = vmatprep.subr.bf16.mxu1 %v5380_v12  ;;  %v754_v5 = vsel %vm738_vm14, %v730_v59, %v746_v63  ;;  %v764_v10 = vmul.f32 %v6285_v61, %v755_v6  ;;  %v5455_v60 = vld [vmem:[%s7218_s4 + $0xb0] ss:$12 sps:$4 sm:$0xff]   ;;  %v5462_v6 = vld [vmem:[%s7218_s4 + $0x634] ss:$12 sps:$4 sm:$0xff]   ;;  %vm4208_vm14 = vcmask 1045509  }
  0x9e   : >> { %3120 = vmatpush2.bf16.msra.mxu0 %v5375_v7  ;;  %2965 = vmatprep.mubr.bf16.mxu0 %v5387_v14  ;;  %v4866_v7 = vld [vmem:[%s6253_s11 + $0x8] sm:$0xff]   ;;  %v763_v9 = vmul.f32 %v6285_v61, %v754_v5  ;;  %v5456_v5 = vld [vmem:[%s7218_s4 + $0x158] ss:$12 sps:$4 sm:$0xff]  }
  0x9f   : >> { %3121 = vmatprep.subr.bf16.mxu0 %v5383_v17  ;;  %3069 = vmatmul.mubr.bf16.gmra.mxu1 %v5374_v24  ;;  %v4830_v11 = vunpack.c.l.bf16 %v4866_v7  ;;  %v4831_v12 = vunpack.c.h.bf16 %v4866_v7  ;;  %v4784_v15 = vpack.c.bf16 %v764_v10, %v764_v10 }
  0xa0   : >> { %3233 = vmatpush2.bf16.msra.mxu1 %v5378_v13  ;;  %3078 = vmatprep.mubr.bf16.mxu1 %v5388_v41  ;;  %v5428_v13 = vld [vmem:[%s7218_s4 + $0x690] ss:$12 sps:$4 sm:$0xff]   ;;  %v4783_v14 = vpack.c.bf16 %v763_v9, %v763_v9 }
  0xa1   : >> { %3234 = vmatprep.subr.bf16.mxu1 %v5386_v21  ;;  %v724_v17 = vmul.f32 %v4830_v11, %v7231_v0  ;;  %v725_v18 = vmul.f32 %v4831_v12, %v7231_v0  ;;  %v805_v22 = vrot.slane %v4784_v15, 7 }
  0xa2   : >> { %3122 = vmatpush2.bf16.msra.mxu0 %v5381_v20  ;;  %v4865_v20 = vld [vmem:[%s6004_s10 + $0x18] sm:$0xff]   ;;  %v803_v21 = vrot.slane %v4783_v14, 7 }
  0xa3   : >> { %3123 = vmatprep.subr.bf16.mxu0 %v5393_v23  ;;  %v5433_v23 = vld [vmem:[#allocation2 + $0x90] sm:$0xff]   ;;  %v732_v24 = vadd.f32 %v7230_v1, %v724_v17  ;;  %v4823_v29 = vunpack.c.h.bf16 %v4865_v20  ;;  %838 = vst [vmem:[#allocation2 + $0xd8] sm:$0xe] %v805_v22 }
  0xa4   : >> { %3235 = vmatpush2.bf16.msra.mxu1 %v5384_v25  ;;  %v733_v25 = vadd.f32 %v7230_v1, %v725_v18  ;;  %836 = vst [vmem:[#allocation2 + $0xd0] sm:$0xe] %v803_v21  ;;  %v5458_v18 = vld [vmem:[%s7218_s4 + $0x98] ss:$12 sps:$4 sm:$0xff]  }
  0xa5   : >> { %2966 = vmatmul.mubr.bf16.gmra.mxu0 %v5389_v28  ;;  %3236 = vmatprep.subr.bf16.mxu1 %v5396_v31  ;;  %v4822_v28 = vunpack.c.l.bf16 %v4865_v20  ;;  %v806_v31 = vrot.slane %v805_v22, 4  ;;  %vm740_vm0 = vcmp.ge.f32.partialorder %v732_v24, 0.0  ;;  %v5460_v22 = vld [vmem:[%s7218_s4 + $0x630] ss:$12 sps:$4 sm:$0xff]  }
  0xa6   : >> { %3124 = vmatpush2.bf16.msra.mxu0 %v5391_v30  ;;  %2975 = vmatprep.mubr.bf16.mxu0 %v5403_v32  ;;  %v804_v30 = vrot.slane %v803_v21, 4  ;;  %v748_v32 = vmul.f32 %v7229_v2, %v732_v24  ;;  %vm741_vm1 = vcmp.ge.f32.partialorder %v733_v25, 0.0 }
  0xa7   : >> { %3125 = vmatprep.subr.bf16.mxu0 %v5399_v33  ;;  %3079 = vmatmul.mubr.bf16.gmra.mxu1 %v5390_v35  ;;  %v4867_v33 = vld [vmem:[%s6253_s11 + $0x10] sm:$0xff]   ;;  %v588_v35 = vmul.f32 %v4822_v28, %v7231_v0  ;;  %839 = vst [vmem:[#allocation2 + $0xdc] sm:$0x1] %v806_v31  ;;  %v5466_v31 = vld [vmem:[%s7218_s4 + $0x80] ss:$12 sps:$4 sm:$0xff]  }
  0xa8   : >> { %3237 = vmatpush2.bf16.msra.mxu1 %v5394_v34  ;;  %3088 = vmatprep.mubr.bf16.mxu1 %v5404_v42  ;;  %v749_v34 = vmul.f32 %v7229_v2, %v733_v25  ;;  %837 = vst [vmem:[#allocation2 + $0xd4] sm:$0x1] %v804_v30 }
  0xa9   : >> { %3238 = vmatprep.subr.bf16.mxu1 %v5402_v37  ;;  %v5454_v37 = vld [vmem:[%s7218_s4 + $0x170] ss:$12 sps:$4 sm:$0xff]  }
  0xaa   : >> { %3126 = vmatpush2.bf16.msra.mxu0 %v5397_v36  ;;  %v4834_v36 = vunpack.c.l.bf16 %v4867_v33  ;;  %v757_v42 = vsel %vm741_vm1, %v733_v25, %v749_v34 }
  0xab   : >> { %3127 = vmatprep.subr.bf16.mxu0 %v5409_v40  ;;  %v4835_v40 = vunpack.c.h.bf16 %v4867_v33 }
  0xac   : >> { %3239 = vmatpush2.bf16.msra.mxu1 %v5400_v38  ;;  %v756_v38 = vsel %vm740_vm0, %v732_v24, %v748_v32  ;;  %v5467_v32 = vld [vmem:[%s7218_s4 + $0x128] ss:$12 sps:$4 sm:$0xff]   ;;  %vm4212_vm0 = vcmask 1047559  }
  0xad   : >> { %2976 = vmatmul.mubr.bf16.gmra.mxu0 %v5405_v39  ;;  %3240 = vmatprep.subr.bf16.mxu1 %v5412_v43  ;;  %v589_v39 = vmul.f32 %v4823_v29, %v7231_v0  ;;  %v765_v41 = vmul.f32 %v6285_v61, %v756_v38  ;;  %v596_v43 = vadd.f32 %v7230_v1, %v588_v35 }
  0xae   : >> { %3128 = vmatpush2.bf16.msra.mxu0 %v5407_v8  ;;  %3131 = vmatprep.mubr.bf16.mxu0 %v5419_v45  ;;  %v5442_v8 = vld [vmem:[%s7218_s4 + $0x660] ss:$12 sps:$4 sm:$0xff]   ;;  %v727_v50 = vmul.f32 %v4835_v40, %v7231_v0  ;;  %v5431_v12 = vld [vmem:[#allocation2 + $0xd8] sm:$0xff]   ;;  %v5469_v40 = vld [vmem:[%s7218_s4 + $0x68] ss:$12 sps:$4 sm:$0xff]  }
  0xaf   : >> { %3129 = vmatprep.subr.bf16.mxu0 %v5415_v46  ;;  %3089 = vmatmul.mubr.bf16.gmra.mxu1 %v5406_v51  ;;  %v5451_v45 = vld [vmem:[%s7218_s4 + $0x64c] ss:$12 sps:$4 sm:$0xff]   ;;  %v726_v46 = vmul.f32 %v4834_v36, %v7231_v0  ;;  %v597_v47 = vadd.f32 %v7230_v1, %v589_v39  ;;  %vm604_vm2 = vcmp.ge.f32.partialorder %v596_v43, 0.0  ;;  %v612_v49 = vmul.f32 %v7229_v2, %v596_v43  ;;  %v5425_v51 = vld [vmem:[#allocation2 + $0xc0] sm:$0xff]   ;;  %v5424_v7 = vld [vmem:[#allocation2 + $0xd0] sm:$0xff]  }
  0xb0   : >> { %3241 = vmatpush2.bf16.msra.mxu1 %v5410_v44  ;;  %v766_v44 = vmul.f32 %v6285_v61, %v757_v42  ;;  %3244 = vmatprep.mubr.bf16.mxu1 %v5424_v7  ;;  %v5439_v39 = vld [vmem:[#allocation2 + $0xd0] sm:$0xff]   ;;  %v5471_v42 = vld [vmem:[%s7218_s4 + $0x618] ss:$12 sps:$4 sm:$0xff]  }
  0xb1   : >> { %3242 = vmatprep.subr.bf16.mxu1 %v5418_v52  ;;  %v5434_v52 = vld [vmem:[#allocation2 + $0x80] sm:$0xff]   ;;  %v734_v55 = vadd.f32 %v7230_v1, %v726_v46  ;;  %vm605_vm3 = vcmp.ge.f32.partialorder %v597_v47, 0.0  ;;  %v620_v59 = vsel %vm604_vm2, %v596_v43, %v612_v49  ;;  %v5473_v43 = vld [vmem:[%s7218_s4 + $0x61c] ss:$12 sps:$4 sm:$0xff]  }
  0xb2   : >> { %3130 = vmatpush2.bf16.msra.mxu0 %v5413_v48  ;;  %v4785_v48 = vpack.c.bf16 %v765_v41, %v765_v41  ;;  %v4780_v3 = vpack.c.bf16 %v620_v59, %v620_v59 }
  0xb3   : >> { %3325 = vmatprep.subr.bf16.mxu0 %v5423_v57  ;;  %vm742_vm4 = vcmp.ge.f32.partialorder %v734_v55, 0.0 }
  0xb4   : >> { %3243 = vmatpush2.bf16.msra.mxu1 %v5416_v53  ;;  %v4786_v53 = vpack.c.bf16 %v766_v44, %v766_v44  ;;  %v807_v57 = vrot.slane %v4785_v48, 7  ;;  %v666_v14 = vrot.slane %v4780_v3, 7  ;;  %v4868_v44 = vld [vmem:[%s6253_s11 + $0x18] sm:$0xff]   ;;  %v5482_v3 = vld [vmem:[%s7218_s4 + $0x600] ss:$12 sps:$4 sm:$0xff]  }
  0xb5   : >> { %3132 = vmatmul.mubr.bf16.vlgmr.msra.gmra.mxu0 %v5420_v56  ;;  %4872 = vmatprep.subr.bf16.mxu1 %v5454_v37  ;;  %v613_v56 = vmul.f32 %v7229_v2, %v597_v47  ;;  %v5448_v37 = vld [vmem:[#allocation2 + $0x90] sm:$0xff]   ;;  %v4839_v46 = vunpack.c.h.bf16 %v4868_v44 }
  0xb6   : >> { %3326 = vmatpush1.bf16.msra.mxu0 %v5421_v58  ;;  %3141 = vmatprep.mubr.bf16.mxu0 %v5426_v62  ;;  %v5440_v58 = vld [vmem:[#allocation2 + $0x98] sm:$0xff]   ;;  %v735_v62 = vadd.f32 %v7230_v1, %v727_v50  ;;  %v809_v63 = vrot.slane %v4786_v53, 7  ;;  %v808_v9 = vrot.slane %v807_v57, 4  ;;  %840 = vst [vmem:[#allocation2 + $0xe0] sm:$0xe] %v807_v57  ;;  %v667_v20 = vrot.slane %v666_v14, 4 }
  0xb7   : >> { %3327 = vmatprep.subr.bf16.mxu0 %v5430_v4  ;;  %v750_v4 = vmul.f32 %v7229_v2, %v734_v55  ;;  %v621_v10 = vsel %vm605_vm3, %v597_v47, %v613_v56  ;;  %3245 = vmatmul.mubr.bf16.vlgmr.msra.gmra.mxu1 %v5425_v51  ;;  %699 = vst [vmem:[#allocation2 + $0xa0] sm:$0xe] %v666_v14  ;;  %v6384_v47 = vld [vmem:[#allocation2 + $0x98] sm:$0xff]   ;;  %v6388_v50 = vld [vmem:[#allocation2 + $0xb0] sm:$0xff]  }
  0xb8   : >> { %v751_v11 = vmul.f32 %v7229_v2, %v735_v62  ;;  %842 = vst [vmem:[#allocation2 + $0xe8] sm:$0xe] %v809_v63  ;;  %841 = vst [vmem:[#allocation2 + $0xe4] sm:$0x1] %v808_v9  ;;  %vm743_vm5 = vcmp.ge.f32.partialorder %v735_v62, 0.0  ;;  %3254 = vmatprep.mubr.bf16.mxu1 %v5431_v12  ;;  %4873 = vmatpush3.bf16.msra.mxu1 %v5455_v60  ;;  %v729_v49 = vmul.f32 %v4839_v46, %v7231_v0  ;;  %v6424_v14 = vld [vmem:[#allocation2 + $0xb8] sm:$0xff]  }
  0xb9   : >> { %v758_v15 = vsel %vm742_vm4, %v734_v55, %v750_v4  ;;  %700 = vst [vmem:[#allocation2 + $0xa4] sm:$0x1] %v667_v20  ;;  %4874 = vmatprep.subr.bf16.mxu1 %v5456_v5  ;;  %v5476_v51 = vld [vmem:[%s7218_s4 + $0x110] ss:$12 sps:$4 sm:$0xff]   ;;  %v5478_v56 = vld [vmem:[%s7218_s4 + $0xf8] ss:$12 sps:$4 sm:$0xff]  }
  0xba   : >> { %3328 = vmatpush1.bf16.msra.mxu0 %v5428_v13  ;;  %v810_v13 = vrot.slane %v809_v63, 4  ;;  %v767_v17 = vmul.f32 %v6285_v61, %v758_v15  ;;  %v737_v55 = vadd.f32 %v7230_v1, %v729_v49  ;;  %v5480_v60 = vld [vmem:[%s7218_s4 + $0x38] ss:$12 sps:$4 sm:$0xff]   ;;  %v5488_v12 = vld [vmem:[%s7218_s4 + $0x20] ss:$12 sps:$4 sm:$0xff]  }
  0xbb   : >> { %3329 = vmatprep.subr.bf16.mxu0 %v5437_v16  ;;  %v4781_v16 = vpack.c.bf16 %v621_v10, %v621_v10  ;;  %v5484_v4 = vld [vmem:[%s7218_s4 + $0x604] ss:$12 sps:$4 sm:$0xff]   ;;  %v5487_v10 = vld [vmem:[%s7218_s4 + $0xe0] ss:$12 sps:$4 sm:$0xff]  }
  0xbc   : >> { %843 = vst [vmem:[#allocation2 + $0xec] sm:$0x1] %v810_v13  ;;  %v4787_v24 = vpack.c.bf16 %v767_v17, %v767_v17  ;;  %4875 = vmatpush3.bf16.msra.mxu1 %v5458_v18  ;;  %v753_v59 = vmul.f32 %v7229_v2, %v737_v55  ;;  %vm745_vm7 = vcmp.ge.f32.partialorder %v737_v55, 0.0  ;;  %v5508_v46 = vld [vmem:[%s7218_s4 + $0x458] ss:$12 sps:$4 sm:$0xff]  }
  0xbd   : >> { %3142 = vmatmul.mubr.bf16.gmra.mxu0 %v5427_v19  ;;  %v5441_v19 = vld [vmem:[#allocation2 + $0x88] sm:$0xff]   ;;  %v668_v21 = vrot.slane %v4781_v16, 7  ;;  %v5556_v49 = vld [vmem:[#allocation2] sm:$0xff]  }
  0xbe   : >> { %3151 = vmatprep.mubr.bf16.mxu0 %v5433_v23  ;;  %3330 = vmatpush1.bf16.msra.mxu0 %v5435_v26  ;;  %v759_v23 = vsel %vm743_vm5, %v735_v62, %v751_v11  ;;  %v5465_v26 = vld [vmem:[%s7218_s4 + $0x140] ss:$12 sps:$4 sm:$0xff]   ;;  %v811_v29 = vrot.slane %v4787_v24, 7  ;;  %v761_v5 = vsel %vm745_vm7, %v737_v55, %v753_v59  ;;  %v5489_v16 = vld [vmem:[%s7218_s4 + $0xc8] ss:$12 sps:$4 sm:$0xff]  }
  0xbf   : >> { %3331 = vmatprep.subr.bf16.mxu0 %v5444_v27  ;;  %v768_v25 = vmul.f32 %v6285_v61, %v759_v23  ;;  %v5432_v27 = vld [vmem:[#allocation2 + $0xc8] sm:$0xff]   ;;  %v669_v28 = vrot.slane %v668_v21, 4  ;;  %701 = vst [vmem:[#allocation2 + $0xa8] sm:$0xe] %v668_v21  ;;  %v5438_v35 = vld [vmem:[#allocation2 + $0xe0] sm:$0xff]   ;;  %4876 = vmatprep.subr.bf16.mxu1 %v5465_v26  ;;  %v770_v7 = vmul.f32 %v6285_v61, %v761_v5 }
  0xc0   : >> { %v812_v33 = vrot.slane %v811_v29, 4  ;;  %844 = vst [vmem:[#allocation2 + $0xf0] sm:$0xe] %v811_v29  ;;  %3255 = vmatmul.mubr.bf16.gmra.mxu1 %v5432_v27  ;;  %v6368_v38 = vld [vmem:[#allocation2 + $0xa0] sm:$0xff]   ;;  %v5492_v21 = vld [vmem:[%s7218_s4 + $0x2f0] ss:$12 sps:$4 sm:$0xff]  }
  0xc1   : >> { %v4788_v30 = vpack.c.bf16 %v768_v25, %v768_v25  ;;  %702 = vst [vmem:[#allocation2 + $0xac] sm:$0x1] %v669_v28  ;;  %3264 = vmatprep.mubr.bf16.mxu1 %v5438_v35  ;;  %4877 = vmatpush3.bf16.msra.mxu1 %v5466_v31  ;;  %v4790_v11 = vpack.c.bf16 %v770_v7, %v770_v7  ;;  %v6426_v15 = vld [vmem:[#allocation2 + $0xe0] sm:$0xff]   ;;  %v5623_v25 = vmov 0   ;;  %v5493_v28 = vld [vmem:[%s7218_s4 + $0x230] ss:$12 sps:$4 sm:$0xff]  }
  0xc2   : >> { %3332 = vmatpush1.bf16.msra.mxu0 %v5442_v8  ;;  %845 = vst [vmem:[#allocation2 + $0xf4] sm:$0x1] %v812_v33  ;;  %4878 = vmatprep.subr.bf16.mxu1 %v5467_v32  ;;  %v6455_v27 = vld [vmem:[#allocation2 + $0xe0] sm:$0xff]   ;;  %v5506_v31 = vld [vmem:[%s7218_s4 + $0x470] ss:$12 sps:$4 sm:$0xff]  }
  0xc3   : >> { %3333 = vmatprep.subr.bf16.mxu0 %v5451_v45  ;;  %v813_v34 = vrot.slane %v4788_v30, 7  ;;  %v5445_v8 = vld [vmem:[#allocation2 + $0xe8] sm:$0xff]   ;;  %v4838_v45 = vunpack.c.l.bf16 %v4868_v44  ;;  %v5495_v29 = vld [vmem:[%s7218_s4 + $0x2d8] ss:$12 sps:$4 sm:$0xff]   ;;  %v5520_v7 = vld [vmem:[%s7218_s4 + $0x410] ss:$12 sps:$4 sm:$0xff]  }
  0xc4   : >> { %v6445_v23 = vld [vmem:[#allocation2 + $0xe8] sm:$0xff]   ;;  %v5496_v32 = vld [vmem:[%s7218_s4 + $0x218] ss:$12 sps:$4 sm:$0xff]  }
  0xc5   : >> { %3152 = vmatmul.mubr.bf16.gmra.mxu0 %v5434_v52  ;;  %v814_v36 = vrot.slane %v813_v34, 4  ;;  %846 = vst [vmem:[#allocation2 + $0xf8] sm:$0xe] %v813_v34  ;;  %4879 = vmatpush3.bf16.msra.mxu1 %v5469_v40  ;;  %v728_v48 = vmul.f32 %v4838_v45, %v7231_v0  ;;  %v5446_v52 = vld [vmem:[#allocation2 + $0xd8] sm:$0xff]   ;;  %v5498_v33 = vld [vmem:[%s7218_s4 + $0x2c0] ss:$12 sps:$4 sm:$0xff]  }
  0xc6   : >> { %3161 = vmatprep.mubr.bf16.mxu0 %v5440_v58  ;;  %3334 = vmatpush1.bf16.msra.mxu0 %v5449_v54  ;;  %v5477_v54 = vld [vmem:[%s7218_s4 + $0x50] ss:$12 sps:$4 sm:$0xff]   ;;  %v6480_v35 = vld [vmem:[#allocation2 + $0xe8] sm:$0xff]   ;;  %v5511_v44 = vld [vmem:[%s7218_s4 + $0x278] ss:$12 sps:$4 sm:$0xff]  }
  0xc7   : >> { %3335 = vmatprep.subr.bf16.mxu0 %v5462_v6  ;;  %847 = vst [vmem:[#allocation2 + $0xfc] sm:$0x1] %v814_v36  ;;  %v736_v53 = vadd.f32 %v7230_v1, %v728_v48  ;;  %4880 = vmatprep.subr.bf16.mxu1 %v5476_v51  ;;  %v6415_v6 = vld [vmem:[#allocation2 + $0xa0] sm:$0xff]   ;;  %v5504_v40 = vld [vmem:[%s7218_s4 + $0x290] ss:$12 sps:$4 sm:$0xff]  }
  0xc8   : >> { %v6374_v41 = vld [vmem:[#allocation2 + $0xa8] sm:$0xff]   ;;  %3265 = vmatmul.mubr.bf16.gmra.mxu1 %v5439_v39  ;;  %v5507_v45 = vld [vmem:[%s7218_s4 + $0x3b0] ss:$12 sps:$4 sm:$0xff]   ;;  %v5512_v48 = vld [vmem:[%s7218_s4 + $0x1b8] ss:$12 sps:$4 sm:$0xff]  }
  0xc9   : >> { %3274 = vmatprep.mubr.bf16.mxu1 %v5445_v8  ;;  %v5452_v57 = vld [vmem:[#allocation2 + $0xf0] sm:$0xff]   ;;  %vm744_vm6 = vcmp.ge.f32.partialorder %v736_v53, 0.0  ;;  %v752_v58 = vmul.f32 %v7229_v2, %v736_v53  ;;  %4881 = vmatpush3.bf16.msra.mxu1 %v5477_v54  ;;  %v5499_v36 = vld [vmem:[%s7218_s4 + $0x200] ss:$12 sps:$4 sm:$0xff]   ;;  %v5509_v54 = vld [vmem:[%s7218_s4 + $0x398] ss:$12 sps:$4 sm:$0xff]  }
  0xca   : >> { %3336 = vmatpush1.bf16.msra.mxu0 %v5460_v22  ;;  %4882 = vmatprep.subr.bf16.mxu1 %v5478_v56  ;;  %v6443_v22 = vld [vmem:[#allocation2 + $0xa8] sm:$0xff]   ;;  %v6453_v26 = vld [vmem:[#allocation2 + $0xf0] sm:$0xff]  }
  0xcb   : >> { %3337 = vmatprep.subr.bf16.mxu0 %v5473_v43  ;;  %v760_v62 = vsel %vm744_vm6, %v736_v53, %v752_v58  ;;  %v5502_v39 = vld [vmem:[%s7218_s4 + $0x1e8] ss:$12 sps:$4 sm:$0xff]   ;;  %v5505_v43 = vld [vmem:[%s7218_s4 + $0x1d0] ss:$12 sps:$4 sm:$0xff]   ;;  %v5513_v55 = vld [vmem:[%s7218_s4 + $0x440] ss:$12 sps:$4 sm:$0xff]  }
  0xcc   : >> { %v769_v63 = vmul.f32 %v6285_v61, %v760_v62  ;;  %v817_v61 = vrot.slane %v4790_v11, 7  ;;  %v5555_v8 = vld [vmem:[#allocation2 + $0x10] sm:$0xff]   ;;  %v5557_v53 = vld [vmem:[#allocation2 + $0x18] sm:$0xff]   ;;  %v5519_v56 = vld [vmem:[%s7218_s4 + $0x1a0] ss:$12 sps:$4 sm:$0xff]  }
  0xcd   : >> { %3162 = vmatmul.mubr.bf16.gmra.mxu0 %v5441_v19  ;;  %4883 = vmatpush3.bf16.msra.mxu1 %v5480_v60  ;;  %v5490_v19 = vld [vmem:[%s7218_s4 + $0x8] ss:$12 sps:$4 sm:$0xff]   ;;  %v5514_v58 = vld [vmem:[%s7218_s4 + $0x380] ss:$12 sps:$4 sm:$0xff]  }
  0xce   : >> { %3171 = vmatprep.mubr.bf16.mxu0 %v6368_v38  ;;  %3338 = vmatpush1.bf16.msra.mxu0 %v5471_v42  ;;  %v4789_v9 = vpack.c.bf16 %v769_v63, %v769_v63  ;;  %v6431_v17 = vld [vmem:[#allocation2 + $0xf8] sm:$0xff]   ;;  %v818_v20 = vrot.slane %v817_v61, 4  ;;  %850 = vst [vmem:[#allocation2 + $0x108] sm:$0xe] %v817_v61  ;;  %v6497_v42 = vld [vmem:[#allocation2 + $0xf0] sm:$0xff]   ;;  %v5558_v62 = vld [vmem:[#allocation2 + $0x8] sm:$0xff]  }
  0xcf   : >> { %3339 = vmatprep.subr.bf16.mxu0 %v5484_v4  ;;  %4884 = vmatprep.subr.bf16.mxu1 %v5487_v10  ;;  %v6478_v34 = vld [vmem:[#allocation2 + $0xf8] sm:$0xff]   ;;  %v5515_v59 = vld [vmem:[%s7218_s4 + $0x428] ss:$12 sps:$4 sm:$0xff]   ;;  %v5559_v4 = vld [vmem:[#allocation2 + $0x20] sm:$0xff]  }
  0xd0   : >> { %3275 = vmatmul.mubr.bf16.gmra.mxu1 %v5446_v52  ;;  %v815_v13 = vrot.slane %v4789_v9, 7  ;;  %851 = vst [vmem:[#allocation2 + $0x10c] sm:$0x1] %v818_v20  ;;  %v6516_v51 = vld [vmem:[#allocation2 + $0xf8] sm:$0xff]   ;;  %v5518_v52 = vld [vmem:[%s7218_s4 + $0x260] ss:$12 sps:$4 sm:$0xff]  }
  0xd1   : >> { %3284 = vmatprep.mubr.bf16.mxu1 %v5452_v57  ;;  %4885 = vmatpush3.bf16.msra.mxu1 %v5488_v12  ;;  %v5525_v57 = vld [vmem:[%s7218_s4 + $0x248] ss:$12 sps:$4 sm:$0xff]   ;;  %v5521_v9 = vld [vmem:[%s7218_s4 + $0x350] ss:$12 sps:$4 sm:$0xff]   ;;  %v5522_v10 = vld [vmem:[%s7218_s4 + $0x3f8] ss:$12 sps:$4 sm:$0xff]  }
  0xd2   : >> { %3340 = vmatpush1.bf16.msra.mxu0 %v5482_v3  ;;  %v816_v18 = vrot.slane %v815_v13, 4  ;;  %848 = vst [vmem:[#allocation2 + $0x100] sm:$0xe] %v815_v13  ;;  %4886 = vmatprep.subr.bf16.mxu1 %v5489_v16  ;;  %v5526_v60 = vld [vmem:[%s7218_s4 + $0x188] ss:$12 sps:$4 sm:$0xff]   ;;  %v5562_v20 = vld [vmem:[#allocation2 + $0x18] sm:$0xff]  }
  0xd3   : >> { %4936 = vmatprep.subr.bf16.mxu0 %v5492_v21  ;;  %v5531_v3 = vld [vmem:[%s7218_s4 + $0x5f0] ss:$12 sps:$4 sm:$0xff]   ;;  %v5516_v5 = vld [vmem:[%s7218_s4 + $0x368] ss:$12 sps:$4 sm:$0xff]   ;;  %v5523_v61 = vld [vmem:[%s7218_s4 + $0x338] ss:$12 sps:$4 sm:$0xff]  }
  0xd4   : >> { %849 = vst [vmem:[#allocation2 + $0x104] sm:$0x1] %v816_v18  ;;  %v5560_v11 = vld [vmem:[#allocation2 + $0x10] sm:$0xff]   ;;  %v5561_v13 = vld [vmem:[#allocation2 + $0x28] sm:$0xff]  }
  0xd5   : >> { %3172 = vmatmul.mubr.bf16.gmra.mxu0 %v5448_v37  ;;  %4887 = vmatpush3.bf16.msra.mxu1 %v5490_v19  ;;  %v5501_v37 = vld [vmem:[%s7218_s4 + $0x2a8] ss:$12 sps:$4 sm:$0xff]   ;;  %v5527_v16 = vld [vmem:[%s7218_s4 + $0x3e0] ss:$12 sps:$4 sm:$0xff]  }
  0xd6   : >> { %3181 = vmatprep.mubr.bf16.mxu0 %v6374_v41  ;;  %5000 = vmatprep.subr.bf16.mxu1 %v5506_v31  ;;  %v5528_v18 = vld [vmem:[%s7218_s4 + $0x320] ss:$12 sps:$4 sm:$0xff]   ;;  %v5529_v19 = vld [vmem:[%s7218_s4 + $0x3c8] ss:$12 sps:$4 sm:$0xff]   ;;  %v6587_v31 = vld [vmem:[%s7218_s4 + $0x6b0] ss:$12 sps:$4 sm:$0xff]  }
  0xd7   : >> { %v6463_v30 = vld [vmem:[#allocation2 + $0x108] sm:$0xff]   ;;  %v6579_v21 = vld [vmem:[#allocation2 + $0x110] sm:$0xff]  }
  0xd8   : >> { %3285 = vmatmul.mubr.bf16.gmra.mxu1 %v6426_v15  ;;  %v6563_v12 = vld [vmem:[#allocation2 + $0x108] sm:$0xff]  }
  0xd9   : >> { %3294 = vmatprep.mubr.bf16.mxu1 %v6431_v17 }
  0xdb   : >> { %v6447_v24 = vld [vmem:[#allocation2 + $0x100] sm:$0xff]  }
  0xdc   : >> { %v6544_v63 = vld [vmem:[#allocation2 + $0x100] sm:$0xff]  }
  0xdd   : >> { %3182 = vmatmul.mubr.bf16.gmra.mxu0 %v6384_v47 }
  0xde   : >> { %3191 = vmatprep.mubr.bf16.mxu0 %v6388_v50 }
  0xe0   : >> { %3295 = vmatmul.mubr.bf16.gmra.mxu1 %v6445_v23 }
  0xe1   : >> { %3304 = vmatprep.mubr.bf16.mxu1 %v6447_v24 }
  0xe5   : >> { %3192 = vmatmul.mubr.bf16.gmra.mxu0 %v6415_v6 }
  0xe6   : >> { %3201 = vmatprep.mubr.bf16.mxu0 %v6424_v14 }
  0xe8   : >> { %3305 = vmatmul.mubr.bf16.gmra.mxu1 %v6453_v26 }
  0xe9   : >> { %3314 = vmatprep.mubr.bf16.mxu1 %v6463_v30 }
  0xed   : >> { %3202 = vmatmul.mubr.bf16.gmra.mxu0 %v6443_v22 }
  0xee   : >> { %3357 = vmatprep.mubr.bf16.mxu0 %v5623_v25 }
  0xf0   : >> { %3315 = vmatmul.mubr.bf16.gmra.mxu1 %v6478_v34 }
  0xf1   : >> { %3470 = vmatprep.mubr.bf16.mxu1 %v5555_v8  ;;  %v5532_v8 = vld [vmem:[%s7218_s4 + $0x530] ss:$12 sps:$4 sm:$0xff]  }
  0xf5   : >> { %3358 = vmatmul.mubr.bf16.vlgmr.msra.gmra.mxu0 %v6455_v27 }
  0xf6   : >> { %4937 = vmatpush3.bf16.msra.mxu0 %v5493_v28  ;;  %3367 = vmatprep.mubr.bf16.mxu0 %v5623_v25  ;;  %v5563_v28 = vld [vmem:[#allocation2 + $0x30] sm:$0xff]  }
  0xf7   : >> { %4938 = vmatprep.subr.bf16.mxu0 %v5495_v29  ;;  %v5530_v29 = vld [vmem:[%s7218_s4 + $0x308] ss:$12 sps:$4 sm:$0xff]  }
  0xf8   : >> { %3471 = vmatmul.mubr.bf16.vlgmr.msra.gmra.mxu1 %v5556_v49 }
  0xf9   : >> { %3478 = vmatprep.mubr.bf16.mxu1 %v5557_v53  ;;  %5001 = vmatpush3.bf16.msra.mxu1 %v5507_v45  ;;  %v5570_v45 = vld [vmem:[#allocation2 + $0x68] sm:$0xff]  }
  0xfa   : >> { %4939 = vmatpush3.bf16.msra.mxu0 %v5496_v32  ;;  %5002 = vmatprep.subr.bf16.mxu1 %v5508_v46  ;;  %v5564_v32 = vld [vmem:[#allocation2 + $0x20] sm:$0xff]  }
  0xfb   : >> { %4940 = vmatprep.subr.bf16.mxu0 %v5498_v33  ;;  %v5565_v33 = vld [vmem:[#allocation2 + $0x38] sm:$0xff]   ;;  %v5535_v53 = vld [vmem:[%s7218_s4 + $0x5c0] ss:$12 sps:$4 sm:$0xff]  }
  0xfc   : >> { %v5534_v46 = vld [vmem:[%s7218_s4 + $0x518] ss:$12 sps:$4 sm:$0xff]  }
  0xfd   : >> { %3368 = vmatmul.mubr.bf16.gmra.mxu0 %v6480_v35  ;;  %5003 = vmatpush3.bf16.msra.mxu1 %v5509_v54  ;;  %v5572_v54 = vld [vmem:[#allocation2 + $0x48] sm:$0xff]  }
  0xfe   : >> { %3377 = vmatprep.mubr.bf16.mxu0 %v5623_v25  ;;  %4941 = vmatpush3.bf16.msra.mxu0 %v5499_v36  ;;  %v6592_v36 = vld [vmem:[#allocation2 + $0x118] sm:$0xff]  }
  0xff   : >> { %4942 = vmatprep.subr.bf16.mxu0 %v5501_v37  ;;  %5004 = vmatprep.subr.bf16.mxu1 %v5513_v55  ;;  %v5566_v37 = vld [vmem:[#allocation2 + $0x60] sm:$0xff]  }
 0x100   : >> { %3479 = vmatmul.mubr.bf16.gmra.mxu1 %v5558_v62 }
 0x101   : >> { %3486 = vmatprep.mubr.bf16.mxu1 %v5559_v4  ;;  %5005 = vmatpush3.bf16.msra.mxu1 %v5514_v58 }
 0x102   : >> { %4943 = vmatpush3.bf16.msra.mxu0 %v5502_v39  ;;  %5006 = vmatprep.subr.bf16.mxu1 %v5515_v59  ;;  %v5567_v39 = vld [vmem:[#allocation2 + $0x28] sm:$0xff]  }
 0x103   : >> { %4944 = vmatprep.subr.bf16.mxu0 %v5504_v40  ;;  %v5568_v40 = vld [vmem:[#allocation2 + $0x40] sm:$0xff]  }
 0x104   : >> { %v5536_v59 = vld [vmem:[%s7218_s4 + $0x500] ss:$12 sps:$4 sm:$0xff]  }
 0x105   : >> { %3378 = vmatmul.mubr.bf16.gmra.mxu0 %v6497_v42  ;;  %5007 = vmatpush3.bf16.msra.mxu1 %v5516_v5 }
 0x106   : >> { %3387 = vmatprep.mubr.bf16.mxu0 %v5623_v25  ;;  %4945 = vmatpush3.bf16.msra.mxu0 %v5505_v43 }
 0x107   : >> { %4946 = vmatprep.subr.bf16.mxu0 %v5511_v44  ;;  %5008 = vmatprep.subr.bf16.mxu1 %v5520_v7  ;;  %v5569_v44 = vld [vmem:[#allocation2 + $0x20] sm:$0xff]   ;;  %v5573_v7 = vld [vmem:[#allocation2 + $0x28] sm:$0xff]  }
 0x108   : >> { %3487 = vmatmul.mubr.bf16.gmra.mxu1 %v5560_v11  ;;  %v5538_v11 = vld [vmem:[%s7218_s4 + $0x4e8] ss:$12 sps:$4 sm:$0xff]  }
 0x109   : >> { %3494 = vmatprep.mubr.bf16.mxu1 %v5561_v13  ;;  %5009 = vmatpush3.bf16.msra.mxu1 %v5521_v9  ;;  %v5575_v13 = vld [vmem:[#allocation2 + $0x38] sm:$0xff]  }
 0x10a   : >> { %4947 = vmatpush3.bf16.msra.mxu0 %v5512_v48  ;;  %5010 = vmatprep.subr.bf16.mxu1 %v5522_v10  ;;  %v5571_v48 = vld [vmem:[#allocation2 + $0x30] sm:$0xff]  }
 0x10b   : >> { %4948 = vmatprep.subr.bf16.mxu0 %v5518_v52  ;;  %v5574_v10 = vld [vmem:[#allocation2 + $0x70] sm:$0xff]  }
 0x10d   : >> { %3388 = vmatmul.mubr.bf16.gmra.mxu0 %v6516_v51  ;;  %5011 = vmatpush3.bf16.msra.mxu1 %v5523_v61 }
 0x10e   : >> { %3397 = vmatprep.mubr.bf16.mxu0 %v5623_v25  ;;  %4949 = vmatpush3.bf16.msra.mxu0 %v5519_v56 }
 0x10f   : >> { %4950 = vmatprep.subr.bf16.mxu0 %v5525_v57  ;;  %5012 = vmatprep.subr.bf16.mxu1 %v5527_v16 }
 0x110   : >> { %3495 = vmatmul.mubr.bf16.gmra.mxu1 %v5562_v20 }
 0x111   : >> { %3502 = vmatprep.mubr.bf16.mxu1 %v5563_v28  ;;  %5013 = vmatpush3.bf16.msra.mxu1 %v5528_v18  ;;  %v5539_v18 = vld [vmem:[%s7218_s4 + $0x590] ss:$12 sps:$4 sm:$0xff]  }
 0x112   : >> { %4951 = vmatpush3.bf16.msra.mxu0 %v5526_v60  ;;  %5014 = vmatprep.subr.bf16.mxu1 %v5529_v19  ;;  %v5576_v19 = vld [vmem:[#allocation2 + $0x80] sm:$0xff]  }
 0x113   : >> { %5064 = vmatprep.subr.bf16.mxu0 %v5531_v3  ;;  %v5537_v3 = vld [vmem:[%s7218_s4 + $0x5a8] ss:$12 sps:$4 sm:$0xff]  }
 0x115   : >> { %3398 = vmatmul.mubr.bf16.gmra.mxu0 %v6544_v63  ;;  %5015 = vmatpush3.bf16.msra.mxu1 %v5530_v29 }
 0x116   : >> { %3407 = vmatprep.mubr.bf16.mxu0 %v5623_v25  ;;  %5144 = vmatprep.subr.bf16.mxu1 %v6587_v31 }
 0x118   : >> { %3503 = vmatmul.mubr.bf16.gmra.mxu1 %v5564_v32 }
 0x119   : >> { %3510 = vmatprep.mubr.bf16.mxu1 %v5565_v33  ;;  %v5540_v33 = vld [vmem:[%s7218_s4 + $0x4d0] ss:$12 sps:$4 sm:$0xff]  }
 0x11d   : >> { %3408 = vmatmul.mubr.bf16.gmra.mxu0 %v6563_v12 }
 0x11e   : >> { %3417 = vmatprep.mubr.bf16.mxu0 %v5623_v25 }
 0x120   : >> { %3511 = vmatmul.mubr.bf16.gmra.mxu1 %v5567_v39 }
 0x121   : >> { %3518 = vmatprep.mubr.bf16.mxu1 %v5568_v40  ;;  %v5542_v40 = vld [vmem:[%s7218_s4 + $0x578] ss:$12 sps:$4 sm:$0xff]  }
 0x125   : >> { %3418 = vmatmul.mubr.bf16.gmra.mxu0 %v6579_v21 }
 0x126   : >> { %3427 = vmatprep.mubr.bf16.mxu0 %v5623_v25  ;;  %v5533_v25 = vld [vmem:[%s7218_s4 + $0x5d8] ss:$12 sps:$4 sm:$0xff]  }
 0x128   : >> { %3519 = vmatmul.mubr.bf16.gmra.mxu1 %v5571_v48  ;;  %v5544_v48 = vld [vmem:[%s7218_s4 + $0x4b8] ss:$12 sps:$4 sm:$0xff]  }
 0x129   : >> { %3526 = vmatprep.mubr.bf16.mxu1 %v5572_v54  ;;  %v5546_v54 = vld [vmem:[%s7218_s4 + $0x560] ss:$12 sps:$4 sm:$0xff]  }
 0x12d   : >> { %3428 = vmatmul.mubr.bf16.gmra.mxu0 %v6592_v36 }
 0x12e   : >> { %3567 = vmatprep.mubr.bf16.mxu0 %v5566_v37 }
 0x130   : >> { %3527 = vmatmul.mubr.bf16.gmra.mxu1 %v5575_v13  ;;  %v5581_v13 = vld [vmem:[#allocation2 + $0x38] sm:$0xff]  }
 0x131   : >> { %3664 = vmatprep.mubr.bf16.mxu1 %v5576_v19  ;;  %v5552_v19 = vld [vmem:[%s7218_s4 + $0x488] ss:$12 sps:$4 sm:$0xff]  }
 0x135   : >> { %v2907_v43 = vpop.f32.mrf.mxu0  ;;  %3568 = vmatmul.mubr.bf16.vlgmr.msra.gmra.mxu0 %v5569_v44  ;;  %v5543_v44 = vld [vmem:[%s7218_s4 + $0x698] ss:$12 sps:$4 sm:$0xff]  }
 0x136   : >> { %5065 = vmatpush3.bf16.msra.mxu0 %v5532_v8  ;;  %3575 = vmatprep.mubr.bf16.mxu0 %v5570_v45 }
 0x137   : >> { %v3020_v49 = vpop.f32.mrf.mxu1  ;;  %v2909_v52 = vpop.f32.mrf.mxu0  ;;  %5066 = vmatprep.subr.bf16.mxu0 %v5533_v25 }
 0x138   : >> { %v6607_v55 = vadd.f32 %v3020_v49, %v2907_v43  ;;  %v5577_v43 = vld [vmem:[#allocation2 + $0x30] sm:$0xff]  }
 0x139   : >> { %v3022_v56 = vpop.f32.mrf.mxu1  ;;  %v2911_v57 = vpop.f32.mrf.mxu0  ;;  %v5579_v49 = vld [vmem:[#allocation2 + $0x70] sm:$0xff]  }
 0x13a   : >> { %v6609_v58 = vadd.f32 %v3022_v56, %v2909_v52  ;;  %5067 = vmatpush3.bf16.msra.mxu0 %v5534_v46  ;;  %v5578_v46 = vld [vmem:[#allocation2 + $0x78] sm:$0xff]   ;;  %3665 = vmatmul.mubr.bf16.vlgmr.msra.gmra.mxu1 %v5579_v49  ;;  %v5580_v56 = vld [vmem:[#allocation2 + $0x88] sm:$0xff]  }
 0x13b   : >> { %v3024_v60 = vpop.f32.mrf.mxu1  ;;  %v2913_v62 = vpop.f32.mrf.mxu0  ;;  %5068 = vmatprep.subr.bf16.mxu0 %v5535_v53  ;;  %3672 = vmatprep.mubr.bf16.mxu1 %v5580_v56  ;;  %v5586_v56 = vld [vmem:[#allocation2 + $0x88] sm:$0xff]  }
 0x13c   : >> { %5145 = vmatpush3.bf16.msra.mxu1 %v6587_v31  ;;  %v5550_v31 = vld [vmem:[%s7218_s4 + $0x548] ss:$12 sps:$4 sm:$0xff]  }
 0x13d   : >> { %v3026_v4 = vpop.f32.mrf.mxu1  ;;  %v2917_v5 = vpop.f32.mrf.mxu0  ;;  %3576 = vmatmul.mubr.bf16.gmra.mxu0 %v5573_v7  ;;  %5146 = vmatprep.subr.bf16.mxu1 %v5543_v44 }
 0x13e   : >> { %v6617_v9 = vadd.f32 %v3026_v4, %v2913_v62  ;;  %3583 = vmatprep.mubr.bf16.mxu0 %v5574_v10  ;;  %5069 = vmatpush3.bf16.msra.mxu0 %v5536_v59  ;;  %v5545_v62 = vld [vmem:[%s7218_s4 + $0x680] ss:$12 sps:$4 sm:$0xff]  }
 0x13f   : >> { %v3030_v61 = vpop.f32.mrf.mxu1  ;;  %v2919_v16 = vpop.f32.mrf.mxu0  ;;  %5070 = vmatprep.subr.bf16.mxu0 %v5537_v3  ;;  %v5548_v4 = vld [vmem:[%s7218_s4 + $0x4a0] ss:$12 sps:$4 sm:$0xff]  }
 0x140   : >> { %v6625_v20 = vadd.f32 %v3030_v61, %v2917_v5  ;;  %5147 = vmatpush3.bf16.msra.mxu1 %v5543_v44  ;;  %v5547_v61 = vld [vmem:[%s7218_s4 + $0x668] ss:$12 sps:$4 sm:$0xff]  }
 0x141   : >> { %v3032_v28 = vpop.f32.mrf.mxu1  ;;  %v2921_v29 = vpop.f32.mrf.mxu0  ;;  %5148 = vmatprep.subr.bf16.mxu1 %v5545_v62 }
 0x142   : >> { %v6627_v32 = vadd.f32 %v3032_v28, %v2919_v16  ;;  %5071 = vmatpush3.bf16.msra.mxu0 %v5538_v11  ;;  %v5583_v28 = vld [vmem:[#allocation2 + $0x78] sm:$0xff]  }
 0x143   : >> { %v3034_v37 = vpop.f32.mrf.mxu1  ;;  %v2923_v39 = vpop.f32.mrf.mxu0  ;;  %5072 = vmatprep.subr.bf16.mxu0 %v5539_v18  ;;  %v5582_v18 = vld [vmem:[#allocation2 + $0x80] sm:$0xff]   ;;  %3673 = vmatmul.mubr.bf16.gmra.mxu1 %v5583_v28 }
 0x144   : >> { %v5584_v37 = vld [vmem:[#allocation2 + $0x90] sm:$0xff]   ;;  %5149 = vmatpush3.bf16.msra.mxu1 %v5545_v62  ;;  %v5588_v62 = vld [vmem:[#allocation2 + $0x98] sm:$0xff]  }
 0x145   : >> { %v3036_v8 = vpop.f32.mrf.mxu1  ;;  %v2927_v25 = vpop.f32.mrf.mxu0  ;;  %3584 = vmatmul.mubr.bf16.gmra.mxu0 %v5577_v43  ;;  %3680 = vmatprep.mubr.bf16.mxu1 %v5584_v37 }
 0x146   : >> { %v6638_v45 = vadd.f32 %v3036_v8, %v2923_v39  ;;  %3591 = vmatprep.mubr.bf16.mxu0 %v5578_v46  ;;  %5073 = vmatpush3.bf16.msra.mxu0 %v5540_v33 }
 0x147   : >> { %v3040_v52 = vpop.f32.mrf.mxu1  ;;  %v2929_v53 = vpop.f32.mrf.mxu0  ;;  %5074 = vmatprep.subr.bf16.mxu0 %v5542_v40  ;;  %5150 = vmatprep.subr.bf16.mxu1 %v5547_v61 }
 0x148   : >> { %v6646_v57 = vadd.f32 %v3040_v52, %v2927_v25  ;;  %v5549_v25 = vld [vmem:[%s7218_s4 + $0x650] ss:$12 sps:$4 sm:$0xff]   ;;  %5151 = vmatpush3.bf16.msra.mxu1 %v5547_v61  ;;  %v5585_v52 = vld [vmem:[#allocation2 + $0x40] sm:$0xff]  }
 0x149   : >> { %v3042_v59 = vpop.f32.mrf.mxu1  ;;  %v2931_v60 = vpop.f32.mrf.mxu0  ;;  %5152 = vmatprep.subr.bf16.mxu1 %v5549_v25 }
 0x14a   : >> { %v6652_v3 = vadd.f32 %v3042_v59, %v2929_v53  ;;  %5075 = vmatpush3.bf16.msra.mxu0 %v5544_v48  ;;  %v5551_v53 = vld [vmem:[%s7218_s4 + $0x638] ss:$12 sps:$4 sm:$0xff]  }
 0x14b   : >> { %v3044_v5 = vpop.f32.mrf.mxu1  ;;  %v2933_v7 = vpop.f32.mrf.mxu0  ;;  %5076 = vmatprep.subr.bf16.mxu0 %v5546_v54  ;;  %v5587_v59 = vld [vmem:[#allocation2 + $0x80] sm:$0xff]  }
 0x14c   : >> { %3681 = vmatmul.mubr.bf16.gmra.mxu1 %v5587_v59  ;;  %v5553_v5 = vld [vmem:[%s7218_s4 + $0x620] ss:$12 sps:$4 sm:$0xff]  }
 0x14d   : >> { %v3046_v10 = vpop.f32.mrf.mxu1  ;;  %v2937_v11 = vpop.f32.mrf.mxu0  ;;  %3592 = vmatmul.mubr.bf16.gmra.mxu0 %v5581_v13  ;;  %3688 = vmatprep.mubr.bf16.mxu1 %v5588_v62 }
 0x14e   : >> { %v6663_v16 = vadd.f32 %v3046_v10, %v2933_v7  ;;  %3599 = vmatprep.mubr.bf16.mxu0 %v5582_v18  ;;  %5077 = vmatpush3.bf16.msra.mxu0 %v5548_v4  ;;  %v5589_v18 = vld [vmem:[#allocation2 + $0x48] sm:$0xff]  }
 0x14f   : >> { %v3050_v29 = vpop.f32.mrf.mxu1  ;;  %v2939_v33 = vpop.f32.mrf.mxu0  ;;  %5078 = vmatprep.subr.bf16.mxu0 %v5550_v31  ;;  %5153 = vmatpush3.bf16.msra.mxu1 %v5549_v25 }
 0x150   : >> { %v6668_v39 = vadd.f32 %v3050_v29, %v2937_v11  ;;  %5154 = vmatprep.subr.bf16.mxu1 %v5551_v53  ;;  %v5590_v29 = vld [vmem:[#allocation2 + $0x90] sm:$0xff]  }
 0x151   : >> { %v3052_v40 = vpop.f32.mrf.mxu1  ;;  %v2941_v8 = vpop.f32.mrf.mxu0 }
 0x152   : >> { %v6673_v43 = vadd.f32 %v3052_v40, %v2939_v33  ;;  %5079 = vmatpush3.bf16.msra.mxu0 %v5552_v19  ;;  %v5554_v19 = vld [vmem:[%s7218_s4 + $0x608] ss:$12 sps:$4 sm:$0xff]  }
 0x153   : >> { %v3054_v44 = vpop.f32.mrf.mxu1  ;;  %v2943_v46 = vpop.f32.mrf.mxu0  ;;  %5155 = vmatpush3.bf16.msra.mxu1 %v5551_v53  ;;  %v5591_v33 = vld [vmem:[#allocation2 + $0x88] sm:$0xff]  }
 0x154   : >> { %5156 = vmatprep.subr.bf16.mxu1 %v5553_v5  ;;  %3689 = vmatmul.mubr.bf16.gmra.mxu1 %v5591_v33  ;;  %v5596_v33 = vld [vmem:[#allocation2 + $0xd0] sm:$0xff]  }
 0x155   : >> { %v3056_v48 = vpop.f32.mrf.mxu1  ;;  %v2947_v49 = vpop.f32.mrf.mxu0  ;;  %3600 = vmatmul.mubr.bf16.gmra.mxu0 %v5585_v52  ;;  %3696 = vmatprep.mubr.bf16.mxu1 %v6368_v38  ;;  %v5594_v38 = vld [vmem:[#allocation2 + $0x90] sm:$0xff]  }
 0x156   : >> { %v6678_v54 = vadd.f32 %v3056_v48, %v2943_v46  ;;  %3607 = vmatprep.mubr.bf16.mxu0 %v5586_v56  ;;  %v5592_v56 = vld [vmem:[#allocation2 + $0x50] sm:$0xff]  }
 0x157   : >> { %v2949_v60 = vpop.f32.mrf.mxu0  ;;  %v3060_v7 = vpop.f32.mrf.mxu1  ;;  %5157 = vmatpush3.bf16.msra.mxu1 %v5553_v5 }
 0x158   : >> { %v6683_v31 = vadd.f32 %v3060_v7, %v2947_v49  ;;  %5158 = vmatprep.subr.bf16.mxu1 %v5554_v19 }
 0x159   : >> { %v2951_v4 = vpop.f32.mrf.mxu0  ;;  %v3062_v11 = vpop.f32.mrf.mxu1 }
 0x15a   : >> { %v6685_v13 = vadd.f32 %v3062_v11, %v2949_v60  ;;  %v5593_v60 = vld [vmem:[#allocation2 + $0x98] sm:$0xff]  }
 0x15b   : >> { %v2953_v10 = vpop.f32.mrf.mxu0  ;;  %v3064_v28 = vpop.f32.mrf.mxu1  ;;  %5159 = vmatpush3.bf16.msra.mxu1 %v5554_v19 }
 0x15c   : >> { %3697 = vmatmul.mubr.bf16.gmra.mxu1 %v5594_v38  ;;  %v5595_v28 = vld [vmem:[#allocation2 + $0x58] sm:$0xff]  }
 0x15d   : >> { %v2957_v61 = vpop.f32.mrf.mxu0  ;;  %3608 = vmatmul.mubr.bf16.gmra.mxu0 %v5589_v18  ;;  %v3066_v40 = vpop.f32.mrf.mxu1  ;;  %3704 = vmatprep.mubr.bf16.mxu1 %v6374_v41 }
 0x15e   : >> { %3615 = vmatprep.mubr.bf16.mxu0 %v5590_v29  ;;  %v6691_v8 = vadd.f32 %v3066_v40, %v2953_v10 }
 0x15f   : >> { %v2959_v37 = vpop.f32.mrf.mxu0  ;;  %v3070_v44 = vpop.f32.mrf.mxu1 }
 0x160   : >> { %v6693_v46 = vadd.f32 %v3070_v44, %v2957_v61 }
 0x161   : >> { %v2961_v25 = vpop.f32.mrf.mxu0  ;;  %v3072_v49 = vpop.f32.mrf.mxu1 }
 0x162   : >> { %v6695_v52 = vadd.f32 %v3072_v49, %v2959_v37 }
 0x163   : >> { %v2963_v48 = vpop.f32.mrf.mxu0  ;;  %v3074_v59 = vpop.f32.mrf.mxu1 }
 0x164   : >> { %3705 = vmatmul.mubr.bf16.gmra.mxu1 %v6384_v47  ;;  %v5598_v47 = vld [vmem:[#allocation2 + $0xd8] sm:$0xff]  }
 0x165   : >> { %v2967_v53 = vpop.f32.mrf.mxu0  ;;  %3616 = vmatmul.mubr.bf16.gmra.mxu0 %v5592_v56  ;;  %v3076_v4 = vpop.f32.mrf.mxu1  ;;  %3712 = vmatprep.mubr.bf16.mxu1 %v6388_v50 }
 0x166   : >> { %3623 = vmatprep.mubr.bf16.mxu0 %v5593_v60  ;;  %v6698_v5 = vadd.f32 %v3076_v4, %v2963_v48  ;;  %v5597_v60 = vld [vmem:[#allocation2 + $0xc0] sm:$0xff]  }
 0x167   : >> { %v2969_v62 = vpop.f32.mrf.mxu0  ;;  %v3080_v10 = vpop.f32.mrf.mxu1 }
 0x168   : >> { %v6700_v61 = vadd.f32 %v3080_v10, %v2967_v53 }
 0x169   : >> { %v2971_v7 = vpop.f32.mrf.mxu0  ;;  %v3082_v18 = vpop.f32.mrf.mxu1 }
 0x16a   : >> { %v6702_v29 = vadd.f32 %v3082_v18, %v2969_v62 }
 0x16b   : >> { %v2973_v11 = vpop.f32.mrf.mxu0  ;;  %v3084_v37 = vpop.f32.mrf.mxu1 }
 0x16c   : >> { %7233 = vst [vmem:[#allocation9_spill] sm:$0xff] %v6702_v29  ;;  %3713 = vmatmul.mubr.bf16.gmra.mxu1 %v6415_v6 }
 0x16d   : >> { %v2977_v19 = vpop.f32.mrf.mxu0  ;;  %3624 = vmatmul.mubr.bf16.gmra.mxu0 %v5595_v28  ;;  %v3086_v40 = vpop.f32.mrf.mxu1  ;;  %3720 = vmatprep.mubr.bf16.mxu1 %v6424_v14  ;;  %v5600_v28 = vld [vmem:[#allocation2 + $0xe0] sm:$0xff]  }
 0x16e   : >> { %3761 = vmatprep.mubr.bf16.mxu0 %v5596_v33  ;;  %v6706_v44 = vadd.f32 %v3086_v40, %v2973_v11  ;;  %v5602_v40 = vld [vmem:[#allocation2 + $0xe8] sm:$0xff]  }
 0x16f   : >> { %v2979_v41 = vpop.f32.mrf.mxu0  ;;  %v3090_v48 = vpop.f32.mrf.mxu1 }
 0x170   : >> { %7234 = vst [vmem:[#allocation10_spill] sm:$0xff] %v6706_v44  ;;  %v6708_v53 = vadd.f32 %v3090_v48, %v2977_v19  ;;  %v5599_v19 = vld [vmem:[#allocation2 + $0xc8] sm:$0xff]  }
 0x171   : >> { %v2981_v25 = vpop.f32.mrf.mxu0  ;;  %v3092_v56 = vpop.f32.mrf.mxu1 }
 0x172   : >> { %7235 = vst [vmem:[#allocation11_spill] sm:$0xff] %v6708_v53  ;;  %v6712_v38 = vadd.f32 %v3092_v56, %v2979_v41  ;;  %v5601_v41 = vld [vmem:[#allocation2 + $0xd0] sm:$0xff]  }
 0x173   : >> { %v2983_v49 = vpop.f32.mrf.mxu0  ;;  %v3094_v50 = vpop.f32.mrf.mxu1 }
 0x174   : >> { %7236 = vst [vmem:[#allocation12_spill] sm:$0xff] %v6712_v38  ;;  %3721 = vmatmul.mubr.bf16.gmra.mxu1 %v6443_v22  ;;  %v5603_v50 = vld [vmem:[#allocation2 + $0xd8] sm:$0xff]  }
 0x175   : >> { %v6710_v59 = vpop.f32.mrf.mxu0  ;;  %3762 = vmatmul.mubr.bf16.vlgmr.msra.gmra.mxu0 %v5597_v60  ;;  %v3096_v4 = vpop.f32.mrf.mxu1  ;;  %5160 = vmatprep.mubr.bf16.mxu1 %v6455_v27 }
 0x176   : >> { %3769 = vmatprep.mubr.bf16.mxu0 %v5598_v47  ;;  %v6718_v10 = vadd.f32 %v3096_v4, %v2983_v49  ;;  %v5604_v4 = vld [vmem:[#allocation2 + $0xf0] sm:$0xff]  }
 0x177   : >> { %v6715_v62 = vpop.f32.mrf.mxu0  ;;  %v6732_v25 = vpop.f32.mrf.mxu1 }
 0x178   : >> { %7237 = vst [vmem:[#allocation13_spill] sm:$0xff] %v6718_v10 }
 0x179   : >> { %v3137_v7 = vpop.f32.mrf.mxu0  ;;  %v6738_v22 = vpop.f32.mrf.mxu1 }
 0x17b   : >> { %v6720_v11 = vpop.f32.mrf.mxu0  ;;  %v3250_v49 = vpop.f32.mrf.mxu1 }
 0x17c   : >> { %5161 = vmatmul.mubr.bf16.vlgmr.msra.gmra.mxu1 %v6480_v35 }
 0x17d   : >> { %v6722_v18 = vpop.f32.mrf.mxu0  ;;  %3770 = vmatmul.mubr.bf16.gmra.mxu0 %v5599_v19  ;;  %5164 = vmatprep.mubr.bf16.mxu1 %v6497_v42  ;;  %v6742_v60 = vpop.f32.mrf.mxu1 }
 0x17e   : >> { %3777 = vmatprep.mubr.bf16.mxu0 %v5600_v28 }
 0x17f   : >> { %v6725_v6 = vpop.f32.mrf.mxu0 }
 0x180   : >> { %v6746_v7 = vpop.f32.mrf.mxu1 }
 0x181   : >> { %v3147_v33 = vpop.f32.mrf.mxu0 }
 0x182   : >> { %v6752_v42 = vpop.f32.mrf.mxu1 }
 0x183   : >> { %v6728_v14 = vpop.f32.mrf.mxu0 }
 0x184   : >> { %5165 = vmatmul.mubr.bf16.gmra.mxu1 %v6516_v51  ;;  %v3260_v28 = vpop.f32.mrf.mxu1 }
 0x185   : >> { %v6730_v37 = vpop.f32.mrf.mxu0  ;;  %3778 = vmatmul.mubr.bf16.gmra.mxu0 %v5601_v41  ;;  %5168 = vmatprep.mubr.bf16.mxu1 %v6544_v63 }
 0x186   : >> { %3785 = vmatprep.mubr.bf16.mxu0 %v5602_v40  ;;  %v6756_v41 = vpop.f32.mrf.mxu1 }
 0x187   : >> { %v6735_v48 = vpop.f32.mrf.mxu0 }
 0x189   : >> { %v3157_v27 = vpop.f32.mrf.mxu0 }
 0x18a   : >> { %v6762_v27 = vpop.f32.mrf.mxu1 }
 0x18b   : >> { %v6740_v56 = vpop.f32.mrf.mxu0 }
 0x18c   : >> { %5169 = vmatmul.mubr.bf16.gmra.mxu1 %v6563_v12  ;;  %v6768_v63 = vpop.f32.mrf.mxu1 }
 0x18d   : >> { %v6744_v47 = vpop.f32.mrf.mxu0  ;;  %3786 = vmatmul.mubr.bf16.gmra.mxu0 %v5603_v50  ;;  %5172 = vmatprep.mubr.bf16.mxu1 %v6579_v21 }
 0x18e   : >> { %3793 = vmatprep.mubr.bf16.mxu0 %v5604_v4  ;;  %v3270_v50 = vpop.f32.mrf.mxu1 }
 0x18f   : >> { %v6749_v35 = vpop.f32.mrf.mxu0 }
 0x191   : >> { %v3167_v19 = vpop.f32.mrf.mxu0 }
 0x192   : >> { %v6772_v19 = vpop.f32.mrf.mxu1 }
 0x193   : >> { %v6754_v33 = vpop.f32.mrf.mxu0 }
 0x194   : >> { %5173 = vmatmul.mubr.bf16.gmra.mxu1 %v6592_v36 }
 0x195   : >> { %v6758_v40 = vpop.f32.mrf.mxu0  ;;  %3794 = vmatmul.mubr.bf16.gmra.mxu0 %v6426_v15  ;;  %v6778_v15 = vpop.f32.mrf.mxu1 }
 0x196   : >> { %3801 = vmatprep.mubr.bf16.mxu0 %v6431_v17 }
 0x197   : >> { %v6764_v51 = vpop.f32.mrf.mxu0  ;;  %v6783_v12 = vpop.f32.mrf.mxu1 }
 0x199   : >> { %v3177_v49 = vpop.f32.mrf.mxu0 }
 0x19a   : >> { %v3280_v49 = vpop.f32.mrf.mxu1 }
 0x19b   : >> { %v6770_v4 = vpop.f32.mrf.mxu0 }
 0x19c   : >> { %v6787_v0 = vpop.f32.mrf.mxu1 }
 0x19d   : >> { %v6774_v28 = vpop.f32.mrf.mxu0  ;;  %3802 = vmatmul.mubr.bf16.gmra.mxu0 %v6445_v23 }
 0x19e   : >> { %3809 = vmatprep.mubr.bf16.mxu0 %v6447_v24  ;;  %v6793_v23 = vpop.f32.mrf.mxu1 }
 0x19f   : >> { %v6780_v17 = vpop.f32.mrf.mxu0 }
 0x1a0   : >> { %v6797_v2 = vpop.f32.mrf.mxu1 }
 0x1a1   : >> { %v3187_v21 = vpop.f32.mrf.mxu0 }
 0x1a2   : >> { %v3290_v10 = vpop.f32.mrf.mxu1 }
 0x1a3   : >> { %v6785_v50 = vpop.f32.mrf.mxu0  ;;  %v3136_v10 = vadd.f32 %v6715_v62, %v6609_v58  ;;  %v3144_v58 = vadd.f32 %v6722_v18, %v6625_v20 }
 0x1a4   : >> { %v6801_v49 = vpop.f32.mrf.mxu1 }
 0x1a5   : >> { %v6789_v1 = vpop.f32.mrf.mxu0  ;;  %3810 = vmatmul.mubr.bf16.gmra.mxu0 %v6453_v26 }
 0x1a6   : >> { %7238 = vst [vmem:[#allocation14_spill] sm:$0xff] %v6789_v1  ;;  %3817 = vmatprep.mubr.bf16.mxu0 %v6463_v30  ;;  %v6806_v53 = vpop.f32.mrf.mxu1  ;;  %v3134_v30 = vadd.f32 %v6710_v59, %v6607_v55  ;;  %v3249_v1 = vadd.f32 %v6738_v22, %v3136_v10  ;;  %v3146_v22 = vadd.f32 %v6725_v6, %v6627_v32 }
 0x1a7   : >> { %v6795_v24 = vpop.f32.mrf.mxu0  ;;  %v3154_v6 = vadd.f32 %v6730_v37, %v6646_v57  ;;  %v3160_v37 = vadd.f32 %v6740_v56, %v6663_v16 }
 0x1a8   : >> { %7239 = vst [vmem:[#allocation15_spill] sm:$0xff] %v6795_v24  ;;  %v6812_v44 = vpop.f32.mrf.mxu1  ;;  %v3259_v20 = vadd.f32 %v6752_v42, %v3146_v22  ;;  %v3156_v42 = vadd.f32 %v6735_v48, %v6652_v3  ;;  %v3164_v3 = vadd.f32 %v6744_v47, %v6668_v39  ;;  %v3170_v47 = vadd.f32 %v6754_v33, %v6678_v54 }
 0x1a9   : >> { %v3197_v36 = vpop.f32.mrf.mxu0 }
 0x1aa   : >> { %v3300_v36 = vpop.f32.mrf.mxu1  ;;  %v3269_v57 = vadd.f32 %v6768_v63, %v3156_v42 }
 0x1ab   : >> { %v6799_v21 = vpop.f32.mrf.mxu0 }
 0x1ac   : >> { %7240 = vst [vmem:[#allocation16_spill] sm:$0xff] %v6799_v21  ;;  %v6819_v29 = vpop.f32.mrf.mxu1 }
 0x1ad   : >> { %v6803_v38 = vpop.f32.mrf.mxu0  ;;  %3818 = vmatmul.mubr.bf16.gmra.mxu0 %v6478_v34 }
 0x1ae   : >> { %7241 = vst [vmem:[#allocation17_spill] sm:$0xff] %v6803_v38  ;;  %v3247_v38 = vadd.f32 %v6732_v25, %v3134_v30  ;;  %v6826_v59 = vpop.f32.mrf.mxu1 }
 0x1af   : >> { %v6808_v26 = vpop.f32.mrf.mxu0 }
 0x1b0   : >> { %7242 = vst [vmem:[#allocation18_spill] sm:$0xff] %v6808_v26  ;;  %v3140_v26 = vadd.f32 %v6720_v11, %v6617_v9  ;;  %v6830_v36 = vpop.f32.mrf.mxu1 }
 0x1b1   : >> { %v3207_v24 = vpop.f32.mrf.mxu0 }
 0x1b2   : >> { %v3253_v30 = vadd.f32 %v6742_v60, %v3140_v26  ;;  %v3310_v10 = vpop.f32.mrf.mxu1 }
 0x1b3   : >> { %v6816_v21 = vpop.f32.mrf.mxu0 }
 0x1b5   : >> { %v3359_v34 = vpop.f32.mrf.mxu0 }
 0x1b6   : >> { %v6824_v55 = vadd.f32 %v3359_v34, %v3247_v38  ;;  %v3257_v38 = vadd.f32 %v6746_v7, %v3144_v58  ;;  %v6836_v34 = vpop.f32.mrf.mxu1 }
 0x1b7   : >> { %v3361_v24 = vpop.f32.mrf.mxu0 }
 0x1b8   : >> { %7243 = vst [vmem:[#allocation19_spill] sm:$0xff] %v6824_v55  ;;  %v3362_v62 = vadd.f32 %v3361_v24, %v3249_v1  ;;  %v3150_v1 = vadd.f32 %v6728_v14, %v6638_v45  ;;  %v6843_v60 = vpop.f32.mrf.mxu1 }
 0x1b9   : >> { %v3363_v25 = vpop.f32.mrf.mxu0 }
 0x1ba   : >> { %3924 = vst [vmem:[#allocation3 + $0xd0] sm:$0xff] %v3362_v62  ;;  %v6847_v7 = vpop.f32.mrf.mxu1  ;;  %v3263_v58 = vadd.f32 %v6756_v41, %v3150_v1 }
 0x1bb   : >> { %v3365_v9 = vpop.f32.mrf.mxu0 }
 0x1bc   : >> { %v3366_v11 = vadd.f32 %v3365_v9, %v3253_v30  ;;  %v3320_v45 = vpop.f32.mrf.mxu1 }
 0x1bd   : >> { %v3369_v55 = vpop.f32.mrf.mxu0  ;;  %v3283_v45 = vadd.f32 %v6787_v0, %v3170_v47  ;;  %v7246_v47 = vld [vmem:[#allocation9_spill] sm:$0xff] }
 0x1be   : >> { %3927 = vst [vmem:[#allocation3 + $0x160] sm:$0xff] %v3366_v11  ;;  %v6841_v18 = vadd.f32 %v3369_v55, %v3257_v38  ;;  %v3267_v55 = vadd.f32 %v6762_v27, %v3154_v6  ;;  %v6853_v25 = vpop.f32.mrf.mxu1  ;;  %v3273_v38 = vadd.f32 %v6772_v19, %v3160_v37  ;;  %v3166_v11 = vadd.f32 %v6749_v35, %v6673_v43 }
 0x1bf   : >> { %v3371_v32 = vpop.f32.mrf.mxu0 }
 0x1c0   : >> { %v3372_v26 = vadd.f32 %v3371_v32, %v3259_v20  ;;  %v4888_v41 = vpop.f32.mrf.mxu1  ;;  %v3277_v20 = vadd.f32 %v6778_v15, %v3164_v3  ;;  %v3279_v39 = vadd.f32 %v6783_v12, %v3166_v11  ;;  %v3176_v12 = vadd.f32 %v6764_v51, %v6685_v13 }
 0x1c1   : >> { %v3373_v24 = vpop.f32.mrf.mxu0 }
 0x1c2   : >> { %3930 = vst [vmem:[#allocation3 + $0x178] sm:$0xff] %v3372_v26  ;;  %v4889_v9 = vpop.f32.mrf.mxu1  ;;  %v3174_v24 = vadd.f32 %v6758_v40, %v6683_v31  ;;  %v3289_v31 = vadd.f32 %v6797_v2, %v3176_v12  ;;  %v3180_v40 = vadd.f32 %v6770_v4, %v6691_v8  ;;  %v3186_v2 = vadd.f32 %v6780_v17, %v6695_v52  ;;  %v7249_v12 = vld [vmem:[#allocation16_spill] sm:$0xff] }
 0x1c3   : >> { %v3375_v14 = vpop.f32.mrf.mxu0  ;;  %v6865_v63 = vadd.f32 %v4889_v9, %v4888_v41  ;;  %v3184_v41 = vadd.f32 %v6774_v28, %v6693_v46  ;;  %v3190_v28 = vadd.f32 %v6785_v50, %v6698_v5 }
 0x1c4   : >> { %v3376_v62 = vadd.f32 %v3375_v14, %v3263_v58  ;;  %v4891_v16 = vpop.f32.mrf.mxu1  ;;  %v3299_v46 = vadd.f32 %v6812_v44, %v3186_v2  ;;  %v7247_v44 = vld [vmem:[#allocation15_spill] sm:$0xff] }
 0x1c5   : >> { %v3379_v30 = vpop.f32.mrf.mxu0 }
 0x1c6   : >> { %3933 = vst [vmem:[#allocation3 + $0x90] sm:$0xff] %v3376_v62  ;;  %v6858_v22 = vadd.f32 %v3379_v30, %v3267_v55  ;;  %v4892_v32 = vpop.f32.mrf.mxu1  ;;  %v3287_v55 = vadd.f32 %v6793_v23, %v3174_v24 }
 0x1c7   : >> { %v3381_v10 = vpop.f32.mrf.mxu0  ;;  %v6871_v26 = vadd.f32 %v4892_v32, %v4891_v16 }
 0x1c8   : >> { %v3382_v48 = vadd.f32 %v3381_v10, %v3269_v57  ;;  %v4894_v43 = vpop.f32.mrf.mxu1 }
 0x1c9   : >> { %v3383_v27 = vpop.f32.mrf.mxu0 }
 0x1ca   : >> { %3936 = vst [vmem:[#allocation3 + $0x100] sm:$0xff] %v3382_v48  ;;  %v4895_v15 = vpop.f32.mrf.mxu1  ;;  %v3293_v48 = vadd.f32 %v6801_v49, %v3180_v40  ;;  %v3297_v27 = vadd.f32 %v6806_v53, %v3184_v41  ;;  %v7253_v41 = vld [vmem:[#allocation12_spill] sm:$0xff] }
 0x1cb   : >> { %v3385_v56 = vpop.f32.mrf.mxu0  ;;  %v6880_v14 = vadd.f32 %v4895_v15, %v4894_v43  ;;  %v3196_v43 = vadd.f32 %v7247_v44, %v7246_v47 }
 0x1cc   : >> { %v3386_v1 = vadd.f32 %v3385_v56, %v3273_v38  ;;  %v4897_v54 = vpop.f32.mrf.mxu1 }
 0x1cd   : >> { %v3389_v6 = vpop.f32.mrf.mxu0 }
 0x1ce   : >> { %3939 = vst [vmem:[#allocation3 + $0x80] sm:$0xff] %v3386_v1  ;;  %v6873_v19 = vadd.f32 %v3389_v6, %v3277_v20  ;;  %v4898_v30 = vpop.f32.mrf.mxu1  ;;  %v7245_v20 = vld [vmem:[#allocation14_spill] sm:$0xff] }
 0x1cf   : >> { %v3391_v35 = vpop.f32.mrf.mxu0  ;;  %v6886_v37 = vadd.f32 %v4898_v30, %v4897_v54  ;;  %v3194_v1 = vadd.f32 %v7245_v20, %v6700_v61  ;;  %v3309_v61 = vadd.f32 %v6830_v36, %v3196_v43  ;;  %v7251_v30 = vld [vmem:[#allocation11_spill] sm:$0xff]  ;;  %v7254_v36 = vld [vmem:[#allocation18_spill] sm:$0xff] }
 0x1d0   : >> { %v3392_v58 = vadd.f32 %v3391_v35, %v3279_v39  ;;  %v4900_v13 = vpop.f32.mrf.mxu1  ;;  %v3303_v39 = vadd.f32 %v6819_v29, %v3190_v28 }
 0x1d1   : >> { %v3393_v42 = vpop.f32.mrf.mxu0  ;;  %v3307_v24 = vadd.f32 %v6826_v59, %v3194_v1 }
 0x1d2   : >> { %3942 = vst [vmem:[#allocation3 + $0x120] sm:$0xff] %v3392_v58  ;;  %v4901_v23 = vpop.f32.mrf.mxu1 }
 0x1d3   : >> { %v3395_v33 = vpop.f32.mrf.mxu0  ;;  %v6895_v9 = vadd.f32 %v4901_v23, %v4900_v13 }
 0x1d4   : >> { %v3396_v62 = vadd.f32 %v3395_v33, %v3283_v45  ;;  %v4903_v8 = vpop.f32.mrf.mxu1  ;;  %v7248_v45 = vld [vmem:[#allocation10_spill] sm:$0xff] }
 0x1d5   : >> { %v3399_v57 = vpop.f32.mrf.mxu0  ;;  %v3200_v54 = vadd.f32 %v7249_v12, %v7248_v45 }
 0x1d6   : >> { %3945 = vst [vmem:[#allocation3 + $0xb8] sm:$0xff] %v3396_v62  ;;  %v6888_v0 = vadd.f32 %v3399_v57, %v3287_v55  ;;  %v4904_v11 = vpop.f32.mrf.mxu1  ;;  %v7252_v57 = vld [vmem:[#allocation17_spill] sm:$0xff] }
 0x1d7   : >> { %v3401_v51 = vpop.f32.mrf.mxu0  ;;  %v6901_v56 = vadd.f32 %v4904_v11, %v4903_v8  ;;  %v7255_v11 = vld [vmem:[#allocation13_spill] sm:$0xff] }
 0x1d8   : >> { %v3402_v10 = vadd.f32 %v3401_v51, %v3289_v31  ;;  %v4906_v52 = vpop.f32.mrf.mxu1  ;;  %v3204_v31 = vadd.f32 %v7252_v57, %v7251_v30  ;;  %v3313_v51 = vadd.f32 %v6836_v34, %v3200_v54 }
 0x1d9   : >> { %v3403_v3 = vpop.f32.mrf.mxu0 }
 0x1da   : >> { %3948 = vst [vmem:[#allocation3 + $0xf8] sm:$0xff] %v3402_v10  ;;  %v4907_v53 = vpop.f32.mrf.mxu1  ;;  %v3206_v10 = vadd.f32 %v7254_v36, %v7253_v41  ;;  %v3317_v2 = vadd.f32 %v6843_v60, %v3204_v31 }
 0x1db   : >> { %v3405_v4 = vpop.f32.mrf.mxu0  ;;  %v6910_v35 = vadd.f32 %v4907_v53, %v4906_v52 }
 0x1dc   : >> { %v3406_v38 = vadd.f32 %v3405_v4, %v3293_v48  ;;  %v4909_v5 = vpop.f32.mrf.mxu1 }
 0x1dd   : >> { %v3409_v16 = vpop.f32.mrf.mxu0 }
 0x1de   : >> { %3951 = vst [vmem:[#allocation3 + $0xa0] sm:$0xff] %v3406_v38  ;;  %v6903_v49 = vadd.f32 %v3409_v16, %v3297_v27  ;;  %v4910_v15 = vpop.f32.mrf.mxu1  ;;  %v3319_v38 = vadd.f32 %v6847_v7, %v3206_v10  ;;  %v3210_v16 = vadd.f32 %v6816_v21, %v7255_v11 }
 0x1df   : >> { %v3411_v17 = vpop.f32.mrf.mxu0  ;;  %v6916_v33 = vadd.f32 %v4910_v15, %v4909_v5 }
 0x1e0   : >> { %7244 = vst [vmem:[#allocation20_spill] sm:$0xff] %v6903_v49  ;;  %v3412_v32 = vadd.f32 %v3411_v17, %v3299_v46  ;;  %v4912_v55 = vpop.f32.mrf.mxu1  ;;  %v3323_v60 = vadd.f32 %v6853_v25, %v3210_v16 }
 0x1e1   : >> { %v3413_v6 = vpop.f32.mrf.mxu0 }
 0x1e2   : >> { %3954 = vst [vmem:[#allocation3 + $0x140] sm:$0xff] %v3412_v32  ;;  %v4913_v59 = vpop.f32.mrf.mxu1 }
 0x1e3   : >> { %v3415_v50 = vpop.f32.mrf.mxu0  ;;  %v6925_v23 = vadd.f32 %v4913_v59, %v4912_v55 }
 0x1e4   : >> { %v3416_v58 = vadd.f32 %v3415_v50, %v3303_v39  ;;  %v4915_v3 = vpop.f32.mrf.mxu1 }
 0x1e5   : >> { %v3419_v42 = vpop.f32.mrf.mxu0 }
 0x1e6   : >> { %3957 = vst [vmem:[#allocation3 + $0x28] sm:$0xff] %v3416_v58  ;;  %v6918_v29 = vadd.f32 %v3419_v42, %v3307_v24  ;;  %v4916_v4 = vpop.f32.mrf.mxu1 }
 0x1e7   : >> { %v3421_v62 = vpop.f32.mrf.mxu0  ;;  %v6931_v46 = vadd.f32 %v4916_v4, %v4915_v3 }
 0x1e8   : >> { %7250 = vst [vmem:[#allocation14_spill] sm:$0xff] %v6918_v29  ;;  %v3422_v40 = vadd.f32 %v3421_v62, %v3309_v61  ;;  %v4918_v28 = vpop.f32.mrf.mxu1 }
 0x1e9   : >> { %v3423_v13 = vpop.f32.mrf.mxu0 }
 0x1ea   : >> { %3960 = vst [vmem:[#allocation3 + $0x18] sm:$0xff] %v3422_v40  ;;  %v4919_v20 = vpop.f32.mrf.mxu1 }
 0x1eb   : >> { %v3425_v48 = vpop.f32.mrf.mxu0  ;;  %v6936_v32 = vadd.f32 %v4919_v20, %v4918_v28 }
 0x1ec   : >> { %v3426_v8 = vadd.f32 %v3425_v48, %v3313_v51  ;;  %v4921_v53 = vpop.f32.mrf.mxu1 }
 0x1ed   : >> { %v3429_v27 = vpop.f32.mrf.mxu0  ;;  %7257 = vst [vmem:[#allocation15_spill] sm:$0xff] %v6936_v32  ;;  %v3981_v32 = vld [vmem:[#allocation3 + $0x178] sm:$0xfc] }
 0x1ee   : >> { %3963 = vst [vmem:[#allocation3] sm:$0xff] %v3426_v8  ;;  %v6933_v34 = vadd.f32 %v3429_v27, %v3317_v2  ;;  %v4922_v39 = vpop.f32.mrf.mxu1 }
 0x1ef   : >> { %v3431_v52 = vpop.f32.mrf.mxu0  ;;  %v6938_v47 = vadd.f32 %v4922_v39, %v4921_v53 }
 0x1f0   : >> { %7256 = vst [vmem:[#allocation9_spill] sm:$0xff] %v6933_v34  ;;  %v3432_v17 = vadd.f32 %v3431_v52, %v3319_v38  ;;  %v4924_v44 = vpop.f32.mrf.mxu1 }
 0x1f1   : >> { %v3433_v1 = vpop.f32.mrf.mxu0 }
 0x1f2   : >> { %3966 = vst [vmem:[#allocation3 + $0x68] sm:$0xff] %v3432_v17  ;;  %v4925_v50 = vpop.f32.mrf.mxu1 }
 0x1f3   : >> { %v3435_v7 = vpop.f32.mrf.mxu0  ;;  %v6940_v58 = vadd.f32 %v4925_v50, %v4924_v44 }
 0x1f4   : >> { %v3436_v6 = vadd.f32 %v3435_v7, %v3323_v60  ;;  %v4927_v15 = vpop.f32.mrf.mxu1 }
 0x1f5   : >> { %v4952_v21 = vpop.f32.mrf.mxu0 }
 0x1f6   : >> { %3969 = vst [vmem:[#allocation3 + $0x158] sm:$0xff] %v3436_v6  ;;  %v4928_v45 = vpop.f32.mrf.mxu1 }
 0x1f7   : >> { %v4953_v43 = vpop.f32.mrf.mxu0  ;;  %v6945_v54 = vadd.f32 %v4928_v45, %v4927_v15 }
 0x1f8   : >> { %v4954_v5 = vadd.f32 %v4953_v43, %v4952_v21  ;;  %v4930_v62 = vpop.f32.mrf.mxu1 }
 0x1f9   : >> { %v4955_v24 = vpop.f32.mrf.mxu0 }
 0x1fa   : >> { %v6943_v25 = vadd.f32 %v4954_v5, %v6865_v63  ;;  %v4931_v31 = vpop.f32.mrf.mxu1 }
 0x1fb   : >> { %v4956_v42 = vpop.f32.mrf.mxu0  ;;  %v6950_v59 = vadd.f32 %v4931_v31, %v4930_v62 }
 0x1fc   : >> { %v4957_v61 = vadd.f32 %v4956_v42, %v4955_v24  ;;  %v4933_v13 = vpop.f32.mrf.mxu1 }
 0x1fd   : >> { %v4958_v12 = vpop.f32.mrf.mxu0  ;;  %7258 = vst [vmem:[#allocation10_spill] sm:$0xff] %v6950_v59 }
 0x1fe   : >> { %v6948_v55 = vadd.f32 %v4957_v61, %v6871_v26  ;;  %v4934_v36 = vpop.f32.mrf.mxu1 }
 0x1ff   : >> { %v4959_v30 = vpop.f32.mrf.mxu0  ;;  %v4935_v3 = vadd.f32 %v4934_v36, %v4933_v13 }
 0x200   : >> { %v4960_v57 = vadd.f32 %v4959_v30, %v4958_v12  ;;  %v6958_v26 = vpop.f32.mrf.mxu1 }
 0x201   : >> { %v4961_v40 = vpop.f32.mrf.mxu0 }
 0x202   : >> { %v6953_v63 = vadd.f32 %v4960_v57, %v6880_v14  ;;  %v6960_v4 = vpop.f32.mrf.mxu1 }
 0x203   : >> { %v4962_v51 = vpop.f32.mrf.mxu0 }
 0x204   : >> { %v4963_v41 = vadd.f32 %v4962_v51, %v4961_v40  ;;  %v6965_v14 = vpop.f32.mrf.mxu1 }
 0x205   : >> { %v4964_v10 = vpop.f32.mrf.mxu0 }
 0x206   : >> { %v6956_v48 = vadd.f32 %v4963_v41, %v6886_v37  ;;  %v6967_v28 = vpop.f32.mrf.mxu1 }
 0x207   : >> { %v4965_v2 = vpop.f32.mrf.mxu0 }
 0x208   : >> { %v4966_v8 = vadd.f32 %v4965_v2, %v4964_v10  ;;  %v5022_v17 = vpop.f32.mrf.mxu1 }
 0x209   : >> { %v4967_v27 = vpop.f32.mrf.mxu0 }
 0x20a   : >> { %v6963_v38 = vadd.f32 %v4966_v8, %v6895_v9  ;;  %v5023_v1 = vpop.f32.mrf.mxu1 }
 0x20b   : >> { %v4968_v11 = vpop.f32.mrf.mxu0 }
 0x20c   : >> { %v4969_v16 = vadd.f32 %v4968_v11, %v4967_v27  ;;  %v6978_v53 = vpop.f32.mrf.mxu1 }
 0x20d   : >> { %v6969_v52 = vpop.f32.mrf.mxu0 }
 0x20e   : >> { %v6972_v37 = vadd.f32 %v4969_v16, %v6901_v56  ;;  %v5026_v7 = vpop.f32.mrf.mxu1 }
 0x20f   : >> { %v6974_v20 = vpop.f32.mrf.mxu0 }
 0x210   : >> { %v6984_v39 = vpop.f32.mrf.mxu1 }
 0x211   : >> { %v6976_v60 = vpop.f32.mrf.mxu0 }
 0x212   : >> { %v6988_v44 = vpop.f32.mrf.mxu1 }
 0x213   : >> { %v6980_v9 = vpop.f32.mrf.mxu0 }
 0x214   : >> { %v6992_v43 = vpop.f32.mrf.mxu1 }
 0x215   : >> { %v6982_v6 = vpop.f32.mrf.mxu0 }
 0x216   : >> { %v6996_v50 = vpop.f32.mrf.mxu1 }
 0x217   : >> { %v6986_v21 = vpop.f32.mrf.mxu0 }
 0x218   : >> { %v7000_v15 = vpop.f32.mrf.mxu1 }
 0x219   : >> { %v6990_v56 = vpop.f32.mrf.mxu0 }
 0x21a   : >> { %v7004_v61 = vpop.f32.mrf.mxu1 }
 0x21b   : >> { %v6994_v5 = vpop.f32.mrf.mxu0 }
 0x21c   : >> { %v7006_v12 = vpop.f32.mrf.mxu1 }
 0x21d   : >> { %v6998_v24 = vpop.f32.mrf.mxu0 }
 0x21e   : >> { %v7008_v57 = vpop.f32.mrf.mxu1 }
 0x21f   : >> { %v7002_v42 = vpop.f32.mrf.mxu0 }
 0x220   : >> { %v7013_v13 = vpop.f32.mrf.mxu1 }
 0x221   : >> { %v4985_v45 = vpop.f32.mrf.mxu0 }
 0x222   : >> { %v7015_v36 = vpop.f32.mrf.mxu1 }
 0x223   : >> { %v4986_v62 = vpop.f32.mrf.mxu0 }
 0x224   : >> { %v4987_v30 = vadd.f32 %v4986_v62, %v4985_v45  ;;  %v7020_v8 = vpop.f32.mrf.mxu1 }
 0x225   : >> { %v4988_v31 = vpop.f32.mrf.mxu0 }
 0x226   : >> { %v7011_v40 = vadd.f32 %v4987_v30, %v6938_v47  ;;  %v7022_v16 = vpop.f32.mrf.mxu1 }
 0x227   : >> { %v4989_v51 = vpop.f32.mrf.mxu0  ;;  %7261 = vst [vmem:[#allocation17_spill] sm:$0xff] %v7022_v16 }
 0x228   : >> { %7259 = vst [vmem:[#allocation16_spill] sm:$0xff] %v7011_v40  ;;  %v4990_v41 = vadd.f32 %v4989_v51, %v4988_v31  ;;  %v7029_v62 = vpop.f32.mrf.mxu1 }
 0x229   : >> { %v4991_v10 = vpop.f32.mrf.mxu0  ;;  %7264 = vst [vmem:[#allocation13_spill] sm:$0xff] %v7029_v62  ;;  %v3980_v62 = vld [vmem:[#allocation3 + $0x160] sm:$0x3] }
 0x22a   : >> { %v7018_v2 = vadd.f32 %v4990_v41, %v6940_v58  ;;  %v7033_v31 = vpop.f32.mrf.mxu1 }
 0x22b   : >> { %v4992_v27 = vpop.f32.mrf.mxu0  ;;  %7266 = vst [vmem:[#allocation22_spill] sm:$0xff] %v7033_v31 }
 0x22c   : >> { %7260 = vst [vmem:[#allocation11_spill] sm:$0xff] %v7018_v2  ;;  %v4993_v11 = vadd.f32 %v4992_v27, %v4991_v10  ;;  %v7035_v58 = vpop.f32.mrf.mxu1 }
 0x22d   : >> { %v7024_v45 = vpop.f32.mrf.mxu0  ;;  %7267 = vst [vmem:[#allocation23_spill] sm:$0xff] %v7035_v58  ;;  %v5024_v58 = vadd.f32 %v5023_v1, %v5022_v17 }
 0x22e   : >> { %7262 = vst [vmem:[#allocation12_spill] sm:$0xff] %v7024_v45  ;;  %v7027_v47 = vadd.f32 %v4993_v11, %v6945_v54  ;;  %v7037_v29 = vpop.f32.mrf.mxu1 }
 0x22f   : >> { %v7031_v30 = vpop.f32.mrf.mxu0  ;;  %7268 = vst [vmem:[#allocation24_spill] sm:$0xff] %v7037_v29  ;;  %v3979_v29 = vld [vmem:[#allocation3 + $0xd0] sm:$0xfc] }
 0x230   : >> { %7263 = vst [vmem:[#allocation18_spill] sm:$0xff] %v7027_v47  ;;  %7265 = vst [vmem:[#allocation21_spill] sm:$0xff] %v7031_v30  ;;  %v7041_v2 = vpop.f32.mrf.mxu1  ;;  %v3982_v30 = vld [vmem:[#allocation3 + $0x90] sm:$0x3]  ;;  %v4012_v17 = vrot.slane %v3979_v29, 2 }
 0x231   : >> { %v4997_v51 = vpop.f32.mrf.mxu0  ;;  %7270 = vst [vmem:[#allocation26_spill] sm:$0xff] %v7041_v2  ;;  %v4013_v2 = vrot.slane %v3980_v62, 2  ;;  %v4016_v62 = vrot.slane %v3982_v30, 2  ;;  %v3984_v29 = vld [vmem:[#allocation3 + $0x80] sm:$0x3] }
 0x232   : >> { %v7043_v11 = vpop.f32.mrf.mxu1  ;;  %v3988_v30 = vld [vmem:[#allocation3 + $0xa0] sm:$0x3] }
 0x233   : >> { %v4998_v41 = vpop.f32.mrf.mxu0  ;;  %7271 = vst [vmem:[#allocation27_spill] sm:$0xff] %v7043_v11 }
 0x234   : >> { %v4999_v34 = vadd.f32 %v4998_v41, %v4997_v51  ;;  %v7045_v40 = vpop.f32.mrf.mxu1 }
 0x235   : >> { %v5080_v10 = vpop.f32.mrf.mxu0  ;;  %7272 = vst [vmem:[#allocation28_spill] sm:$0xff] %v7045_v40  ;;  %v3675_v40 = vadd.f32 %v5024_v58, %v6953_v63 }
 0x236   : >> { %v7039_v27 = vadd.f32 %v4999_v34, %v4935_v3  ;;  %v7047_v49 = vpop.f32.mrf.mxu1  ;;  %v5018_v34 = vadd.f32 %v6960_v4, %v6958_v26  ;;  %v5021_v26 = vadd.f32 %v6967_v28, %v6965_v14 }
 0x237   : >> { %v5081_v54 = vpop.f32.mrf.mxu0  ;;  %7273 = vst [vmem:[#allocation29_spill] sm:$0xff] %v7047_v49  ;;  %v5027_v49 = vadd.f32 %v5026_v7, %v6978_v53  ;;  %v4014_v53 = vsel %vm4011_vm8, %v4012_v17, %v4013_v2  ;;  %v3983_v7 = vld [vmem:[#allocation3 + $0x100] sm:$0xfc]  ;;  %v5030_v2 = vadd.f32 %v6988_v44, %v6984_v39  ;;  %v4975_v44 = vadd.f32 %v6980_v9, %v6976_v60 }
 0x238   : >> { %7269 = vst [vmem:[#allocation25_spill] sm:$0xff] %v7039_v27  ;;  %v7049_v51 = vpop.f32.mrf.mxu1  ;;  %v5082_v45 = vadd.f32 %v5081_v54, %v5080_v10  ;;  %v3667_v16 = vadd.f32 %v5018_v34, %v6943_v25  ;;  %v4972_v25 = vadd.f32 %v6974_v20, %v6969_v52  ;;  %v4978_v60 = vadd.f32 %v6986_v21, %v6982_v6 }
 0x239   : >> { %v5083_v47 = vpop.f32.mrf.mxu0  ;;  %7274 = vst [vmem:[#allocation30_spill] sm:$0xff] %v7049_v51  ;;  %v3678_v58 = vadd.f32 %v5027_v49, %v6956_v48  ;;  %v4019_v48 = vrot.slane %v3984_v29, 2 }
 0x23a   : >> { %v7053_v27 = vpop.f32.mrf.mxu1  ;;  %v3764_v54 = vadd.f32 %v5082_v45, %v3667_v16  ;;  %v3987_v45 = vld [vmem:[#allocation3 + $0xf8] sm:$0xfc]  ;;  %v3594_v39 = vadd.f32 %v4972_v25, %v6910_v35  ;;  %v4981_v25 = vadd.f32 %v6994_v5, %v6990_v56 }
 0x23b   : >> { %v5084_v59 = vpop.f32.mrf.mxu0  ;;  %7275 = vst [vmem:[#allocation31_spill] sm:$0xff] %v7053_v27  ;;  %v3986_v27 = vld [vmem:[#allocation3 + $0xb8] sm:$0x3]  ;;  %v4024_v29 = vrot.slane %v3987_v45, 2 }
 0x23c   : >> { %v7057_v1 = vpop.f32.mrf.mxu1  ;;  %v5085_v10 = vadd.f32 %v5084_v59, %v5083_v47  ;;  %v4018_v59 = vrot.slane %v3983_v7, 2  ;;  %v4022_v20 = vrot.slane %v3986_v27, 2  ;;  %v5033_v27 = vadd.f32 %v6996_v50, %v6992_v43 }
 0x23d   : >> { %v5086_v31 = vpop.f32.mrf.mxu0  ;;  %7276 = vst [vmem:[#allocation32_spill] sm:$0xff] %v7057_v1  ;;  %v4015_v1 = vrot.slane %v3981_v32, 2 }
 0x23e   : >> { %v4020_v35 = vsel %vm4011_vm8, %v4018_v59, %v4019_v48  ;;  %v3686_v6 = vadd.f32 %v5033_v27, %v6972_v37 }
 0x23f   : >> { %v5087_v41 = vpop.f32.mrf.mxu0  ;;  %v4017_v32 = vsel %vm4011_vm8, %v4015_v1, %v4016_v62  ;;  %v3990_v1 = vld [vmem:[#allocation3 + $0x28] sm:$0x3]  ;;  %v3683_v62 = vadd.f32 %v5030_v2, %v6963_v38  ;;  %v3602_v2 = vadd.f32 %v4978_v60, %v6925_v23 }
 0x240   : >> { %v5088_v3 = vadd.f32 %v5087_v41, %v5086_v31  ;;  %v7062_v41 = vpop.f32.mrf.mxu1  ;;  %v7084_v7 = vadd.f32 %v4017_v32, %v6841_v18  ;;  %v3597_v18 = vadd.f32 %v4975_v44, %v6916_v33  ;;  %v4984_v33 = vadd.f32 %v7002_v42, %v6998_v24 }
 0x241   : >> { %v5089_v11 = vpop.f32.mrf.mxu0  ;;  %7277 = vst [vmem:[#allocation33_spill] sm:$0xff] %v7062_v41  ;;  %v4025_v41 = vrot.slane %v3988_v30, 2  ;;  %v3605_v32 = vadd.f32 %v4981_v25, %v6931_v46 }
 0x242   : >> { %v3772_v4 = vadd.f32 %v5088_v3, %v3675_v40  ;;  %v5162_v14 = vpop.f32.mrf.mxu1  ;;  %v3985_v40 = vld [vmem:[#allocation3 + $0x120] sm:$0xfc]  ;;  %v7278_v3 = vld [vmem:[#allocation19_spill] sm:$0xff] }
 0x243   : >> { %v5090_v51 = vpop.f32.mrf.mxu0  ;;  %v7072_v49 = vadd.f32 %v4014_v53, %v7278_v3  ;;  %v5036_v53 = vadd.f32 %v7004_v61, %v7000_v15  ;;  %v4026_v61 = vsel %vm4011_vm8, %v4024_v29, %v4025_v41  ;;  %v5042_v41 = vadd.f32 %v7015_v36, %v7013_v13  ;;  %v7288_v29 = vld [vmem:[#allocation27_spill] sm:$0xff] }
 0x244   : >> { %v5091_v31 = vadd.f32 %v5090_v51, %v5089_v11  ;;  %v3670_v11 = vadd.f32 %v5021_v26, %v6948_v55  ;;  %v3869_v51 = vadd.f32 %v5162_v14, %v3772_v4  ;;  %v3860_v16 = vpop.f32.mrf.mxu1  ;;  %v4021_v26 = vrot.slane %v3985_v40, 2 }
 0x245   : >> { %v5092_v63 = vpop.f32.mrf.mxu0  ;;  %v3861_v47 = vadd.f32 %v3860_v16, %v3764_v54  ;;  %v4028_v54 = vrot.slane %v3990_v1, 2  ;;  %v3691_v21 = vadd.f32 %v5036_v53, %v3594_v39  ;;  %v5039_v40 = vadd.f32 %v7008_v57, %v7006_v12  ;;  %v7283_v1 = vld [vmem:[#allocation13_spill] sm:$0xff]  ;;  %v7285_v53 = vld [vmem:[#allocation23_spill] sm:$0xff] }
 0x246   : >> { %v3775_v34 = vadd.f32 %v5091_v31, %v3678_v58  ;;  %3931 = vst [vmem:[#allocation3 + $0x108] sm:$0xff] %v3869_v51  ;;  %v3767_v17 = vadd.f32 %v5085_v10, %v3670_v11  ;;  %v5163_v4 = vpop.f32.mrf.mxu1  ;;  %v4023_v38 = vsel %vm4011_vm8, %v4021_v26, %v4022_v20  ;;  %v3989_v10 = vld [vmem:[#allocation3 + $0x140] sm:$0xfc]  ;;  %v7103_v3 = vadd.f32 %v4020_v35, %v6858_v22  ;;  %v7280_v20 = vld [vmem:[#allocation15_spill] sm:$0xff] }
 0x247   : >> { %v5093_v28 = vpop.f32.mrf.mxu0  ;;  %3925 = vst [vmem:[#allocation3 + $0x10] sm:$0xff] %v3861_v47  ;;  %v4027_v11 = vrot.slane %v3989_v10, 2  ;;  %v7106_v12 = vadd.f32 %v4023_v38, %v6873_v19  ;;  %v7109_v23 = vadd.f32 %v4026_v61, %v6888_v0  ;;  %v3694_v42 = vadd.f32 %v5039_v40, %v3597_v18  ;;  %v7281_v0 = vld [vmem:[#allocation12_spill] sm:$0xff]  ;;  %v7282_v47 = vld [vmem:[#allocation21_spill] sm:$0xff] }
 0x248   : >> { %v5094_v55 = vadd.f32 %v5093_v28, %v5092_v63  ;;  %v3872_v63 = vadd.f32 %v5163_v4, %v3775_v34  ;;  %v3863_v9 = vpop.f32.mrf.mxu1  ;;  %v3699_v22 = vadd.f32 %v5042_v41, %v3602_v2  ;;  %v3610_v45 = vadd.f32 %v4984_v33, %v7280_v20  ;;  %v7293_v41 = vld [vmem:[#allocation30_spill] sm:$0xff]  ;;  %v7294_v33 = vld [vmem:[#allocation31_spill] sm:$0xff] }
 0x249   : >> { %v5095_v52 = vpop.f32.mrf.mxu0  ;;  %v3864_v43 = vadd.f32 %v3863_v9, %v3767_v17  ;;  %v4029_v57 = vsel %vm4011_vm8, %v4027_v11, %v4028_v54  ;;  %v4996_v17 = vadd.f32 %v7282_v47, %v7281_v0  ;;  %v7289_v54 = vld [vmem:[#allocation20_spill] sm:$0xff]  ;;  %v7292_v11 = vld [vmem:[#allocation29_spill] sm:$0xff]  ;;  %v7297_v47 = vld [vmem:[#allocation18_spill] sm:$0xff] }
 0x24a   : >> { %3934 = vst [vmem:[#allocation3 + $0x118] sm:$0xff] %v3872_v63  ;;  %v3780_v15 = vadd.f32 %v5094_v55, %v3683_v62  ;;  %v5166_v14 = vpop.f32.mrf.mxu1  ;;  %v7284_v62 = vld [vmem:[#allocation22_spill] sm:$0xff]  ;;  %v7286_v63 = vld [vmem:[#allocation24_spill] sm:$0xff]  ;;  %v7128_v18 = vadd.f32 %v4029_v57, %v7289_v54 }
 0x24b   : >> { %v5096_v31 = vpop.f32.mrf.mxu0  ;;  %3928 = vst [vmem:[#allocation3 + $0x128] sm:$0xff] %v3864_v43  ;;  %v5048_v27 = vadd.f32 %v7284_v62, %v7283_v1  ;;  %v5051_v35 = vadd.f32 %v7286_v63, %v7285_v53 }
 0x24c   : >> { %v5097_v50 = vadd.f32 %v5096_v31, %v5095_v52  ;;  %v3876_v56 = vpop.f32.mrf.mxu1  ;;  %v7279_v52 = vld [vmem:[#allocation17_spill] sm:$0xff] }
 0x24d   : >> { %v5098_v58 = vpop.f32.mrf.mxu0  ;;  %v3877_v51 = vadd.f32 %v3876_v56, %v3780_v15  ;;  %v4054_v13 = vld [vmem:[#allocation3 + $0x108] sm:$0xf0]  ;;  %v5045_v19 = vadd.f32 %v7279_v52, %v7020_v8  ;;  %v7287_v8 = vld [vmem:[#allocation26_spill] sm:$0xff]  ;;  %v5060_v56 = vadd.f32 %v7294_v33, %v7293_v41 }
 0x24e   : >> { %v3783_v34 = vadd.f32 %v5097_v50, %v3686_v6  ;;  %v5167_v36 = vpop.f32.mrf.mxu1  ;;  %v4052_v59 = vld [vmem:[#allocation3 + $0x10] sm:$0xf0]  ;;  %v4088_v44 = vrot.slane %v4054_v13, 4  ;;  %v5054_v60 = vadd.f32 %v7288_v29, %v7287_v8 }
 0x24f   : >> { %v5099_v28 = vpop.f32.mrf.mxu0  ;;  %3937 = vst [vmem:[#allocation3 + $0x58] sm:$0xff] %v3877_v51  ;;  %v4085_v9 = vrot.slane %v4052_v59, 4  ;;  %v3702_v25 = vadd.f32 %v5045_v19, %v3605_v32  ;;  %v7296_v32 = vld [vmem:[#allocation11_spill] sm:$0xff] }
 0x250   : >> { %v5100_v30 = vadd.f32 %v5099_v28, %v5098_v58  ;;  %v3879_v26 = vpop.f32.mrf.mxu1  ;;  %v7149_v59 = vadd.f32 %v5054_v60, %v7296_v32 }
 0x251   : >> { %v5101_v5 = vpop.f32.mrf.mxu0  ;;  %v4055_v55 = vld [vmem:[#allocation3 + $0x118] sm:$0xf]  ;;  %v3880_v46 = vadd.f32 %v3879_v26, %v3783_v34 }
 0x252   : >> { %v3788_v37 = vadd.f32 %v5100_v30, %v3691_v21  ;;  %v4089_v4 = vrot.slane %v4055_v55, 4  ;;  %v4053_v58 = vld [vmem:[#allocation3 + $0x128] sm:$0xf]  ;;  %v7124_v10 = vpop.f32.mrf.mxu1  ;;  %v7291_v30 = vld [vmem:[#allocation28_spill] sm:$0xff] }
 0x253   : >> { %v5102_v24 = vpop.f32.mrf.mxu0  ;;  %v4086_v43 = vrot.slane %v4053_v58, 4  ;;  %3940 = vst [vmem:[#allocation3 + $0x130] sm:$0xff] %v3880_v46  ;;  %v5057_v2 = vadd.f32 %v7292_v11, %v7291_v30 }
 0x254   : >> { %v3885_v48 = vadd.f32 %v5166_v14, %v3788_v37  ;;  %v5103_v16 = vadd.f32 %v5102_v24, %v5101_v5  ;;  %v4090_v50 = vsel %vm4084_vm9, %v4088_v44, %v4089_v4  ;;  %v7290_v14 = vld [vmem:[#allocation10_spill] sm:$0xff]  ;;  %v3892_v40 = vpop.f32.mrf.mxu1  ;;  %v3707_v37 = vadd.f32 %v5048_v27, %v3610_v45 }
 0x255   : >> { %v5104_v39 = vpop.f32.mrf.mxu0  ;;  %v3626_v28 = vadd.f32 %v4996_v17, %v7290_v14  ;;  %v4118_v6 = vadd.f32 %v4090_v50, %v7084_v7  ;;  %v4087_v5 = vsel %vm4084_vm9, %v4085_v9, %v4086_v43  ;;  %v7295_v7 = vld [vmem:[#allocation16_spill] sm:$0xff]  ;;  %v7152_v17 = vadd.f32 %v5057_v2, %v7297_v47 }
 0x256   : >> { %3943 = vst [vmem:[#allocation3 + $0xe0] sm:$0xff] %v3885_v48  ;;  %v3791_v31 = vadd.f32 %v5103_v16, %v3694_v42  ;;  %v4117_v34 = vadd.f32 %v4087_v5, %v7072_v49  ;;  %v7138_v24 = vpop.f32.mrf.mxu1  ;;  %v7146_v42 = vadd.f32 %v5051_v35, %v7295_v7  ;;  %v4056_v48 = vld [vmem:[#allocation3 + $0x58] sm:$0xf0] }
 0x257   : >> { %v5105_v38 = vpop.f32.mrf.mxu0  ;;  %v4150_v57 = vrot.slane %v4118_v6, 4  ;;  %v4219_v13 = vmul.f32 %v4118_v6, %v4118_v6  ;;  %v7154_v55 = vadd.f32 %v5060_v56, %v3626_v28  ;;  %v4091_v1 = vrot.slane %v4056_v48, 4 }
 0x258   : >> { %v3888_v15 = vadd.f32 %v5167_v36, %v3791_v31  ;;  %v5106_v61 = vadd.f32 %v5105_v38, %v5104_v39  ;;  %v4144_v52 = vrot.slane %v4117_v34, 4  ;;  %v4218_v49 = vmul.f32 %v4117_v34, %v4117_v34  ;;  %v3895_v0 = vpop.f32.mrf.mxu1 }
 0x259   : >> { %v5107_v21 = vpop.f32.mrf.mxu0  ;;  %v4843_v19 = vpack.c.bf16 %v4118_v6, %v4117_v34  ;;  %v4151_v20 = vadd.f32 %v4150_v57, %v4118_v6  ;;  %v4232_v26 = vrot.slane %v4219_v13, 4 }
 0x25a   : >> { %3946 = vst [vmem:[#allocation3 + $0x168] sm:$0xff] %v3888_v15  ;;  %v3796_v51 = vadd.f32 %v5106_v61, %v3699_v22  ;;  %v4145_v4 = vadd.f32 %v4144_v52, %v4117_v34  ;;  %v4226_v46 = vrot.slane %v4218_v49, 4  ;;  %v4057_v62 = vld [vmem:[#allocation3 + $0x130] sm:$0xf] }
 0x25b   : >> { %v5108_v36 = vpop.f32.mrf.mxu0  ;;  %4844 = vst [vmem:[%s7143_s13] sm:$0xff] %v4843_v19   ;;  %v4152_v31 = vrot.slane %v4151_v20, 2  ;;  %v4233_v53 = vadd.f32 %v4232_v26, %v4219_v13  ;;  %v4092_v63 = vrot.slane %v4057_v62, 4 }
 0x25c   : >> { %v5109_v16 = vadd.f32 %v5108_v36, %v5107_v21  ;;  %v3893_v22 = vadd.f32 %v3892_v40, %v3796_v51  ;;  %v4146_v29 = vrot.slane %v4145_v4, 2  ;;  %v4227_v60 = vadd.f32 %v4226_v46, %v4218_v49  ;;  %v7159_v40 = vpop.f32.mrf.mxu1 }
 0x25d   : >> { %v5110_v45 = vpop.f32.mrf.mxu0  ;;  %v4058_v39 = vld [vmem:[#allocation3 + $0xe0] sm:$0xf0]  ;;  %v4153_v9 = vadd.f32 %v4152_v31, %v4151_v20  ;;  %v4234_v50 = vrot.slane %v4233_v53, 2  ;;  %v4093_v15 = vsel %vm4084_vm9, %v4091_v1, %v4092_v63 }
 0x25e   : >> { %3949 = vst [vmem:[#allocation3 + $0x20] sm:$0xff] %v3893_v22  ;;  %v3799_v44 = vadd.f32 %v5109_v16, %v3702_v25  ;;  %v4094_v58 = vrot.slane %v4058_v39, 4  ;;  %v4147_v25 = vadd.f32 %v4146_v29, %v4145_v4  ;;  %v4228_v14 = vrot.slane %v4227_v60, 2  ;;  %v3908_v22 = vpop.f32.mrf.mxu1 }
 0x25f   : >> { %v5111_v27 = vpop.f32.mrf.mxu0  ;;  %v4154_v28 = vrot.slane %v4153_v9, 1  ;;  %v4119_v6 = vadd.f32 %v4093_v15, %v7103_v3  ;;  %v4235_v30 = vadd.f32 %v4234_v50, %v4233_v53  ;;  %v7298_v50 = vld [vmem:[#allocation32_spill] sm:$0xff]  ;;  %v7299_v15 = vld [vmem:[#allocation33_spill] sm:$0xff] }
 0x260   : >> { %v5112_v35 = vadd.f32 %v5111_v27, %v5110_v45  ;;  %v3896_v8 = vadd.f32 %v3895_v0, %v3799_v44  ;;  %v4148_v33 = vrot.slane %v4147_v25, 1  ;;  %v4229_v56 = vadd.f32 %v4228_v14, %v4227_v60  ;;  %v7169_v63 = vpop.f32.mrf.mxu1 }
 0x261   : >> { %v4059_v38 = vld [vmem:[#allocation3 + $0x168] sm:$0xf]  ;;  %v5113_v43 = vpop.f32.mrf.mxu0  ;;  %v4155_v5 = vadd.f32 %v4154_v28, %v4153_v9  ;;  %v4156_v51 = vrot.slane %v4119_v6, 4  ;;  %v4236_v57 = vrot.slane %v4235_v30, 1  ;;  %v4220_v13 = vmul.f32 %v4119_v6, %v4119_v6 }
 0x262   : >> { %v4095_v61 = vrot.slane %v4059_v38, 4  ;;  %v3804_v54 = vadd.f32 %v5112_v35, %v3707_v37  ;;  %3952 = vst [vmem:[#allocation3 + $0x170] sm:$0xff] %v3896_v8  ;;  %v4149_v7 = vadd.f32 %v4148_v33, %v4147_v25  ;;  %v4230_v32 = vrot.slane %v4229_v56, 1 }
 0x263   : >> { %v5114_v21 = vpop.f32.mrf.mxu0  ;;  %v4157_v48 = vadd.f32 %v4156_v51, %v4119_v6  ;;  %v4237_v52 = vadd.f32 %v4236_v57, %v4235_v30  ;;  %v4238_v49 = vrot.slane %v4220_v13, 4  ;;  %v3992_v57 = vld [vmem:[#allocation3] sm:$0x3] }
 0x264   : >> { %v4096_v11 = vsel %vm4084_vm9, %v4094_v58, %v4095_v61  ;;  %v3901_v2 = vadd.f32 %v7124_v10, %v3804_v54  ;;  %v5115_v41 = vadd.f32 %v5114_v21, %v5113_v43  ;;  %v4231_v45 = vadd.f32 %v4230_v32, %v4229_v56 }
 0x265   : >> { %v4060_v37 = vld [vmem:[#allocation3 + $0x20] sm:$0xf0]  ;;  %v5116_v34 = vpop.f32.mrf.mxu0  ;;  %v4120_v3 = vadd.f32 %v4096_v11, %v7106_v12  ;;  %v4158_v0 = vrot.slane %v4157_v48, 2  ;;  %v4201_v47 = vsel %vm4200_vm10, %v4155_v5, %v4149_v7  ;;  %v4239_v44 = vadd.f32 %v4238_v49, %v4220_v13 }
 0x266   : >> { %v4097_v36 = vrot.slane %v4060_v37, 4  ;;  %3955 = vst [vmem:[#allocation3 + $0x60] sm:$0xff] %v3901_v2  ;;  %v3807_v10 = vadd.f32 %v5115_v41, %v7146_v42  ;;  %v4282_v1 = vsel %vm4200_vm10, %v4237_v52, %v4231_v45  ;;  %v5063_v61 = vadd.f32 %v7299_v15, %v7298_v50 }
 0x267   : >> { %v5117_v16 = vpop.f32.mrf.mxu0  ;;  %v4848_v19 = vpack.c.bf16 %v4120_v3, %v4119_v6  ;;  %v4162_v20 = vrot.slane %v4120_v3, 4  ;;  %v4221_v26 = vmul.f32 %v4120_v3, %v4120_v3  ;;  %v4159_v31 = vadd.f32 %v4158_v0, %v4157_v48  ;;  %v3991_v0 = vld [vmem:[#allocation3 + $0x18] sm:$0xfc] }
 0x268   : >> { %v3904_v42 = vadd.f32 %v7138_v24, %v3807_v10  ;;  %v5118_v27 = vadd.f32 %v5117_v16, %v5116_v34  ;;  %v4240_v35 = vrot.slane %v4239_v44, 2 }
 0x269   : >> { %v4061_v12 = vld [vmem:[#allocation3 + $0x170] sm:$0xf]  ;;  %v5119_v39 = vpop.f32.mrf.mxu0  ;;  %4869 = vst [vmem:[%s7143_s13 + $0x8] sm:$0xff] %v4848_v19   ;;  %v4163_v4 = vadd.f32 %v4162_v20, %v4120_v3  ;;  %v4244_v62 = vrot.slane %v4221_v26, 4  ;;  %v4160_v9 = vrot.slane %v4159_v31, 1 }
 0x26a   : >> { %v4098_v46 = vrot.slane %v4061_v12, 4  ;;  %3958 = vst [vmem:[#allocation3 + $0x38] sm:$0xff] %v3904_v42  ;;  %v3812_v24 = vadd.f32 %v5118_v27, %v7149_v59  ;;  %v4241_v54 = vadd.f32 %v4240_v35, %v4239_v44  ;;  %v7300_v44 = vld [vmem:[#allocation25_spill] sm:$0xff] }
 0x26b   : >> { %v5120_v53 = vpop.f32.mrf.mxu0  ;;  %v4164_v8 = vrot.slane %v4163_v4, 2  ;;  %v4245_v58 = vadd.f32 %v4244_v62, %v4221_v26  ;;  %v4161_v28 = vadd.f32 %v4160_v9, %v4159_v31 }
 0x26c   : >> { %v4099_v29 = vsel %vm4084_vm9, %v4097_v36, %v4098_v46  ;;  %v5121_v60 = vadd.f32 %v5120_v53, %v5119_v39  ;;  %v4242_v2 = vrot.slane %v4241_v54, 1  ;;  %v3909_v33 = vadd.f32 %v3908_v22, %v3812_v24 }
 0x26d   : >> { %v7173_v38 = vadd.f32 %v4099_v29, %v7109_v23  ;;  %v5122_v43 = vpop.f32.mrf.mxu0  ;;  %v4165_v25 = vadd.f32 %v4164_v8, %v4163_v4  ;;  %v4246_v6 = vrot.slane %v4245_v58, 2  ;;  %v3911_v23 = vpop.f32.mrf.mxu1  ;;  %v4062_v59 = vld [vmem:[#allocation3 + $0x60] sm:$0xf0]  ;;  %v4203_v5 = vsel %vm4202_vm11, %v4161_v28, %v4201_v47  ;;  %v7301_v28 = vld [vmem:[#allocation14_spill] sm:$0xff] }
 0x26e   : >> { %v3815_v14 = vadd.f32 %v5121_v60, %v7152_v17  ;;  %v4243_v13 = vadd.f32 %v4242_v2, %v4241_v54  ;;  %3961 = vst [vmem:[#allocation3 + $0x98] sm:$0xff] %v3909_v33  ;;  %v4100_v48 = vrot.slane %v4062_v59, 4  ;;  %v4031_v39 = vrot.slane %v3992_v57, 2 }
 0x26f   : >> { %v4168_v21 = vrot.slane %v7173_v38, 4  ;;  %v4222_v30 = vmul.f32 %v7173_v38, %v7173_v38  ;;  %v5123_v11 = vpop.f32.mrf.mxu0  ;;  %v4166_v41 = vrot.slane %v4165_v25, 1  ;;  %v4247_v51 = vadd.f32 %v4246_v6, %v4245_v58  ;;  %v3993_v6 = vld [vmem:[#allocation3 + $0x68] sm:$0xfc] }
 0x270   : >> { %v5124_v56 = vadd.f32 %v5123_v11, %v5122_v43  ;;  %v3912_v7 = vadd.f32 %v3911_v23, %v3815_v14  ;;  %v4283_v49 = vsel %vm4202_vm11, %v4243_v13, %v4282_v1  ;;  %v3726_v4 = vadd.f32 %v5063_v61, %v7300_v44  ;;  %v3994_v43 = vld [vmem:[#allocation3 + $0x158] sm:$0x3] }
 0x271   : >> { %v4169_v37 = vadd.f32 %v4168_v21, %v7173_v38  ;;  %v4250_v17 = vrot.slane %v4222_v30, 4  ;;  %v5125_v34 = vpop.f32.mrf.mxu0  ;;  %v4167_v3 = vadd.f32 %v4166_v41, %v4165_v25  ;;  %v4248_v32 = vrot.slane %v4247_v51, 1  ;;  %v4063_v22 = vld [vmem:[#allocation3 + $0x38] sm:$0xf] }
 0x272   : >> { %v3820_v36 = vadd.f32 %v5124_v56, %v7154_v55  ;;  %v4101_v20 = vrot.slane %v4063_v22, 4  ;;  %3964 = vst [vmem:[#allocation3 + $0x78] sm:$0xff] %v3912_v7  ;;  %v4034_v11 = vrot.slane %v3994_v43, 2  ;;  %v4033_v59 = vrot.slane %v3993_v6, 2 }
 0x273   : >> { %v4170_v10 = vrot.slane %v4169_v37, 2  ;;  %v4251_v16 = vadd.f32 %v4250_v17, %v4222_v30  ;;  %v5126_v52 = vpop.f32.mrf.mxu0  ;;  %v4205_v19 = vsel %vm4204_vm12, %v4167_v3, %v4203_v5  ;;  %v4249_v47 = vadd.f32 %v4248_v32, %v4247_v51 }
 0x274   : >> { %v3917_v45 = vadd.f32 %v7159_v40, %v3820_v36  ;;  %v5127_v55 = vadd.f32 %v5126_v52, %v5125_v34  ;;  %v4102_v46 = vsel %vm4084_vm9, %v4100_v48, %v4101_v20  ;;  %v4030_v40 = vrot.slane %v3991_v0, 2 }
 0x275   : >> { %v4171_v26 = vadd.f32 %v4170_v10, %v4169_v37  ;;  %v4252_v12 = vrot.slane %v4251_v16, 2  ;;  %v4284_v1 = vsel %vm4204_vm12, %v4249_v47, %v4283_v49  ;;  %v4122_v62 = vadd.f32 %v4102_v46, %v7128_v18  ;;  %v4064_v60 = vld [vmem:[#allocation3 + $0x98] sm:$0xf0]  ;;  %v7302_v10 = vld [vmem:[#allocation9_spill] sm:$0xff] }
 0x276   : >> { %3967 = vst [vmem:[#allocation3 + $0x70] sm:$0xff] %v3917_v45  ;;  %v3823_v27 = vadd.f32 %v5127_v55, %v3726_v4  ;;  %v4032_v9 = vsel %vm4011_vm8, %v4030_v40, %v4031_v39  ;;  %v4103_v25 = vrot.slane %v4064_v60, 4  ;;  %v4035_v17 = vsel %vm4011_vm8, %v4033_v59, %v4034_v11 }
 0x277   : >> { %v4172_v42 = vrot.slane %v4171_v26, 1  ;;  %v4253_v31 = vadd.f32 %v4252_v12, %v4251_v16  ;;  %v4853_v8 = vpack.c.bf16 %v4122_v62, %v7173_v38  ;;  %v4174_v29 = vrot.slane %v4122_v62, 4 }
 0x278   : >> { %v4223_v58 = vmul.f32 %v4122_v62, %v4122_v62  ;;  %v3920_v24 = vadd.f32 %v7169_v63, %v3823_v27  ;;  %v4050_v38 = vadd.f32 %v4032_v9, %v7301_v28  ;;  %v4051_v16 = vadd.f32 %v4035_v17, %v7302_v10 }
 0x279   : >> { %v4173_v53 = vadd.f32 %v4172_v42, %v4171_v26  ;;  %v4254_v35 = vrot.slane %v4253_v31, 1  ;;  %4870 = vst [vmem:[%s7143_s13 + $0x10] sm:$0xff] %v4853_v8   ;;  %v4175_v18 = vadd.f32 %v4174_v29, %v4122_v62  ;;  %v4065_v61 = vld [vmem:[#allocation3 + $0x78] sm:$0xf] }
 0x27a   : >> { %v4256_v54 = vrot.slane %v4223_v58, 4  ;;  %v4104_v14 = vrot.slane %v4065_v61, 4  ;;  %3970 = vst [vmem:[#allocation3 + $0x150] sm:$0xff] %v3920_v24 }
 0x27b   : >> { %v4207_v50 = vsel %vm4206_vm13, %v4173_v53, %v4205_v19  ;;  %v4255_v15 = vadd.f32 %v4254_v35, %v4253_v31  ;;  %v4176_v30 = vrot.slane %v4175_v18, 2 }
 0x27c   : >> { %v4257_v23 = vadd.f32 %v4256_v54, %v4223_v58  ;;  %v4105_v63 = vsel %vm4084_vm9, %v4103_v25, %v4104_v14  ;;  %v4143_v58 = vld [vmem:[#allocation4] sm:$0xff] }
 0x27d   : >> { %v4285_v21 = vsel %vm4206_vm13, %v4255_v15, %v4284_v1  ;;  %v4177_v2 = vadd.f32 %v4176_v30, %v4175_v18  ;;  %v4123_v41 = vadd.f32 %v4105_v63, %v4050_v38  ;;  %v4066_v5 = vld [vmem:[#allocation3 + $0x70] sm:$0xf0]  ;;  %v4217_v18 = vld [vmem:[#allocation5] sm:$0xff] }
 0x27e   : >> { %v4258_v33 = vrot.slane %v4257_v23, 2  ;;  %v4106_v32 = vrot.slane %v4066_v5, 4 }
 0x27f   : >> { %v4178_v56 = vrot.slane %v4177_v2, 1  ;;  %v4180_v51 = vrot.slane %v4123_v41, 4  ;;  %v4224_v37 = vmul.f32 %v4123_v41, %v4123_v41 }
 0x280   : >> { %v4259_v34 = vadd.f32 %v4258_v33, %v4257_v23 }
 0x281   : >> { %v4179_v57 = vadd.f32 %v4178_v56, %v4177_v2  ;;  %v4181_v13 = vadd.f32 %v4180_v51, %v4123_v41  ;;  %v4262_v3 = vrot.slane %v4224_v37, 4  ;;  %v4067_v36 = vld [vmem:[#allocation3 + $0x150] sm:$0xf] }
 0x282   : >> { %v4260_v7 = vrot.slane %v4259_v34, 1  ;;  %v4107_v48 = vrot.slane %v4067_v36, 4 }
 0x283   : >> { %v4182_v22 = vrot.slane %v4181_v13, 2  ;;  %v4209_v52 = vsel %vm4208_vm14, %v4179_v57, %v4207_v50  ;;  %v4263_v49 = vadd.f32 %v4262_v3, %v4224_v37 }
 0x284   : >> { %v4261_v19 = vadd.f32 %v4260_v7, %v4259_v34  ;;  %v4108_v20 = vsel %vm4084_vm9, %v4106_v32, %v4107_v48 }
 0x285   : >> { %v4183_v45 = vadd.f32 %v4182_v22, %v4181_v13  ;;  %v4264_v0 = vrot.slane %v4263_v49, 2  ;;  %v4124_v47 = vadd.f32 %v4108_v20, %v4051_v16 }
 0x286   : >> { %v4286_v26 = vsel %vm4208_vm14, %v4261_v19, %v4285_v21 }
 0x287   : >> { %v4184_v12 = vrot.slane %v4183_v45, 1  ;;  %v4265_v55 = vadd.f32 %v4264_v0, %v4263_v49  ;;  %v4858_v39 = vpack.c.bf16 %v4124_v47, %v4123_v41  ;;  %v4186_v44 = vrot.slane %v4124_v47, 4 }
 0x288   : >> { %v4225_v4 = vmul.f32 %v4124_v47, %v4124_v47 }
 0x289   : >> { %v4185_v46 = vadd.f32 %v4184_v12, %v4183_v45  ;;  %v4266_v42 = vrot.slane %v4265_v55, 1  ;;  %4871 = vst [vmem:[%s7143_s13 + $0x18] sm:$0xff] %v4858_v39   ;;  %v4187_v31 = vadd.f32 %v4186_v44, %v4124_v47 }
 0x28a   : >> { %v4268_v1 = vrot.slane %v4225_v4, 4 }
 0x28b   : >> { %v4211_v62 = vsel %vm4210_vm15, %v4185_v46, %v4209_v52  ;;  %v4267_v40 = vadd.f32 %v4266_v42, %v4265_v55  ;;  %v4188_v27 = vrot.slane %v4187_v31, 2 }
 0x28c   : >> { %v4269_v53 = vadd.f32 %v4268_v1, %v4225_v4 }
 0x28d   : >> { %v4287_v35 = vsel %vm4210_vm15, %v4267_v40, %v4286_v26  ;;  %v4189_v8 = vadd.f32 %v4188_v27, %v4187_v31 }
 0x28e   : >> { %v4270_v29 = vrot.slane %v4269_v53, 2 }
 0x28f   : >> { %v4190_v60 = vrot.slane %v4189_v8, 1 }
 0x290   : >> { %v4271_v9 = vadd.f32 %v4270_v29, %v4269_v53 }
 0x291   : >> { %v4191_v24 = vadd.f32 %v4190_v60, %v4189_v8 }
 0x292   : >> { %v4272_v43 = vrot.slane %v4271_v9, 1 }
 0x293   : >> { %v4213_v50 = vsel %vm4212_vm0, %v4191_v24, %v4211_v62 }
 0x294   : >> { %v4215_v15 = vadd.f32 %v4213_v50, %v4143_v58  ;;  %v4273_v61 = vadd.f32 %v4272_v43, %v4271_v9 }
 0x295   : > { %382 = sbr.rel (!%p380_p8) target bundleno = 51 (0x33), region = 113 }
 0x296   : >> { %4216 = vst [vmem:[#allocation4] sm:$0xff] %v4215_v15  ;;  %v4288_v54 = vsel %vm4212_vm0, %v4273_v61, %v4287_v35 }
 0x297   : >> { %v4290_v25 = vadd.f32 %v4288_v54, %v4217_v18 }
 0x299   : >> { %4291 = vst [vmem:[#allocation5] sm:$0xff] %v4290_v25 }
 0x29d   : > { %v4292_v14 = vld [vmem:[#allocation4] sm:$0xff] }
 0x29e   : > { %4293 = vst [vmem:[%s5782_s20] sm:$0xff] %v4292_v14 }
 0x2a0   : > { %v4294_v28 = vld [vmem:[#allocation5] sm:$0xff] }
 0x2a1   : > { %4295 = vst [vmem:[%s5787_s23] sm:$0xff] %v4294_v28 }
 0x2a2 PF: > { %s18_s24 = sadd.s32 1, %s5615_s24  }
 0x2a3   : > { %p15_p9 = scmp.ge.s32.totalorder %s18_s24, 4  }
 0x2a5   :  { %17 = sbr.rel (!%p15_p9) target bundleno = 1 (0x1), region = 124 }

</bundles_post_ra>
